<compile_context>
chip_gen: v6e
topology: v6e:2x2x1
jax: 0.10.0
libtpu: 0.0.40
codegen_flags: <defaults>
</compile_context>

<pallas_src>
import jax
import jax.numpy as jnp
from jax.experimental import pallas as pl
from jax.experimental.pallas import tpu as pltpu

NU_FEATURES = 64
NU_TASKS = 8
H1, H2, H3 = 1024, 512, 256
LANE = 128


def _sigmoid(z):
    # exp goes to the EUP slot; exact logistic.
    return 1.0 / (1.0 + jnp.exp(-z))


def mlp_kernel(x_ref, w1_ref, b1_ref, w2_ref, b2_ref, w3_ref, b3_ref,
               w4_ref, b4_ref, o_ref):
    # Fully fused hot path: four MXU matmuls + bias adds + activations in VMEM.
    x = x_ref[...]
    h1 = jnp.dot(x, w1_ref[...], preferred_element_type=jnp.float32) + b1_ref[...]
    h1 = jnp.maximum(h1, 0.0)
    h2 = _sigmoid(jnp.dot(h1, w2_ref[...], preferred_element_type=jnp.float32) + b2_ref[...])
    h3 = _sigmoid(jnp.dot(h2, w3_ref[...], preferred_element_type=jnp.float32) + b3_ref[...])
    out = jnp.dot(h3, w4_ref[...], preferred_element_type=jnp.float32) + b4_ref[...]
    o_ref[...] = out.astype(o_ref.dtype)


def multitask5_forward(x, params, *, max_batch_tile=512):
    w1, b1, w2, b2, w3, b3, w4, b4 = params
    B, F = x.shape
    T = w4.shape[1]

    # ---- lane-dense output: pad final layer width to a multiple of 128 ----
    T_pad = max(LANE, ((T + LANE - 1) // LANE) * LANE)
    if T_pad != T:
        w4p = jnp.zeros((w4.shape[0], T_pad), w4.dtype).at[:, :T].set(w4)
        b4p = jnp.zeros((1, T_pad), b4.dtype).at[:, :T].set(b4)
    else:
        w4p, b4p = w4, b4

    # ---- batch tile: big for MXU rows (multiple of 256 when possible),
    #      and keep >=2 grid steps when batch allows (v7x: 2 TCs/chip) ----
    if B >= 2 * max_batch_tile:
        tb = max_batch_tile
    elif B >= 512:
        tb = 256
    else:
        tb = min(B, 256)
        tb = ((tb + 7) // 8) * 8          # sublane (8) alignment

    B_pad = ((B + tb - 1) // tb) * tb
    xp = x if B_pad == B else jnp.zeros((B_pad, F), x.dtype).at[:B].set(x)

    grid = (B_pad // tb,)

    in_specs = [
        pl.BlockSpec((tb, F), lambda i: (i, 0)),        # x: tiled over batch
        pl.BlockSpec((F, H1), lambda i: (0, 0)),        # weights/biases resident
        pl.BlockSpec((1, H1), lambda i: (0, 0)),
        pl.BlockSpec((H1, H2), lambda i: (0, 0)),
        pl.BlockSpec((1, H2), lambda i: (0, 0)),
        pl.BlockSpec((H2, H3), lambda i: (0, 0)),
        pl.BlockSpec((1, H3), lambda i: (0, 0)),
        pl.BlockSpec((H3, T_pad), lambda i: (0, 0)),
        pl.BlockSpec((1, T_pad), lambda i: (0, 0)),
    ]
    out_spec = pl.BlockSpec((tb, T_pad), lambda i: (i, 0))

    flops = 2 * B_pad * (F * H1 + H1 * H2 + H2 * H3 + H3 * T_pad)
    transcendentals = B_pad * (H2 + H3)                 # one exp per sigmoid elem
    bytes_accessed = 4 * (B_pad * (F + T_pad)
                          + F * H1 + H1 + H1 * H2 + H2
                          + H2 * H3 + H3 + H3 * T_pad + T_pad)

    out = pl.pallas_call(
        mlp_kernel,
        out_shape=jax.ShapeDtypeStruct((B_pad, T_pad), jnp.float32),
        grid_spec=pltpu.PrefetchScalarGridSpec(
            num_scalar_prefetch=0,
            grid=grid,
            in_specs=in_specs,
            out_specs=out_spec,
        ),
        compiler_params=pltpu.CompilerParams(
            dimension_semantics=("parallel",),
        ),
        cost_estimate=pl.CostEstimate(
            flops=flops,
            transcendentals=transcendentals,
            bytes_accessed=bytes_accessed,
        ),
    )(xp, w1, b1, w2, b2, w3, b3, w4p, b4p)

    # Slice off batch padding and the zero-padded output lanes.
    return out[:B, :T]


def init_params(key, nu_features, nu_tasks):
    # Deterministic init mimicking PyTorch's default Linear init:
    # U(-1/sqrt(fan_in), 1/sqrt(fan_in)) for both weights and biases.
    ks = jax.random.split(key, 8)

    def lin(kw, kb, fan_in, fan_out):
        bound = 1.0 / jnp.sqrt(fan_in)
        w = jax.random.uniform(kw, (fan_in, fan_out), jnp.float32, -bound, bound)
        b = jax.random.uniform(kb, (1, fan_out), jnp.float32, -bound, bound)
        return w, b

    w1, b1 = lin(ks[0], ks[1], nu_features, H1)
    w2, b2 = lin(ks[2], ks[3], H1, H2)
    w3, b3 = lin(ks[4], ks[5], H2, H3)
    w4, b4 = lin(ks[6], ks[7], H3, nu_tasks)
    return (w1, b1, w2, b2, w3, b3, w4, b4)


def reference_forward(x, params):
    w1, b1, w2, b2, w3, b3, w4, b4 = params
    h1 = jnp.maximum(x @ w1 + b1, 0.0)
    h2 = jax.nn.sigmoid(h1 @ w2 + b2)
    h3 = jax.nn.sigmoid(h2 @ w3 + b3)
    return h3 @ w4 + b4


if __name__ == "__main__":
    key = jax.random.PRNGKey(0)
    kx, kp = jax.random.split(key)

    batch = 512  # 2 grid steps of 256 rows -> both v7x TensorCores exercised
    x = jax.random.normal(kx, (batch, NU_FEATURES), jnp.float32)
    params = init_params(kp, NU_FEATURES, NU_TASKS)

    out = jax.block_until_ready(multitask5_forward(x, params))
    ref = reference_forward(x, params)

    assert out.shape == (batch, NU_TASKS)
    # Both paths use the TPU MXU's default f32 handling; allow small drift.
    assert jnp.allclose(out, ref, atol=5e-3, rtol=5e-3), float(
        jnp.max(jnp.abs(out - ref)))

    print("KERNEL_OK")
</pallas_src>

<mosaic_0001>
module attributes {stable_mosaic.version = 11 : i64} {
  func.func @mlp_kernel(%arg0: i32, %arg1: memref<256x64xf32, #tpu.memory_space<vmem>>, %arg2: memref<64x1024xf32, #tpu.memory_space<vmem>>, %arg3: memref<1x1024xf32, #tpu.memory_space<vmem>>, %arg4: memref<1024x512xf32, #tpu.memory_space<vmem>>, %arg5: memref<1x512xf32, #tpu.memory_space<vmem>>, %arg6: memref<512x256xf32, #tpu.memory_space<vmem>>, %arg7: memref<1x256xf32, #tpu.memory_space<vmem>>, %arg8: memref<256x128xf32, #tpu.memory_space<vmem>>, %arg9: memref<1x128xf32, #tpu.memory_space<vmem>>, %arg10: memref<256x128xf32, #tpu.memory_space<vmem>>) attributes {dimension_semantics = [#tpu.dimension_semantics<parallel>], iteration_bounds = array<i64: 2>, scalar_prefetch = 0 : i64, scratch_operands = 0 : i64, tpu.core_type = #tpu.core_type<tc>, window_params = [{transform_indices = @transform_0, window_bounds = array<i64: 256, 64>}, {pipeline_mode = #tpu.pipeline_mode<synchronous>, transform_indices = @transform_1, window_bounds = array<i64: 64, 1024>}, {pipeline_mode = #tpu.pipeline_mode<synchronous>, transform_indices = @transform_2, window_bounds = array<i64: 1, 1024>}, {pipeline_mode = #tpu.pipeline_mode<synchronous>, transform_indices = @transform_3, window_bounds = array<i64: 1024, 512>}, {pipeline_mode = #tpu.pipeline_mode<synchronous>, transform_indices = @transform_4, window_bounds = array<i64: 1, 512>}, {pipeline_mode = #tpu.pipeline_mode<synchronous>, transform_indices = @transform_5, window_bounds = array<i64: 512, 256>}, {pipeline_mode = #tpu.pipeline_mode<synchronous>, transform_indices = @transform_6, window_bounds = array<i64: 1, 256>}, {pipeline_mode = #tpu.pipeline_mode<synchronous>, transform_indices = @transform_7, window_bounds = array<i64: 256, 128>}, {pipeline_mode = #tpu.pipeline_mode<synchronous>, transform_indices = @transform_8, window_bounds = array<i64: 1, 128>}, {transform_indices = @transform_9, window_bounds = array<i64: 256, 128>}]} {
    %c0 = arith.constant 0 : index
    %c0_0 = arith.constant 0 : index
    %0 = vector.load %arg1[%c0, %c0_0] : memref<256x64xf32, #tpu.memory_space<vmem>>, vector<256x64xf32>
    %c0_1 = arith.constant 0 : index
    %c0_2 = arith.constant 0 : index
    %1 = vector.load %arg2[%c0_1, %c0_2] : memref<64x1024xf32, #tpu.memory_space<vmem>>, vector<64x1024xf32>
    %cst = arith.constant dense<0.000000e+00> : vector<256x1024xf32>
    %2 = tpu.matmul %0, %1, %cst {dimension_numbers = #tpu.dot_dimension_numbers<[1], [0], [0], [1], [0, 0, 1, 1], [], []>} : vector<256x64xf32>, vector<64x1024xf32>, vector<256x1024xf32> -> vector<256x1024xf32>
    %c0_3 = arith.constant 0 : index
    %c0_4 = arith.constant 0 : index
    %3 = vector.load %arg3[%c0_3, %c0_4] : memref<1x1024xf32, #tpu.memory_space<vmem>>, vector<1x1024xf32>
    %4 = vector.broadcast %3 : vector<1x1024xf32> to vector<256x1024xf32>
    %5 = arith.addf %2, %4 : vector<256x1024xf32>
    %cst_5 = arith.constant 0.000000e+00 : f32
    %6 = vector.broadcast %cst_5 : f32 to vector<256x1024xf32>
    %7 = arith.maximumf %5, %6 : vector<256x1024xf32>
    %c0_6 = arith.constant 0 : index
    %c0_7 = arith.constant 0 : index
    %8 = vector.load %arg4[%c0_6, %c0_7] : memref<1024x512xf32, #tpu.memory_space<vmem>>, vector<1024x512xf32>
    %cst_8 = arith.constant dense<0.000000e+00> : vector<256x512xf32>
    %9 = tpu.matmul %7, %8, %cst_8 {dimension_numbers = #tpu.dot_dimension_numbers<[1], [0], [0], [1], [0, 0, 1, 1], [], []>} : vector<256x1024xf32>, vector<1024x512xf32>, vector<256x512xf32> -> vector<256x512xf32>
    %c0_9 = arith.constant 0 : index
    %c0_10 = arith.constant 0 : index
    %10 = vector.load %arg5[%c0_9, %c0_10] : memref<1x512xf32, #tpu.memory_space<vmem>>, vector<1x512xf32>
    %11 = vector.broadcast %10 : vector<1x512xf32> to vector<256x512xf32>
    %12 = arith.addf %9, %11 : vector<256x512xf32>
    %cst_11 = arith.constant 0.000000e+00 : f32
    %13 = vector.broadcast %cst_11 : f32 to vector<256x512xf32>
    %14 = arith.subf %13, %12 : vector<256x512xf32>
    %15 = math.exp %14 : vector<256x512xf32>
    %cst_12 = arith.constant 1.000000e+00 : f32
    %16 = vector.broadcast %cst_12 : f32 to vector<256x512xf32>
    %17 = arith.addf %16, %15 : vector<256x512xf32>
    %cst_13 = arith.constant 1.000000e+00 : f32
    %18 = vector.broadcast %cst_13 : f32 to vector<256x512xf32>
    %19 = arith.divf %18, %17 : vector<256x512xf32>
    %c0_14 = arith.constant 0 : index
    %c0_15 = arith.constant 0 : index
    %20 = vector.load %arg6[%c0_14, %c0_15] : memref<512x256xf32, #tpu.memory_space<vmem>>, vector<512x256xf32>
    %cst_16 = arith.constant dense<0.000000e+00> : vector<256x256xf32>
    %21 = tpu.matmul %19, %20, %cst_16 {dimension_numbers = #tpu.dot_dimension_numbers<[1], [0], [0], [1], [0, 0, 1, 1], [], []>} : vector<256x512xf32>, vector<512x256xf32>, vector<256x256xf32> -> vector<256x256xf32>
    %c0_17 = arith.constant 0 : index
    %c0_18 = arith.constant 0 : index
    %22 = vector.load %arg7[%c0_17, %c0_18] : memref<1x256xf32, #tpu.memory_space<vmem>>, vector<1x256xf32>
    %23 = vector.broadcast %22 : vector<1x256xf32> to vector<256x256xf32>
    %24 = arith.addf %21, %23 : vector<256x256xf32>
    %cst_19 = arith.constant 0.000000e+00 : f32
    %25 = vector.broadcast %cst_19 : f32 to vector<256x256xf32>
    %26 = arith.subf %25, %24 : vector<256x256xf32>
    %27 = math.exp %26 : vector<256x256xf32>
    %cst_20 = arith.constant 1.000000e+00 : f32
    %28 = vector.broadcast %cst_20 : f32 to vector<256x256xf32>
    %29 = arith.addf %28, %27 : vector<256x256xf32>
    %cst_21 = arith.constant 1.000000e+00 : f32
    %30 = vector.broadcast %cst_21 : f32 to vector<256x256xf32>
    %31 = arith.divf %30, %29 : vector<256x256xf32>
    %c0_22 = arith.constant 0 : index
    %c0_23 = arith.constant 0 : index
    %32 = vector.load %arg8[%c0_22, %c0_23] : memref<256x128xf32, #tpu.memory_space<vmem>>, vector<256x128xf32>
    %cst_24 = arith.constant dense<0.000000e+00> : vector<256x128xf32>
    %33 = tpu.matmul %31, %32, %cst_24 {dimension_numbers = #tpu.dot_dimension_numbers<[1], [0], [0], [1], [0, 0, 1, 1], [], []>} : vector<256x256xf32>, vector<256x128xf32>, vector<256x128xf32> -> vector<256x128xf32>
    %c0_25 = arith.constant 0 : index
    %c0_26 = arith.constant 0 : index
    %34 = vector.load %arg9[%c0_25, %c0_26] : memref<1x128xf32, #tpu.memory_space<vmem>>, vector<1x128xf32>
    %35 = vector.broadcast %34 : vector<1x128xf32> to vector<256x128xf32>
    %36 = arith.addf %33, %35 : vector<256x128xf32>
    %c0_27 = arith.constant 0 : index
    %c0_28 = arith.constant 0 : index
    %37 = vector.load %arg10[%c0_27, %c0_28] : memref<256x128xf32, #tpu.memory_space<vmem>>, vector<256x128xf32>
    tpu.vector_store %arg10[%c0_27, %c0_28], %36 {strides = array<i32>} : memref<256x128xf32, #tpu.memory_space<vmem>>, vector<256x128xf32>,
    return
  }
  func.func @transform_0(%arg0: i32) -> (i32, i32) {
    %c0_i32 = arith.constant 0 : i32
    %c0_i32_0 = arith.constant 0 : i32
    return %arg0, %c0_i32 : i32, i32
  }
  func.func @transform_1(%arg0: i32) -> (i32, i32) {
    %c0_i32 = arith.constant 0 : i32
    %c0_i32_0 = arith.constant 0 : i32
    %c0_i32_1 = arith.constant 0 : i32
    return %c0_i32, %c0_i32_0 : i32, i32
  }
  func.func @transform_2(%arg0: i32) -> (i32, i32) {
    %c0_i32 = arith.constant 0 : i32
    %c0_i32_0 = arith.constant 0 : i32
    %c0_i32_1 = arith.constant 0 : i32
    return %c0_i32, %c0_i32_0 : i32, i32
  }
  func.func @transform_3(%arg0: i32) -> (i32, i32) {
    %c0_i32 = arith.constant 0 : i32
    %c0_i32_0 = arith.constant 0 : i32
    %c0_i32_1 = arith.constant 0 : i32
    return %c0_i32, %c0_i32_0 : i32, i32
  }
  func.func @transform_4(%arg0: i32) -> (i32, i32) {
    %c0_i32 = arith.constant 0 : i32
    %c0_i32_0 = arith.constant 0 : i32
    %c0_i32_1 = arith.constant 0 : i32
    return %c0_i32, %c0_i32_0 : i32, i32
  }
  func.func @transform_5(%arg0: i32) -> (i32, i32) {
    %c0_i32 = arith.constant 0 : i32
    %c0_i32_0 = arith.constant 0 : i32
    %c0_i32_1 = arith.constant 0 : i32
    return %c0_i32, %c0_i32_0 : i32, i32
  }
  func.func @transform_6(%arg0: i32) -> (i32, i32) {
    %c0_i32 = arith.constant 0 : i32
    %c0_i32_0 = arith.constant 0 : i32
    %c0_i32_1 = arith.constant 0 : i32
    return %c0_i32, %c0_i32_0 : i32, i32
  }
  func.func @transform_7(%arg0: i32) -> (i32, i32) {
    %c0_i32 = arith.constant 0 : i32
    %c0_i32_0 = arith.constant 0 : i32
    %c0_i32_1 = arith.constant 0 : i32
    return %c0_i32, %c0_i32_0 : i32, i32
  }
  func.func @transform_8(%arg0: i32) -> (i32, i32) {
    %c0_i32 = arith.constant 0 : i32
    %c0_i32_0 = arith.constant 0 : i32
    %c0_i32_1 = arith.constant 0 : i32
    return %c0_i32, %c0_i32_0 : i32, i32
  }
  func.func @transform_9(%arg0: i32) -> (i32, i32) {
    %c0_i32 = arith.constant 0 : i32
    %c0_i32_0 = arith.constant 0 : i32
    return %arg0, %c0_i32 : i32, i32
  }
}

</mosaic_0001>

<bundles_post_ra>
// kernel: tpu_custom_call.1
= control target key start
LH: loop header
LB: loop body
LE: loop exit
PB: predicated region body
PF: predicated region fallthrough
CT: control target
= control target key end

     0   :  { %s13338_s0 = inlined_call_operand.vmem [shape: f32[512,64], index: 0, kind: input, shape index: {}]   ;;  %s13339_s1 = inlined_call_operand.hbm [shape: f32[64,1024], index: 1, kind: input, shape index: {}]   ;;  %s13340_s2 = inlined_call_operand.hbm [shape: f32[1,1024], index: 2, kind: input, shape index: {}]   ;;  %s13341_s3 = inlined_call_operand.hbm [shape: f32[1024,512], index: 3, kind: input, shape index: {}]   ;;  %s13342_s4 = inlined_call_operand.hbm [shape: f32[1,512], index: 4, kind: input, shape index: {}]   ;;  %s13343_s5 = inlined_call_operand.hbm [shape: f32[512,256], index: 5, kind: input, shape index: {}]   ;;  %s13344_s6 = inlined_call_operand.hbm [shape: f32[1,256], index: 6, kind: input, shape index: {}]   ;;  %s13345_s7 = inlined_call_operand.hbm [shape: f32[256,128], index: 7, kind: input, shape index: {}]   ;;  %s13346_s8 = inlined_call_operand.hbm [shape: f32[1,128], index: 8, kind: input, shape index: {}]   ;;  %s13347_s9 = inlined_call_operand.hbm [shape: f32[512,128], index: 9, kind: output, shape index: {}]  }
   0x1   :  { %13698 = sst [smem:[#allocation273_spill]] %s13339_s1 }
   0x2   :  { %13699 = sst [smem:[#allocation274_spill]] %s13340_s2 }
   0x3   :  { %14 = vsyncpa [#allocation3], 0 }
   0x4   :  { %15 = vsyncpa [#allocation6], 0 }
   0x5   :  { %16 = vsyncpa [#allocation9], 0 }
   0x6   :  { %17 = vsyncpa [#allocation12], 0 }
   0x7   :  { %18 = vsyncpa [#allocation15], 0 }
   0x8   :  { %19 = vsyncpa [#allocation4], 0 }
   0x9   :  { %21 = vsyncpa [#allocation4 + $0x1], 0  ;;  %s8270_s30 = smov 0   ;;  %s8272_s10 = smov 0  }
   0xa   :  { %s8274_s11 = smov 0   ;;  %s8276_s12 = smov 0  }
   0xb LB: > { %s8291_s13 = sadd.s32 4294967295, %s8198_s12   ;;  %s6809_s14 = sadd.s32 4294967294, %s8198_s12   ;;  %s8198_s12 = sphi %s8276_s12, %s15076_s12   ;;  %s8194_s11 = sphi %s8274_s11, %s15075_s11   ;;  %s8190_s10 = sphi %s8272_s10, %s15074_s10   ;;  %s8186_s30 = sphi %s8270_s30, %s15073_s30  }
   0xc   : > { %s8295_s15 = sadd.s32 1, %s8198_s12   ;;  %s228_s16 = sadd.s32 1, %s8194_s11 }
   0xd   : > { %s225_s17 = ssub.s32 %s8198_s12, %s8295_s15  ;;  %p238_p0 = scmp.ne.s32.totalorder %s8194_s11, %s8190_s10 }
   0xe   : > { %p226_p1 = scmp.eq.s32.totalorder %s225_s17, 0  ;;  %p239_p2 = scmp.eq.s32.totalorder %s8291_s13, 1 }
   0xf   : > { %p244_p3 = scmp.ne.s32.totalorder %s8190_s10, %s8186_s30  ;;  %p245_p4 = scmp.eq.s32.totalorder %s6809_s14, 1 }
  0x10   : > { %s8306_s18 = scalar_select %p226_p1, %s8194_s11, %s228_s16  }
  0x11   : > { %p8308_p5 = por %p239_p2, %p238_p0  ;;  %p8312_p6 = por %p245_p4, %p244_p3 }
  0x12   : > { %p6810_p7 = scmp.ge.s32.totalorder %s8198_s12, 1  ;;  %p252_p8 = scmp.lt.s32.totalorder %s8198_s12, 3 }
  0x13   : > { %s13700_s19 = scalar_select %p8308_p5, 1, 0 }
  0x14   : > { %s13701_s20 = scalar_select %p8312_p6, 1, 0 }
  0x15   : > { %p13348_p9 = scmp.eq.s32.totalorder %s8291_s13, 0  ;;  %p8319_p10 = pnand %p6810_p7, %p252_p8 }
  0x16   : > { %s8200_s22 = smov [#allocation5]   ;;  %s8201_s24 = smov [#allocation8]  }
  0x17   : > { %s13702_s21 = scalar_select %p8319_p10, 1, 0 }
  0x18   : > { %s278_s23 = sshll.u32 %s8200_s22, 4  ;;  %p7017_p11 = pneg %p8319_p10  ;;  %s279_s23 = int_to_ptr.vmem [resolvable:$true] %s278_s23 }
  0x19   : > { %s302_s25 = sshll.u32 %s8201_s24, 4  ;;  %s8202_s27 = smov [#allocation11]   ;;  %s303_s25 = int_to_ptr.vmem [resolvable:$true] %s302_s25 }
  0x1a   : > { %p8327_p12 = pnand %p13348_p9, %p7017_p11  ;;  %s326_s28 = sshll.u32 %s8202_s27, 4  ;;  %s8331_s28 = int_to_ptr.vmem [resolvable:$true] %s326_s28 }
  0x1b   : > { %s7921_s14 = scalar_lea.vmem %s279_s23, 128  ;;  %p7929_p3 = scmp.lt.s32.totalorder %s279_s23, %s279_s23 }
  0x1c   : > { %p8335_p13 = pneg %p8327_p12  ;;  %p7922_p0 = scmp.ne.s32.totalorder %s279_s23, %s7921_s14 }
  0x1d   : > { %p7930_p4 = scmp.lt.s32.totalorder %s7921_s14, %s7921_s14 }
  0x1e   : > { %p7924_p1 = pnand %p7922_p0, %p8335_p13 }
  0x1f   : > { %p7931_p7 = por %p7930_p4, %p7929_p3 }
  0x20   : > { %p7925_p2 = pneg %p7924_p1 }
  0x22   : > { %p7932_p8 = pnand %p7931_p7, %p7925_p2 }
  0x24   : > { %7935 = shalt.err (!%p7932_p8)
}
  0x25   : > { %s13705_s2 = sld [smem:[#allocation274_spill]]  ;;  %s7947_s22 = scalar_lea.vmem %s303_s25, 64 }
  0x26   : > { %p7948_p11 = scmp.ne.s32.totalorder %s303_s25, %s7947_s22  ;;  %p7955_p5 = scmp.lt.s32.totalorder %s303_s25, %s303_s25 }
  0x27   : > { %p7956_p0 = scmp.lt.s32.totalorder %s7947_s22, %s7947_s22 }
  0x28   : > { %p7950_p9 = pnand %p7948_p11, %p8335_p13 }
  0x29   : > { %p7957_p1 = por %p7956_p0, %p7955_p5 }
  0x2a   : > { %p7951_p6 = pneg %p7950_p9 }
  0x2b   : > { %7023 = dma.hbm_to_vmem [thread:$0]  (!%p8327_p12), %s13705_s2, 128, %s279_s23, [#allocation6]  }
  0x2c   : > { %p7958_p10 = pnand %p7957_p1, %p7951_p6 }
  0x2e   : > { %7961 = shalt.err (!%p7958_p10)
}
  0x2f   : > { %7029 = dma.hbm_to_vmem [thread:$0]  (!%p8327_p12), %s13342_s4, 64, %s303_s25, [#allocation9]  }
  0x30   : > { %s7973_s23 = scalar_lea.vmem %s8331_s28, 32  ;;  %p7981_p4 = scmp.lt.s32.totalorder %s8331_s28, %s8331_s28 }
  0x31   : > { %p7974_p2 = scmp.ne.s32.totalorder %s8331_s28, %s7973_s23  ;;  %p7982_p5 = scmp.lt.s32.totalorder %s7973_s23, %s7973_s23 }
  0x33   : > { %p7976_p3 = pnand %p7974_p2, %p8335_p13  ;;  %p7983_p6 = por %p7982_p5, %p7981_p4 }
  0x35   : > { %p7977_p9 = pneg %p7976_p3 }
  0x37   : > { %p7984_p10 = pnand %p7983_p6, %p7977_p9 }
  0x39   : > { %7987 = shalt.err (!%p7984_p10)
}
  0x3a   : > { %7035 = dma.hbm_to_vmem [thread:$0]  (!%p8327_p12), %s13344_s6, 32, %s8331_s28, [#allocation12]  }
  0x3b   : > { %s8203_s25 = smov [#allocation2]  }
  0x3c   : > { %s264_s17 = sshll.u32 %s8203_s25, 4  ;;  %s265_s17 = int_to_ptr.vmem [resolvable:$true] %s264_s17 }
  0x3d   : > { %s7999_s22 = scalar_lea.vmem %s265_s17, 8192  ;;  %p8007_p0 = scmp.lt.s32.totalorder %s265_s17, %s265_s17 }
  0x3e   : > { %p8000_p7 = scmp.ne.s32.totalorder %s265_s17, %s7999_s22  ;;  %p8008_p1 = scmp.lt.s32.totalorder %s7999_s22, %s7999_s22 }
  0x40   : > { %p8002_p8 = pnand %p8000_p7, %p8335_p13  ;;  %p8009_p2 = por %p8008_p1, %p8007_p0 }
  0x42   : > { %p8003_p11 = pneg %p8002_p8 }
  0x44   : > { %p8010_p3 = pnand %p8009_p2, %p8003_p11 }
  0x46   : > { %8013 = shalt.err (!%p8010_p3)
}
  0x47   : > { %s8204_s24 = smov 1024   ;;  %s8205_s27 = smov 64  }
  0x48   : > { %s13706_s1 = sld [smem:[#allocation273_spill]]  ;;  %s8206_s14 = smov [#allocation7]  }
  0x49   : > { %s288_s16 = sshll.u32 %s8206_s14, 4  ;;  %s289_s16 = int_to_ptr.vmem [resolvable:$true] %s288_s16 }
  0x4a   : > { %s8025_s25 = scalar_lea.vmem %s289_s16, 65536  ;;  %p8033_p6 = scmp.lt.s32.totalorder %s289_s16, %s289_s16 }
  0x4b   : > { %p8026_p9 = scmp.ne.s32.totalorder %s289_s16, %s8025_s25  ;;  %p8034_p10 = scmp.lt.s32.totalorder %s8025_s25, %s8025_s25 }
  0x4d   : > { %p8028_p4 = pnand %p8026_p9, %p8335_p13  ;;  %p8035_p7 = por %p8034_p10, %p8033_p6 }
  0x4e   : > { %7020 = dma.hbm_to_vmem [thread:$0]  (!%p8327_p12), %s13706_s1, 8192, %s265_s17, [#allocation3], %s8204_s24, %s8204_s24, %s8205_s27  }
  0x4f   : > { %p8029_p5 = pneg %p8028_p4 }
  0x51   : > { %p8036_p8 = pnand %p8035_p7, %p8029_p5 }
  0x53   : > { %8039 = shalt.err (!%p8036_p8)
}
  0x54   : > { %s8207_s22 = smov 512   ;;  %s8208_s2 = smov 32  }
  0x55   : > { %7026 = dma.hbm_to_vmem [thread:$0]  (!%p8327_p12), %s13341_s3, 65536, %s289_s16, [#allocation6], %s8207_s22, %s8207_s22, %s8208_s2  }
  0x56   : > { %s8209_s24 = smov [#allocation10]  }
  0x57   : > { %s312_s27 = sshll.u32 %s8209_s24, 4  ;;  %s313_s27 = int_to_ptr.vmem [resolvable:$true] %s312_s27 }
  0x58   : > { %s8051_s28 = scalar_lea.vmem %s313_s27, 16384  ;;  %p8059_p2 = scmp.lt.s32.totalorder %s313_s27, %s313_s27 }
  0x59   : > { %p8052_p11 = scmp.ne.s32.totalorder %s313_s27, %s8051_s28  ;;  %p8060_p3 = scmp.lt.s32.totalorder %s8051_s28, %s8051_s28 }
  0x5b   : > { %p8054_p0 = pnand %p8052_p11, %p8335_p13  ;;  %p8061_p9 = por %p8060_p3, %p8059_p2 }
  0x5d   : > { %p8055_p1 = pneg %p8054_p0 }
  0x5f   : > { %p8062_p4 = pnand %p8061_p9, %p8055_p1 }
  0x61   : > { %8065 = shalt.err (!%p8062_p4)
}
  0x62   : > { %s8210_s14 = smov 256   ;;  %s8211_s25 = smov 16  }
  0x63   : > { %7032 = dma.hbm_to_vmem [thread:$0]  (!%p8327_p12), %s13343_s5, 16384, %s313_s27, [#allocation9], %s8210_s14, %s8210_s14, %s8211_s25  }
  0x64   : > { %s8212_s16 = smov [#allocation13]  }
  0x65   : > { %s336_s22 = sshll.u32 %s8212_s16, 4  ;;  %s337_s22 = int_to_ptr.vmem [resolvable:$true] %s336_s22 }
  0x66   : > { %s8077_s17 = scalar_lea.vmem %s337_s22, 4096  ;;  %p8085_p7 = scmp.lt.s32.totalorder %s337_s22, %s337_s22 }
  0x67   : > { %p8078_p5 = scmp.ne.s32.totalorder %s337_s22, %s8077_s17  ;;  %p8086_p8 = scmp.lt.s32.totalorder %s8077_s17, %s8077_s17 }
  0x69   : > { %p8080_p6 = pnand %p8078_p5, %p8335_p13  ;;  %p8087_p11 = por %p8086_p8, %p8085_p7 }
  0x6b   : > { %p8081_p10 = pneg %p8080_p6 }
  0x6d   : > { %p8088_p0 = pnand %p8087_p11, %p8081_p10 }
  0x6f   : > { %8091 = shalt.err (!%p8088_p0)
}
  0x70   : > { %s8213_s24 = smov 128   ;;  %s8214_s28 = smov 8  }
  0x71   : > { %7038 = dma.hbm_to_vmem [thread:$0]  (!%p8327_p12), %s13345_s7, 4096, %s337_s22, [#allocation12], %s8213_s24, %s8213_s24, %s8214_s28  }
  0x72   : > { %s8215_s14 = smov [#allocation14]  }
  0x73   : > { %s350_s25 = sshll.u32 %s8215_s14, 4  ;;  %s351_s25 = int_to_ptr.vmem [resolvable:$true] %s350_s25 }
  0x74   : > { %s8103_s2 = scalar_lea.vmem %s351_s25, 16  ;;  %s8110_s16 = scalar_lea.vmem %s351_s25, 32 }
  0x75   : > { %p8104_p1 = scmp.ne.s32.totalorder %s351_s25, %s8103_s2  ;;  %p8111_p9 = scmp.lt.s32.totalorder %s351_s25, %s351_s25 }
  0x76   : > { %p8112_p4 = scmp.lt.s32.totalorder %s8110_s16, %s8103_s2 }
  0x77   : > { %p8106_p2 = pnand %p8104_p1, %p8335_p13 }
  0x78   : > { %p8113_p5 = por %p8112_p4, %p8111_p9 }
  0x79   : > { %p8107_p3 = pneg %p8106_p2 }
  0x7b   : > { %p8114_p6 = pnand %p8113_p5, %p8107_p3 }
  0x7d   : > { %8117 = shalt.err (!%p8114_p6)
}
  0x7e   : > { %7041 = dma.hbm_to_vmem [thread:$0]  (!%p8327_p12), %s13346_s8, 16, %s351_s25, [#allocation15]  }
  0x7f   : > { %p13707_p10 = scmp.ne.s32.totalorder %s13702_s21, 0 }
  0x81   : > { %372 = sbr.rel (%p13707_p10) target bundleno = 1683 (0x693), region = 56 }
  0x86   : > { %p13708_p7 = scmp.eq.s32.totalorder %s8291_s13, 0 }
  0x88   : > { %8161 = dma.done.wait (%p13708_p7), [#allocation3], 8192   ;;  %p13709_p13 = pmov %p13708_p7 }
  0x89   : > { %p13710_p8 = pmov %p13708_p7 }
  0x8a   : > { %8163 = vsyncadd (%p13709_p13), [#allocation3], 4294959104 }
  0x8b   : > { %8165 = dma.done.wait (%p13710_p8), [#allocation6], 65664   ;;  %p13711_p11 = pmov %p13708_p7 }
  0x8c   : > { %p13712_p0 = pmov %p13708_p7 }
  0x8d   : > { %8167 = vsyncadd (%p13711_p11), [#allocation6], 4294901632 }
  0x8e   : > { %8169 = dma.done.wait (%p13712_p0), [#allocation9], 16448   ;;  %p13713_p12 = pmov %p13712_p0 }
  0x8f   : > { %p13714_p1 = pmov %p13712_p0 }
  0x90   : > { %8171 = vsyncadd (%p13713_p12), [#allocation9], 4294950848 }
  0x91   : > { %8173 = dma.done.wait (%p13714_p1), [#allocation12], 4128   ;;  %p13715_p2 = pmov %p13712_p0 }
  0x92   : > { %p13716_p3 = pmov %p13712_p0 }
  0x93   : > { %8175 = vsyncadd (%p13715_p2), [#allocation12], 4294963168 }
  0x94   : > { %8177 = dma.done.wait (%p13716_p3), [#allocation15], 16   ;;  %p13717_p9 = pmov %p13712_p0 }
  0x95   : > { %v13373_v0 = vmov 0.0   ;;  %s6830_s1 = sshll.u32 %s8291_s13, 5  ;;  %v532_v1 = vld [vmem:[#allocation2 + $0x1c8] sm:$0xff]  ;;  %v531_v2 = vld [vmem:[#allocation2 + $0x1c0] sm:$0xff]  ;;  %vm581_vm0 = vcmask 523264   ;;  %v534_v19 = vld [vmem:[#allocation2 + $0x1d8] sm:$0xff] }
  0x96   : > { %8179 = vsyncadd (%p13717_p9), [#allocation15], 4294967280  ;;  %742 = vmatprep.mubr.f32.mxu0 %v13373_v0  ;;  %838 = vmatprep.mubr.f32.mxu1 %v13373_v0  ;;  %v524_v3 = vld [vmem:[#allocation2 + $0x188] sm:$0xff]  ;;  %p437_p4 = scmp.lt.s32.totalorder %s6830_s1, 63  ;;  %v523_v4 = vld [vmem:[#allocation2 + $0x180] sm:$0xff]  ;;  %s433_s24 = sand.u32 1, %s8190_s10  }
  0x97   : > { %694 = vmatprep.subr.mxu0 %v532_v1  ;;  %6967 = vmatprep.subr.mxu1 %v532_v1  ;;  %v516_v5 = vld [vmem:[#allocation2 + $0x148] sm:$0xff]  ;;  %v515_v6 = vld [vmem:[#allocation2 + $0x140] sm:$0xff]  ;;  %v533_v20 = vld [vmem:[#allocation2 + $0x1d0] sm:$0xff]  ;;  %s6829_s28 = sshll.u32 %s433_s24, 8  ;;  %s6966_s27 = sshll.u32 %s8291_s13, 12 }
  0x98   : > { %695 = vmatpush1.msra.mxu0 %v531_v2  ;;  %6975 = vmatpush1.msra.mxu1 %v531_v2  ;;  %v508_v7 = vld [vmem:[#allocation2 + $0x108] sm:$0xff]  ;;  %s15078_s1 = smov (!%p437_p4, %s6830_s1), 63  ;;  %v507_v8 = vld [vmem:[#allocation2 + $0x100] sm:$0xff]  ;;  %v526_v21 = vld [vmem:[#allocation2 + $0x198] sm:$0xff]  ;;  %s13222_s23 = scalar_lea.vmem [#allocation16], %s6829_s28 }
  0x99   : > { %696 = vmatprep.subr.mxu0 %v524_v3  ;;  %6968 = vmatprep.subr.mxu1 %v524_v3  ;;  %v500_v9 = vld [vmem:[#allocation2 + $0xc8] sm:$0xff]  ;;  %v499_v10 = vld [vmem:[#allocation2 + $0xc0] sm:$0xff]  ;;  %s6831_s21 = sshll.u32 %s15078_s1, 3  ;;  %v525_v24 = vld [vmem:[#allocation2 + $0x190] sm:$0xff]  ;;  %s6668_s14 = sshll.u32 %s13222_s23, 4  ;;  %s13292_s14 = int_to_ptr.vmem [resolvable:$true] %s6668_s14 }
  0x9a   : > { %697 = vmatpush1.msra.mxu0 %v523_v4  ;;  %6976 = vmatpush1.msra.mxu1 %v523_v4  ;;  %v492_v11 = vld [vmem:[#allocation2 + $0x88] sm:$0xff]  ;;  %v491_v12 = vld [vmem:[#allocation2 + $0x80] sm:$0xff]  ;;  %s8428_s22 = scalar_lea.vmem %s13338_s0, %s6831_s21  ;;  %v518_v26 = vld [vmem:[#allocation2 + $0x158] sm:$0xff]  ;;  %s13290_s16 = scalar_lea.hbm %s13347_s9, %s6966_s27 }
  0x9b   : > { %698 = vmatprep.subr.mxu0 %v516_v5  ;;  %6969 = vmatprep.subr.mxu1 %v516_v5  ;;  %v484_v13 = vld [vmem:[#allocation2 + $0x48] sm:$0xff]  ;;  %v483_v14 = vld [vmem:[#allocation2 + $0x40] sm:$0xff]  ;;  %v8455_v28 = vld [vmem:[%s8428_s22 + $0x10] sm:$0xff]  ;;  %s13298_s13 = scalar_lea.sflag [#allocation4], %s433_s24  ;;  %s8118_s17 = scalar_lea.vmem %s13292_s14, 4096 }
  0x9c   : > { %699 = vmatpush1.msra.mxu0 %v515_v6  ;;  %6977 = vmatpush1.msra.mxu1 %v515_v6  ;;  %v476_v15 = vld [vmem:[#allocation2 + $0x8] sm:$0xff]  ;;  %v475_v16 = vld [vmem:[#allocation2] sm:$0xff]  ;;  %v8458_v29 = vld [vmem:[%s8428_s22 + $0x90] sm:$0xff]  ;;  %p8119_p5 = scmp.ne.s32.totalorder %s13292_s14, %s8118_s17  ;;  %p15071_p6 = scmp.ne.s32.totalorder %s13700_s19, 0 }
  0x9d   : > { %700 = vmatprep.subr.mxu0 %v508_v7  ;;  %6970 = vmatprep.subr.mxu1 %v508_v7  ;;  %v8431_v17 = vld [vmem:[%s8428_s22] sm:$0xff]  ;;  %v8442_v22 = vld [vmem:[%s8428_s22 + $0x8] sm:$0xff]  ;;  %v517_v30 = vld [vmem:[#allocation2 + $0x150] sm:$0xff]  ;;  %s8217_s1 = smov [#allocation16]  }
  0x9e   : > { %701 = vmatpush1.msra.mxu0 %v507_v8  ;;  %6978 = vmatpush1.msra.mxu1 %v507_v8  ;;  %v8434_v18 = vld [vmem:[%s8428_s22 + $0x80] sm:$0xff]  ;;  %v8445_v23 = vld [vmem:[%s8428_s22 + $0x88] sm:$0xff]  ;;  %v510_v32 = vld [vmem:[#allocation2 + $0x118] sm:$0xff]  ;;  %p8120_p10 = pnand %p8119_p5, %p15071_p6  ;;  %s8122_s21 = sshll.u32 %s8217_s1, 4  ;;  %s8123_s21 = int_to_ptr.vmem [resolvable:$false] %s8122_s21 }
  0x9f   : > { %702 = vmatprep.subr.mxu0 %v500_v9  ;;  %6971 = vmatprep.subr.mxu1 %v500_v9  ;;  %v536_v25 = vld [vmem:[#allocation2 + $0x1e8] sm:$0xff]  ;;  %v535_v27 = vld [vmem:[#allocation2 + $0x1e0] sm:$0xff]  ;;  %v8467_v34 = vld [vmem:[%s8428_s22 + $0x18] sm:$0xff]  ;;  %s8124_s26 = scalar_lea.vmem %s8123_s21, 8192  ;;  %p8125_p13 = scmp.lt.s32.totalorder %s13292_s14, %s8123_s21 }
  0xa0   : > { %703 = vmatpush1.msra.mxu0 %v499_v10  ;;  %6979 = vmatpush1.msra.mxu1 %v499_v10  ;;  %v528_v31 = vld [vmem:[#allocation2 + $0x1a8] sm:$0xff]  ;;  %v527_v33 = vld [vmem:[#allocation2 + $0x1a0] sm:$0xff]  ;;  %v8470_v35 = vld [vmem:[%s8428_s22 + $0x98] sm:$0xff]  ;;  %p8121_p7 = pneg %p8120_p10  ;;  %p8126_p8 = scmp.lt.s32.totalorder %s8124_s26, %s8118_s17 }
  0xa1   : > { %704 = vmatprep.subr.mxu0 %v492_v11  ;;  %6972 = vmatprep.subr.mxu1 %v492_v11  ;;  %v509_v36 = vld [vmem:[#allocation2 + $0x110] sm:$0xff]  ;;  %v520_v37 = vld [vmem:[#allocation2 + $0x168] sm:$0xff]  ;;  %v502_v38 = vld [vmem:[#allocation2 + $0xd8] sm:$0xff] }
  0xa2   : > { %705 = vmatpush1.msra.mxu0 %v491_v12  ;;  %6980 = vmatpush1.msra.mxu1 %v491_v12  ;;  %v519_v39 = vld [vmem:[#allocation2 + $0x160] sm:$0xff]  ;;  %v501_v42 = vld [vmem:[#allocation2 + $0xd0] sm:$0xff]  ;;  %v512_v43 = vld [vmem:[#allocation2 + $0x128] sm:$0xff]  ;;  %p8127_p11 = por %p8126_p8, %p8125_p13 }
  0xa3   : > { %706 = vmatprep.subr.mxu0 %v484_v13  ;;  %6973 = vmatprep.subr.mxu1 %v484_v13  ;;  %v8479_v40 = vld [vmem:[%s8428_s22 + $0x20] sm:$0xff]  ;;  %v494_v44 = vld [vmem:[#allocation2 + $0x98] sm:$0xff]  ;;  %v8491_v46 = vld [vmem:[%s8428_s22 + $0x28] sm:$0xff] }
  0xa4   : > { %707 = vmatpush1.msra.mxu0 %v483_v14  ;;  %6981 = vmatpush1.msra.mxu1 %v483_v14  ;;  %v8482_v41 = vld [vmem:[%s8428_s22 + $0xa0] sm:$0xff]  ;;  %v8494_v47 = vld [vmem:[%s8428_s22 + $0xa8] sm:$0xff]  ;;  %v493_v48 = vld [vmem:[#allocation2 + $0x90] sm:$0xff]  ;;  %p8128_p0 = pnand %p8127_p11, %p8121_p7 }
  0xa5   : > { %708 = vmatprep.subr.mxu0 %v476_v15  ;;  %6974 = vmatprep.subr.mxu1 %v476_v15  ;;  %v511_v45 = vld [vmem:[#allocation2 + $0x120] sm:$0xff]  ;;  %v504_v49 = vld [vmem:[#allocation2 + $0xe8] sm:$0xff]  ;;  %v486_v50 = vld [vmem:[#allocation2 + $0x58] sm:$0xff] }
  0xa6   : > { %709 = vmatpush1.msra.mxu0 %v475_v16  ;;  %6982 = vmatpush1.msra.mxu1 %v475_v16  ;;  %v503_v51 = vld [vmem:[#allocation2 + $0xe0] sm:$0xff]  ;;  %v8503_v52 = vld [vmem:[%s8428_s22 + $0x30] sm:$0xff]  ;;  %v496_v55 = vld [vmem:[#allocation2 + $0xa8] sm:$0xff] }
  0xa7   : > { %6832 = vmatmul.mubr.msk.f32.vlgmr.msra.gmra.mxu0 %vm581_vm0, %v8431_v17  ;;  %6848 = vmatmul.mubr.msk.f32.vlgmr.msra.gmra.mxu1 %vm581_vm0, %v8434_v18  ;;  %v8506_v53 = vld [vmem:[%s8428_s22 + $0xb0] sm:$0xff]  ;;  %v478_v56 = vld [vmem:[#allocation2 + $0x18] sm:$0xff]  ;;  %v495_v57 = vld [vmem:[#allocation2 + $0xa0] sm:$0xff] }
  0xa8   : > { %951 = vmatprep.subr.mxu1 %v534_v19  ;;  %748 = vmatprep.mubr.f32.mxu0 %v13373_v0  ;;  %v485_v54 = vld [vmem:[#allocation2 + $0x50] sm:$0xff]  ;;  %v8515_v58 = vld [vmem:[%s8428_s22 + $0x38] sm:$0xff]  ;;  %v488_v61 = vld [vmem:[#allocation2 + $0x68] sm:$0xff] }
  0xa9   : > { %952 = vmatpush1.msra.mxu1 %v533_v20  ;;  %844 = vmatprep.mubr.f32.mxu1 %v13373_v0  ;;  %v8518_v59 = vld [vmem:[%s8428_s22 + $0xb8] sm:$0xff]  ;;  %v477_v60 = vld [vmem:[#allocation2 + $0x10] sm:$0xff]  ;;  %v487_v63 = vld [vmem:[#allocation2 + $0x60] sm:$0xff] }
  0xaa   : > { %953 = vmatprep.subr.mxu1 %v526_v21  ;;  %1208 = vmatprep.subr.mxu0 %v536_v25  ;;  %v538_v62 = vld [vmem:[#allocation2 + $0x1f8] sm:$0xff]  ;;  %v8527_v1 = vld [vmem:[%s8428_s22 + $0x40] sm:$0xff]  ;;  %v480_v3 = vld [vmem:[#allocation2 + $0x28] sm:$0xff] }
  0xab   : > { %6833 = vmatmul.mubr.msk.f32.gmra.mxu0 %vm581_vm0, %v8442_v22  ;;  %6849 = vmatmul.mubr.msk.f32.gmra.mxu1 %vm581_vm0, %v8445_v23  ;;  %v8530_v2 = vld [vmem:[%s8428_s22 + $0xc0] sm:$0xff]  ;;  %v8539_v5 = vld [vmem:[%s8428_s22 + $0x48] sm:$0xff]  ;;  %v2023_v7 = vld [vmem:[#allocation7 + $0x1e8] sm:$0xff] }
  0xac   : > { %754 = vmatprep.mubr.f32.mxu0 %v13373_v0  ;;  %850 = vmatprep.mubr.f32.mxu1 %v13373_v0  ;;  %v479_v4 = vld [vmem:[#allocation2 + $0x20] sm:$0xff]  ;;  %v8542_v6 = vld [vmem:[%s8428_s22 + $0xc8] sm:$0xff]  ;;  %v8551_v8 = vld [vmem:[%s8428_s22 + $0x50] sm:$0xff] }
  0xad   : > { %954 = vmatpush1.msra.mxu1 %v525_v24  ;;  %1209 = vmatpush1.msra.mxu0 %v535_v27  ;;  %v8554_v9 = vld [vmem:[%s8428_s22 + $0xd0] sm:$0xff]  ;;  %v8563_v10 = vld [vmem:[%s8428_s22 + $0x58] sm:$0xff]  ;;  %v8575_v12 = vld [vmem:[%s8428_s22 + $0x60] sm:$0xff] }
  0xae   : > { %955 = vmatprep.subr.mxu1 %v518_v26  ;;  %1210 = vmatprep.subr.mxu0 %v528_v31  ;;  %v8566_v11 = vld [vmem:[%s8428_s22 + $0xd8] sm:$0xff]  ;;  %v8578_v13 = vld [vmem:[%s8428_s22 + $0xe0] sm:$0xff]  ;;  %v8587_v14 = vld [vmem:[%s8428_s22 + $0x68] sm:$0xff] }
  0xaf   : > { %6834 = vmatmul.mubr.msk.f32.gmra.mxu0 %vm581_vm0, %v8455_v28  ;;  %6850 = vmatmul.mubr.msk.f32.gmra.mxu1 %vm581_vm0, %v8458_v29  ;;  %v8590_v15 = vld [vmem:[%s8428_s22 + $0xe8] sm:$0xff]  ;;  %v8599_v16 = vld [vmem:[%s8428_s22 + $0x70] sm:$0xff]  ;;  %v8611_v20 = vld [vmem:[%s8428_s22 + $0x78] sm:$0xff] }
  0xb0   : > { %760 = vmatprep.mubr.f32.mxu0 %v13373_v0  ;;  %856 = vmatprep.mubr.f32.mxu1 %v13373_v0  ;;  %v8602_v19 = vld [vmem:[%s8428_s22 + $0xf0] sm:$0xff]  ;;  %v8614_v21 = vld [vmem:[%s8428_s22 + $0xf8] sm:$0xff]  ;;  %v2022_v27 = vld [vmem:[#allocation7 + $0x1e0] sm:$0xff] }
  0xb1   : > { %956 = vmatpush1.msra.mxu1 %v517_v30  ;;  %1211 = vmatpush1.msra.mxu0 %v527_v33  ;;  %v537_v24 = vld [vmem:[#allocation2 + $0x1f0] sm:$0xff]  ;;  %v530_v25 = vld [vmem:[#allocation2 + $0x1b8] sm:$0xff]  ;;  %v2018_v33 = vld [vmem:[#allocation7 + $0x1c0] sm:$0xff] }
  0xb2   : > { %957 = vmatprep.subr.mxu1 %v510_v32  ;;  %1212 = vmatprep.subr.mxu0 %v520_v37  ;;  %v529_v26 = vld [vmem:[#allocation2 + $0x1b0] sm:$0xff]  ;;  %v522_v30 = vld [vmem:[#allocation2 + $0x178] sm:$0xff] }
  0xb3   : > { %6835 = vmatmul.mubr.msk.f32.gmra.mxu0 %vm581_vm0, %v8467_v34  ;;  %6851 = vmatmul.mubr.msk.f32.gmra.mxu1 %vm581_vm0, %v8470_v35  ;;  %v2019_v31 = vld [vmem:[#allocation7 + $0x1c8] sm:$0xff] }
  0xb4   : > { %766 = vmatprep.mubr.f32.mxu0 %v13373_v0  ;;  %862 = vmatprep.mubr.f32.mxu1 %v13373_v0  ;;  %v521_v32 = vld [vmem:[#allocation2 + $0x170] sm:$0xff] }
  0xb5   : > { %958 = vmatpush1.msra.mxu1 %v509_v36  ;;  %1213 = vmatpush1.msra.mxu0 %v519_v39  ;;  %v514_v36 = vld [vmem:[#allocation2 + $0x138] sm:$0xff]  ;;  %v2015_v37 = vld [vmem:[#allocation7 + $0x1a8] sm:$0xff]  ;;  %v2014_v39 = vld [vmem:[#allocation7 + $0x1a0] sm:$0xff] }
  0xb6   : > { %959 = vmatprep.subr.mxu1 %v502_v38  ;;  %1214 = vmatprep.subr.mxu0 %v512_v43  ;;  %v513_v38 = vld [vmem:[#allocation2 + $0x130] sm:$0xff] }
  0xb7   : > { %6836 = vmatmul.mubr.msk.f32.gmra.mxu0 %vm581_vm0, %v8479_v40  ;;  %6852 = vmatmul.mubr.msk.f32.gmra.mxu1 %vm581_vm0, %v8482_v41  ;;  %v2011_v43 = vld [vmem:[#allocation7 + $0x188] sm:$0xff] }
  0xb8   : > { %772 = vmatprep.mubr.f32.mxu0 %v13373_v0  ;;  %868 = vmatprep.mubr.f32.mxu1 %v13373_v0 }
  0xb9   : > { %960 = vmatpush1.msra.mxu1 %v501_v42  ;;  %1215 = vmatpush1.msra.mxu0 %v511_v45  ;;  %v506_v42 = vld [vmem:[#allocation2 + $0xf8] sm:$0xff]  ;;  %v2010_v45 = vld [vmem:[#allocation7 + $0x180] sm:$0xff] }
  0xba   : > { %961 = vmatprep.subr.mxu1 %v494_v44  ;;  %1216 = vmatprep.subr.mxu0 %v504_v49  ;;  %v505_v44 = vld [vmem:[#allocation2 + $0xf0] sm:$0xff] }
  0xbb   : > { %6837 = vmatmul.mubr.msk.f32.gmra.mxu0 %vm581_vm0, %v8491_v46  ;;  %6853 = vmatmul.mubr.msk.f32.gmra.mxu1 %vm581_vm0, %v8494_v47  ;;  %v2007_v49 = vld [vmem:[#allocation7 + $0x168] sm:$0xff] }
  0xbc   : > { %778 = vmatprep.mubr.f32.mxu0 %v13373_v0  ;;  %874 = vmatprep.mubr.f32.mxu1 %v13373_v0 }
  0xbd   : > { %962 = vmatpush1.msra.mxu1 %v493_v48  ;;  %1217 = vmatpush1.msra.mxu0 %v503_v51  ;;  %v498_v48 = vld [vmem:[#allocation2 + $0xb8] sm:$0xff]  ;;  %v2006_v51 = vld [vmem:[#allocation7 + $0x160] sm:$0xff] }
  0xbe   : > { %963 = vmatprep.subr.mxu1 %v486_v50  ;;  %1218 = vmatprep.subr.mxu0 %v496_v55  ;;  %v497_v50 = vld [vmem:[#allocation2 + $0xb0] sm:$0xff]  ;;  %v490_v55 = vld [vmem:[#allocation2 + $0x78] sm:$0xff] }
  0xbf   : > { %6838 = vmatmul.mubr.msk.f32.gmra.mxu0 %vm581_vm0, %v8503_v52  ;;  %6854 = vmatmul.mubr.msk.f32.gmra.mxu1 %vm581_vm0, %v8506_v53 }
  0xc0   : > { %784 = vmatprep.mubr.f32.mxu0 %v13373_v0  ;;  %880 = vmatprep.mubr.f32.mxu1 %v13373_v0 }
  0xc1   : > { %964 = vmatpush1.msra.mxu1 %v485_v54  ;;  %1219 = vmatpush1.msra.mxu0 %v495_v57  ;;  %v2003_v54 = vld [vmem:[#allocation7 + $0x148] sm:$0xff] }
  0xc2   : > { %965 = vmatprep.subr.mxu1 %v478_v56  ;;  %1220 = vmatprep.subr.mxu0 %v488_v61  ;;  %v2002_v56 = vld [vmem:[#allocation7 + $0x140] sm:$0xff]  ;;  %v489_v57 = vld [vmem:[#allocation2 + $0x70] sm:$0xff]  ;;  %v482_v61 = vld [vmem:[#allocation2 + $0x38] sm:$0xff] }
  0xc3   : > { %6839 = vmatmul.mubr.msk.f32.gmra.mxu0 %vm581_vm0, %v8515_v58  ;;  %6855 = vmatmul.mubr.msk.f32.gmra.mxu1 %vm581_vm0, %v8518_v59 }
  0xc4   : > { %790 = vmatprep.mubr.f32.mxu0 %v13373_v0  ;;  %886 = vmatprep.mubr.f32.mxu1 %v13373_v0 }
  0xc5   : > { %966 = vmatpush1.msra.mxu1 %v477_v60  ;;  %1221 = vmatpush1.msra.mxu0 %v487_v63  ;;  %v1999_v60 = vld [vmem:[#allocation7 + $0x128] sm:$0xff] }
  0xc6   : > { %1465 = vmatprep.subr.mxu1 %v538_v62  ;;  %1222 = vmatprep.subr.mxu0 %v480_v3  ;;  %v1998_v62 = vld [vmem:[#allocation7 + $0x120] sm:$0xff]  ;;  %v481_v63 = vld [vmem:[#allocation2 + $0x30] sm:$0xff] }
  0xc7   : > { %6840 = vmatmul.mubr.msk.f32.gmra.mxu0 %vm581_vm0, %v8527_v1  ;;  %6856 = vmatmul.mubr.msk.f32.gmra.mxu1 %vm581_vm0, %v8530_v2  ;;  %v1995_v3 = vld [vmem:[#allocation7 + $0x108] sm:$0xff] }
  0xc8   : > { %796 = vmatprep.mubr.f32.mxu0 %v13373_v0  ;;  %892 = vmatprep.mubr.f32.mxu1 %v13373_v0 }
  0xc9   : > { %1223 = vmatpush1.msra.mxu0 %v479_v4  ;;  %v2151_v4 = vld [vmem:[#allocation7 + $0x5e8] sm:$0xff] }
  0xca   : > { %2496 = vmatprep.subr.mxu0 %v2023_v7  ;;  %v1994_v7 = vld [vmem:[#allocation7 + $0x100] sm:$0xff] }
  0xcb   : > { %6841 = vmatmul.mubr.msk.f32.gmra.mxu0 %vm581_vm0, %v8539_v5  ;;  %6857 = vmatmul.mubr.msk.f32.gmra.mxu1 %vm581_vm0, %v8542_v6 }
  0xcc   : > { %802 = vmatprep.mubr.f32.mxu0 %v13373_v0  ;;  %898 = vmatprep.mubr.f32.mxu1 %v13373_v0 }
  0xcf   : > { %6842 = vmatmul.mubr.msk.f32.gmra.mxu0 %vm581_vm0, %v8551_v8  ;;  %6858 = vmatmul.mubr.msk.f32.gmra.mxu1 %vm581_vm0, %v8554_v9 }
  0xd0   : > { %808 = vmatprep.mubr.f32.mxu0 %v13373_v0  ;;  %904 = vmatprep.mubr.f32.mxu1 %v13373_v0 }
  0xd3   : > { %6843 = vmatmul.mubr.msk.f32.gmra.mxu0 %vm581_vm0, %v8563_v10  ;;  %6859 = vmatmul.mubr.msk.f32.gmra.mxu1 %vm581_vm0, %v8566_v11 }
  0xd4   : > { %814 = vmatprep.mubr.f32.mxu0 %v13373_v0  ;;  %910 = vmatprep.mubr.f32.mxu1 %v13373_v0 }
  0xd7   : > { %6844 = vmatmul.mubr.msk.f32.gmra.mxu0 %vm581_vm0, %v8575_v12  ;;  %6860 = vmatmul.mubr.msk.f32.gmra.mxu1 %vm581_vm0, %v8578_v13 }
  0xd8   : > { %820 = vmatprep.mubr.f32.mxu0 %v13373_v0  ;;  %916 = vmatprep.mubr.f32.mxu1 %v13373_v0 }
  0xdb   : > { %6845 = vmatmul.mubr.msk.f32.gmra.mxu0 %vm581_vm0, %v8587_v14  ;;  %6861 = vmatmul.mubr.msk.f32.gmra.mxu1 %vm581_vm0, %v8590_v15 }
  0xdc   : > { %826 = vmatprep.mubr.f32.mxu0 %v13373_v0  ;;  %922 = vmatprep.mubr.f32.mxu1 %v13373_v0 }
  0xdf   : > { %6846 = vmatmul.mubr.msk.f32.gmra.mxu0 %vm581_vm0, %v8599_v16  ;;  %6862 = vmatmul.mubr.msk.f32.gmra.mxu1 %vm581_vm0, %v8602_v19 }
  0xe0   : > { %832 = vmatprep.mubr.f32.mxu0 %v13373_v0  ;;  %928 = vmatprep.mubr.f32.mxu1 %v13373_v0 }
  0xe3   : > { %6847 = vmatmul.mubr.msk.f32.gmra.mxu0 %vm581_vm0, %v8611_v20  ;;  %6863 = vmatmul.mubr.msk.f32.gmra.mxu1 %vm581_vm0, %v8614_v21 }
  0xe4   : > { %999 = vmatprep.mubr.f32.mxu1 %v13373_v0  ;;  %1256 = vmatprep.mubr.f32.mxu0 %v13373_v0 }
  0xe7   : > { %6864 = vmatmul.mubr.msk.f32.vlgmr.msra.gmra.mxu1 %vm581_vm0, %v8431_v17  ;;  %6896 = vmatmul.mubr.msk.f32.vlgmr.msra.gmra.mxu0 %vm581_vm0, %v8431_v17 }
  0xe8   : > { %1466 = vmatpush1.msra.mxu1 %v537_v24  ;;  %1005 = vmatprep.mubr.f32.mxu1 %v13373_v0  ;;  %v1991_v24 = vld [vmem:[#allocation7 + $0xe8] sm:$0xff] }
  0xe9   : > { %1262 = vmatprep.mubr.f32.mxu0 %v13373_v0  ;;  %1467 = vmatprep.subr.mxu1 %v530_v25  ;;  %v1990_v25 = vld [vmem:[#allocation7 + $0xe0] sm:$0xff] }
  0xea   : > { %1468 = vmatpush1.msra.mxu1 %v529_v26  ;;  %2497 = vmatpush1.msra.mxu0 %v2022_v27  ;;  %v1986_v26 = vld [vmem:[#allocation7 + $0xc0] sm:$0xff] }
  0xeb   : > { %6865 = vmatmul.mubr.msk.f32.gmra.mxu1 %vm581_vm0, %v8442_v22  ;;  %6897 = vmatmul.mubr.msk.f32.gmra.mxu0 %vm581_vm0, %v8442_v22  ;;  %v1982_v27 = vld [vmem:[#allocation7 + $0xa0] sm:$0xff] }
  0xec   : > { %1011 = vmatprep.mubr.f32.mxu1 %v13373_v0  ;;  %1268 = vmatprep.mubr.f32.mxu0 %v13373_v0 }
  0xed   : > { %1469 = vmatprep.subr.mxu1 %v522_v30  ;;  %2498 = vmatprep.subr.mxu0 %v2019_v31  ;;  %v1978_v30 = vld [vmem:[#allocation7 + $0x80] sm:$0xff] }
  0xee   : > { %1470 = vmatpush1.msra.mxu1 %v521_v32  ;;  %2499 = vmatpush1.msra.mxu0 %v2018_v33  ;;  %v1974_v31 = vld [vmem:[#allocation7 + $0x60] sm:$0xff] }
  0xef   : > { %6866 = vmatmul.mubr.msk.f32.gmra.mxu1 %vm581_vm0, %v8455_v28  ;;  %6898 = vmatmul.mubr.msk.f32.gmra.mxu0 %vm581_vm0, %v8455_v28  ;;  %v1970_v32 = vld [vmem:[#allocation7 + $0x40] sm:$0xff] }
  0xf0   : > { %1017 = vmatprep.mubr.f32.mxu1 %v13373_v0  ;;  %1274 = vmatprep.mubr.f32.mxu0 %v13373_v0  ;;  %v1966_v33 = vld [vmem:[#allocation7 + $0x20] sm:$0xff] }
  0xf1   : > { %1471 = vmatprep.subr.mxu1 %v514_v36  ;;  %2500 = vmatprep.subr.mxu0 %v2015_v37  ;;  %v1962_v36 = vld [vmem:[#allocation7] sm:$0xff] }
  0xf2   : > { %1472 = vmatpush1.msra.mxu1 %v513_v38  ;;  %2501 = vmatpush1.msra.mxu0 %v2014_v39  ;;  %v2086_v37 = vld [vmem:[#allocation7 + $0x3e0] sm:$0xff] }
  0xf3   : > { %6867 = vmatmul.mubr.msk.f32.gmra.mxu1 %vm581_vm0, %v8467_v34  ;;  %6899 = vmatmul.mubr.msk.f32.gmra.mxu0 %vm581_vm0, %v8467_v34  ;;  %v2082_v38 = vld [vmem:[#allocation7 + $0x3c0] sm:$0xff] }
  0xf4   : > { %1023 = vmatprep.mubr.f32.mxu1 %v13373_v0  ;;  %1280 = vmatprep.mubr.f32.mxu0 %v13373_v0  ;;  %v2078_v39 = vld [vmem:[#allocation7 + $0x3a0] sm:$0xff] }
  0xf5   : > { %1473 = vmatprep.subr.mxu1 %v506_v42  ;;  %2502 = vmatprep.subr.mxu0 %v2011_v43  ;;  %v2074_v42 = vld [vmem:[#allocation7 + $0x380] sm:$0xff] }
  0xf6   : > { %1474 = vmatpush1.msra.mxu1 %v505_v44  ;;  %2503 = vmatpush1.msra.mxu0 %v2010_v45  ;;  %v2070_v43 = vld [vmem:[#allocation7 + $0x360] sm:$0xff] }
  0xf7   : > { %6868 = vmatmul.mubr.msk.f32.gmra.mxu1 %vm581_vm0, %v8479_v40  ;;  %6900 = vmatmul.mubr.msk.f32.gmra.mxu0 %vm581_vm0, %v8479_v40  ;;  %v2066_v44 = vld [vmem:[#allocation7 + $0x340] sm:$0xff] }
  0xf8   : > { %1029 = vmatprep.mubr.f32.mxu1 %v13373_v0  ;;  %1286 = vmatprep.mubr.f32.mxu0 %v13373_v0  ;;  %v2062_v45 = vld [vmem:[#allocation7 + $0x320] sm:$0xff] }
  0xf9   : > { %1475 = vmatprep.subr.mxu1 %v498_v48  ;;  %2504 = vmatprep.subr.mxu0 %v2007_v49  ;;  %v2058_v48 = vld [vmem:[#allocation7 + $0x300] sm:$0xff] }
  0xfa   : > { %1476 = vmatpush1.msra.mxu1 %v497_v50  ;;  %2505 = vmatpush1.msra.mxu0 %v2006_v51  ;;  %v2054_v49 = vld [vmem:[#allocation7 + $0x2e0] sm:$0xff] }
  0xfb   : > { %6869 = vmatmul.mubr.msk.f32.gmra.mxu1 %vm581_vm0, %v8491_v46  ;;  %6901 = vmatmul.mubr.msk.f32.gmra.mxu0 %vm581_vm0, %v8491_v46  ;;  %v2050_v50 = vld [vmem:[#allocation7 + $0x2c0] sm:$0xff] }
  0xfc   : > { %1035 = vmatprep.mubr.f32.mxu1 %v13373_v0  ;;  %1292 = vmatprep.mubr.f32.mxu0 %v13373_v0  ;;  %v2046_v51 = vld [vmem:[#allocation7 + $0x2a0] sm:$0xff] }
  0xfd   : > { %2506 = vmatprep.subr.mxu0 %v2003_v54  ;;  %1477 = vmatprep.subr.mxu1 %v490_v55  ;;  %v2042_v54 = vld [vmem:[#allocation7 + $0x280] sm:$0xff] }
  0xfe   : > { %2507 = vmatpush1.msra.mxu0 %v2002_v56  ;;  %1478 = vmatpush1.msra.mxu1 %v489_v57  ;;  %v2038_v55 = vld [vmem:[#allocation7 + $0x260] sm:$0xff]  ;;  %v2035_v56 = vld [vmem:[#allocation7 + $0x248] sm:$0xff] }
  0xff   : > { %6870 = vmatmul.mubr.msk.f32.gmra.mxu1 %vm581_vm0, %v8503_v52  ;;  %6902 = vmatmul.mubr.msk.f32.gmra.mxu0 %vm581_vm0, %v8503_v52  ;;  %v2034_v57 = vld [vmem:[#allocation7 + $0x240] sm:$0xff] }
 0x100   : > { %1041 = vmatprep.mubr.f32.mxu1 %v13373_v0  ;;  %1298 = vmatprep.mubr.f32.mxu0 %v13373_v0 }
 0x101   : > { %2508 = vmatprep.subr.mxu0 %v1999_v60  ;;  %1479 = vmatprep.subr.mxu1 %v482_v61  ;;  %v2031_v60 = vld [vmem:[#allocation7 + $0x228] sm:$0xff]  ;;  %v2030_v61 = vld [vmem:[#allocation7 + $0x220] sm:$0xff] }
 0x102   : > { %2509 = vmatpush1.msra.mxu0 %v1998_v62  ;;  %1480 = vmatpush1.msra.mxu1 %v481_v63  ;;  %v539_v62 = vld [vmem:[#allocation5] sm:$0xff]  ;;  %v2027_v63 = vld [vmem:[#allocation7 + $0x208] sm:$0xff] }
 0x103   : > { %6871 = vmatmul.mubr.msk.f32.gmra.mxu1 %vm581_vm0, %v8515_v58  ;;  %6903 = vmatmul.mubr.msk.f32.gmra.mxu0 %vm581_vm0, %v8515_v58  ;;  %v1987_v58 = vld [vmem:[#allocation7 + $0xc8] sm:$0xff] }
 0x104   : > { %1047 = vmatprep.mubr.f32.mxu1 %v13373_v0  ;;  %1304 = vmatprep.mubr.f32.mxu0 %v13373_v0 }
 0x105   : > { %2510 = vmatprep.subr.mxu0 %v1995_v3  ;;  %2753 = vmatprep.subr.mxu1 %v2151_v4  ;;  %v2026_v4 = vld [vmem:[#allocation7 + $0x200] sm:$0xff] }
 0x106   : > { %2511 = vmatpush1.msra.mxu0 %v1994_v7 }
 0x107   : > { %6872 = vmatmul.mubr.msk.f32.gmra.mxu1 %vm581_vm0, %v8527_v1  ;;  %6904 = vmatmul.mubr.msk.f32.gmra.mxu0 %vm581_vm0, %v8527_v1  ;;  %v1983_v1 = vld [vmem:[#allocation7 + $0xa8] sm:$0xff] }
 0x108   : > { %1053 = vmatprep.mubr.f32.mxu1 %v13373_v0  ;;  %1310 = vmatprep.mubr.f32.mxu0 %v13373_v0 }
 0x109   : > { %2512 = vmatprep.subr.mxu0 %v1991_v24  ;;  %v2150_v24 = vld [vmem:[#allocation7 + $0x5e0] sm:$0xff] }
 0x10a   : > { %2513 = vmatpush1.msra.mxu0 %v1990_v25 }
 0x10b   : > { %6873 = vmatmul.mubr.msk.f32.gmra.mxu1 %vm581_vm0, %v8539_v5  ;;  %6905 = vmatmul.mubr.msk.f32.gmra.mxu0 %vm581_vm0, %v8539_v5  ;;  %v1979_v5 = vld [vmem:[#allocation7 + $0x88] sm:$0xff] }
 0x10c   : > { %1059 = vmatprep.mubr.f32.mxu1 %v13373_v0  ;;  %1316 = vmatprep.mubr.f32.mxu0 %v13373_v0 }
 0x10d   : > { %2514 = vmatprep.subr.mxu0 %v1987_v58  ;;  %v2147_v58 = vld [vmem:[#allocation7 + $0x5c8] sm:$0xff] }
 0x10e   : > { %2515 = vmatpush1.msra.mxu0 %v1986_v26 }
 0x10f   : > { %6874 = vmatmul.mubr.msk.f32.gmra.mxu1 %vm581_vm0, %v8551_v8  ;;  %6906 = vmatmul.mubr.msk.f32.gmra.mxu0 %vm581_vm0, %v8551_v8  ;;  %v1975_v8 = vld [vmem:[#allocation7 + $0x68] sm:$0xff] }
 0x110   : > { %1065 = vmatprep.mubr.f32.mxu1 %v13373_v0  ;;  %1322 = vmatprep.mubr.f32.mxu0 %v13373_v0 }
 0x111   : > { %2516 = vmatprep.subr.mxu0 %v1983_v1 }
 0x112   : > { %2517 = vmatpush1.msra.mxu0 %v1982_v27 }
 0x113   : > { %6875 = vmatmul.mubr.msk.f32.gmra.mxu1 %vm581_vm0, %v8563_v10  ;;  %6907 = vmatmul.mubr.msk.f32.gmra.mxu0 %vm581_vm0, %v8563_v10  ;;  %v1971_v10 = vld [vmem:[#allocation7 + $0x48] sm:$0xff] }
 0x114   : > { %1071 = vmatprep.mubr.f32.mxu1 %v13373_v0  ;;  %1328 = vmatprep.mubr.f32.mxu0 %v13373_v0 }
 0x115   : > { %2518 = vmatprep.subr.mxu0 %v1979_v5 }
 0x116   : > { %2519 = vmatpush1.msra.mxu0 %v1978_v30  ;;  %v2143_v30 = vld [vmem:[#allocation7 + $0x5a8] sm:$0xff] }
 0x117   : > { %6876 = vmatmul.mubr.msk.f32.gmra.mxu1 %vm581_vm0, %v8575_v12  ;;  %6908 = vmatmul.mubr.msk.f32.gmra.mxu0 %vm581_vm0, %v8575_v12  ;;  %v1967_v12 = vld [vmem:[#allocation7 + $0x28] sm:$0xff] }
 0x118   : > { %1077 = vmatprep.mubr.f32.mxu1 %v13373_v0  ;;  %1334 = vmatprep.mubr.f32.mxu0 %v13373_v0 }
 0x119   : > { %2520 = vmatprep.subr.mxu0 %v1975_v8 }
 0x11a   : > { %2521 = vmatpush1.msra.mxu0 %v1974_v31 }
 0x11b   : > { %6877 = vmatmul.mubr.msk.f32.gmra.mxu1 %vm581_vm0, %v8587_v14  ;;  %6909 = vmatmul.mubr.msk.f32.gmra.mxu0 %vm581_vm0, %v8587_v14  ;;  %v1963_v14 = vld [vmem:[#allocation7 + $0x8] sm:$0xff] }
 0x11c   : > { %1083 = vmatprep.mubr.f32.mxu1 %v13373_v0  ;;  %1340 = vmatprep.mubr.f32.mxu0 %v13373_v0 }
 0x11d   : > { %2522 = vmatprep.subr.mxu0 %v1971_v10  ;;  %v2142_v10 = vld [vmem:[#allocation7 + $0x5a0] sm:$0xff] }
 0x11e   : > { %2523 = vmatpush1.msra.mxu0 %v1970_v32 }
 0x11f   : > { %6878 = vmatmul.mubr.msk.f32.gmra.mxu1 %vm581_vm0, %v8599_v16  ;;  %6910 = vmatmul.mubr.msk.f32.gmra.mxu0 %vm581_vm0, %v8599_v16  ;;  %v2087_v16 = vld [vmem:[#allocation7 + $0x3e8] sm:$0xff] }
 0x120   : > { %1089 = vmatprep.mubr.f32.mxu1 %v13373_v0  ;;  %1346 = vmatprep.mubr.f32.mxu0 %v13373_v0 }
 0x121   : > { %2524 = vmatprep.subr.mxu0 %v1967_v12 }
 0x122   : > { %2525 = vmatpush1.msra.mxu0 %v1966_v33 }
 0x123   : > { %6879 = vmatmul.mubr.msk.f32.gmra.mxu1 %vm581_vm0, %v8611_v20  ;;  %6911 = vmatmul.mubr.msk.f32.gmra.mxu0 %vm581_vm0, %v8611_v20  ;;  %v2083_v20 = vld [vmem:[#allocation7 + $0x3c8] sm:$0xff] }
 0x124   : > { %1095 = vmatprep.mubr.f32.mxu1 %v13373_v0  ;;  %1352 = vmatprep.mubr.f32.mxu0 %v13373_v0 }
 0x125   : > { %2526 = vmatprep.subr.mxu0 %v1963_v14 }
 0x126   : > { %2527 = vmatpush1.msra.mxu0 %v1962_v36  ;;  %v2138_v36 = vld [vmem:[#allocation7 + $0x580] sm:$0xff] }
 0x127   : > { %6880 = vmatmul.mubr.msk.f32.gmra.mxu1 %vm581_vm0, %v8434_v18  ;;  %6912 = vmatmul.mubr.msk.f32.gmra.mxu0 %vm581_vm0, %v8434_v18  ;;  %v2079_v18 = vld [vmem:[#allocation7 + $0x3a8] sm:$0xff] }
 0x128   : > { %1101 = vmatprep.mubr.f32.mxu1 %v13373_v0  ;;  %1358 = vmatprep.mubr.f32.mxu0 %v13373_v0 }
 0x129   : > { %2528 = vmatprep.subr.mxu0 %v2087_v16 }
 0x12a   : > { %2529 = vmatpush2.msra.mxu0 %v2086_v37 }
 0x12b   : > { %6881 = vmatmul.mubr.msk.f32.gmra.mxu1 %vm581_vm0, %v8445_v23  ;;  %6913 = vmatmul.mubr.msk.f32.gmra.mxu0 %vm581_vm0, %v8445_v23  ;;  %v2075_v23 = vld [vmem:[#allocation7 + $0x388] sm:$0xff] }
 0x12c   : > { %1107 = vmatprep.mubr.f32.mxu1 %v13373_v0  ;;  %1364 = vmatprep.mubr.f32.mxu0 %v13373_v0 }
 0x12d   : > { %2530 = vmatprep.subr.mxu0 %v2083_v20 }
 0x12e   : > { %2531 = vmatpush2.msra.mxu0 %v2082_v38 }
 0x12f   : > { %6882 = vmatmul.mubr.msk.f32.gmra.mxu1 %vm581_vm0, %v8458_v29  ;;  %6914 = vmatmul.mubr.msk.f32.gmra.mxu0 %vm581_vm0, %v8458_v29  ;;  %v2071_v29 = vld [vmem:[#allocation7 + $0x368] sm:$0xff] }
 0x130   : > { %1113 = vmatprep.mubr.f32.mxu1 %v13373_v0  ;;  %1370 = vmatprep.mubr.f32.mxu0 %v13373_v0 }
 0x131   : > { %2532 = vmatprep.subr.mxu0 %v2079_v18 }
 0x132   : > { %2533 = vmatpush2.msra.mxu0 %v2078_v39  ;;  %v2135_v39 = vld [vmem:[#allocation7 + $0x568] sm:$0xff] }
 0x133   : > { %6883 = vmatmul.mubr.msk.f32.gmra.mxu1 %vm581_vm0, %v8470_v35  ;;  %6915 = vmatmul.mubr.msk.f32.gmra.mxu0 %vm581_vm0, %v8470_v35  ;;  %v2067_v35 = vld [vmem:[#allocation7 + $0x348] sm:$0xff] }
 0x134   : > { %1119 = vmatprep.mubr.f32.mxu1 %v13373_v0  ;;  %1376 = vmatprep.mubr.f32.mxu0 %v13373_v0 }
 0x135   : > { %2534 = vmatprep.subr.mxu0 %v2075_v23  ;;  %v2134_v23 = vld [vmem:[#allocation7 + $0x560] sm:$0xff] }
 0x136   : > { %2535 = vmatpush2.msra.mxu0 %v2074_v42  ;;  %v2278_v42 = vld [vmem:[#allocation7 + $0x9e0] sm:$0xff] }
 0x137   : > { %6884 = vmatmul.mubr.msk.f32.gmra.mxu1 %vm581_vm0, %v8482_v41  ;;  %6916 = vmatmul.mubr.msk.f32.gmra.mxu0 %vm581_vm0, %v8482_v41  ;;  %v2063_v41 = vld [vmem:[#allocation7 + $0x328] sm:$0xff] }
 0x138   : > { %1125 = vmatprep.mubr.f32.mxu1 %v13373_v0  ;;  %1382 = vmatprep.mubr.f32.mxu0 %v13373_v0 }
 0x139   : > { %2536 = vmatprep.subr.mxu0 %v2071_v29 }
 0x13a   : > { %2537 = vmatpush2.msra.mxu0 %v2070_v43 }
 0x13b   : > { %6885 = vmatmul.mubr.msk.f32.gmra.mxu1 %vm581_vm0, %v8494_v47  ;;  %6917 = vmatmul.mubr.msk.f32.gmra.mxu0 %vm581_vm0, %v8494_v47  ;;  %v2059_v47 = vld [vmem:[#allocation7 + $0x308] sm:$0xff] }
 0x13c   : > { %1131 = vmatprep.mubr.f32.mxu1 %v13373_v0  ;;  %1388 = vmatprep.mubr.f32.mxu0 %v13373_v0 }
 0x13d   : > { %2538 = vmatprep.subr.mxu0 %v2067_v35 }
 0x13e   : > { %2539 = vmatpush2.msra.mxu0 %v2066_v44  ;;  %v2131_v44 = vld [vmem:[#allocation7 + $0x548] sm:$0xff] }
 0x13f   : > { %6886 = vmatmul.mubr.msk.f32.gmra.mxu1 %vm581_vm0, %v8506_v53  ;;  %6918 = vmatmul.mubr.msk.f32.gmra.mxu0 %vm581_vm0, %v8506_v53  ;;  %v2055_v53 = vld [vmem:[#allocation7 + $0x2e8] sm:$0xff] }
 0x140   : > { %1137 = vmatprep.mubr.f32.mxu1 %v13373_v0  ;;  %1394 = vmatprep.mubr.f32.mxu0 %v13373_v0 }
 0x141   : > { %2540 = vmatprep.subr.mxu0 %v2063_v41 }
 0x142   : > { %2541 = vmatpush2.msra.mxu0 %v2062_v45 }
 0x143   : > { %6887 = vmatmul.mubr.msk.f32.gmra.mxu1 %vm581_vm0, %v8518_v59  ;;  %6919 = vmatmul.mubr.msk.f32.gmra.mxu0 %vm581_vm0, %v8518_v59  ;;  %v2051_v59 = vld [vmem:[#allocation7 + $0x2c8] sm:$0xff] }
 0x144   : > { %1143 = vmatprep.mubr.f32.mxu1 %v13373_v0  ;;  %1400 = vmatprep.mubr.f32.mxu0 %v13373_v0 }
 0x145   : > { %2542 = vmatprep.subr.mxu0 %v2059_v47 }
 0x146   : > { %2543 = vmatpush2.msra.mxu0 %v2058_v48 }
 0x147   : > { %6888 = vmatmul.mubr.msk.f32.gmra.mxu1 %vm581_vm0, %v8530_v2  ;;  %6920 = vmatmul.mubr.msk.f32.gmra.mxu0 %vm581_vm0, %v8530_v2  ;;  %v2047_v2 = vld [vmem:[#allocation7 + $0x2a8] sm:$0xff] }
 0x148   : > { %1149 = vmatprep.mubr.f32.mxu1 %v13373_v0  ;;  %1406 = vmatprep.mubr.f32.mxu0 %v13373_v0 }
 0x149   : > { %2544 = vmatprep.subr.mxu0 %v2055_v53 }
 0x14a   : > { %2545 = vmatpush2.msra.mxu0 %v2054_v49 }
 0x14b   : > { %6889 = vmatmul.mubr.msk.f32.gmra.mxu1 %vm581_vm0, %v8542_v6  ;;  %6921 = vmatmul.mubr.msk.f32.gmra.mxu0 %vm581_vm0, %v8542_v6  ;;  %v2043_v6 = vld [vmem:[#allocation7 + $0x288] sm:$0xff] }
 0x14c   : > { %1155 = vmatprep.mubr.f32.mxu1 %v13373_v0  ;;  %1412 = vmatprep.mubr.f32.mxu0 %v13373_v0 }
 0x14d   : > { %2546 = vmatprep.subr.mxu0 %v2051_v59  ;;  %v2127_v59 = vld [vmem:[#allocation7 + $0x528] sm:$0xff] }
 0x14e   : > { %2547 = vmatpush2.msra.mxu0 %v2050_v50  ;;  %v2275_v50 = vld [vmem:[#allocation7 + $0x9c8] sm:$0xff] }
 0x14f   : > { %6890 = vmatmul.mubr.msk.f32.gmra.mxu1 %vm581_vm0, %v8554_v9  ;;  %6922 = vmatmul.mubr.msk.f32.gmra.mxu0 %vm581_vm0, %v8554_v9  ;;  %v2039_v9 = vld [vmem:[#allocation7 + $0x268] sm:$0xff] }
 0x150   : > { %1161 = vmatprep.mubr.f32.mxu1 %v13373_v0  ;;  %1418 = vmatprep.mubr.f32.mxu0 %v13373_v0 }
 0x151   : > { %2548 = vmatprep.subr.mxu0 %v2047_v2 }
 0x152   : > { %2549 = vmatpush2.msra.mxu0 %v2046_v51 }
 0x153   : > { %6891 = vmatmul.mubr.msk.f32.gmra.mxu1 %vm581_vm0, %v8566_v11  ;;  %6923 = vmatmul.mubr.msk.f32.gmra.mxu0 %vm581_vm0, %v8566_v11  ;;  %v541_v11 = vlaneseq }
 0x154   : > { %1167 = vmatprep.mubr.f32.mxu1 %v13373_v0  ;;  %1424 = vmatprep.mubr.f32.mxu0 %v13373_v0 }
 0x155   : > { %2550 = vmatprep.subr.mxu0 %v2043_v6 }
 0x156   : > { %2551 = vmatpush2.msra.mxu0 %v2042_v54  ;;  %v2126_v54 = vld [vmem:[#allocation7 + $0x520] sm:$0xff] }
 0x157   : > { %6892 = vmatmul.mubr.msk.f32.gmra.mxu1 %vm581_vm0, %v8578_v13  ;;  %6924 = vmatmul.mubr.msk.f32.gmra.mxu0 %vm581_vm0, %v8578_v13  ;;  %v8802_v13 = vshrl.u32 %v541_v11, 7 }
 0x158   : > { %1173 = vmatprep.mubr.f32.mxu1 %v13373_v0  ;;  %1430 = vmatprep.mubr.f32.mxu0 %v13373_v0 }
 0x159   : > { %2552 = vmatprep.subr.mxu0 %v2039_v9  ;;  %13718 = vst [vmem:[#allocation23_spill] sm:$0xff] %v8802_v13  ;;  %v8814_v3 = vsub.s32 1, %v8802_v13 }
 0x15a   : > { %2553 = vmatpush2.msra.mxu0 %v2038_v55 }
 0x15b   : > { %6893 = vmatmul.mubr.msk.f32.gmra.mxu1 %vm581_vm0, %v8590_v15  ;;  %6925 = vmatmul.mubr.msk.f32.gmra.mxu0 %vm581_vm0, %v8590_v15  ;;  %v8810_v15 = vsub.s32 0, %v8802_v13  ;;  %13720 = vst [vmem:[#allocation25_spill] sm:$0xff] %v8814_v3  ;;  %v8825_v25 = vrot.slane %v539_v62, %v8814_v3 }
 0x15c   : > { %1179 = vmatprep.mubr.f32.mxu1 %v13373_v0  ;;  %1436 = vmatprep.mubr.f32.mxu0 %v13373_v0 }
 0x15d   : > { %2554 = vmatprep.subr.mxu0 %v2035_v56  ;;  %13719 = vst [vmem:[#allocation24_spill] sm:$0xff] %v8810_v15  ;;  %v8822_v7 = vrot.slane %v539_v62, %v8810_v15  ;;  %v2274_v62 = vld [vmem:[#allocation7 + $0x9c0] sm:$0xff] }
 0x15e   : > { %2555 = vmatpush2.msra.mxu0 %v2034_v57 }
 0x15f   : > { %6894 = vmatmul.mubr.msk.f32.gmra.mxu1 %vm581_vm0, %v8602_v19  ;;  %6926 = vmatmul.mubr.msk.f32.gmra.mxu0 %vm581_vm0, %v8602_v19  ;;  %v2279_v19 = vld [vmem:[#allocation7 + $0x9e8] sm:$0xff] }
 0x160   : > { %1185 = vmatprep.mubr.f32.mxu1 %v13373_v0  ;;  %1442 = vmatprep.mubr.f32.mxu0 %v13373_v0 }
 0x161   : > { %2556 = vmatprep.subr.mxu0 %v2031_v60 }
 0x162   : > { %2557 = vmatpush2.msra.mxu0 %v2030_v61  ;;  %v2122_v61 = vld [vmem:[#allocation7 + $0x500] sm:$0xff] }
 0x163   : > { %6895 = vmatmul.mubr.msk.f32.gmra.mxu1 %vm581_vm0, %v8614_v21  ;;  %6927 = vmatmul.mubr.msk.f32.gmra.mxu0 %vm581_vm0, %v8614_v21  ;;  %v2146_v21 = vld [vmem:[#allocation7 + $0x5c0] sm:$0xff] }
 0x164   : > { %1513 = vmatprep.mubr.f32.mxu1 %v13373_v0  ;;  %2558 = vmatprep.subr.mxu0 %v2027_v63 }
 0x165   : > { %2559 = vmatpush2.msra.mxu0 %v2026_v4 }
 0x166   : > { %3010 = vmatprep.subr.mxu0 %v2279_v19 }
 0x167   : > { %v744_v26 = vpop.f32.mrf.mxu0  ;;  %v840_v1 = vpop.f32.mrf.mxu1  ;;  %6928 = vmatmul.mubr.msk.f32.vlgmr.msra.gmra.mxu1 %vm581_vm0, %v8431_v17  ;;  %v2139_v17 = vld [vmem:[#allocation7 + $0x588] sm:$0xff] }
 0x168   : > { %v8830_v27 = vadd.f32 %v744_v26, %v8822_v7  ;;  %v8833_v5 = vadd.f32 %v840_v1, %v8822_v7  ;;  %2754 = vmatpush1.msra.mxu1 %v2150_v24  ;;  %1519 = vmatprep.mubr.f32.mxu1 %v13373_v0  ;;  %v2119_v24 = vld [vmem:[#allocation7 + $0x4e8] sm:$0xff] }
 0x169   : > { %v746_v8 = vpop.f32.mrf.mxu0  ;;  %v8836_v31 = vpop.f32.mrf.mxu1  ;;  %2755 = vmatprep.subr.mxu1 %v2147_v58 }
 0x16a   : > { %13721 = vst [vmem:[#allocation26_spill] sm:$0xff] %v8830_v27  ;;  %13722 = vst [vmem:[#allocation27_spill] sm:$0xff] %v8833_v5  ;;  %v8839_v32 = vadd.f32 %v746_v8, %v8825_v25  ;;  %2756 = vmatpush1.msra.mxu1 %v2146_v21  ;;  %v13367_v12 = vmax.f32 %v8830_v27, 0.0  ;;  %v7898_v27 = vld [vmem:[%s8428_s22 + $0xb8] sm:$0xff] }
 0x16b   : > { %v750_v33 = vpop.f32.mrf.mxu0  ;;  %v846_v14 = vpop.f32.mrf.mxu1  ;;  %6929 = vmatmul.mubr.msk.f32.gmra.mxu1 %vm581_vm0, %v8442_v22  ;;  %2757 = vmatprep.subr.mxu1 %v2143_v30 }
 0x16c   : > { %13723 = vst [vmem:[#allocation28_spill] sm:$0xff] %v8839_v32  ;;  %v13369_v16 = vmax.f32 %v8839_v32, 0.0  ;;  %v8846_v37 = vadd.f32 %v750_v33, %v8822_v7  ;;  %v8849_v20 = vadd.f32 %v846_v14, %v8822_v7  ;;  %1525 = vmatprep.mubr.f32.mxu1 %v13373_v0  ;;  %2758 = vmatpush1.msra.mxu1 %v2142_v10  ;;  %v2115_v10 = vld [vmem:[#allocation7 + $0x4c8] sm:$0xff] }
 0x16d   : > { %v752_v38 = vpop.f32.mrf.mxu0  ;;  %v8852_v18 = vpop.f32.mrf.mxu1  ;;  %2759 = vmatprep.subr.mxu1 %v2139_v17  ;;  %v2271_v17 = vld [vmem:[#allocation7 + $0x9a8] sm:$0xff] }
 0x16e   : > { %13724 = vst [vmem:[#allocation29_spill] sm:$0xff] %v8846_v37  ;;  %13725 = vst [vmem:[#allocation30_spill] sm:$0xff] %v8849_v20  ;;  %v8855_v22 = vadd.f32 %v752_v38, %v8825_v25  ;;  %2560 = vmatprep.mubr.f32.mxu0 %v13369_v16  ;;  %2760 = vmatpush1.msra.mxu1 %v2138_v36  ;;  %v13365_v29 = vmax.f32 %v8846_v37, 0.0  ;;  %v2114_v38 = vld [vmem:[#allocation7 + $0x4c0] sm:$0xff]  ;;  %v7897_v37 = vld [vmem:[%s8428_s22 + $0xb0] sm:$0xff] }
 0x16f   : > { %v756_v43 = vpop.f32.mrf.mxu0  ;;  %v852_v35 = vpop.f32.mrf.mxu1  ;;  %6930 = vmatmul.mubr.msk.f32.gmra.mxu1 %vm581_vm0, %v8455_v28  ;;  %2561 = vmatmul.mubr.f32.vlgmr.msra.gmra.mxu0 %v13367_v12  ;;  %v2130_v28 = vld [vmem:[#allocation7 + $0x540] sm:$0xff] }
 0x170   : > { %13726 = vst [vmem:[#allocation31_spill] sm:$0xff] %v8855_v22  ;;  %v13366_v41 = vmax.f32 %v8855_v22, 0.0  ;;  %v8866_v45 = vadd.f32 %v756_v43, %v8822_v7  ;;  %v8869_v47 = vadd.f32 %v852_v35, %v8822_v7  ;;  %1531 = vmatprep.mubr.f32.mxu1 %v13373_v0  ;;  %2761 = vmatprep.subr.mxu1 %v2135_v39 }
 0x171   : > { %v758_v48 = vpop.f32.mrf.mxu0  ;;  %v8872_v53 = vpop.f32.mrf.mxu1  ;;  %2762 = vmatpush1.msra.mxu1 %v2134_v23  ;;  %3011 = vmatpush1.msra.mxu0 %v2278_v42 }
 0x172   : > { %13727 = vst [vmem:[#allocation32_spill] sm:$0xff] %v8866_v45  ;;  %13728 = vst [vmem:[#allocation33_spill] sm:$0xff] %v8869_v47  ;;  %v8875_v49 = vadd.f32 %v758_v48, %v8825_v25  ;;  %2566 = vmatprep.mubr.f32.mxu0 %v13366_v41  ;;  %2763 = vmatprep.subr.mxu1 %v2131_v44  ;;  %v13361_v2 = vmax.f32 %v8866_v45, 0.0  ;;  %v2110_v48 = vld [vmem:[#allocation7 + $0x4a0] sm:$0xff] }
 0x173   : > { %v762_v51 = vpop.f32.mrf.mxu0  ;;  %v858_v6 = vpop.f32.mrf.mxu1  ;;  %6931 = vmatmul.mubr.msk.f32.gmra.mxu1 %vm581_vm0, %v8467_v34  ;;  %2567 = vmatmul.mubr.f32.gmra.mxu0 %v13365_v29  ;;  %v2123_v34 = vld [vmem:[#allocation7 + $0x508] sm:$0xff]  ;;  %v7896_v45 = vld [vmem:[%s8428_s22 + $0xa8] sm:$0xff] }
 0x174   : > { %13729 = vst [vmem:[#allocation34_spill] sm:$0xff] %v8875_v49  ;;  %v13363_v9 = vmax.f32 %v8875_v49, 0.0  ;;  %v8886_v55 = vadd.f32 %v762_v51, %v8822_v7  ;;  %v8889_v11 = vadd.f32 %v858_v6, %v8822_v7  ;;  %1537 = vmatprep.mubr.f32.mxu1 %v13373_v0  ;;  %2764 = vmatpush1.msra.mxu1 %v2130_v28  ;;  %v2270_v28 = vld [vmem:[#allocation7 + $0x9a0] sm:$0xff]  ;;  %v2107_v6 = vld [vmem:[#allocation7 + $0x488] sm:$0xff] }
 0x175   : > { %v764_v56 = vpop.f32.mrf.mxu0  ;;  %v8892_v57 = vpop.f32.mrf.mxu1  ;;  %2765 = vmatprep.subr.mxu1 %v2127_v59  ;;  %3012 = vmatprep.subr.mxu0 %v2275_v50 }
 0x176   : > { %13730 = vst [vmem:[#allocation35_spill] sm:$0xff] %v8886_v55  ;;  %13731 = vst [vmem:[#allocation36_spill] sm:$0xff] %v8889_v11  ;;  %v8895_v60 = vadd.f32 %v764_v56, %v8825_v25  ;;  %2572 = vmatprep.mubr.f32.mxu0 %v13363_v9  ;;  %2766 = vmatpush1.msra.mxu1 %v2126_v54  ;;  %v13359_v63 = vmax.f32 %v8886_v55, 0.0  ;;  %v7895_v55 = vld [vmem:[%s8428_s22 + $0xa0] sm:$0xff] }
 0x177   : > { %v768_v4 = vpop.f32.mrf.mxu0  ;;  %v864_v19 = vpop.f32.mrf.mxu1  ;;  %6932 = vmatmul.mubr.msk.f32.gmra.mxu1 %vm581_vm0, %v8479_v40  ;;  %2573 = vmatmul.mubr.f32.gmra.mxu0 %v13361_v2  ;;  %v2118_v40 = vld [vmem:[#allocation7 + $0x4e0] sm:$0xff] }
 0x178   : > { %13732 = vst [vmem:[#allocation37_spill] sm:$0xff] %v8895_v60  ;;  %v13360_v58 = vmax.f32 %v8895_v60, 0.0  ;;  %v8906_v26 = vadd.f32 %v768_v4, %v8822_v7  ;;  %v8909_v1 = vadd.f32 %v864_v19, %v8822_v7  ;;  %1543 = vmatprep.mubr.f32.mxu1 %v13373_v0  ;;  %2767 = vmatprep.subr.mxu1 %v2123_v34  ;;  %v2103_v19 = vld [vmem:[#allocation7 + $0x468] sm:$0xff] }
 0x179   : > { %v770_v21 = vpop.f32.mrf.mxu0  ;;  %v8912_v30 = vpop.f32.mrf.mxu1  ;;  %2768 = vmatpush1.msra.mxu1 %v2122_v61  ;;  %3013 = vmatpush1.msra.mxu0 %v2274_v62 }
 0x17a   : > { %13733 = vst [vmem:[#allocation38_spill] sm:$0xff] %v8906_v26  ;;  %13734 = vst [vmem:[#allocation39_spill] sm:$0xff] %v8909_v1  ;;  %v8915_v8 = vadd.f32 %v770_v21, %v8825_v25  ;;  %2578 = vmatprep.mubr.f32.mxu0 %v13360_v58  ;;  %2769 = vmatprep.subr.mxu1 %v2119_v24  ;;  %v13355_v33 = vmax.f32 %v8906_v26, 0.0  ;;  %v2267_v24 = vld [vmem:[#allocation7 + $0x988] sm:$0xff]  ;;  %v7894_v26 = vld [vmem:[%s8428_s22 + $0x98] sm:$0xff] }
 0x17b   : > { %v774_v14 = vpop.f32.mrf.mxu0  ;;  %v870_v36 = vpop.f32.mrf.mxu1  ;;  %6933 = vmatmul.mubr.msk.f32.gmra.mxu1 %vm581_vm0, %v8491_v46  ;;  %2579 = vmatmul.mubr.f32.gmra.mxu0 %v13359_v63  ;;  %v2111_v46 = vld [vmem:[#allocation7 + $0x4a8] sm:$0xff] }
 0x17c   : > { %13735 = vst [vmem:[#allocation40_spill] sm:$0xff] %v8915_v8  ;;  %v13357_v39 = vmax.f32 %v8915_v8, 0.0  ;;  %v8926_v23 = vadd.f32 %v774_v14, %v8822_v7  ;;  %v8929_v42 = vadd.f32 %v870_v36, %v8822_v7  ;;  %1549 = vmatprep.mubr.f32.mxu1 %v13373_v0  ;;  %2770 = vmatpush1.msra.mxu1 %v2118_v40  ;;  %v2102_v14 = vld [vmem:[#allocation7 + $0x460] sm:$0xff] }
 0x17d   : > { %v776_v43 = vpop.f32.mrf.mxu0  ;;  %v8932_v35 = vpop.f32.mrf.mxu1  ;;  %2771 = vmatprep.subr.mxu1 %v2115_v10  ;;  %3014 = vmatprep.subr.mxu0 %v2271_v17  ;;  %v7882_v17 = vld [vmem:[%s8428_s22 + $0x38] sm:$0xff] }
 0x17e   : > { %13736 = vst [vmem:[#allocation41_spill] sm:$0xff] %v8926_v23  ;;  %13737 = vst [vmem:[#allocation42_spill] sm:$0xff] %v8929_v42  ;;  %v8935_v44 = vadd.f32 %v776_v43, %v8825_v25  ;;  %2584 = vmatprep.mubr.f32.mxu0 %v13357_v39  ;;  %2772 = vmatpush1.msra.mxu1 %v2114_v38  ;;  %v13353_v59 = vmax.f32 %v8926_v23, 0.0  ;;  %v7893_v23 = vld [vmem:[%s8428_s22 + $0x90] sm:$0xff] }
 0x17f   : > { %v780_v50 = vpop.f32.mrf.mxu0  ;;  %v876_v51 = vpop.f32.mrf.mxu1  ;;  %6934 = vmatmul.mubr.msk.f32.gmra.mxu1 %vm581_vm0, %v8503_v52  ;;  %2585 = vmatmul.mubr.f32.gmra.mxu0 %v13355_v33  ;;  %v2106_v52 = vld [vmem:[#allocation7 + $0x480] sm:$0xff] }
 0x180   : > { %13738 = vst [vmem:[#allocation43_spill] sm:$0xff] %v8935_v44  ;;  %v13354_v54 = vmax.f32 %v8935_v44, 0.0  ;;  %v8946_v56 = vadd.f32 %v780_v50, %v8822_v7  ;;  %v8949_v34 = vadd.f32 %v876_v51, %v8822_v7  ;;  %1555 = vmatprep.mubr.f32.mxu1 %v13373_v0  ;;  %2773 = vmatprep.subr.mxu1 %v2111_v46  ;;  %v2098_v51 = vld [vmem:[#allocation7 + $0x440] sm:$0xff] }
 0x181   : > { %v782_v61 = vpop.f32.mrf.mxu0  ;;  %v8952_v62 = vpop.f32.mrf.mxu1  ;;  %2774 = vmatpush1.msra.mxu1 %v2110_v48  ;;  %3015 = vmatpush1.msra.mxu0 %v2270_v28  ;;  %v2099_v28 = vld [vmem:[#allocation7 + $0x448] sm:$0xff] }
 0x182   : > { %13739 = vst [vmem:[#allocation44_spill] sm:$0xff] %v8946_v56  ;;  %13740 = vst [vmem:[#allocation45_spill] sm:$0xff] %v8949_v34  ;;  %v8955_v4 = vadd.f32 %v782_v61, %v8825_v25  ;;  %2590 = vmatprep.mubr.f32.mxu0 %v13354_v54  ;;  %2775 = vmatprep.subr.mxu1 %v2107_v6  ;;  %v13352_v21 = vmax.f32 %v8946_v56, 0.0  ;;  %v2266_v6 = vld [vmem:[#allocation7 + $0x980] sm:$0xff] }
 0x183   : > { %v786_v40 = vpop.f32.mrf.mxu0  ;;  %v882_v10 = vpop.f32.mrf.mxu1  ;;  %6935 = vmatmul.mubr.msk.f32.gmra.mxu1 %vm581_vm0, %v7882_v17  ;;  %2591 = vmatmul.mubr.f32.gmra.mxu0 %v13353_v59 }
 0x184   : > { %13741 = vst [vmem:[#allocation46_spill] sm:$0xff] %v8955_v4  ;;  %v13351_v36 = vmax.f32 %v8955_v4, 0.0  ;;  %v8966_v38 = vadd.f32 %v786_v40, %v8822_v7  ;;  %v8969_v43 = vadd.f32 %v882_v10, %v8822_v7  ;;  %1561 = vmatprep.mubr.f32.mxu1 %v13373_v0  ;;  %2776 = vmatpush1.msra.mxu1 %v2106_v52  ;;  %v7883_v52 = vld [vmem:[%s8428_s22 + $0x40] sm:$0xff] }
 0x185   : > { %v788_v46 = vpop.f32.mrf.mxu0  ;;  %v8972_v48 = vpop.f32.mrf.mxu1  ;;  %2777 = vmatprep.subr.mxu1 %v2103_v19  ;;  %3016 = vmatprep.subr.mxu0 %v2267_v24  ;;  %v2095_v19 = vld [vmem:[#allocation7 + $0x428] sm:$0xff] }
 0x186   : > { %13742 = vst [vmem:[#allocation47_spill] sm:$0xff] %v8966_v38  ;;  %13743 = vst [vmem:[#allocation48_spill] sm:$0xff] %v8969_v43  ;;  %v8975_v50 = vadd.f32 %v788_v46, %v8825_v25  ;;  %2596 = vmatprep.mubr.f32.mxu0 %v13351_v36  ;;  %2778 = vmatpush1.msra.mxu1 %v2102_v14  ;;  %v13358_v61 = vmax.f32 %v8966_v38, 0.0 }
 0x187   : > { %v792_v40 = vpop.f32.mrf.mxu0  ;;  %v888_v10 = vpop.f32.mrf.mxu1  ;;  %6936 = vmatmul.mubr.msk.f32.gmra.mxu1 %vm581_vm0, %v7883_v52  ;;  %2597 = vmatmul.mubr.f32.gmra.mxu0 %v13352_v21  ;;  %v2094_v52 = vld [vmem:[#allocation7 + $0x420] sm:$0xff] }
 0x188   : > { %13744 = vst [vmem:[#allocation49_spill] sm:$0xff] %v8975_v50  ;;  %v13356_v24 = vmax.f32 %v8975_v50, 0.0  ;;  %v8986_v17 = vadd.f32 %v792_v40, %v8822_v7  ;;  %v8989_v14 = vadd.f32 %v888_v10, %v8822_v7  ;;  %1567 = vmatprep.mubr.f32.mxu1 %v13373_v0  ;;  %2779 = vmatprep.subr.mxu1 %v2099_v28  ;;  %v2091_v40 = vld [vmem:[#allocation7 + $0x408] sm:$0xff]  ;;  %v7884_v28 = vld [vmem:[%s8428_s22 + $0x48] sm:$0xff] }
 0x189   : > { %v794_v46 = vpop.f32.mrf.mxu0  ;;  %v8992_v36 = vpop.f32.mrf.mxu1  ;;  %2780 = vmatpush1.msra.mxu1 %v2098_v51  ;;  %3017 = vmatpush1.msra.mxu0 %v2266_v6  ;;  %v2263_v10 = vld [vmem:[#allocation7 + $0x968] sm:$0xff]  ;;  %v2090_v51 = vld [vmem:[#allocation7 + $0x400] sm:$0xff] }
 0x18a   : > { %13745 = vst [vmem:[#allocation50_spill] sm:$0xff] %v8986_v17  ;;  %13746 = vst [vmem:[#allocation51_spill] sm:$0xff] %v8989_v14  ;;  %v8995_v21 = vadd.f32 %v794_v46, %v8825_v25  ;;  %2602 = vmatprep.mubr.f32.mxu0 %v13356_v24  ;;  %2781 = vmatprep.subr.mxu1 %v2095_v19  ;;  %v13364_v59 = vmax.f32 %v8986_v17, 0.0 }
 0x18b   : > { %v798_v54 = vpop.f32.mrf.mxu0  ;;  %v894_v33 = vpop.f32.mrf.mxu1  ;;  %6937 = vmatmul.mubr.msk.f32.gmra.mxu1 %vm581_vm0, %v7884_v28  ;;  %2603 = vmatmul.mubr.f32.gmra.mxu0 %v13358_v61  ;;  %v2215_v28 = vld [vmem:[#allocation7 + $0x7e8] sm:$0xff] }
 0x18c   : > { %13747 = vst [vmem:[#allocation52_spill] sm:$0xff] %v8995_v21  ;;  %v13362_v6 = vmax.f32 %v8995_v21, 0.0  ;;  %v9006_v46 = vadd.f32 %v798_v54, %v8822_v7  ;;  %v9009_v19 = vadd.f32 %v894_v33, %v8822_v7  ;;  %1573 = vmatprep.mubr.f32.mxu1 %v13373_v0  ;;  %2782 = vmatpush1.msra.mxu1 %v2094_v52  ;;  %v2214_v54 = vld [vmem:[#allocation7 + $0x7e0] sm:$0xff]  ;;  %v7885_v52 = vld [vmem:[%s8428_s22 + $0x50] sm:$0xff] }
 0x18d   : > { %v800_v24 = vpop.f32.mrf.mxu0  ;;  %v9012_v39 = vpop.f32.mrf.mxu1  ;;  %2783 = vmatprep.subr.mxu1 %v2091_v40  ;;  %3018 = vmatprep.subr.mxu0 %v2263_v10  ;;  %v2262_v33 = vld [vmem:[#allocation7 + $0x960] sm:$0xff]  ;;  %v2211_v40 = vld [vmem:[#allocation7 + $0x7c8] sm:$0xff] }
 0x18e   : > { %13748 = vst [vmem:[#allocation53_spill] sm:$0xff] %v9006_v46  ;;  %13749 = vst [vmem:[#allocation54_spill] sm:$0xff] %v9009_v19  ;;  %v9015_v61 = vadd.f32 %v800_v24, %v8825_v25  ;;  %2608 = vmatprep.mubr.f32.mxu0 %v13362_v6  ;;  %2784 = vmatpush1.msra.mxu1 %v2090_v51  ;;  %v13370_v63 = vmax.f32 %v9006_v46, 0.0 }
 0x18f   : > { %v804_v58 = vpop.f32.mrf.mxu0  ;;  %v900_v2 = vpop.f32.mrf.mxu1  ;;  %6938 = vmatmul.mubr.msk.f32.gmra.mxu1 %vm581_vm0, %v7885_v52  ;;  %2609 = vmatmul.mubr.f32.gmra.mxu0 %v13364_v59  ;;  %v2210_v52 = vld [vmem:[#allocation7 + $0x7c0] sm:$0xff] }
 0x190   : > { %13750 = vst [vmem:[#allocation55_spill] sm:$0xff] %v9015_v61  ;;  %v13368_v24 = vmax.f32 %v9015_v61, 0.0  ;;  %v9026_v10 = vadd.f32 %v804_v58, %v8822_v7  ;;  %v9029_v51 = vadd.f32 %v900_v2, %v8822_v7  ;;  %1579 = vmatprep.mubr.f32.mxu1 %v13373_v0  ;;  %2785 = vmatprep.subr.mxu1 %v2215_v28  ;;  %v2207_v58 = vld [vmem:[#allocation7 + $0x7a8] sm:$0xff]  ;;  %v7886_v28 = vld [vmem:[%s8428_s22 + $0x58] sm:$0xff] }
 0x191   : > { %v806_v6 = vpop.f32.mrf.mxu0  ;;  %v9032_v9 = vpop.f32.mrf.mxu1  ;;  %2786 = vmatpush2.msra.mxu1 %v2214_v54  ;;  %3019 = vmatpush1.msra.mxu0 %v2262_v33  ;;  %v2259_v2 = vld [vmem:[#allocation7 + $0x948] sm:$0xff]  ;;  %v2206_v54 = vld [vmem:[#allocation7 + $0x7a0] sm:$0xff] }
 0x192   : > { %13751 = vst [vmem:[#allocation56_spill] sm:$0xff] %v9026_v10  ;;  %13752 = vst [vmem:[#allocation57_spill] sm:$0xff] %v9029_v51  ;;  %v9035_v59 = vadd.f32 %v806_v6, %v8825_v25  ;;  %2614 = vmatprep.mubr.f32.mxu0 %v13368_v24  ;;  %2787 = vmatprep.subr.mxu1 %v2211_v40 }
 0x193   : > { %v810_v41 = vpop.f32.mrf.mxu0  ;;  %v906_v12 = vpop.f32.mrf.mxu1  ;;  %6939 = vmatmul.mubr.msk.f32.gmra.mxu1 %vm581_vm0, %v7886_v28  ;;  %2615 = vmatmul.mubr.f32.gmra.mxu0 %v13370_v63  ;;  %v2203_v28 = vld [vmem:[#allocation7 + $0x788] sm:$0xff] }
 0x194   : > { %13753 = vst [vmem:[#allocation58_spill] sm:$0xff] %v9035_v59  ;;  %v13377_v6 = vmax.f32 %v9035_v59, 0.0  ;;  %v9046_v33 = vadd.f32 %v810_v41, %v8822_v7  ;;  %v9049_v40 = vadd.f32 %v906_v12, %v8822_v7  ;;  %1585 = vmatprep.mubr.f32.mxu1 %v13373_v0  ;;  %2788 = vmatpush2.msra.mxu1 %v2210_v52  ;;  %v2202_v41 = vld [vmem:[#allocation7 + $0x780] sm:$0xff]  ;;  %v7887_v52 = vld [vmem:[%s8428_s22 + $0x60] sm:$0xff] }
 0x195   : > { %v812_v24 = vpop.f32.mrf.mxu0  ;;  %v9052_v16 = vpop.f32.mrf.mxu1  ;;  %2789 = vmatprep.subr.mxu1 %v2207_v58  ;;  %3020 = vmatprep.subr.mxu0 %v2259_v2  ;;  %v2258_v12 = vld [vmem:[#allocation7 + $0x940] sm:$0xff]  ;;  %v13757_v58 = vmax.f32 %v9026_v10, 0.0  ;;  %v2199_v2 = vld [vmem:[#allocation7 + $0x768] sm:$0xff] }
 0x196   : > { %13754 = vst [vmem:[#allocation59_spill] sm:$0xff] %v9046_v33  ;;  %13755 = vst [vmem:[#allocation60_spill] sm:$0xff] %v9049_v40  ;;  %v9055_v63 = vadd.f32 %v812_v24, %v8825_v25  ;;  %2620 = vmatprep.mubr.f32.mxu0 %v13377_v6  ;;  %2790 = vmatpush2.msra.mxu1 %v2206_v54  ;;  %v13760_v6 = vmov 0.0  }
 0x197   : > { %v816_v3 = vpop.f32.mrf.mxu0  ;;  %v912_v0 = vpop.f32.mrf.mxu1  ;;  %6940 = vmatmul.mubr.msk.f32.gmra.mxu1 %vm581_vm0, %v7887_v52  ;;  %2621 = vmatmul.mubr.f32.gmra.mxu0 %v13757_v58  ;;  %v2198_v52 = vld [vmem:[#allocation7 + $0x760] sm:$0xff] }
 0x198   : > { %13756 = vst [vmem:[#allocation61_spill] sm:$0xff] %v9055_v63  ;;  %v13383_v24 = vmax.f32 %v9055_v63, 0.0  ;;  %v9066_v15 = vadd.f32 %v816_v3, %v8822_v7  ;;  %v9069_v54 = vadd.f32 %v912_v0, %v8822_v7  ;;  %1591 = vmatprep.mubr.f32.mxu1 %v13760_v6  ;;  %2791 = vmatprep.subr.mxu1 %v2203_v28  ;;  %v2195_v3 = vld [vmem:[#allocation7 + $0x748] sm:$0xff]  ;;  %v7888_v28 = vld [vmem:[%s8428_s22 + $0x68] sm:$0xff] }
 0x199   : > { %v818_v29 = vpop.f32.mrf.mxu0  ;;  %v9072_v59 = vpop.f32.mrf.mxu1  ;;  %2792 = vmatpush2.msra.mxu1 %v2202_v41  ;;  %3021 = vmatpush1.msra.mxu0 %v2258_v12  ;;  %v2255_v0 = vld [vmem:[#allocation7 + $0x928] sm:$0xff]  ;;  %v13762_v41 = vmax.f32 %v9046_v33, 0.0  ;;  %v2194_v12 = vld [vmem:[#allocation7 + $0x740] sm:$0xff] }
 0x19a   : > { %13758 = vst [vmem:[#allocation62_spill] sm:$0xff] %v9066_v15  ;;  %13759 = vst [vmem:[#allocation63_spill] sm:$0xff] %v9069_v54  ;;  %v9075_v58 = vadd.f32 %v818_v29, %v8825_v25  ;;  %2626 = vmatprep.mubr.f32.mxu0 %v13383_v24  ;;  %2793 = vmatprep.subr.mxu1 %v2199_v2 }
 0x19b   : > { %v822_v46 = vpop.f32.mrf.mxu0  ;;  %v918_v61 = vpop.f32.mrf.mxu1  ;;  %6941 = vmatmul.mubr.msk.f32.gmra.mxu1 %vm581_vm0, %v7888_v28  ;;  %2627 = vmatmul.mubr.f32.gmra.mxu0 %v13762_v41  ;;  %v2254_v28 = vld [vmem:[#allocation7 + $0x920] sm:$0xff] }
 0x19c   : > { %13761 = vst [vmem:[#allocation64_spill] sm:$0xff] %v9075_v58  ;;  %v13388_v29 = vmax.f32 %v9075_v58, 0.0  ;;  %v9086_v17 = vadd.f32 %v822_v46, %v8822_v7  ;;  %v9089_v2 = vadd.f32 %v918_v61, %v8822_v7  ;;  %1597 = vmatprep.mubr.f32.mxu1 %v13760_v6  ;;  %2794 = vmatpush2.msra.mxu1 %v2198_v52  ;;  %v2251_v46 = vld [vmem:[#allocation7 + $0x908] sm:$0xff] }
 0x19d   : > { %v824_v24 = vpop.f32.mrf.mxu0  ;;  %v9092_v10 = vpop.f32.mrf.mxu1  ;;  %2795 = vmatprep.subr.mxu1 %v2195_v3  ;;  %3022 = vmatprep.subr.mxu0 %v2255_v0  ;;  %v2191_v61 = vld [vmem:[#allocation7 + $0x728] sm:$0xff]  ;;  %v13766_v3 = vmax.f32 %v9066_v15, 0.0  ;;  %v2250_v0 = vld [vmem:[#allocation7 + $0x900] sm:$0xff] }
 0x19e   : > { %13763 = vst [vmem:[#allocation65_spill] sm:$0xff] %v9086_v17  ;;  %13764 = vst [vmem:[#allocation66_spill] sm:$0xff] %v9089_v2  ;;  %v9095_v41 = vadd.f32 %v824_v24, %v8825_v25  ;;  %2632 = vmatprep.mubr.f32.mxu0 %v13388_v29  ;;  %2796 = vmatpush2.msra.mxu1 %v2194_v12  ;;  %v7889_v52 = vld [vmem:[%s8428_s22 + $0x70] sm:$0xff] }
 0x19f   : > { %v828_v63 = vpop.f32.mrf.mxu0  ;;  %v924_v21 = vpop.f32.mrf.mxu1  ;;  %6942 = vmatmul.mubr.msk.f32.gmra.mxu1 %vm581_vm0, %v7889_v52  ;;  %2633 = vmatmul.mubr.f32.gmra.mxu0 %v13766_v3  ;;  %v2247_v52 = vld [vmem:[#allocation7 + $0x8e8] sm:$0xff] }
 0x1a0   : > { %13765 = vst [vmem:[#allocation67_spill] sm:$0xff] %v9095_v41  ;;  %v13393_v24 = vmax.f32 %v9095_v41, 0.0  ;;  %v9106_v38 = vadd.f32 %v828_v63, %v8822_v7  ;;  %v9109_v12 = vadd.f32 %v924_v21, %v8822_v7  ;;  %1603 = vmatprep.mubr.f32.mxu1 %v13760_v6  ;;  %3023 = vmatpush1.msra.mxu0 %v2254_v28  ;;  %v2190_v63 = vld [vmem:[#allocation7 + $0x720] sm:$0xff]  ;;  %v7890_v28 = vld [vmem:[%s8428_s22 + $0x78] sm:$0xff] }
 0x1a1   : > { %v830_v29 = vpop.f32.mrf.mxu0  ;;  %v9112_v33 = vpop.f32.mrf.mxu1  ;;  %3024 = vmatprep.subr.mxu0 %v2251_v46  ;;  %2797 = vmatprep.subr.mxu1 %v2191_v61  ;;  %v2246_v21 = vld [vmem:[#allocation7 + $0x8e0] sm:$0xff]  ;;  %v13770_v46 = vmax.f32 %v9086_v17, 0.0  ;;  %v2243_v61 = vld [vmem:[#allocation7 + $0x8c8] sm:$0xff] }
 0x1a2   : > { %13767 = vst [vmem:[#allocation68_spill] sm:$0xff] %v9106_v38  ;;  %13768 = vst [vmem:[#allocation69_spill] sm:$0xff] %v9109_v12  ;;  %v9115_v3 = vadd.f32 %v830_v29, %v8825_v25  ;;  %2638 = vmatprep.mubr.f32.mxu0 %v13393_v24  ;;  %3025 = vmatpush1.msra.mxu0 %v2250_v0 }
 0x1a3   : > { %v834_v58 = vpop.f32.mrf.mxu0  ;;  %v930_v50 = vpop.f32.mrf.mxu1  ;;  %6943 = vmatmul.mubr.msk.f32.gmra.mxu1 %vm581_vm0, %v7890_v28  ;;  %2639 = vmatmul.mubr.f32.gmra.mxu0 %v13770_v46  ;;  %v2242_v28 = vld [vmem:[#allocation7 + $0x8c0] sm:$0xff]  ;;  %v9136_v46 = vadd.f32 %v8836_v31, %v8825_v25 }
 0x1a4   : > { %13769 = vst [vmem:[#allocation70_spill] sm:$0xff] %v9115_v3  ;;  %v13396_v29 = vmax.f32 %v9115_v3, 0.0  ;;  %v9126_v56 = vadd.f32 %v834_v58, %v8822_v7  ;;  %v9129_v0 = vadd.f32 %v930_v50, %v8822_v7  ;;  %1609 = vmatprep.mubr.f32.mxu1 %v13760_v6  ;;  %3026 = vmatprep.subr.mxu0 %v2247_v52  ;;  %v2187_v7 = vld [vmem:[#allocation7 + $0x708] sm:$0xff]  ;;  %v2238_v52 = vld [vmem:[#allocation7 + $0x8a0] sm:$0xff] }
 0x1a5   : > { %v836_v24 = vpop.f32.mrf.mxu0  ;;  %v9132_v15 = vpop.f32.mrf.mxu1  ;;  %2798 = vmatpush2.msra.mxu1 %v2190_v63  ;;  %3027 = vmatpush1.msra.mxu0 %v2246_v21  ;;  %13773 = vst [vmem:[#allocation73_spill] sm:$0xff] %v9136_v46  ;;  %v2239_v50 = vld [vmem:[#allocation7 + $0x8a8] sm:$0xff]  ;;  %v7891_v63 = vld [vmem:[%s8428_s22 + $0x80] sm:$0xff]  ;;  %v13775_v21 = vmax.f32 %v9106_v38, 0.0  ;;  %v13778_v4 = vmax.f32 %v9136_v46, 0.0 }
 0x1a6   : > { %13771 = vst [vmem:[#allocation71_spill] sm:$0xff] %v9126_v56  ;;  %13772 = vst [vmem:[#allocation72_spill] sm:$0xff] %v9129_v0  ;;  %v9139_v58 = vadd.f32 %v836_v24, %v8825_v25  ;;  %2644 = vmatprep.mubr.f32.mxu0 %v13396_v29  ;;  %3028 = vmatprep.subr.mxu0 %v2243_v61  ;;  %v2186_v24 = vld [vmem:[#allocation7 + $0x700] sm:$0xff]  ;;  %v2183_v38 = vld [vmem:[#allocation7 + $0x6e8] sm:$0xff] }
 0x1a7   : > { %v9144_v17 = vpop.f32.mrf.mxu1  ;;  %6944 = vmatmul.mubr.msk.f32.gmra.mxu1 %vm581_vm0, %v7891_v63  ;;  %2645 = vmatmul.mubr.f32.gmra.mxu0 %v13775_v21  ;;  %v9150_v31 = vpop.f32.mrf.mxu0  ;;  %v9161_v21 = vadd.f32 %v8852_v18, %v8825_v25  ;;  %v2235_v63 = vld [vmem:[#allocation7 + $0x888] sm:$0xff]  ;;  %v2182_v18 = vld [vmem:[#allocation7 + $0x6e0] sm:$0xff] }
 0x1a8   : > { %13774 = vst [vmem:[#allocation74_spill] sm:$0xff] %v9139_v58  ;;  %v13400_v3 = vmax.f32 %v9139_v58, 0.0  ;;  %1615 = vmatprep.mubr.f32.mxu1 %v13760_v6  ;;  %3029 = vmatpush1.msra.mxu0 %v2242_v28  ;;  %v7892_v28 = vld [vmem:[%s8428_s22 + $0x88] sm:$0xff] }
 0x1a9   : > { %v9154_v61 = vpop.f32.mrf.mxu1  ;;  %v9156_v29 = vpop.f32.mrf.mxu0  ;;  %2799 = vmatprep.subr.mxu1 %v2187_v7  ;;  %3030 = vmatprep.subr.mxu0 %v2239_v50  ;;  %13776 = vst [vmem:[#allocation75_spill] sm:$0xff] %v9161_v21  ;;  %v13777_v7 = vmax.f32 %v9126_v56, 0.0  ;;  %v2234_v56 = vld [vmem:[#allocation7 + $0x880] sm:$0xff] }
 0x1aa   : > { %2650 = vmatprep.mubr.f32.mxu0 %v13400_v3  ;;  %2800 = vmatpush2.msra.mxu1 %v2186_v24  ;;  %v13406_v24 = vmax.f32 %v8833_v5, 0.0  ;;  %v2230_v5 = vld [vmem:[#allocation7 + $0x860] sm:$0xff] }
 0x1ab   : > { %v9165_v41 = vpop.f32.mrf.mxu1  ;;  %6945 = vmatmul.mubr.msk.f32.gmra.mxu1 %vm581_vm0, %v7892_v28  ;;  %2651 = vmatmul.mubr.f32.gmra.mxu0 %v13777_v7  ;;  %v9171_v50 = vpop.f32.mrf.mxu0  ;;  %v9184_v7 = vadd.f32 %v8872_v53, %v8825_v25  ;;  %v2178_v28 = vld [vmem:[#allocation7 + $0x6c0] sm:$0xff]  ;;  %v13780_v53 = vmax.f32 %v9161_v21, 0.0 }
 0x1ac   : > { %2656 = vmatprep.mubr.f32.mxu0 %v13778_v4  ;;  %1621 = vmatprep.mubr.f32.mxu1 %v13760_v6  ;;  %v2179_v4 = vld [vmem:[#allocation7 + $0x6c8] sm:$0xff] }
 0x1ad   : > { %v9177_v3 = vpop.f32.mrf.mxu1  ;;  %v9179_v58 = vpop.f32.mrf.mxu0  ;;  %3031 = vmatpush1.msra.mxu0 %v2238_v52  ;;  %2801 = vmatprep.subr.mxu1 %v2183_v38  ;;  %13779 = vst [vmem:[#allocation76_spill] sm:$0xff] %v9184_v7  ;;  %v2231_v38 = vld [vmem:[#allocation7 + $0x868] sm:$0xff] }
 0x1ae   : > { %3032 = vmatprep.subr.mxu0 %v2235_v63  ;;  %2802 = vmatpush2.msra.mxu1 %v2182_v18  ;;  %v13411_v63 = vmax.f32 %v8849_v20, 0.0  ;;  %v2226_v20 = vld [vmem:[#allocation7 + $0x840] sm:$0xff] }
 0x1af   : > { %v9186_v46 = vpop.f32.mrf.mxu1  ;;  %6946 = vmatmul.mubr.msk.f32.gmra.mxu1 %vm581_vm0, %v7893_v23  ;;  %2657 = vmatmul.mubr.f32.gmra.mxu0 %v13406_v24  ;;  %v9192_v52 = vpop.f32.mrf.mxu0  ;;  %v9205_v24 = vadd.f32 %v8892_v57, %v8825_v25  ;;  %v2174_v23 = vld [vmem:[#allocation7 + $0x6a0] sm:$0xff]  ;;  %v13782_v57 = vmax.f32 %v9184_v7, 0.0 }
 0x1b0   : > { %2662 = vmatprep.mubr.f32.mxu0 %v13780_v53  ;;  %1627 = vmatprep.mubr.f32.mxu1 %v13760_v6  ;;  %v2175_v53 = vld [vmem:[#allocation7 + $0x6a8] sm:$0xff] }
 0x1b1   : > { %v9198_v18 = vpop.f32.mrf.mxu1  ;;  %v9200_v44 = vpop.f32.mrf.mxu0  ;;  %3033 = vmatpush1.msra.mxu0 %v2234_v56  ;;  %2803 = vmatprep.subr.mxu1 %v2179_v4  ;;  %13781 = vst [vmem:[#allocation77_spill] sm:$0xff] %v9205_v24  ;;  %v2227_v4 = vld [vmem:[#allocation7 + $0x848] sm:$0xff] }
 0x1b2   : > { %3034 = vmatprep.subr.mxu0 %v2231_v38  ;;  %2804 = vmatpush2.msra.mxu1 %v2178_v28  ;;  %v13416_v28 = vmax.f32 %v8869_v47, 0.0  ;;  %v2222_v47 = vld [vmem:[#allocation7 + $0x820] sm:$0xff] }
 0x1b3   : > { %v9207_v21 = vpop.f32.mrf.mxu1  ;;  %6947 = vmatmul.mubr.msk.f32.gmra.mxu1 %vm581_vm0, %v7894_v26  ;;  %2663 = vmatmul.mubr.f32.gmra.mxu0 %v13411_v63  ;;  %v9213_v56 = vpop.f32.mrf.mxu0  ;;  %v9226_v63 = vadd.f32 %v8912_v30, %v8825_v25  ;;  %v2170_v26 = vld [vmem:[#allocation7 + $0x680] sm:$0xff]  ;;  %v13784_v30 = vmax.f32 %v9205_v24, 0.0 }
 0x1b4   : > { %2668 = vmatprep.mubr.f32.mxu0 %v13782_v57  ;;  %1633 = vmatprep.mubr.f32.mxu1 %v13760_v6  ;;  %v2171_v57 = vld [vmem:[#allocation7 + $0x688] sm:$0xff] }
 0x1b5   : > { %v9219_v38 = vpop.f32.mrf.mxu1  ;;  %v9221_v8 = vpop.f32.mrf.mxu0  ;;  %3035 = vmatpush1.msra.mxu0 %v2230_v5  ;;  %2805 = vmatprep.subr.mxu1 %v2175_v53  ;;  %13783 = vst [vmem:[#allocation78_spill] sm:$0xff] %v9226_v63  ;;  %v2223_v53 = vld [vmem:[#allocation7 + $0x828] sm:$0xff] }
 0x1b6   : > { %3036 = vmatprep.subr.mxu0 %v2227_v4  ;;  %2806 = vmatpush2.msra.mxu1 %v2174_v23  ;;  %v13421_v23 = vmax.f32 %v8889_v11, 0.0  ;;  %v2218_v11 = vld [vmem:[#allocation7 + $0x800] sm:$0xff] }
 0x1b7   : > { %v9228_v7 = vpop.f32.mrf.mxu1  ;;  %6948 = vmatmul.mubr.msk.f32.gmra.mxu1 %vm581_vm0, %v7895_v55  ;;  %2669 = vmatmul.mubr.f32.gmra.mxu0 %v13416_v28  ;;  %v9234_v5 = vpop.f32.mrf.mxu0  ;;  %v9247_v28 = vadd.f32 %v8932_v35, %v8825_v25  ;;  %v2166_v55 = vld [vmem:[#allocation7 + $0x660] sm:$0xff]  ;;  %v13786_v35 = vmax.f32 %v9226_v63, 0.0 }
 0x1b8   : > { %2674 = vmatprep.mubr.f32.mxu0 %v13784_v30  ;;  %1639 = vmatprep.mubr.f32.mxu1 %v13760_v6  ;;  %v2167_v30 = vld [vmem:[#allocation7 + $0x668] sm:$0xff] }
 0x1b9   : > { %v9240_v4 = vpop.f32.mrf.mxu1  ;;  %v9242_v60 = vpop.f32.mrf.mxu0  ;;  %3037 = vmatpush1.msra.mxu0 %v2226_v20  ;;  %2807 = vmatprep.subr.mxu1 %v2171_v57  ;;  %13785 = vst [vmem:[#allocation79_spill] sm:$0xff] %v9247_v28  ;;  %v2219_v57 = vld [vmem:[#allocation7 + $0x808] sm:$0xff] }
 0x1ba   : > { %3038 = vmatprep.subr.mxu0 %v2223_v53  ;;  %2808 = vmatpush2.msra.mxu1 %v2170_v26  ;;  %v13426_v26 = vmax.f32 %v8909_v1, 0.0  ;;  %v2342_v1 = vld [vmem:[#allocation7 + $0xbe0] sm:$0xff] }
 0x1bb   : > { %v9249_v24 = vpop.f32.mrf.mxu1  ;;  %6949 = vmatmul.mubr.msk.f32.gmra.mxu1 %vm581_vm0, %v7896_v45  ;;  %2675 = vmatmul.mubr.f32.gmra.mxu0 %v13421_v23  ;;  %v9255_v20 = vpop.f32.mrf.mxu0  ;;  %v9268_v23 = vadd.f32 %v8952_v62, %v8825_v25  ;;  %v2162_v45 = vld [vmem:[#allocation7 + $0x640] sm:$0xff]  ;;  %v13788_v62 = vmax.f32 %v9247_v28, 0.0 }
 0x1bc   : > { %2680 = vmatprep.mubr.f32.mxu0 %v13786_v35  ;;  %1645 = vmatprep.mubr.f32.mxu1 %v13760_v6  ;;  %v2163_v35 = vld [vmem:[#allocation7 + $0x648] sm:$0xff] }
 0x1bd   : > { %v9261_v53 = vpop.f32.mrf.mxu1  ;;  %v9263_v49 = vpop.f32.mrf.mxu0  ;;  %3039 = vmatpush1.msra.mxu0 %v2222_v47  ;;  %2809 = vmatprep.subr.mxu1 %v2167_v30  ;;  %13787 = vst [vmem:[#allocation80_spill] sm:$0xff] %v9268_v23  ;;  %v2343_v30 = vld [vmem:[#allocation7 + $0xbe8] sm:$0xff] }
 0x1be   : > { %3040 = vmatprep.subr.mxu0 %v2219_v57  ;;  %2810 = vmatpush2.msra.mxu1 %v2166_v55  ;;  %v13431_v55 = vmax.f32 %v8929_v42, 0.0  ;;  %v2338_v42 = vld [vmem:[#allocation7 + $0xbc0] sm:$0xff] }
 0x1bf   : > { %v9270_v63 = vpop.f32.mrf.mxu1  ;;  %6950 = vmatmul.mubr.msk.f32.gmra.mxu1 %vm581_vm0, %v7897_v37  ;;  %2681 = vmatmul.mubr.f32.gmra.mxu0 %v13426_v26  ;;  %v9276_v47 = vpop.f32.mrf.mxu0  ;;  %v9289_v26 = vadd.f32 %v8972_v48, %v8825_v25  ;;  %v2158_v37 = vld [vmem:[#allocation7 + $0x620] sm:$0xff]  ;;  %v13791_v48 = vmax.f32 %v9268_v23, 0.0 }
 0x1c0   : > { %2686 = vmatprep.mubr.f32.mxu0 %v13788_v62  ;;  %1651 = vmatprep.mubr.f32.mxu1 %v13760_v6  ;;  %v2159_v62 = vld [vmem:[#allocation7 + $0x628] sm:$0xff] }
 0x1c1   : > { %v9282_v57 = vpop.f32.mrf.mxu1  ;;  %v9284_v22 = vpop.f32.mrf.mxu0  ;;  %3041 = vmatpush1.msra.mxu0 %v2218_v11  ;;  %2811 = vmatprep.subr.mxu1 %v2163_v35  ;;  %13789 = vst [vmem:[#allocation81_spill] sm:$0xff] %v9289_v26  ;;  %v2339_v35 = vld [vmem:[#allocation7 + $0xbc8] sm:$0xff] }
 0x1c2   : > { %3042 = vmatprep.subr.mxu0 %v2343_v30  ;;  %2812 = vmatpush2.msra.mxu1 %v2162_v45  ;;  %v13434_v45 = vmax.f32 %v8949_v34, 0.0  ;;  %v2334_v34 = vld [vmem:[#allocation7 + $0xba0] sm:$0xff] }
 0x1c3   : > { %v9291_v28 = vpop.f32.mrf.mxu1  ;;  %6951 = vmatmul.mubr.msk.f32.gmra.mxu1 %vm581_vm0, %v7898_v27  ;;  %2687 = vmatmul.mubr.f32.gmra.mxu0 %v13431_v55  ;;  %v9297_v11 = vpop.f32.mrf.mxu0  ;;  %v9310_v55 = vadd.f32 %v8992_v36, %v8825_v25  ;;  %v2154_v27 = vld [vmem:[#allocation7 + $0x600] sm:$0xff]  ;;  %v13795_v36 = vmax.f32 %v9289_v26, 0.0 }
 0x1c4   : > { %13790 = vst [vmem:[#allocation82_spill] sm:$0xff] %v9297_v11  ;;  %2692 = vmatprep.mubr.f32.mxu0 %v13791_v48  ;;  %1657 = vmatprep.mubr.f32.mxu1 %v13760_v6  ;;  %v2155_v48 = vld [vmem:[#allocation7 + $0x608] sm:$0xff]  ;;  %v7899_v11 = vld [vmem:[%s8428_s22 + $0xc0] sm:$0xff] }
 0x1c5   : > { %v9303_v30 = vpop.f32.mrf.mxu1  ;;  %v9305_v32 = vpop.f32.mrf.mxu0  ;;  %3043 = vmatpush2.msra.mxu0 %v2342_v1  ;;  %2813 = vmatprep.subr.mxu1 %v2159_v62  ;;  %13793 = vst [vmem:[#allocation84_spill] sm:$0xff] %v9310_v55  ;;  %v2335_v62 = vld [vmem:[#allocation7 + $0xba8] sm:$0xff] }
 0x1c6   : > { %13792 = vst [vmem:[#allocation83_spill] sm:$0xff] %v9305_v32  ;;  %3044 = vmatprep.subr.mxu0 %v2339_v35  ;;  %2814 = vmatpush2.msra.mxu1 %v2158_v37  ;;  %v13437_v37 = vmax.f32 %v8969_v43, 0.0  ;;  %v2330_v43 = vld [vmem:[#allocation7 + $0xb80] sm:$0xff] }
 0x1c7   : > { %v9312_v23 = vpop.f32.mrf.mxu1  ;;  %6952 = vmatmul.mubr.msk.f32.gmra.mxu1 %vm581_vm0, %v7899_v11  ;;  %2693 = vmatmul.mubr.f32.gmra.mxu0 %v13434_v45  ;;  %v9318_v1 = vpop.f32.mrf.mxu0  ;;  %v13440_v11 = vmax.f32 %v9310_v55, 0.0  ;;  %v9331_v45 = vadd.f32 %v9012_v39, %v8825_v25  ;;  %v13441_v39 = vmax.f32 %v8989_v14, 0.0  ;;  %v2326_v14 = vld [vmem:[#allocation7 + $0xb60] sm:$0xff] }
 0x1c8   : > { %13794 = vst [vmem:[#allocation85_spill] sm:$0xff] %v9318_v1  ;;  %2698 = vmatprep.mubr.f32.mxu0 %v13795_v36  ;;  %1663 = vmatprep.mubr.f32.mxu1 %v13760_v6  ;;  %v2407_v36 = vld [vmem:[#allocation7 + $0xde8] sm:$0xff]  ;;  %v7900_v1 = vld [vmem:[%s8428_s22 + $0xc8] sm:$0xff] }
 0x1c9   : > { %v9324_v35 = vpop.f32.mrf.mxu1  ;;  %v9326_v32 = vpop.f32.mrf.mxu0  ;;  %3045 = vmatpush2.msra.mxu0 %v2338_v42  ;;  %2815 = vmatprep.subr.mxu1 %v2155_v48  ;;  %13796 = vst [vmem:[#allocation86_spill] sm:$0xff] %v9331_v45  ;;  %v2331_v48 = vld [vmem:[#allocation7 + $0xb88] sm:$0xff] }
 0x1ca   : > { %3046 = vmatprep.subr.mxu0 %v2335_v62  ;;  %2816 = vmatpush2.msra.mxu1 %v2154_v27 }
 0x1cb   : > { %v9333_v26 = vpop.f32.mrf.mxu1  ;;  %6953 = vmatmul.mubr.msk.f32.gmra.mxu1 %vm581_vm0, %v7900_v1  ;;  %2699 = vmatmul.mubr.f32.gmra.mxu0 %v13437_v37  ;;  %v9339_v42 = vpop.f32.mrf.mxu0  ;;  %v13443_v1 = vmax.f32 %v9331_v45, 0.0  ;;  %v9352_v37 = vadd.f32 %v9032_v9, %v8825_v25  ;;  %v13445_v9 = vmax.f32 %v9009_v19, 0.0  ;;  %v2322_v19 = vld [vmem:[#allocation7 + $0xb40] sm:$0xff] }
 0x1cc   : > { %13797 = vst [vmem:[#allocation87_spill] sm:$0xff] %v9339_v42  ;;  %2704 = vmatprep.mubr.f32.mxu0 %v13440_v11  ;;  %1669 = vmatprep.mubr.f32.mxu1 %v13760_v6  ;;  %v7901_v11 = vld [vmem:[%s8428_s22 + $0xd0] sm:$0xff] }
 0x1cd   : > { %v9345_v27 = vpop.f32.mrf.mxu1  ;;  %3047 = vmatpush2.msra.mxu0 %v2334_v34  ;;  %v9347_v62 = vpop.f32.mrf.mxu0  ;;  %3267 = vmatprep.subr.mxu1 %v2407_v36  ;;  %13798 = vst [vmem:[#allocation88_spill] sm:$0xff] %v9352_v37  ;;  %v2327_v36 = vld [vmem:[#allocation7 + $0xb68] sm:$0xff] }
 0x1ce   : > { %3048 = vmatprep.subr.mxu0 %v2331_v48 }
 0x1cf   : > { %v9354_v55 = vpop.f32.mrf.mxu1  ;;  %6954 = vmatmul.mubr.msk.f32.gmra.mxu1 %vm581_vm0, %v7901_v11  ;;  %2705 = vmatmul.mubr.f32.gmra.mxu0 %v13441_v39  ;;  %v9360_v34 = vpop.f32.mrf.mxu0  ;;  %v13448_v11 = vmax.f32 %v9352_v37, 0.0  ;;  %v9373_v39 = vadd.f32 %v9052_v16, %v8825_v25  ;;  %v13449_v16 = vmax.f32 %v9029_v51, 0.0  ;;  %v9417_v51 = vadd.f32 %v9092_v10, %v8825_v25 }
 0x1d0   : > { %13799 = vst [vmem:[#allocation89_spill] sm:$0xff] %v9360_v34  ;;  %2710 = vmatprep.mubr.f32.mxu0 %v13443_v1  ;;  %1675 = vmatprep.mubr.f32.mxu1 %v13760_v6  ;;  %v7902_v1 = vld [vmem:[%s8428_s22 + $0xd8] sm:$0xff] }
 0x1d1   : > { %v9366_v48 = vpop.f32.mrf.mxu1  ;;  %3049 = vmatpush2.msra.mxu0 %v2330_v43  ;;  %v9368_v42 = vpop.f32.mrf.mxu0  ;;  %13801 = vst [vmem:[#allocation91_spill] sm:$0xff] %v9373_v39  ;;  %v2323_v43 = vld [vmem:[#allocation7 + $0xb48] sm:$0xff]  ;;  %13810 = vst [vmem:[#allocation100_spill] sm:$0xff] %v9417_v51 }
 0x1d2   : > { %13800 = vst [vmem:[#allocation90_spill] sm:$0xff] %v9368_v42  ;;  %3050 = vmatprep.subr.mxu0 %v2327_v36 }
 0x1d3   : > { %v9375_v34 = vpop.f32.mrf.mxu1  ;;  %6955 = vmatmul.mubr.msk.f32.gmra.mxu1 %vm581_vm0, %v7902_v1  ;;  %2711 = vmatmul.mubr.f32.gmra.mxu0 %v13445_v9  ;;  %v9381_v45 = vpop.f32.mrf.mxu0  ;;  %v13451_v1 = vmax.f32 %v9373_v39, 0.0  ;;  %v9394_v9 = vadd.f32 %v9072_v59, %v8825_v25  ;;  %v9419_v39 = vld [vmem:[#allocation5] sm:$0xff]  ;;  %v13811_v59 = vsub.s32 3, %v8802_v13 }
 0x1d4   : > { %13802 = vst [vmem:[#allocation92_spill] sm:$0xff] %v9375_v34  ;;  %13803 = vst [vmem:[#allocation93_spill] sm:$0xff] %v9381_v45  ;;  %2716 = vmatprep.mubr.f32.mxu0 %v13448_v11  ;;  %1681 = vmatprep.mubr.f32.mxu1 %v13760_v6  ;;  %v7903_v45 = vld [vmem:[%s8428_s22 + $0xe0] sm:$0xff] }
 0x1d5   : > { %v9387_v36 = vpop.f32.mrf.mxu1  ;;  %3051 = vmatpush2.msra.mxu0 %v2326_v14  ;;  %v9389_v42 = vpop.f32.mrf.mxu0  ;;  %13805 = vst [vmem:[#allocation95_spill] sm:$0xff] %v9394_v9  ;;  %v2319_v14 = vld [vmem:[#allocation7 + $0xb28] sm:$0xff] }
 0x1d6   : > { %13804 = vst [vmem:[#allocation94_spill] sm:$0xff] %v9389_v42  ;;  %3052 = vmatprep.subr.mxu0 %v2323_v43  ;;  %v9424_v43 = vrot.slane %v9419_v39, %v13811_v59  ;;  %v13816_v59 = vsub.s32 2, %v8802_v13 }
 0x1d7   : > { %v9397_v11 = vpop.f32.mrf.mxu1  ;;  %6956 = vmatmul.mubr.msk.f32.gmra.mxu1 %vm581_vm0, %v7903_v45  ;;  %2717 = vmatmul.mubr.f32.gmra.mxu0 %v13449_v16  ;;  %v9403_v42 = vpop.f32.mrf.mxu0  ;;  %v2318_v45 = vld [vmem:[#allocation7 + $0xb20] sm:$0xff]  ;;  %v13813_v16 = vmax.f32 %v9049_v40, 0.0  ;;  %v13821_v40 = vmax.f32 %v9069_v54, 0.0 }
 0x1d8   : > { %13806 = vst [vmem:[#allocation96_spill] sm:$0xff] %v9397_v11  ;;  %13807 = vst [vmem:[#allocation97_spill] sm:$0xff] %v9403_v42  ;;  %2722 = vmatprep.mubr.f32.mxu0 %v13451_v1  ;;  %1687 = vmatprep.mubr.f32.mxu1 %v13760_v6  ;;  %v2315_v1 = vld [vmem:[#allocation7 + $0xb08] sm:$0xff] }
 0x1d9   : > { %v9410_v37 = vpop.f32.mrf.mxu1  ;;  %3053 = vmatpush2.msra.mxu0 %v2322_v19  ;;  %v9412_v11 = vpop.f32.mrf.mxu0  ;;  %v7905_v19 = vld [vmem:[%s8428_s22 + $0xe8] sm:$0xff] }
 0x1da   : > { %13808 = vst [vmem:[#allocation98_spill] sm:$0xff] %v9410_v37  ;;  %13809 = vst [vmem:[#allocation99_spill] sm:$0xff] %v9412_v11  ;;  %3054 = vmatprep.subr.mxu0 %v2319_v14  ;;  %v2314_v11 = vld [vmem:[#allocation7 + $0xb00] sm:$0xff]  ;;  %v13815_v14 = vmax.f32 %v9394_v9, 0.0 }
 0x1db   : > { %v9426_v42 = vpop.f32.mrf.mxu1  ;;  %6957 = vmatmul.mubr.msk.f32.gmra.mxu1 %vm581_vm0, %v7905_v19  ;;  %2723 = vmatmul.mubr.f32.gmra.mxu0 %v13813_v16  ;;  %v9432_v10 = vpop.f32.mrf.mxu0  ;;  %v2311_v16 = vld [vmem:[#allocation7 + $0xae8] sm:$0xff] }
 0x1dc   : > { %13812 = vst [vmem:[#allocation101_spill] sm:$0xff] %v9426_v42  ;;  %13814 = vst [vmem:[#allocation102_spill] sm:$0xff] %v9432_v10  ;;  %2728 = vmatprep.mubr.f32.mxu0 %v13815_v14  ;;  %3055 = vmatpush2.msra.mxu0 %v2318_v45  ;;  %v9440_v42 = vrot.slane %v9419_v39, %v13816_v59  ;;  %v2310_v14 = vld [vmem:[#allocation7 + $0xae0] sm:$0xff]  ;;  %v9450_v45 = vadd.f32 %v9112_v33, %v8825_v25  ;;  %v2307_v10 = vld [vmem:[#allocation7 + $0xac8] sm:$0xff]  ;;  %v13823_v33 = vmax.f32 %v9417_v51, 0.0 }
 0x1dd   : > { %v9442_v34 = vpop.f32.mrf.mxu1  ;;  %3056 = vmatprep.subr.mxu0 %v2315_v1  ;;  %1693 = vmatprep.mubr.f32.mxu1 %v13760_v6  ;;  %v9445_v19 = vpop.f32.mrf.mxu0  ;;  %v9454_v59 = vadd.f32 %v9154_v61, %v9424_v43  ;;  %v7906_v1 = vld [vmem:[%s8428_s22 + $0xf0] sm:$0xff]  ;;  %v2306_v61 = vld [vmem:[#allocation7 + $0xac0] sm:$0xff] }
 0x1de   : > { %13817 = vst [vmem:[#allocation103_spill] sm:$0xff] %v9445_v19  ;;  %3057 = vmatpush2.msra.mxu0 %v2314_v11  ;;  %13818 = vst [vmem:[#allocation104_spill] sm:$0xff] %v9450_v45  ;;  %v563_v11 = vsub.s32 5, %v8802_v13  ;;  %v9469_v19 = vadd.f32 %v9144_v17, %v9440_v42  ;;  %v13460_v17 = vmax.f32 %v9450_v45, 0.0  ;;  %v2294_v45 = vld [vmem:[#allocation7 + $0xa60] sm:$0xff] }
 0x1df   : > { %13819 = vst [vmem:[#allocation105_spill] sm:$0xff] %v9454_v59  ;;  %v9456_v37 = vpop.f32.mrf.mxu1  ;;  %6958 = vmatmul.mubr.msk.f32.gmra.mxu1 %vm581_vm0, %v7906_v1  ;;  %2729 = vmatmul.mubr.f32.gmra.mxu0 %v13821_v40  ;;  %v9462_v9 = vpop.f32.mrf.mxu0  ;;  %v2303_v40 = vld [vmem:[#allocation7 + $0xaa8] sm:$0xff] }
 0x1e0   : > { %13820 = vst [vmem:[#allocation106_spill] sm:$0xff] %v9456_v37  ;;  %13822 = vst [vmem:[#allocation107_spill] sm:$0xff] %v9462_v9  ;;  %3058 = vmatprep.subr.mxu0 %v2311_v16  ;;  %2734 = vmatprep.mubr.f32.mxu0 %v13823_v33  ;;  %v9479_v16 = vadd.f32 %v9177_v3, %v9424_v43  ;;  %v559_v33 = vsub.s32 4, %v8802_v13  ;;  %v9492_v3 = vadd.f32 %v9132_v15, %v8825_v25  ;;  %v2298_v15 = vld [vmem:[#allocation7 + $0xa80] sm:$0xff] }
 0x1e1   : > { %13824 = vst [vmem:[#allocation108_spill] sm:$0xff] %v9469_v19  ;;  %3059 = vmatpush2.msra.mxu0 %v2310_v14  ;;  %v9471_v1 = vpop.f32.mrf.mxu1  ;;  %1699 = vmatprep.mubr.f32.mxu1 %v13760_v6  ;;  %v9474_v54 = vpop.f32.mrf.mxu0  ;;  %v7907_v6 = vld [vmem:[%s8428_s22 + $0xf8] sm:$0xff]  ;;  %v9495_v9 = vrot.slane %v9419_v39, %v563_v11  ;;  %v9510_v11 = vadd.f32 %v9165_v41, %v9440_v42  ;;  %v2295_v14 = vld [vmem:[#allocation7 + $0xa68] sm:$0xff]  ;;  %v2290_v41 = vld [vmem:[#allocation7 + $0xa40] sm:$0xff] }
 0x1e2   : > { %13825 = vst [vmem:[#allocation109_spill] sm:$0xff] %v9474_v54  ;;  %13826 = vst [vmem:[#allocation110_spill] sm:$0xff] %v9479_v16  ;;  %3060 = vmatprep.subr.mxu0 %v2307_v10  ;;  %v2302_v54 = vld [vmem:[#allocation7 + $0xaa0] sm:$0xff]  ;;  %v13828_v10 = vmax.f32 %v9089_v2, 0.0 }
 0x1e3   : > { %3061 = vmatpush2.msra.mxu0 %v2306_v61  ;;  %v9484_v51 = vpop.f32.mrf.mxu1  ;;  %6959 = vmatmul.mubr.msk.f32.gmra.mxu1 %vm581_vm0, %v7907_v6  ;;  %v9488_v37 = vpop.f32.mrf.mxu0  ;;  %13827 = vst [vmem:[#allocation111_spill] sm:$0xff] %v9492_v3  ;;  %v2299_v61 = vld [vmem:[#allocation7 + $0xa88] sm:$0xff]  ;;  %v13829_v6 = vmax.f32 %v9454_v59, 0.0  ;;  %13830 = vst [vmem:[#allocation112_spill] sm:$0xff] %v9510_v11  ;;  %v13831_v59 = vmax.f32 %v9469_v19, 0.0 }
 0x1e4   : > { %2735 = vmatmul.mubr.f32.gmra.mxu0 %v13828_v10  ;;  %3062 = vmatprep.subr.mxu0 %v2303_v40  ;;  %v9514_v10 = vrot.slane %v9419_v39, %v559_v33  ;;  %v9526_v40 = vadd.f32 %v9198_v18, %v9424_v43  ;;  %v13834_v39 = vmax.f32 %v9479_v16, 0.0  ;;  %v2406_v33 = vld [vmem:[#allocation7 + $0xde0] sm:$0xff]  ;;  %v13470_v16 = vmax.f32 %v9129_v0, 0.0  ;;  %v2403_v18 = vld [vmem:[#allocation7 + $0xdc8] sm:$0xff] }
 0x1e5   : > { %2740 = vmatprep.mubr.f32.mxu0 %v13460_v17  ;;  %2817 = vmatprep.mubr.f32.mxu1 %v13829_v6  ;;  %v9504_v13 = vpop.f32.mrf.mxu1  ;;  %v9506_v25 = vpop.f32.mrf.mxu0  ;;  %v13466_v17 = vmax.f32 %v9109_v12, 0.0  ;;  %v9597_v0 = vadd.f32 %v9240_v4, %v9424_v43 }
 0x1e6   : > { %3063 = vmatpush2.msra.mxu0 %v2302_v54  ;;  %13832 = vst [vmem:[#allocation113_spill] sm:$0xff] %v9526_v40  ;;  %v9530_v54 = vadd.f32 %v9156_v29, %v9495_v9  ;;  %v9543_v29 = vadd.f32 %v9150_v31, %v9514_v10  ;;  %v9611_v4 = vadd.f32 %v9192_v52, %v9514_v10 }
 0x1e7   : > { %3064 = vmatprep.subr.mxu0 %v2299_v61  ;;  %v9517_v6 = vpop.f32.mrf.mxu1  ;;  %2818 = vmatmul.mubr.f32.vlgmr.msra.gmra.mxu1 %v13831_v59  ;;  %v9521_v2 = vpop.f32.mrf.mxu0  ;;  %v2291_v61 = vld [vmem:[#allocation7 + $0xa48] sm:$0xff]  ;;  %13847 = vst [vmem:[#allocation124_spill] sm:$0xff] %v9597_v0 }
 0x1e8   : > { %13833 = vst [vmem:[#allocation114_spill] sm:$0xff] %v9530_v54  ;;  %3065 = vmatpush2.msra.mxu0 %v2298_v15  ;;  %2823 = vmatprep.mubr.f32.mxu1 %v13834_v39  ;;  %13835 = vst [vmem:[#allocation115_spill] sm:$0xff] %v9543_v29  ;;  %v13836_v15 = vmax.f32 %v9492_v3, 0.0  ;;  %v2287_v39 = vld [vmem:[#allocation7 + $0xa28] sm:$0xff] }
 0x1e9   : > { %2741 = vmatmul.mubr.f32.gmra.mxu0 %v13466_v17  ;;  %3066 = vmatprep.subr.mxu0 %v2295_v14  ;;  %v9536_v59 = vpop.f32.mrf.mxu1  ;;  %v9538_v19 = vpop.f32.mrf.mxu0  ;;  %v9550_v14 = vadd.f32 %v9186_v46, %v9440_v42  ;;  %v2286_v46 = vld [vmem:[#allocation7 + $0xa20] sm:$0xff]  ;;  %v2283_v3 = vld [vmem:[#allocation7 + $0xa08] sm:$0xff]  ;;  %13850 = vst [vmem:[#allocation125_spill] sm:$0xff] %v9611_v4 }
 0x1ea   : > { %2746 = vmatprep.mubr.f32.mxu0 %v13836_v15  ;;  %3067 = vmatpush2.msra.mxu0 %v2294_v45  ;;  %v9560_v45 = vadd.f32 %v9179_v58, %v9495_v9  ;;  %v13840_v15 = vmax.f32 %v9510_v11, 0.0  ;;  %v2395_v11 = vld [vmem:[#allocation7 + $0xd88] sm:$0xff] }
 0x1eb   : > { %13837 = vst [vmem:[#allocation116_spill] sm:$0xff] %v9550_v14  ;;  %3268 = vmatpush1.msra.mxu1 %v2406_v33  ;;  %3068 = vmatprep.subr.mxu0 %v2291_v61  ;;  %v9552_v17 = vpop.f32.mrf.mxu1  ;;  %v9554_v12 = vpop.f32.mrf.mxu0  ;;  %v2402_v33 = vld [vmem:[#allocation7 + $0xdc0] sm:$0xff]  ;;  %v9566_v61 = vadd.f32 %v9219_v38, %v9424_v43 }
 0x1ec   : > { %13838 = vst [vmem:[#allocation117_spill] sm:$0xff] %v9554_v12  ;;  %13839 = vst [vmem:[#allocation118_spill] sm:$0xff] %v9560_v45  ;;  %3069 = vmatpush2.msra.mxu0 %v2290_v41  ;;  %2824 = vmatmul.mubr.f32.gmra.mxu1 %v13840_v15  ;;  %v9577_v41 = vadd.f32 %v9171_v50, %v9514_v10  ;;  %v13843_v15 = vmax.f32 %v9526_v40, 0.0  ;;  %v2282_v38 = vld [vmem:[#allocation7 + $0xa00] sm:$0xff]  ;;  %v2399_v50 = vld [vmem:[#allocation7 + $0xda8] sm:$0xff] }
 0x1ed   : > { %13841 = vst [vmem:[#allocation119_spill] sm:$0xff] %v9566_v61  ;;  %2747 = vmatmul.mubr.f32.gmra.mxu0 %v13470_v16  ;;  %3070 = vmatprep.subr.mxu0 %v2287_v39  ;;  %v9570_v31 = vpop.f32.mrf.mxu1  ;;  %v9572_v12 = vpop.f32.mrf.mxu0  ;;  %v9584_v39 = vadd.f32 %v9207_v21, %v9440_v42  ;;  %v9588_v16 = vadd.f32 %v9200_v44, %v9495_v9  ;;  %v13848_v21 = vmax.f32 %v9530_v54, 0.0  ;;  %v2398_v40 = vld [vmem:[#allocation7 + $0xda0] sm:$0xff]  ;;  %v13854_v52 = vmax.f32 %v9566_v61, 0.0 }
 0x1ee   : > { %13842 = vst [vmem:[#allocation120_spill] sm:$0xff] %v9577_v41  ;;  %3269 = vmatprep.subr.mxu1 %v2403_v18  ;;  %2829 = vmatprep.mubr.f32.mxu1 %v13843_v15  ;;  %v9623_v15 = vadd.f32 %v9221_v8, %v9495_v9  ;;  %v13856_v44 = vmax.f32 %v9560_v45, 0.0  ;;  %v2394_v8 = vld [vmem:[#allocation7 + $0xd80] sm:$0xff]  ;;  %v9656_v45 = vadd.f32 %v9249_v24, %v9440_v42 }
 0x1ef   : > { %13844 = vst [vmem:[#allocation121_spill] sm:$0xff] %v9584_v39  ;;  %13845 = vst [vmem:[#allocation122_spill] sm:$0xff] %v9588_v16  ;;  %3071 = vmatpush2.msra.mxu0 %v2286_v46  ;;  %3270 = vmatpush1.msra.mxu1 %v2402_v33  ;;  %v9590_v58 = vpop.f32.mrf.mxu1  ;;  %v9592_v18 = vpop.f32.mrf.mxu0  ;;  %v13849_v46 = vmax.f32 %v9550_v14, 0.0  ;;  %v2024_v14 = vld [vmem:[#allocation7 + $0x1f0] sm:$0xff]  ;;  %v9672_v24 = vadd.f32 %v9282_v57, %v9424_v43  ;;  %v13866_v57 = vmax.f32 %v9611_v4, 0.0 }
 0x1f0   : > { %13846 = vst [vmem:[#allocation123_spill] sm:$0xff] %v9592_v18  ;;  %3072 = vmatprep.subr.mxu0 %v2283_v3  ;;  %3074 = vmatprep.mubr.f32.mxu0 %v13848_v21  ;;  %v13851_v3 = vmax.f32 %v9543_v29, 0.0  ;;  %v2025_v21 = vld [vmem:[#allocation7 + $0x1f8] sm:$0xff]  ;;  %13853 = vst [vmem:[#allocation127_spill] sm:$0xff] %v9623_v15  ;;  %v9733_v4 = vadd.f32 %v9284_v22, %v9495_v9 }
 0x1f1   : > { %3073 = vmatpush2.msra.mxu0 %v2282_v38  ;;  %2830 = vmatmul.mubr.f32.gmra.mxu1 %v13849_v46  ;;  %v9604_v33 = vpop.f32.mrf.mxu1  ;;  %v9606_v18 = vpop.f32.mrf.mxu0  ;;  %v13476_v38 = vmax.f32 %v9584_v39, 0.0  ;;  %v9618_v46 = vadd.f32 %v9228_v7, %v9440_v42  ;;  %v9634_v7 = vadd.f32 %v9261_v53, %v9424_v43  ;;  %v9647_v53 = vadd.f32 %v9213_v56, %v9514_v10 }
 0x1f2   : > { %3075 = vmatmul.mubr.f32.vlgmr.msra.gmra.mxu0 %v13851_v3  ;;  %3271 = vmatprep.subr.mxu1 %v2399_v50  ;;  %13860 = vst [vmem:[#allocation130_spill] sm:$0xff] %v9656_v45  ;;  %v9661_v3 = vadd.f32 %v9242_v60, %v9495_v9  ;;  %v13862_v56 = vmax.f32 %v9588_v16, 0.0  ;;  %13863 = vst [vmem:[#allocation132_spill] sm:$0xff] %v9672_v24  ;;  %v2387_v16 = vld [vmem:[#allocation7 + $0xd48] sm:$0xff]  ;;  %v9683_v39 = vadd.f32 %v9234_v5, %v9514_v10 }
 0x1f3   : > { %13852 = vst [vmem:[#allocation126_spill] sm:$0xff] %v9618_v46  ;;  %2835 = vmatprep.mubr.f32.mxu1 %v13854_v52  ;;  %3272 = vmatpush1.msra.mxu1 %v2398_v40  ;;  %v9627_v29 = vpop.f32.mrf.mxu1  ;;  %v9629_v50 = vpop.f32.mrf.mxu0  ;;  %13855 = vst [vmem:[#allocation128_spill] sm:$0xff] %v9634_v7  ;;  %v2391_v40 = vld [vmem:[#allocation7 + $0xd68] sm:$0xff]  ;;  %v13864_v60 = vmax.f32 %v9618_v46, 0.0  ;;  %v9692_v46 = vadd.f32 %v9270_v63, %v9440_v42  ;;  %v13870_v5 = vmax.f32 %v9623_v15, 0.0 }
 0x1f4   : > { %3080 = vmatprep.mubr.f32.mxu0 %v13856_v44  ;;  %3273 = vmatprep.subr.mxu1 %v2395_v11  ;;  %13857 = vst [vmem:[#allocation129_spill] sm:$0xff] %v9647_v53  ;;  %v13858_v44 = vmax.f32 %v9577_v41, 0.0  ;;  %v13859_v11 = vmax.f32 %v9597_v0, 0.0  ;;  %13861 = vst [vmem:[#allocation131_spill] sm:$0xff] %v9661_v3  ;;  %v2020_v0 = vld [vmem:[#allocation7 + $0x1d0] sm:$0xff]  ;;  %v9697_v41 = vadd.f32 %v9263_v49, %v9495_v9  ;;  %v13872_v49 = vmax.f32 %v9656_v45, 0.0 }
 0x1f5   : > { %2836 = vmatmul.mubr.f32.gmra.mxu1 %v13476_v38  ;;  %v9640_v52 = vpop.f32.mrf.mxu1  ;;  %v9642_v61 = vpop.f32.mrf.mxu0  ;;  %3524 = vmatprep.subr.mxu0 %v2025_v21  ;;  %v2021_v38 = vld [vmem:[#allocation7 + $0x1d8] sm:$0xff]  ;;  %v2390_v21 = vld [vmem:[#allocation7 + $0xd60] sm:$0xff]  ;;  %13865 = vst [vmem:[#allocation133_spill] sm:$0xff] %v9683_v39  ;;  %13868 = vst [vmem:[#allocation134_spill] sm:$0xff] %v9692_v46  ;;  %v9708_v63 = vadd.f32 %v9303_v30, %v9424_v43  ;;  %v13874_v30 = vmax.f32 %v9647_v53, 0.0  ;;  %v9728_v45 = vadd.f32 %v9291_v28, %v9440_v42 }
 0x1f6   : > { %3081 = vmatmul.mubr.f32.gmra.mxu0 %v13858_v44  ;;  %2841 = vmatprep.mubr.f32.mxu1 %v13859_v11  ;;  %13869 = vst [vmem:[#allocation135_spill] sm:$0xff] %v9697_v41  ;;  %v2383_v15 = vld [vmem:[#allocation7 + $0xd28] sm:$0xff]  ;;  %13877 = vst [vmem:[#allocation139_spill] sm:$0xff] %v9733_v4  ;;  %v9744_v28 = vadd.f32 %v9324_v35, %v9424_v43  ;;  %v13880_v22 = vmax.f32 %v9692_v46, 0.0  ;;  %v13882_v35 = vmax.f32 %v9683_v39, 0.0 }
 0x1f7   : > { %3274 = vmatpush1.msra.mxu1 %v2394_v8  ;;  %3086 = vmatprep.mubr.f32.mxu0 %v13862_v56  ;;  %v9665_v44 = vpop.f32.mrf.mxu1  ;;  %v9667_v11 = vpop.f32.mrf.mxu0  ;;  %13871 = vst [vmem:[#allocation136_spill] sm:$0xff] %v9708_v63  ;;  %13876 = vst [vmem:[#allocation138_spill] sm:$0xff] %v9728_v45  ;;  %v9764_v46 = vadd.f32 %v9312_v23, %v9440_v42  ;;  %v13885_v53 = vld [vmem:[#allocation83_spill] sm:$0xff]  ;;  %v9780_v23 = vadd.f32 %v9345_v27, %v9424_v43 }
 0x1f8   : > { %3275 = vmatprep.subr.mxu1 %v2391_v40  ;;  %3525 = vmatpush1.msra.mxu0 %v2024_v14  ;;  %v13867_v14 = vmax.f32 %v9634_v7, 0.0  ;;  %v2017_v40 = vld [vmem:[#allocation7 + $0x1b8] sm:$0xff]  ;;  %v2016_v7 = vld [vmem:[#allocation7 + $0x1b0] sm:$0xff]  ;;  %13879 = vst [vmem:[#allocation140_spill] sm:$0xff] %v9744_v28  ;;  %v9769_v54 = vadd.f32 %v13885_v53, %v9495_v9  ;;  %v13890_v53 = vmax.f32 %v9728_v45, 0.0  ;;  %v9800_v45 = vadd.f32 %v9333_v26, %v9440_v42 }
 0x1f9   : > { %2842 = vmatmul.mubr.f32.gmra.mxu1 %v13864_v60  ;;  %v9676_v8 = vpop.f32.mrf.mxu1  ;;  %v9678_v56 = vpop.f32.mrf.mxu0  ;;  %3526 = vmatprep.subr.mxu0 %v2021_v38  ;;  %v2386_v38 = vld [vmem:[#allocation7 + $0xd40] sm:$0xff]  ;;  %v9719_v60 = vadd.f32 %v9255_v20, %v9514_v10  ;;  %v13878_v20 = vmax.f32 %v9661_v3, 0.0  ;;  %v2379_v3 = vld [vmem:[#allocation7 + $0xd08] sm:$0xff]  ;;  %13884 = vst [vmem:[#allocation142_spill] sm:$0xff] %v9764_v46  ;;  %13889 = vst [vmem:[#allocation144_spill] sm:$0xff] %v9780_v23  ;;  %v9805_v39 = vadd.f32 %v9326_v32, %v9495_v9 }
 0x1fa   : > { %3087 = vmatmul.mubr.f32.gmra.mxu0 %v13866_v57  ;;  %2847 = vmatprep.mubr.f32.mxu1 %v13867_v14  ;;  %13886 = vst [vmem:[#allocation83_spill] sm:$0xff] %v9769_v54  ;;  %13895 = vst [vmem:[#allocation145_spill] sm:$0xff] %v9800_v45  ;;  %v9816_v26 = vadd.f32 %v9366_v48, %v9424_v43  ;;  %v13900_v32 = vmax.f32 %v9764_v46, 0.0  ;;  %v9836_v46 = vadd.f32 %v9354_v55, %v9440_v42 }
 0x1fb   : > { %3276 = vmatpush1.msra.mxu1 %v2390_v21  ;;  %3092 = vmatprep.mubr.f32.mxu0 %v13870_v5  ;;  %v9701_v57 = vpop.f32.mrf.mxu1  ;;  %v9703_v14 = vpop.f32.mrf.mxu0  ;;  %13873 = vst [vmem:[#allocation137_spill] sm:$0xff] %v9719_v60  ;;  %v13893_v27 = vmax.f32 %v9719_v60, 0.0  ;;  %13896 = vst [vmem:[#allocation146_spill] sm:$0xff] %v9805_v39  ;;  %v9841_v60 = vadd.f32 %v9347_v62, %v9495_v9  ;;  %v9852_v55 = vadd.f32 %v9387_v36, %v9424_v43 }
 0x1fc   : > { %3277 = vmatprep.subr.mxu1 %v2387_v16  ;;  %3527 = vmatpush1.msra.mxu0 %v2020_v0  ;;  %v13875_v0 = vmax.f32 %v9672_v24, 0.0  ;;  %v2013_v16 = vld [vmem:[#allocation7 + $0x198] sm:$0xff]  ;;  %v2012_v24 = vld [vmem:[#allocation7 + $0x190] sm:$0xff]  ;;  %13899 = vst [vmem:[#allocation148_spill] sm:$0xff] %v9816_v26  ;;  %13906 = vst [vmem:[#allocation150_spill] sm:$0xff] %v9836_v46  ;;  %v13911_v62 = vmax.f32 %v9800_v45, 0.0 }
 0x1fd   : > { %2848 = vmatmul.mubr.f32.gmra.mxu1 %v13872_v49  ;;  %v9712_v21 = vpop.f32.mrf.mxu1  ;;  %v9714_v5 = vpop.f32.mrf.mxu0  ;;  %3528 = vmatprep.subr.mxu0 %v2017_v40  ;;  %v2382_v40 = vld [vmem:[#allocation7 + $0xd20] sm:$0xff]  ;;  %v9755_v49 = vadd.f32 %v9276_v47, %v9514_v10  ;;  %v13887_v47 = vmax.f32 %v9697_v41, 0.0  ;;  %v2375_v41 = vld [vmem:[#allocation7 + $0xce8] sm:$0xff]  ;;  %13907 = vst [vmem:[#allocation151_spill] sm:$0xff] %v9841_v60  ;;  %13910 = vst [vmem:[#allocation153_spill] sm:$0xff] %v9852_v55 }
 0x1fe   : > { %3093 = vmatmul.mubr.f32.gmra.mxu0 %v13874_v30  ;;  %2853 = vmatprep.mubr.f32.mxu1 %v13875_v0  ;;  %v13917_v45 = vld [vmem:[#allocation92_spill] sm:$0xff] }
 0x1ff   : > { %3278 = vmatpush1.msra.mxu1 %v2386_v38  ;;  %3098 = vmatprep.mubr.f32.mxu0 %v13878_v20  ;;  %v9737_v30 = vpop.f32.mrf.mxu1  ;;  %v9739_v0 = vpop.f32.mrf.mxu0  ;;  %13881 = vst [vmem:[#allocation141_spill] sm:$0xff] %v9755_v49  ;;  %v13904_v48 = vmax.f32 %v9755_v49, 0.0  ;;  %v13919_v49 = vld [vmem:[#allocation90_spill] sm:$0xff] }
 0x200   : > { %3279 = vmatprep.subr.mxu1 %v2383_v15  ;;  %3529 = vmatpush1.msra.mxu0 %v2016_v7  ;;  %v13883_v15 = vmax.f32 %v9708_v63, 0.0  ;;  %v2009_v7 = vld [vmem:[#allocation7 + $0x178] sm:$0xff]  ;;  %v2008_v63 = vld [vmem:[#allocation7 + $0x170] sm:$0xff] }
 0x201   : > { %2854 = vmatmul.mubr.f32.gmra.mxu1 %v13880_v22  ;;  %v9748_v38 = vpop.f32.mrf.mxu1  ;;  %v9750_v20 = vpop.f32.mrf.mxu0  ;;  %3530 = vmatprep.subr.mxu0 %v2013_v16  ;;  %v2378_v16 = vld [vmem:[#allocation7 + $0xd00] sm:$0xff] }
 0x202   : > { %3099 = vmatmul.mubr.f32.gmra.mxu0 %v13882_v35  ;;  %2859 = vmatprep.mubr.f32.mxu1 %v13883_v15  ;;  %v13891_v22 = vld [vmem:[#allocation82_spill] sm:$0xff] }
 0x203   : > { %3280 = vmatpush1.msra.mxu1 %v2382_v40  ;;  %3104 = vmatprep.mubr.f32.mxu0 %v13887_v47  ;;  %v9773_v35 = vpop.f32.mrf.mxu1  ;;  %v9775_v15 = vpop.f32.mrf.mxu0 }
 0x204   : > { %13888 = vst [vmem:[#allocation143_spill] sm:$0xff] %v9775_v15  ;;  %3281 = vmatprep.subr.mxu1 %v2379_v3  ;;  %3531 = vmatpush1.msra.mxu0 %v2012_v24  ;;  %v9791_v15 = vadd.f32 %v13891_v22, %v9514_v10  ;;  %v13894_v3 = vmax.f32 %v9744_v28, 0.0  ;;  %v2005_v24 = vld [vmem:[#allocation7 + $0x158] sm:$0xff]  ;;  %v13897_v22 = vmax.f32 %v9733_v4, 0.0  ;;  %v2371_v4 = vld [vmem:[#allocation7 + $0xcc8] sm:$0xff]  ;;  %v2004_v28 = vld [vmem:[#allocation7 + $0x150] sm:$0xff] }
 0x205   : > { %2860 = vmatmul.mubr.f32.gmra.mxu1 %v13890_v53  ;;  %v9784_v40 = vpop.f32.mrf.mxu1  ;;  %v9786_v47 = vpop.f32.mrf.mxu0  ;;  %3532 = vmatprep.subr.mxu0 %v2009_v7  ;;  %v2374_v7 = vld [vmem:[#allocation7 + $0xce0] sm:$0xff]  ;;  %v13902_v53 = vld [vmem:[#allocation85_spill] sm:$0xff] }
 0x206   : > { %13892 = vst [vmem:[#allocation82_spill] sm:$0xff] %v9791_v15  ;;  %3105 = vmatmul.mubr.f32.gmra.mxu0 %v13893_v27  ;;  %2865 = vmatprep.mubr.f32.mxu1 %v13894_v3  ;;  %v13915_v36 = vmax.f32 %v9791_v15, 0.0  ;;  %v1996_v15 = vld [vmem:[#allocation7 + $0x110] sm:$0xff] }
 0x207   : > { %3282 = vmatpush1.msra.mxu1 %v2378_v16  ;;  %3110 = vmatprep.mubr.f32.mxu0 %v13897_v22  ;;  %v9809_v27 = vpop.f32.mrf.mxu1  ;;  %v9811_v3 = vpop.f32.mrf.mxu0 }
 0x208   : > { %13898 = vst [vmem:[#allocation147_spill] sm:$0xff] %v9811_v3  ;;  %3283 = vmatprep.subr.mxu1 %v2375_v41  ;;  %3533 = vmatpush1.msra.mxu0 %v2008_v63  ;;  %v9827_v3 = vadd.f32 %v13902_v53, %v9514_v10  ;;  %v13905_v41 = vmax.f32 %v9780_v23, 0.0  ;;  %v2001_v63 = vld [vmem:[#allocation7 + $0x138] sm:$0xff]  ;;  %v13908_v53 = vmax.f32 %v9769_v54, 0.0  ;;  %v2367_v54 = vld [vmem:[#allocation7 + $0xca8] sm:$0xff]  ;;  %v2000_v23 = vld [vmem:[#allocation7 + $0x130] sm:$0xff] }
 0x209   : > { %2866 = vmatmul.mubr.f32.gmra.mxu1 %v13900_v32  ;;  %v9820_v16 = vpop.f32.mrf.mxu1  ;;  %v9822_v22 = vpop.f32.mrf.mxu0  ;;  %3534 = vmatprep.subr.mxu0 %v2005_v24  ;;  %v2370_v24 = vld [vmem:[#allocation7 + $0xcc0] sm:$0xff]  ;;  %v13913_v32 = vld [vmem:[#allocation87_spill] sm:$0xff] }
 0x20a   : > { %13901 = vst [vmem:[#allocation149_spill] sm:$0xff] %v9822_v22  ;;  %13903 = vst [vmem:[#allocation85_spill] sm:$0xff] %v9827_v3  ;;  %3111 = vmatmul.mubr.f32.gmra.mxu0 %v13904_v48  ;;  %2871 = vmatprep.mubr.f32.mxu1 %v13905_v41  ;;  %v9877_v22 = vadd.f32 %v13919_v49, %v9495_v9  ;;  %v13926_v49 = vmax.f32 %v9836_v46, 0.0  ;;  %v13933_v46 = vld [vmem:[#allocation96_spill] sm:$0xff] }
 0x20b   : > { %3284 = vmatpush1.msra.mxu1 %v2374_v7  ;;  %3116 = vmatprep.mubr.f32.mxu0 %v13908_v53  ;;  %v9845_v48 = vpop.f32.mrf.mxu1  ;;  %v9847_v41 = vpop.f32.mrf.mxu0 }
 0x20c   : > { %13909 = vst [vmem:[#allocation152_spill] sm:$0xff] %v9847_v41  ;;  %3285 = vmatprep.subr.mxu1 %v2371_v4  ;;  %3535 = vmatpush1.msra.mxu0 %v2004_v28  ;;  %v9863_v41 = vadd.f32 %v13913_v32, %v9514_v10  ;;  %v13916_v4 = vmax.f32 %v9816_v26, 0.0  ;;  %v1997_v28 = vld [vmem:[#allocation7 + $0x118] sm:$0xff]  ;;  %13920 = vst [vmem:[#allocation90_spill] sm:$0xff] %v9877_v22  ;;  %v13921_v32 = vmax.f32 %v9805_v39, 0.0  ;;  %v13924_v26 = vld [vmem:[#allocation98_spill] sm:$0xff] }
 0x20d   : > { %2872 = vmatmul.mubr.f32.gmra.mxu1 %v13911_v62  ;;  %v9856_v7 = vpop.f32.mrf.mxu1  ;;  %v9858_v53 = vpop.f32.mrf.mxu0  ;;  %3536 = vmatprep.subr.mxu0 %v2001_v63  ;;  %v2366_v63 = vld [vmem:[#allocation7 + $0xca0] sm:$0xff]  ;;  %v2363_v39 = vld [vmem:[#allocation7 + $0xc88] sm:$0xff]  ;;  %v13929_v62 = vld [vmem:[#allocation89_spill] sm:$0xff] }
 0x20e   : > { %13912 = vst [vmem:[#allocation154_spill] sm:$0xff] %v9858_v53  ;;  %13914 = vst [vmem:[#allocation87_spill] sm:$0xff] %v9863_v41  ;;  %3117 = vmatmul.mubr.f32.gmra.mxu0 %v13915_v36  ;;  %2877 = vmatprep.mubr.f32.mxu1 %v13916_v4  ;;  %v9872_v53 = vadd.f32 %v13917_v45, %v9440_v42  ;;  %v9888_v45 = vadd.f32 %v13924_v26, %v9424_v43  ;;  %v1993_v26 = vld [vmem:[#allocation7 + $0xf8] sm:$0xff] }
 0x20f   : > { %3286 = vmatpush1.msra.mxu1 %v2370_v24  ;;  %3122 = vmatprep.mubr.f32.mxu0 %v13921_v32  ;;  %v9881_v36 = vpop.f32.mrf.mxu1  ;;  %v9883_v4 = vpop.f32.mrf.mxu0 }
 0x210   : > { %13918 = vst [vmem:[#allocation92_spill] sm:$0xff] %v9872_v53  ;;  %13922 = vst [vmem:[#allocation155_spill] sm:$0xff] %v9881_v36  ;;  %3287 = vmatprep.subr.mxu1 %v2367_v54  ;;  %3537 = vmatpush1.msra.mxu0 %v2000_v23  ;;  %v9899_v36 = vadd.f32 %v13929_v62, %v9514_v10  ;;  %v13931_v54 = vmax.f32 %v9827_v3, 0.0  ;;  %v13932_v23 = vmax.f32 %v9852_v55, 0.0  ;;  %v13937_v62 = vmax.f32 %v9841_v60, 0.0  ;;  %v2359_v60 = vld [vmem:[#allocation7 + $0xc68] sm:$0xff] }
 0x211   : > { %13923 = vst [vmem:[#allocation156_spill] sm:$0xff] %v9883_v4  ;;  %13925 = vst [vmem:[#allocation98_spill] sm:$0xff] %v9888_v45  ;;  %2878 = vmatmul.mubr.f32.gmra.mxu1 %v13926_v49  ;;  %v9892_v24 = vpop.f32.mrf.mxu1  ;;  %v9894_v32 = vpop.f32.mrf.mxu0  ;;  %3538 = vmatprep.subr.mxu0 %v1997_v28  ;;  %v13935_v4 = vld [vmem:[#allocation94_spill] sm:$0xff]  ;;  %v1992_v55 = vld [vmem:[#allocation7 + $0xf0] sm:$0xff] }
 0x212   : > { %13927 = vst [vmem:[#allocation157_spill] sm:$0xff] %v9892_v24  ;;  %13928 = vst [vmem:[#allocation158_spill] sm:$0xff] %v9894_v32  ;;  %3123 = vmatmul.mubr.f32.gmra.mxu0 %v13931_v54  ;;  %2883 = vmatprep.mubr.f32.mxu1 %v13932_v23  ;;  %v9908_v32 = vadd.f32 %v13933_v46, %v9440_v42  ;;  %v9913_v24 = vadd.f32 %v13935_v4, %v9495_v9  ;;  %v2362_v28 = vld [vmem:[#allocation7 + $0xc80] sm:$0xff]  ;;  %v13941_v4 = vmax.f32 %v9872_v53, 0.0  ;;  %v13943_v49 = vld [vmem:[#allocation93_spill] sm:$0xff] }
 0x213   : > { %13930 = vst [vmem:[#allocation89_spill] sm:$0xff] %v9899_v36  ;;  %3288 = vmatpush1.msra.mxu1 %v2366_v63  ;;  %3128 = vmatprep.mubr.f32.mxu0 %v13937_v62  ;;  %v9917_v54 = vpop.f32.mrf.mxu1  ;;  %v9919_v23 = vpop.f32.mrf.mxu0  ;;  %v9924_v46 = vadd.f32 %v9442_v34, %v9424_v43  ;;  %v13945_v34 = vmax.f32 %v9863_v41, 0.0  ;;  %v13947_v53 = vld [vmem:[#allocation101_spill] sm:$0xff]  ;;  %v13949_v3 = vld [vmem:[#allocation99_spill] sm:$0xff] }
 0x214   : > { %13934 = vst [vmem:[#allocation96_spill] sm:$0xff] %v9908_v32  ;;  %13936 = vst [vmem:[#allocation94_spill] sm:$0xff] %v9913_v24  ;;  %3289 = vmatprep.subr.mxu1 %v2363_v39  ;;  %3539 = vmatpush1.msra.mxu0 %v1996_v15  ;;  %v13946_v39 = vmax.f32 %v9888_v45, 0.0  ;;  %v1989_v15 = vld [vmem:[#allocation7 + $0xd8] sm:$0xff]  ;;  %v1988_v45 = vld [vmem:[#allocation7 + $0xd0] sm:$0xff] }
 0x215   : > { %13938 = vst [vmem:[#allocation159_spill] sm:$0xff] %v9917_v54  ;;  %13939 = vst [vmem:[#allocation160_spill] sm:$0xff] %v9919_v23  ;;  %2884 = vmatmul.mubr.f32.gmra.mxu1 %v13941_v4  ;;  %v9928_v63 = vpop.f32.mrf.mxu1  ;;  %v9930_v62 = vpop.f32.mrf.mxu0  ;;  %3540 = vmatprep.subr.mxu0 %v1993_v26  ;;  %v9935_v23 = vadd.f32 %v13943_v49, %v9514_v10  ;;  %v9949_v54 = vadd.f32 %v13949_v3, %v9495_v9  ;;  %v13951_v49 = vmax.f32 %v9877_v22, 0.0  ;;  %v2358_v26 = vld [vmem:[#allocation7 + $0xc60] sm:$0xff]  ;;  %v2355_v22 = vld [vmem:[#allocation7 + $0xc48] sm:$0xff] }
 0x216   : > { %13940 = vst [vmem:[#allocation161_spill] sm:$0xff] %v9924_v46  ;;  %13942 = vst [vmem:[#allocation162_spill] sm:$0xff] %v9930_v62  ;;  %3129 = vmatmul.mubr.f32.gmra.mxu0 %v13945_v34  ;;  %2889 = vmatprep.mubr.f32.mxu1 %v13946_v39  ;;  %v9944_v62 = vadd.f32 %v13947_v53, %v9440_v42  ;;  %v9960_v53 = vadd.f32 %v9471_v1, %v9424_v43  ;;  %v13955_v3 = vmax.f32 %v9908_v32, 0.0  ;;  %v13957_v4 = vld [vmem:[#allocation97_spill] sm:$0xff]  ;;  %v13961_v32 = vld [vmem:[#allocation106_spill] sm:$0xff] }
 0x217   : > { %13944 = vst [vmem:[#allocation93_spill] sm:$0xff] %v9935_v23  ;;  %13950 = vst [vmem:[#allocation99_spill] sm:$0xff] %v9949_v54  ;;  %3290 = vmatpush1.msra.mxu1 %v2362_v28  ;;  %3134 = vmatprep.mubr.f32.mxu0 %v13951_v49  ;;  %v9953_v34 = vpop.f32.mrf.mxu1  ;;  %v9955_v39 = vpop.f32.mrf.mxu0  ;;  %v13959_v1 = vmax.f32 %v9899_v36, 0.0  ;;  %v13963_v41 = vld [vmem:[#allocation103_spill] sm:$0xff]  ;;  %v13975_v36 = vld [vmem:[#allocation109_spill] sm:$0xff] }
 0x218   : > { %13948 = vst [vmem:[#allocation101_spill] sm:$0xff] %v9944_v62  ;;  %13952 = vst [vmem:[#allocation163_spill] sm:$0xff] %v9953_v34  ;;  %3291 = vmatprep.subr.mxu1 %v2359_v60  ;;  %3541 = vmatpush1.msra.mxu0 %v1992_v55  ;;  %v13960_v60 = vmax.f32 %v9924_v46, 0.0  ;;  %v1985_v55 = vld [vmem:[#allocation7 + $0xb8] sm:$0xff]  ;;  %v9985_v34 = vadd.f32 %v13963_v41, %v9495_v9  ;;  %v13968_v41 = vmax.f32 %v9944_v62, 0.0  ;;  %v1984_v46 = vld [vmem:[#allocation7 + $0xb0] sm:$0xff] }
 0x219   : > { %13953 = vst [vmem:[#allocation164_spill] sm:$0xff] %v9955_v39  ;;  %13954 = vst [vmem:[#allocation165_spill] sm:$0xff] %v9960_v53  ;;  %2890 = vmatmul.mubr.f32.gmra.mxu1 %v13955_v3  ;;  %v9964_v28 = vpop.f32.mrf.mxu1  ;;  %v9966_v49 = vpop.f32.mrf.mxu0  ;;  %3542 = vmatprep.subr.mxu0 %v1989_v15  ;;  %v9971_v39 = vadd.f32 %v13957_v4, %v9514_v10  ;;  %v13965_v4 = vmax.f32 %v9913_v24, 0.0  ;;  %v2354_v15 = vld [vmem:[#allocation7 + $0xc40] sm:$0xff]  ;;  %v2351_v24 = vld [vmem:[#allocation7 + $0xc28] sm:$0xff]  ;;  %v10016_v62 = vadd.f32 %v9484_v51, %v9440_v42 }
 0x21a   : > { %13956 = vst [vmem:[#allocation166_spill] sm:$0xff] %v9966_v49  ;;  %3135 = vmatmul.mubr.f32.gmra.mxu0 %v13959_v1  ;;  %2895 = vmatprep.mubr.f32.mxu1 %v13960_v60  ;;  %v9980_v49 = vadd.f32 %v13961_v32, %v9440_v42  ;;  %13964 = vst [vmem:[#allocation103_spill] sm:$0xff] %v9985_v34  ;;  %v9996_v32 = vadd.f32 %v9504_v13, %v9424_v43  ;;  %v13970_v3 = vld [vmem:[#allocation102_spill] sm:$0xff]  ;;  %v13972_v13 = vmax.f32 %v9935_v23, 0.0  ;;  %v13980_v23 = vld [vmem:[#allocation107_spill] sm:$0xff] }
 0x21b   : > { %13958 = vst [vmem:[#allocation97_spill] sm:$0xff] %v9971_v39  ;;  %3292 = vmatpush1.msra.mxu1 %v2358_v26  ;;  %3140 = vmatprep.mubr.f32.mxu0 %v13965_v4  ;;  %v9989_v1 = vpop.f32.mrf.mxu1  ;;  %v9991_v60 = vpop.f32.mrf.mxu0  ;;  %13974 = vst [vmem:[#allocation170_spill] sm:$0xff] %v10016_v62  ;;  %v10032_v51 = vadd.f32 %v9536_v59, %v9424_v43  ;;  %v13982_v59 = vmax.f32 %v9971_v39, 0.0 }
 0x21c   : > { %13962 = vst [vmem:[#allocation106_spill] sm:$0xff] %v9980_v49  ;;  %13966 = vst [vmem:[#allocation167_spill] sm:$0xff] %v9991_v60  ;;  %3293 = vmatprep.subr.mxu1 %v2355_v22  ;;  %3543 = vmatpush1.msra.mxu0 %v1988_v45  ;;  %v10007_v60 = vadd.f32 %v13970_v3, %v9514_v10  ;;  %v13973_v22 = vmax.f32 %v9960_v53, 0.0  ;;  %v1981_v45 = vld [vmem:[#allocation7 + $0x98] sm:$0xff]  ;;  %v13977_v3 = vmax.f32 %v9949_v54, 0.0  ;;  %v2347_v54 = vld [vmem:[#allocation7 + $0xc08] sm:$0xff] }
 0x21d   : > { %13967 = vst [vmem:[#allocation168_spill] sm:$0xff] %v9996_v32  ;;  %2896 = vmatmul.mubr.f32.gmra.mxu1 %v13968_v41  ;;  %v10000_v26 = vpop.f32.mrf.mxu1  ;;  %v10002_v4 = vpop.f32.mrf.mxu0  ;;  %3544 = vmatprep.subr.mxu0 %v1985_v55  ;;  %13978 = vst [vmem:[#allocation171_spill] sm:$0xff] %v10032_v51  ;;  %v2350_v55 = vld [vmem:[#allocation7 + $0xc20] sm:$0xff]  ;;  %v10041_v41 = vadd.f32 %v13980_v23, %v9514_v10  ;;  %v10055_v53 = vadd.f32 %v9506_v25, %v9495_v9  ;;  %v13986_v23 = vmax.f32 %v9985_v34, 0.0  ;;  %v2471_v34 = vld [vmem:[#allocation7 + $0xfe8] sm:$0xff] }
 0x21e   : > { %13969 = vst [vmem:[#allocation169_spill] sm:$0xff] %v10002_v4  ;;  %13971 = vst [vmem:[#allocation102_spill] sm:$0xff] %v10007_v60  ;;  %3141 = vmatmul.mubr.f32.gmra.mxu0 %v13972_v13  ;;  %2901 = vmatprep.mubr.f32.mxu1 %v13973_v22  ;;  %v10021_v4 = vadd.f32 %v13975_v36, %v9495_v9  ;;  %v13979_v36 = vmax.f32 %v9980_v49, 0.0  ;;  %v10050_v49 = vadd.f32 %v9517_v6, %v9440_v42 }
 0x21f   : > { %3294 = vmatpush1.msra.mxu1 %v2354_v15  ;;  %3146 = vmatprep.mubr.f32.mxu0 %v13977_v3  ;;  %v10025_v13 = vpop.f32.mrf.mxu1  ;;  %v10027_v22 = vpop.f32.mrf.mxu0  ;;  %v1980_v3 = vld [vmem:[#allocation7 + $0x90] sm:$0xff]  ;;  %13981 = vst [vmem:[#allocation107_spill] sm:$0xff] %v10041_v41  ;;  %13985 = vst [vmem:[#allocation173_spill] sm:$0xff] %v10055_v53  ;;  %v10066_v6 = vadd.f32 %v9570_v31, %v9424_v43  ;;  %v13988_v25 = vmax.f32 %v10016_v62, 0.0  ;;  %v13990_v31 = vmax.f32 %v10007_v60, 0.0 }
 0x220   : > { %13976 = vst [vmem:[#allocation109_spill] sm:$0xff] %v10021_v4  ;;  %3295 = vmatprep.subr.mxu1 %v2351_v24  ;;  %3545 = vmatpush1.msra.mxu0 %v1984_v46  ;;  %v13983_v24 = vmax.f32 %v9996_v32, 0.0  ;;  %v1977_v46 = vld [vmem:[#allocation7 + $0x78] sm:$0xff]  ;;  %13984 = vst [vmem:[#allocation172_spill] sm:$0xff] %v10050_v49  ;;  %v10084_v62 = vadd.f32 %v9552_v17, %v9440_v42  ;;  %v10089_v32 = vadd.f32 %v9538_v19, %v9495_v9 }
 0x221   : > { %2902 = vmatmul.mubr.f32.gmra.mxu1 %v13979_v36  ;;  %v10036_v15 = vpop.f32.mrf.mxu1  ;;  %3546 = vmatprep.subr.mxu0 %v1981_v45  ;;  %13987 = vst [vmem:[#allocation174_spill] sm:$0xff] %v10066_v6  ;;  %v2346_v45 = vld [vmem:[#allocation7 + $0xc00] sm:$0xff]  ;;  %v10075_v36 = vadd.f32 %v9488_v37, %v9514_v10  ;;  %v13994_v37 = vmax.f32 %v10021_v4, 0.0  ;;  %v10100_v17 = vadd.f32 %v9604_v33, %v9424_v43  ;;  %v13996_v19 = vmax.f32 %v10050_v49, 0.0  ;;  %v2467_v4 = vld [vmem:[#allocation7 + $0xfc8] sm:$0xff] }
 0x222   : > { %3147 = vmatmul.mubr.f32.gmra.mxu0 %v13982_v59  ;;  %2907 = vmatprep.mubr.f32.mxu1 %v13983_v24  ;;  %v10061_v24 = vpop.f32.mrf.mxu0  ;;  %13992 = vst [vmem:[#allocation176_spill] sm:$0xff] %v10084_v62  ;;  %13993 = vst [vmem:[#allocation177_spill] sm:$0xff] %v10089_v32  ;;  %v13998_v33 = vmax.f32 %v10041_v41, 0.0  ;;  %v10118_v49 = vadd.f32 %v9590_v58, %v9440_v42  ;;  %v10134_v58 = vadd.f32 %v9640_v52, %v9424_v43  ;;  %v14005_v41 = vld [vmem:[#allocation117_spill] sm:$0xff] }
 0x223   : > { %3296 = vmatpush1.msra.mxu1 %v2350_v55  ;;  %3152 = vmatprep.mubr.f32.mxu0 %v13986_v23  ;;  %v10059_v59 = vpop.f32.mrf.mxu1  ;;  %v1976_v23 = vld [vmem:[#allocation7 + $0x70] sm:$0xff]  ;;  %13989 = vst [vmem:[#allocation175_spill] sm:$0xff] %v10075_v36  ;;  %13995 = vst [vmem:[#allocation178_spill] sm:$0xff] %v10100_v17  ;;  %v14007_v52 = vmax.f32 %v10075_v36, 0.0  ;;  %v10193_v36 = vadd.f32 %v9642_v61, %v9495_v9 }
 0x224   : > { %3297 = vmatprep.subr.mxu1 %v2347_v54  ;;  %3547 = vmatpush1.msra.mxu0 %v1980_v3  ;;  %v13991_v54 = vmax.f32 %v10032_v51, 0.0  ;;  %v1973_v3 = vld [vmem:[#allocation7 + $0x58] sm:$0xff]  ;;  %14000 = vst [vmem:[#allocation180_spill] sm:$0xff] %v10118_v49  ;;  %v10123_v51 = vadd.f32 %v9572_v12, %v9495_v9  ;;  %14003 = vst [vmem:[#allocation182_spill] sm:$0xff] %v10134_v58  ;;  %v14004_v12 = vmax.f32 %v10084_v62, 0.0 }
 0x225   : > { %2908 = vmatmul.mubr.f32.gmra.mxu1 %v13988_v25  ;;  %v10070_v55 = vpop.f32.mrf.mxu1  ;;  %3548 = vmatprep.subr.mxu0 %v1977_v46  ;;  %v2470_v46 = vld [vmem:[#allocation7 + $0xfe0] sm:$0xff]  ;;  %v10109_v25 = vadd.f32 %v9521_v2, %v9514_v10  ;;  %v14002_v2 = vmax.f32 %v10055_v53, 0.0  ;;  %v2463_v53 = vld [vmem:[#allocation7 + $0xfa8] sm:$0xff]  ;;  %v10152_v62 = vadd.f32 %v9627_v29, %v9440_v42  ;;  %v10168_v29 = vadd.f32 %v9676_v8, %v9424_v43 }
 0x226   : > { %3153 = vmatmul.mubr.f32.gmra.mxu0 %v13990_v31  ;;  %2913 = vmatprep.mubr.f32.mxu1 %v13991_v54  ;;  %v10095_v54 = vpop.f32.mrf.mxu0  ;;  %14001 = vst [vmem:[#allocation181_spill] sm:$0xff] %v10123_v51  ;;  %14019 = vst [vmem:[#allocation187_spill] sm:$0xff] %v10193_v36 }
 0x227   : > { %3298 = vmatpush1.msra.mxu1 %v2346_v45  ;;  %3158 = vmatprep.mubr.f32.mxu0 %v13994_v37  ;;  %v10093_v31 = vpop.f32.mrf.mxu1  ;;  %v1972_v37 = vld [vmem:[#allocation7 + $0x50] sm:$0xff]  ;;  %13997 = vst [vmem:[#allocation179_spill] sm:$0xff] %v10109_v25  ;;  %14009 = vst [vmem:[#allocation183_spill] sm:$0xff] %v10152_v62  ;;  %v14016_v8 = vmax.f32 %v10109_v25, 0.0  ;;  %v14022_v61 = vmax.f32 %v10152_v62, 0.0  ;;  %v10224_v62 = vadd.f32 %v9701_v57, %v9440_v42 }
 0x228   : > { %3299 = vmatprep.subr.mxu1 %v2471_v34  ;;  %3549 = vmatpush1.msra.mxu0 %v1976_v23  ;;  %v13999_v34 = vmax.f32 %v10066_v6, 0.0  ;;  %v1969_v23 = vld [vmem:[#allocation7 + $0x38] sm:$0xff]  ;;  %v10157_v6 = vadd.f32 %v9606_v18, %v9495_v9  ;;  %14012 = vst [vmem:[#allocation185_spill] sm:$0xff] %v10168_v29  ;;  %v14013_v18 = vmax.f32 %v10118_v49, 0.0  ;;  %v10188_v49 = vadd.f32 %v9665_v44, %v9440_v42 }
 0x229   : > { %2914 = vmatmul.mubr.f32.gmra.mxu1 %v13996_v19  ;;  %v10104_v45 = vpop.f32.mrf.mxu1  ;;  %3550 = vmatprep.subr.mxu0 %v1973_v3  ;;  %v2466_v3 = vld [vmem:[#allocation7 + $0xfc0] sm:$0xff]  ;;  %v10143_v19 = vadd.f32 %v14005_v41, %v9514_v10  ;;  %v14011_v41 = vmax.f32 %v10089_v32, 0.0  ;;  %v10204_v44 = vadd.f32 %v9712_v21, %v9424_v43  ;;  %14026 = vst [vmem:[#allocation190_spill] sm:$0xff] %v10224_v62 }
 0x22a   : > { %3159 = vmatmul.mubr.f32.gmra.mxu0 %v13998_v33  ;;  %2919 = vmatprep.mubr.f32.mxu1 %v13999_v34  ;;  %v10129_v34 = vpop.f32.mrf.mxu0  ;;  %14010 = vst [vmem:[#allocation184_spill] sm:$0xff] %v10157_v6  ;;  %14018 = vst [vmem:[#allocation186_spill] sm:$0xff] %v10188_v49  ;;  %v10229_v25 = vadd.f32 %v9678_v56, %v9495_v9  ;;  %v10240_v57 = vadd.f32 %v9748_v38, %v9424_v43  ;;  %v14030_v56 = vmax.f32 %v10188_v49, 0.0 }
 0x22b   : > { %3300 = vmatpush2.msra.mxu1 %v2470_v46  ;;  %3164 = vmatprep.mubr.f32.mxu0 %v14002_v2  ;;  %v10127_v33 = vpop.f32.mrf.mxu1  ;;  %v1968_v2 = vld [vmem:[#allocation7 + $0x30] sm:$0xff]  ;;  %14006 = vst [vmem:[#allocation117_spill] sm:$0xff] %v10143_v19  ;;  %14021 = vst [vmem:[#allocation188_spill] sm:$0xff] %v10204_v44  ;;  %v14024_v21 = vmax.f32 %v10143_v19, 0.0  ;;  %v10260_v49 = vadd.f32 %v9737_v30, %v9440_v42  ;;  %v10265_v19 = vadd.f32 %v9714_v5, %v9495_v9 }
 0x22c   : > { %3301 = vmatprep.subr.mxu1 %v2467_v4  ;;  %3551 = vmatpush1.msra.mxu0 %v1972_v37  ;;  %v14008_v4 = vmax.f32 %v10100_v17, 0.0  ;;  %v1965_v37 = vld [vmem:[#allocation7 + $0x18] sm:$0xff]  ;;  %v1964_v17 = vld [vmem:[#allocation7 + $0x10] sm:$0xff]  ;;  %14027 = vst [vmem:[#allocation191_spill] sm:$0xff] %v10229_v25  ;;  %14029 = vst [vmem:[#allocation192_spill] sm:$0xff] %v10240_v57  ;;  %v10276_v30 = vadd.f32 %v9784_v40, %v9424_v43  ;;  %v14040_v5 = vmax.f32 %v10224_v62, 0.0 }
 0x22d   : > { %2920 = vmatmul.mubr.f32.gmra.mxu1 %v14004_v12  ;;  %v10138_v46 = vpop.f32.mrf.mxu1  ;;  %3552 = vmatprep.subr.mxu0 %v1969_v23  ;;  %v2462_v23 = vld [vmem:[#allocation7 + $0xfa0] sm:$0xff]  ;;  %v14014_v12 = vld [vmem:[#allocation123_spill] sm:$0xff]  ;;  %14035 = vst [vmem:[#allocation195_spill] sm:$0xff] %v10260_v49  ;;  %14036 = vst [vmem:[#allocation196_spill] sm:$0xff] %v10265_v19  ;;  %v10296_v62 = vadd.f32 %v9773_v35, %v9440_v42  ;;  %v10312_v35 = vadd.f32 %v9820_v16, %v9424_v43 }
 0x22e   : > { %3165 = vmatmul.mubr.f32.gmra.mxu0 %v14007_v52  ;;  %2925 = vmatprep.mubr.f32.mxu1 %v14008_v4  ;;  %v10179_v60 = vadd.f32 %v14014_v12, %v9514_v10  ;;  %v14020_v12 = vmax.f32 %v10123_v51, 0.0  ;;  %14039 = vst [vmem:[#allocation198_spill] sm:$0xff] %v10276_v30 }
 0x22f   : > { %3302 = vmatpush2.msra.mxu1 %v2466_v3  ;;  %3170 = vmatprep.mubr.f32.mxu0 %v14011_v41  ;;  %v10161_v52 = vpop.f32.mrf.mxu1  ;;  %v10163_v4 = vpop.f32.mrf.mxu0  ;;  %v2459_v41 = vld [vmem:[#allocation7 + $0xf88] sm:$0xff]  ;;  %14045 = vst [vmem:[#allocation201_spill] sm:$0xff] %v10296_v62  ;;  %14049 = vst [vmem:[#allocation204_spill] sm:$0xff] %v10312_v35 }
 0x230   : > { %3303 = vmatprep.subr.mxu1 %v2463_v53  ;;  %3553 = vmatpush1.msra.mxu0 %v1968_v2  ;;  %14015 = vst [vmem:[#allocation123_spill] sm:$0xff] %v10179_v60  ;;  %v14017_v53 = vmax.f32 %v10134_v58, 0.0  ;;  %v2089_v2 = vld [vmem:[#allocation7 + $0x3f8] sm:$0xff]  ;;  %v2088_v58 = vld [vmem:[#allocation7 + $0x3f0] sm:$0xff]  ;;  %v14033_v38 = vmax.f32 %v10179_v60, 0.0  ;;  %v10301_v60 = vadd.f32 %v9750_v20, %v9495_v9  ;;  %v14050_v20 = vmax.f32 %v10260_v49, 0.0 }
 0x231   : > { %2926 = vmatmul.mubr.f32.gmra.mxu1 %v14013_v18  ;;  %v10172_v3 = vpop.f32.mrf.mxu1  ;;  %v10174_v32 = vpop.f32.mrf.mxu0  ;;  %3554 = vmatprep.subr.mxu0 %v1965_v37  ;;  %v2458_v37 = vld [vmem:[#allocation7 + $0xf80] sm:$0xff]  ;;  %v10215_v18 = vadd.f32 %v9629_v50, %v9514_v10  ;;  %v14028_v50 = vmax.f32 %v10157_v6, 0.0  ;;  %v10332_v49 = vadd.f32 %v9809_v27, %v9440_v42  ;;  %v10348_v27 = vadd.f32 %v9856_v7, %v9424_v43 }
 0x232   : > { %3171 = vmatmul.mubr.f32.gmra.mxu0 %v14016_v8  ;;  %2931 = vmatprep.mubr.f32.mxu1 %v14017_v53  ;;  %14046 = vst [vmem:[#allocation202_spill] sm:$0xff] %v10301_v60 }
 0x233   : > { %3304 = vmatpush2.msra.mxu1 %v2462_v23  ;;  %3176 = vmatprep.mubr.f32.mxu0 %v14020_v12  ;;  %v10197_v8 = vpop.f32.mrf.mxu1  ;;  %v10199_v53 = vpop.f32.mrf.mxu0  ;;  %v2455_v12 = vld [vmem:[#allocation7 + $0xf68] sm:$0xff]  ;;  %14023 = vst [vmem:[#allocation189_spill] sm:$0xff] %v10215_v18  ;;  %v14043_v40 = vmax.f32 %v10215_v18, 0.0  ;;  %14055 = vst [vmem:[#allocation207_spill] sm:$0xff] %v10332_v49  ;;  %v10337_v18 = vadd.f32 %v9786_v47, %v9495_v9  ;;  %v14060_v47 = vmax.f32 %v10296_v62, 0.0 }
 0x234   : > { %3305 = vmatprep.subr.mxu1 %v2459_v41  ;;  %3555 = vmatpush1.msra.mxu0 %v1964_v17  ;;  %v14025_v17 = vmax.f32 %v10168_v29, 0.0  ;;  %v2085_v41 = vld [vmem:[#allocation7 + $0x3d8] sm:$0xff]  ;;  %v2084_v29 = vld [vmem:[#allocation7 + $0x3d0] sm:$0xff]  ;;  %14059 = vst [vmem:[#allocation210_spill] sm:$0xff] %v10348_v27  ;;  %v10368_v62 = vadd.f32 %v9845_v48, %v9440_v42 }
 0x235   : > { %2932 = vmatmul.mubr.f32.gmra.mxu1 %v14022_v61  ;;  %v10208_v23 = vpop.f32.mrf.mxu1  ;;  %v10210_v51 = vpop.f32.mrf.mxu0  ;;  %3556 = vmatprep.subr.mxu0 %v2089_v2  ;;  %v2454_v2 = vld [vmem:[#allocation7 + $0xf60] sm:$0xff]  ;;  %v10251_v61 = vadd.f32 %v9667_v11, %v9514_v10  ;;  %v14037_v11 = vmax.f32 %v10193_v36, 0.0  ;;  %14056 = vst [vmem:[#allocation208_spill] sm:$0xff] %v10337_v18 }
 0x236   : > { %3177 = vmatmul.mubr.f32.gmra.mxu0 %v14024_v21  ;;  %2937 = vmatprep.mubr.f32.mxu1 %v14025_v17  ;;  %14066 = vst [vmem:[#allocation212_spill] sm:$0xff] %v10368_v62 }
 0x237   : > { %3306 = vmatpush2.msra.mxu1 %v2458_v37  ;;  %3182 = vmatprep.mubr.f32.mxu0 %v14028_v50  ;;  %v10233_v21 = vpop.f32.mrf.mxu1  ;;  %v10235_v17 = vpop.f32.mrf.mxu0  ;;  %v2451_v50 = vld [vmem:[#allocation7 + $0xf48] sm:$0xff]  ;;  %14032 = vst [vmem:[#allocation194_spill] sm:$0xff] %v10251_v61  ;;  %v14053_v16 = vmax.f32 %v10251_v61, 0.0  ;;  %v14067_v61 = vld [vmem:[#allocation149_spill] sm:$0xff] }
 0x238   : > { %3307 = vmatprep.subr.mxu1 %v2455_v12  ;;  %3557 = vmatpush2.msra.mxu0 %v2088_v58  ;;  %v14034_v58 = vmax.f32 %v10204_v44, 0.0  ;;  %v2081_v12 = vld [vmem:[#allocation7 + $0x3b8] sm:$0xff]  ;;  %v2080_v44 = vld [vmem:[#allocation7 + $0x3b0] sm:$0xff] }
 0x239   : > { %2938 = vmatmul.mubr.f32.gmra.mxu1 %v14030_v56  ;;  %v10244_v37 = vpop.f32.mrf.mxu1  ;;  %v10246_v6 = vpop.f32.mrf.mxu0  ;;  %3558 = vmatprep.subr.mxu0 %v2085_v41  ;;  %v2450_v41 = vld [vmem:[#allocation7 + $0xf40] sm:$0xff]  ;;  %v10287_v56 = vadd.f32 %v9703_v14, %v9514_v10  ;;  %v14047_v14 = vmax.f32 %v10229_v25, 0.0 }
 0x23a   : > { %14031 = vst [vmem:[#allocation193_spill] sm:$0xff] %v10246_v6  ;;  %3183 = vmatmul.mubr.f32.gmra.mxu0 %v14033_v38  ;;  %2943 = vmatprep.mubr.f32.mxu1 %v14034_v58 }
 0x23b   : > { %3308 = vmatpush2.msra.mxu1 %v2454_v2  ;;  %3188 = vmatprep.mubr.f32.mxu0 %v14037_v11  ;;  %v10269_v38 = vpop.f32.mrf.mxu1  ;;  %v10271_v58 = vpop.f32.mrf.mxu0  ;;  %v2447_v11 = vld [vmem:[#allocation7 + $0xf28] sm:$0xff]  ;;  %14042 = vst [vmem:[#allocation200_spill] sm:$0xff] %v10287_v56  ;;  %v14064_v7 = vmax.f32 %v10287_v56, 0.0  ;;  %v2068_v56 = vld [vmem:[#allocation7 + $0x350] sm:$0xff] }
 0x23c   : > { %14038 = vst [vmem:[#allocation197_spill] sm:$0xff] %v10271_v58  ;;  %3309 = vmatprep.subr.mxu1 %v2451_v50  ;;  %3559 = vmatpush2.msra.mxu0 %v2084_v29  ;;  %v14044_v29 = vmax.f32 %v10240_v57, 0.0  ;;  %v2077_v50 = vld [vmem:[#allocation7 + $0x398] sm:$0xff]  ;;  %v2076_v57 = vld [vmem:[#allocation7 + $0x390] sm:$0xff] }
 0x23d   : > { %2944 = vmatmul.mubr.f32.gmra.mxu1 %v14040_v5  ;;  %v10280_v2 = vpop.f32.mrf.mxu1  ;;  %v10282_v36 = vpop.f32.mrf.mxu0  ;;  %3560 = vmatprep.subr.mxu0 %v2081_v12  ;;  %v2446_v12 = vld [vmem:[#allocation7 + $0xf20] sm:$0xff]  ;;  %v10323_v5 = vadd.f32 %v9739_v0, %v9514_v10  ;;  %v14057_v0 = vmax.f32 %v10265_v19, 0.0 }
 0x23e   : > { %14041 = vst [vmem:[#allocation199_spill] sm:$0xff] %v10282_v36  ;;  %3189 = vmatmul.mubr.f32.gmra.mxu0 %v14043_v40  ;;  %2949 = vmatprep.mubr.f32.mxu1 %v14044_v29 }
 0x23f   : > { %3310 = vmatpush2.msra.mxu1 %v2450_v41  ;;  %3194 = vmatprep.mubr.f32.mxu0 %v14047_v14  ;;  %v10305_v40 = vpop.f32.mrf.mxu1  ;;  %v10307_v29 = vpop.f32.mrf.mxu0  ;;  %v2443_v14 = vld [vmem:[#allocation7 + $0xf08] sm:$0xff]  ;;  %14052 = vst [vmem:[#allocation206_spill] sm:$0xff] %v10323_v5 }
 0x240   : > { %14048 = vst [vmem:[#allocation203_spill] sm:$0xff] %v10307_v29  ;;  %3311 = vmatprep.subr.mxu1 %v2447_v11  ;;  %3561 = vmatpush2.msra.mxu0 %v2080_v44  ;;  %v14054_v44 = vmax.f32 %v10276_v30, 0.0  ;;  %v2073_v11 = vld [vmem:[#allocation7 + $0x378] sm:$0xff]  ;;  %v2072_v30 = vld [vmem:[#allocation7 + $0x370] sm:$0xff] }
 0x241   : > { %2950 = vmatmul.mubr.f32.gmra.mxu1 %v14050_v20  ;;  %v10316_v41 = vpop.f32.mrf.mxu1  ;;  %v10318_v25 = vpop.f32.mrf.mxu0  ;;  %3562 = vmatprep.subr.mxu0 %v2077_v50  ;;  %v2442_v50 = vld [vmem:[#allocation7 + $0xf00] sm:$0xff]  ;;  %v14062_v20 = vld [vmem:[#allocation143_spill] sm:$0xff] }
 0x242   : > { %14051 = vst [vmem:[#allocation205_spill] sm:$0xff] %v10318_v25  ;;  %3195 = vmatmul.mubr.f32.gmra.mxu0 %v14053_v16  ;;  %2955 = vmatprep.mubr.f32.mxu1 %v14054_v44  ;;  %v10359_v39 = vadd.f32 %v14062_v20, %v9514_v10  ;;  %v14069_v20 = vmax.f32 %v10301_v60, 0.0 }
 0x243   : > { %3312 = vmatpush2.msra.mxu1 %v2446_v12  ;;  %3200 = vmatprep.mubr.f32.mxu0 %v14057_v0  ;;  %v10341_v16 = vpop.f32.mrf.mxu1  ;;  %v10343_v44 = vpop.f32.mrf.mxu0  ;;  %v2439_v0 = vld [vmem:[#allocation7 + $0xee8] sm:$0xff] }
 0x244   : > { %14058 = vst [vmem:[#allocation209_spill] sm:$0xff] %v10343_v44  ;;  %3313 = vmatprep.subr.mxu1 %v2443_v14  ;;  %3563 = vmatpush2.msra.mxu0 %v2076_v57  ;;  %14063 = vst [vmem:[#allocation143_spill] sm:$0xff] %v10359_v39  ;;  %v14065_v57 = vmax.f32 %v10312_v35, 0.0  ;;  %v2069_v14 = vld [vmem:[#allocation7 + $0x358] sm:$0xff] }
 0x245   : > { %2956 = vmatmul.mubr.f32.gmra.mxu1 %v14060_v47  ;;  %v10352_v12 = vpop.f32.mrf.mxu1  ;;  %v10354_v19 = vpop.f32.mrf.mxu0  ;;  %3564 = vmatprep.subr.mxu0 %v2073_v11  ;;  %v14071_v35 = vld [vmem:[#allocation157_spill] sm:$0xff]  ;;  %v2438_v11 = vld [vmem:[#allocation7 + $0xee0] sm:$0xff]  ;;  %v14075_v47 = vld [vmem:[#allocation147_spill] sm:$0xff] }
 0x246   : > { %14061 = vst [vmem:[#allocation211_spill] sm:$0xff] %v10354_v19  ;;  %3201 = vmatmul.mubr.f32.gmra.mxu0 %v14064_v7  ;;  %2961 = vmatprep.mubr.f32.mxu1 %v14065_v57  ;;  %v10373_v19 = vadd.f32 %v14067_v61, %v9495_v9  ;;  %v10384_v48 = vadd.f32 %v14071_v35, %v9424_v43  ;;  %v14073_v61 = vmax.f32 %v10332_v49, 0.0  ;;  %v14077_v35 = vmax.f32 %v10323_v5, 0.0  ;;  %v14079_v49 = vld [vmem:[#allocation155_spill] sm:$0xff]  ;;  %v14094_v5 = vld [vmem:[#allocation158_spill] sm:$0xff] }
 0x247   : > { %3314 = vmatpush2.msra.mxu1 %v2442_v50  ;;  %3206 = vmatprep.mubr.f32.mxu0 %v14069_v20  ;;  %v10377_v7 = vpop.f32.mrf.mxu1  ;;  %v10379_v57 = vpop.f32.mrf.mxu0  ;;  %v2435_v20 = vld [vmem:[#allocation7 + $0xec8] sm:$0xff]  ;;  %v10395_v44 = vadd.f32 %v14075_v47, %v9514_v10  ;;  %v14083_v47 = vmax.f32 %v10337_v18, 0.0  ;;  %v10445_v29 = vadd.f32 %v14094_v5, %v9495_v9 }
 0x248   : > { %14068 = vst [vmem:[#allocation149_spill] sm:$0xff] %v10373_v19  ;;  %14070 = vst [vmem:[#allocation213_spill] sm:$0xff] %v10379_v57  ;;  %3315 = vmatprep.subr.mxu1 %v2439_v0  ;;  %3565 = vmatpush2.msra.mxu0 %v2072_v30  ;;  %v14078_v30 = vmax.f32 %v10348_v27, 0.0  ;;  %v2065_v0 = vld [vmem:[#allocation7 + $0x338] sm:$0xff]  ;;  %v14081_v57 = vld [vmem:[#allocation154_spill] sm:$0xff] }
 0x249   : > { %14072 = vst [vmem:[#allocation157_spill] sm:$0xff] %v10384_v48  ;;  %2962 = vmatmul.mubr.f32.gmra.mxu1 %v14073_v61  ;;  %v10388_v50 = vpop.f32.mrf.mxu1  ;;  %v10390_v60 = vpop.f32.mrf.mxu0  ;;  %3566 = vmatprep.subr.mxu0 %v2069_v14  ;;  %14076 = vst [vmem:[#allocation147_spill] sm:$0xff] %v10395_v44  ;;  %v10409_v25 = vadd.f32 %v14081_v57, %v9495_v9  ;;  %v2434_v14 = vld [vmem:[#allocation7 + $0xec0] sm:$0xff]  ;;  %v14086_v57 = vmax.f32 %v10368_v62, 0.0  ;;  %v2064_v27 = vld [vmem:[#allocation7 + $0x330] sm:$0xff] }
 0x24a   : > { %14074 = vst [vmem:[#allocation214_spill] sm:$0xff] %v10390_v60  ;;  %3207 = vmatmul.mubr.f32.gmra.mxu0 %v14077_v35  ;;  %2967 = vmatprep.mubr.f32.mxu1 %v14078_v30  ;;  %v10404_v60 = vadd.f32 %v14079_v49, %v9440_v42  ;;  %v10420_v49 = vadd.f32 %v9928_v63, %v9424_v43  ;;  %v14088_v61 = vld [vmem:[#allocation152_spill] sm:$0xff]  ;;  %v14090_v63 = vmax.f32 %v10359_v39, 0.0  ;;  %v14092_v62 = vld [vmem:[#allocation159_spill] sm:$0xff]  ;;  %14095 = vst [vmem:[#allocation158_spill] sm:$0xff] %v10445_v29 }
 0x24b   : > { %14082 = vst [vmem:[#allocation154_spill] sm:$0xff] %v10409_v25  ;;  %3316 = vmatpush2.msra.mxu1 %v2438_v11  ;;  %3212 = vmatprep.mubr.f32.mxu0 %v14083_v47  ;;  %v10413_v35 = vpop.f32.mrf.mxu1  ;;  %v10415_v30 = vpop.f32.mrf.mxu0  ;;  %v2431_v47 = vld [vmem:[#allocation7 + $0xea8] sm:$0xff]  ;;  %v14107_v39 = vld [vmem:[#allocation162_spill] sm:$0xff] }
 0x24c   : > { %14080 = vst [vmem:[#allocation155_spill] sm:$0xff] %v10404_v60  ;;  %14084 = vst [vmem:[#allocation215_spill] sm:$0xff] %v10415_v30  ;;  %3317 = vmatprep.subr.mxu1 %v2435_v20  ;;  %3567 = vmatpush2.msra.mxu0 %v2068_v56  ;;  %v10431_v30 = vadd.f32 %v14088_v61, %v9514_v10  ;;  %v14091_v56 = vmax.f32 %v10384_v48, 0.0  ;;  %v2061_v20 = vld [vmem:[#allocation7 + $0x318] sm:$0xff]  ;;  %v14096_v61 = vmax.f32 %v10373_v19, 0.0  ;;  %v14099_v5 = vmax.f32 %v10404_v60, 0.0 }
 0x24d   : > { %14085 = vst [vmem:[#allocation216_spill] sm:$0xff] %v10420_v49  ;;  %2968 = vmatmul.mubr.f32.gmra.mxu1 %v14086_v57  ;;  %v10424_v11 = vpop.f32.mrf.mxu1  ;;  %v10426_v18 = vpop.f32.mrf.mxu0  ;;  %3568 = vmatprep.subr.mxu0 %v2065_v0  ;;  %v2430_v0 = vld [vmem:[#allocation7 + $0xea0] sm:$0xff]  ;;  %v2060_v48 = vld [vmem:[#allocation7 + $0x310] sm:$0xff]  ;;  %v14105_v60 = vld [vmem:[#allocation163_spill] sm:$0xff]  ;;  %v10481_v36 = vadd.f32 %v14107_v39, %v9495_v9 }
 0x24e   : > { %14087 = vst [vmem:[#allocation217_spill] sm:$0xff] %v10426_v18  ;;  %14089 = vst [vmem:[#allocation152_spill] sm:$0xff] %v10431_v30  ;;  %3213 = vmatmul.mubr.f32.gmra.mxu0 %v14090_v63  ;;  %2973 = vmatprep.mubr.f32.mxu1 %v14091_v56  ;;  %v10440_v18 = vadd.f32 %v14092_v62, %v9440_v42  ;;  %v10456_v62 = vadd.f32 %v9964_v28, %v9424_v43  ;;  %v14101_v57 = vld [vmem:[#allocation156_spill] sm:$0xff]  ;;  %v14103_v28 = vmax.f32 %v10395_v44, 0.0  ;;  %v14119_v44 = vld [vmem:[#allocation166_spill] sm:$0xff] }
 0x24f   : > { %3318 = vmatpush2.msra.mxu1 %v2434_v14  ;;  %3218 = vmatprep.mubr.f32.mxu0 %v14096_v61  ;;  %v10449_v63 = vpop.f32.mrf.mxu1  ;;  %v10451_v56 = vpop.f32.mrf.mxu0  ;;  %v2427_v61 = vld [vmem:[#allocation7 + $0xe88] sm:$0xff]  ;;  %14108 = vst [vmem:[#allocation162_spill] sm:$0xff] %v10481_v36 }
 0x250   : > { %14093 = vst [vmem:[#allocation159_spill] sm:$0xff] %v10440_v18  ;;  %14097 = vst [vmem:[#allocation218_spill] sm:$0xff] %v10451_v56  ;;  %3319 = vmatprep.subr.mxu1 %v2431_v47  ;;  %3569 = vmatpush2.msra.mxu0 %v2064_v27  ;;  %v10467_v56 = vadd.f32 %v14101_v57, %v9514_v10  ;;  %v14104_v27 = vmax.f32 %v10420_v49, 0.0  ;;  %v2057_v47 = vld [vmem:[#allocation7 + $0x2f8] sm:$0xff]  ;;  %v14109_v57 = vmax.f32 %v10409_v25, 0.0  ;;  %v14112_v39 = vmax.f32 %v10440_v18, 0.0 }
 0x251   : > { %14098 = vst [vmem:[#allocation219_spill] sm:$0xff] %v10456_v62  ;;  %2974 = vmatmul.mubr.f32.gmra.mxu1 %v14099_v5  ;;  %v10460_v14 = vpop.f32.mrf.mxu1  ;;  %v10462_v19 = vpop.f32.mrf.mxu0  ;;  %3570 = vmatprep.subr.mxu0 %v2061_v20  ;;  %v2426_v20 = vld [vmem:[#allocation7 + $0xe80] sm:$0xff]  ;;  %v2056_v49 = vld [vmem:[#allocation7 + $0x2f0] sm:$0xff]  ;;  %v10512_v18 = vadd.f32 %v9989_v1, %v9440_v42  ;;  %v10528_v1 = vadd.f32 %v10036_v15, %v9424_v43 }
 0x252   : > { %14100 = vst [vmem:[#allocation220_spill] sm:$0xff] %v10462_v19  ;;  %14102 = vst [vmem:[#allocation156_spill] sm:$0xff] %v10467_v56  ;;  %3219 = vmatmul.mubr.f32.gmra.mxu0 %v14103_v28  ;;  %2979 = vmatprep.mubr.f32.mxu1 %v14104_v27  ;;  %v10476_v19 = vadd.f32 %v14105_v60, %v9440_v42  ;;  %v10492_v60 = vadd.f32 %v10000_v26, %v9424_v43  ;;  %v14114_v5 = vld [vmem:[#allocation160_spill] sm:$0xff]  ;;  %v14116_v26 = vmax.f32 %v10431_v30, 0.0  ;;  %v2419_v30 = vld [vmem:[#allocation7 + $0xe48] sm:$0xff] }
 0x253   : > { %3320 = vmatpush2.msra.mxu1 %v2430_v0  ;;  %3224 = vmatprep.mubr.f32.mxu0 %v14109_v57  ;;  %v10485_v28 = vpop.f32.mrf.mxu1  ;;  %v10487_v27 = vpop.f32.mrf.mxu0  ;;  %v2423_v57 = vld [vmem:[#allocation7 + $0xe68] sm:$0xff]  ;;  %14118 = vst [vmem:[#allocation224_spill] sm:$0xff] %v10512_v18  ;;  %14123 = vst [vmem:[#allocation226_spill] sm:$0xff] %v10528_v1  ;;  %v14127_v15 = vld [vmem:[#allocation164_spill] sm:$0xff] }
 0x254   : > { %14106 = vst [vmem:[#allocation163_spill] sm:$0xff] %v10476_v19  ;;  %14110 = vst [vmem:[#allocation221_spill] sm:$0xff] %v10487_v27  ;;  %3321 = vmatprep.subr.mxu1 %v2427_v61  ;;  %3571 = vmatpush2.msra.mxu0 %v2060_v48  ;;  %v10503_v27 = vadd.f32 %v14114_v5, %v9514_v10  ;;  %v14117_v48 = vmax.f32 %v10456_v62, 0.0  ;;  %v2053_v61 = vld [vmem:[#allocation7 + $0x2d8] sm:$0xff]  ;;  %v14121_v5 = vmax.f32 %v10445_v29, 0.0  ;;  %v14124_v62 = vld [vmem:[#allocation23_spill] sm:$0xff] }
 0x255   : > { %14111 = vst [vmem:[#allocation222_spill] sm:$0xff] %v10492_v60  ;;  %2980 = vmatmul.mubr.f32.gmra.mxu1 %v14112_v39  ;;  %v10496_v0 = vpop.f32.mrf.mxu1  ;;  %v10498_v25 = vpop.f32.mrf.mxu0  ;;  %3572 = vmatprep.subr.mxu0 %v2057_v47  ;;  %v2422_v47 = vld [vmem:[#allocation7 + $0xe60] sm:$0xff]  ;;  %v10540_v58 = vadd.f32 %v14127_v15, %v9514_v10  ;;  %v14132_v15 = vld [vmem:[#allocation169_spill] sm:$0xff] }
 0x256   : > { %14113 = vst [vmem:[#allocation223_spill] sm:$0xff] %v10498_v25  ;;  %14115 = vst [vmem:[#allocation160_spill] sm:$0xff] %v10503_v27  ;;  %3225 = vmatmul.mubr.f32.gmra.mxu0 %v14116_v26  ;;  %2985 = vmatprep.mubr.f32.mxu1 %v14117_v48  ;;  %v10517_v25 = vadd.f32 %v14119_v44, %v9495_v9  ;;  %v571_v44 = vsub.s32 7, %v14124_v62  ;;  %v10555_v6 = vadd.f32 %v14132_v15, %v9495_v9  ;;  %v2418_v39 = vld [vmem:[#allocation7 + $0xe40] sm:$0xff] }
 0x257   : > { %3322 = vmatpush2.msra.mxu1 %v2426_v20  ;;  %3230 = vmatprep.mubr.f32.mxu0 %v14121_v5  ;;  %v10521_v26 = vpop.f32.mrf.mxu1  ;;  %v10523_v48 = vpop.f32.mrf.mxu0  ;;  %v14125_v20 = vmax.f32 %v10476_v19, 0.0  ;;  %14128 = vst [vmem:[#allocation164_spill] sm:$0xff] %v10540_v58  ;;  %v2049_v19 = vld [vmem:[#allocation7 + $0x2b8] sm:$0xff] }
 0x258   : > { %14120 = vst [vmem:[#allocation166_spill] sm:$0xff] %v10517_v25  ;;  %14122 = vst [vmem:[#allocation225_spill] sm:$0xff] %v10523_v48  ;;  %3323 = vmatprep.subr.mxu1 %v2423_v57  ;;  %3573 = vmatpush2.msra.mxu0 %v2056_v49  ;;  %v2052_v48 = vld [vmem:[#allocation7 + $0x2d0] sm:$0xff]  ;;  %v567_v49 = vsub.s32 6, %v14124_v62  ;;  %v14129_v57 = vmax.f32 %v10467_v56, 0.0  ;;  %v14134_v62 = vmax.f32 %v10481_v36, 0.0 }
 0x259   : > { %2986 = vmatmul.mubr.f32.gmra.mxu1 %v14125_v20  ;;  %v10533_v29 = vpop.f32.mrf.mxu1  ;;  %v10535_v5 = vpop.f32.mrf.mxu0  ;;  %3574 = vmatprep.subr.mxu0 %v2053_v61  ;;  %v14130_v20 = vmax.f32 %v10492_v60, 0.0  ;;  %v10550_v61 = vadd.f32 %v10025_v13, %v9440_v42  ;;  %14133 = vst [vmem:[#allocation169_spill] sm:$0xff] %v10555_v6  ;;  %v10566_v13 = vadd.f32 %v10070_v55, %v9424_v43  ;;  %v7908_v60 = vld [vmem:[#allocation5] sm:$0xff]  ;;  %v2415_v56 = vld [vmem:[#allocation7 + $0xe28] sm:$0xff] }
 0x25a   : > { %14126 = vst [vmem:[#allocation227_spill] sm:$0xff] %v10535_v5  ;;  %3231 = vmatmul.mubr.f32.gmra.mxu0 %v14129_v57  ;;  %3324 = vmatpush2.msra.mxu1 %v2422_v47  ;;  %v10568_v15 = vrot.slane %v7908_v60, %v571_v44  ;;  %v14137_v47 = vmax.f32 %v10512_v18, 0.0  ;;  %v2048_v5 = vld [vmem:[#allocation7 + $0x2b0] sm:$0xff]  ;;  %v14138_v43 = vld [vmem:[#allocation167_spill] sm:$0xff]  ;;  %v14141_v44 = vmax.f32 %v10528_v1, 0.0  ;;  %v2414_v18 = vld [vmem:[#allocation7 + $0xe20] sm:$0xff] }
 0x25b   : > { %2991 = vmatprep.mubr.f32.mxu1 %v14130_v20  ;;  %14131 = vst [vmem:[#allocation228_spill] sm:$0xff] %v10550_v61  ;;  %3236 = vmatprep.mubr.f32.mxu0 %v14134_v62  ;;  %v10559_v57 = vpop.f32.mrf.mxu1  ;;  %v10561_v20 = vpop.f32.mrf.mxu0  ;;  %14136 = vst [vmem:[#allocation230_spill] sm:$0xff] %v10566_v13  ;;  %v10579_v55 = vadd.f32 %v14138_v43, %v9514_v10  ;;  %v10595_v43 = vadd.f32 %v10061_v24, %v9495_v9 }
 0x25c   : > { %14135 = vst [vmem:[#allocation229_spill] sm:$0xff] %v10561_v20  ;;  %3325 = vmatprep.subr.mxu1 %v2419_v30  ;;  %3575 = vmatpush2.msra.mxu0 %v2052_v48  ;;  %v10581_v30 = vrot.slane %v7908_v60, %v567_v49  ;;  %v14140_v48 = vmax.f32 %v10503_v27, 0.0  ;;  %v14144_v60 = vmax.f32 %v10517_v25, 0.0  ;;  %v2044_v20 = vld [vmem:[#allocation7 + $0x290] sm:$0xff]  ;;  %v10631_v25 = vadd.f32 %v10129_v34, %v9495_v9 }
 0x25d   : > { %2992 = vmatmul.mubr.f32.gmra.mxu1 %v14137_v47  ;;  %v10572_v62 = vpop.f32.mrf.mxu1  ;;  %v10574_v36 = vpop.f32.mrf.mxu0  ;;  %3576 = vmatprep.subr.mxu0 %v2049_v19  ;;  %14139 = vst [vmem:[#allocation167_spill] sm:$0xff] %v10579_v55  ;;  %v2045_v47 = vld [vmem:[#allocation7 + $0x298] sm:$0xff]  ;;  %v10590_v19 = vadd.f32 %v10059_v59, %v9440_v42  ;;  %14143 = vst [vmem:[#allocation232_spill] sm:$0xff] %v10595_v43  ;;  %v10606_v42 = vadd.f32 %v10104_v45, %v10568_v15  ;;  %v14146_v59 = vmax.f32 %v10550_v61, 0.0 }
 0x25e   : > { %3237 = vmatmul.mubr.f32.gmra.mxu0 %v14140_v48  ;;  %2997 = vmatprep.mubr.f32.mxu1 %v14141_v44  ;;  %v13587_v44 = vmax.f32 %v10566_v13, 0.0  ;;  %v2041_v45 = vld [vmem:[#allocation7 + $0x278] sm:$0xff]  ;;  %v10626_v61 = vadd.f32 %v10093_v31, %v10581_v30  ;;  %14150 = vst [vmem:[#allocation236_spill] sm:$0xff] %v10631_v25  ;;  %v2410_v13 = vld [vmem:[#allocation7 + $0xe00] sm:$0xff]  ;;  %v10660_v31 = vadd.f32 %v10127_v33, %v10581_v30  ;;  %v2152_v33 = vld [vmem:[#allocation7 + $0x5f0] sm:$0xff] }
 0x25f   : > { %14142 = vst [vmem:[#allocation231_spill] sm:$0xff] %v10590_v19  ;;  %3326 = vmatpush2.msra.mxu1 %v2418_v39  ;;  %3242 = vmatprep.mubr.f32.mxu0 %v14144_v60  ;;  %v10599_v49 = vpop.f32.mrf.mxu1  ;;  %v10601_v48 = vpop.f32.mrf.mxu0  ;;  %14145 = vst [vmem:[#allocation233_spill] sm:$0xff] %v10606_v42  ;;  %v2411_v60 = vld [vmem:[#allocation7 + $0xe08] sm:$0xff]  ;;  %v14153_v9 = vmax.f32 %v10590_v19, 0.0  ;;  %v14157_v19 = vmax.f32 %v10606_v42, 0.0  ;;  %v2149_v42 = vld [vmem:[#allocation7 + $0x5d8] sm:$0xff] }
 0x260   : > { %3327 = vmatprep.subr.mxu1 %v2415_v56  ;;  %3577 = vmatpush2.msra.mxu0 %v2048_v5  ;;  %v10617_v56 = vadd.f32 %v10027_v22, %v9514_v10  ;;  %v14148_v5 = vmax.f32 %v10540_v58, 0.0  ;;  %14149 = vst [vmem:[#allocation235_spill] sm:$0xff] %v10626_v61  ;;  %v14151_v22 = vmax.f32 %v10555_v6, 0.0  ;;  %14156 = vst [vmem:[#allocation239_spill] sm:$0xff] %v10660_v31  ;;  %v14158_v6 = vmax.f32 %v10595_v43, 0.0 }
 0x261   : > { %2998 = vmatmul.mubr.f32.gmra.mxu1 %v14146_v59  ;;  %v10610_v24 = vpop.f32.mrf.mxu1  ;;  %v10612_v39 = vpop.f32.mrf.mxu0  ;;  %3578 = vmatprep.subr.mxu0 %v2045_v47  ;;  %v10641_v59 = vadd.f32 %v10138_v46, %v10568_v15  ;;  %v2040_v47 = vld [vmem:[#allocation7 + $0x270] sm:$0xff]  ;;  %v10653_v46 = vadd.f32 %v10095_v54, %v9514_v10 }
 0x262   : > { %14147 = vst [vmem:[#allocation234_spill] sm:$0xff] %v10617_v56  ;;  %3243 = vmatmul.mubr.f32.gmra.mxu0 %v14148_v5  ;;  %3003 = vmatprep.mubr.f32.mxu1 %v13587_v44 }
 0x263   : > { %3328 = vmatpush2.msra.mxu1 %v2414_v18  ;;  %3248 = vmatprep.mubr.f32.mxu0 %v14151_v22  ;;  %v10635_v5 = vpop.f32.mrf.mxu1  ;;  %v10637_v44 = vpop.f32.mrf.mxu0  ;;  %14152 = vst [vmem:[#allocation237_spill] sm:$0xff] %v10641_v59  ;;  %v2153_v22 = vld [vmem:[#allocation7 + $0x5f8] sm:$0xff]  ;;  %14154 = vst [vmem:[#allocation238_spill] sm:$0xff] %v10653_v46 }
 0x264   : > { %3329 = vmatprep.subr.mxu1 %v2411_v60  ;;  %3579 = vmatpush2.msra.mxu0 %v2044_v20  ;;  %v14155_v20 = vmax.f32 %v10579_v55, 0.0  ;;  %v2037_v60 = vld [vmem:[#allocation7 + $0x258] sm:$0xff] }
 0x265   : > { %3004 = vmatmul.mubr.f32.gmra.mxu1 %v14153_v9  ;;  %v10646_v34 = vpop.f32.mrf.mxu1  ;;  %v10648_v18 = vpop.f32.mrf.mxu0  ;;  %3580 = vmatprep.subr.mxu0 %v2041_v45  ;;  %v13593_v9 = vmax.f32 %v10626_v61, 0.0 }
 0x266   : > { %3249 = vmatmul.mubr.f32.gmra.mxu0 %v14155_v20  ;;  %3330 = vmatpush2.msra.mxu1 %v2410_v13  ;;  %v10674_v20 = vadd.f32 %v10172_v3, %v10568_v15  ;;  %v14160_v13 = vmax.f32 %v10617_v56, 0.0  ;;  %v14161_v3 = vmax.f32 %v10641_v59, 0.0  ;;  %v2029_v59 = vld [vmem:[#allocation7 + $0x218] sm:$0xff]  ;;  %v14166_v56 = vmax.f32 %v10653_v46, 0.0 }
 0x267   : > { %3331 = vmatprep.mubr.f32.mxu1 %v14157_v19  ;;  %3254 = vmatprep.mubr.f32.mxu0 %v14158_v6  ;;  %v10667_v10 = vpop.f32.mrf.mxu1  ;;  %v10669_v54 = vpop.f32.mrf.mxu0  ;;  %v2036_v6 = vld [vmem:[#allocation7 + $0x250] sm:$0xff]  ;;  %v2145_v46 = vld [vmem:[#allocation7 + $0x5b8] sm:$0xff] }
 0x268   : > { %14159 = vst [vmem:[#allocation240_spill] sm:$0xff] %v10674_v20  ;;  %3781 = vmatprep.subr.mxu1 %v2153_v22  ;;  %3581 = vmatpush2.msra.mxu0 %v2040_v47  ;;  %v2033_v47 = vld [vmem:[#allocation7 + $0x238] sm:$0xff]  ;;  %v10701_v22 = vadd.f32 %v10208_v23, %v10568_v15 }
 0x269   : > { %3332 = vmatmul.mubr.f32.vlgmr.msra.gmra.mxu1 %v13593_v9  ;;  %v10678_v19 = vpop.f32.mrf.mxu1  ;;  %v10680_v45 = vpop.f32.mrf.mxu0  ;;  %3582 = vmatprep.subr.mxu0 %v2037_v60  ;;  %v10690_v9 = vadd.f32 %v10161_v52, %v10581_v30  ;;  %v14163_v60 = vmax.f32 %v10631_v25, 0.0  ;;  %v14165_v52 = vmax.f32 %v10660_v31, 0.0 }
 0x26a   : > { %3255 = vmatmul.mubr.f32.gmra.mxu0 %v14160_v13  ;;  %3337 = vmatprep.mubr.f32.mxu1 %v14161_v3  ;;  %v13601_v13 = vmax.f32 %v10674_v20, 0.0  ;;  %v2032_v3 = vld [vmem:[#allocation7 + $0x230] sm:$0xff]  ;;  %14164 = vst [vmem:[#allocation242_spill] sm:$0xff] %v10701_v22  ;;  %v14173_v20 = vld [vmem:[#allocation26_spill] sm:$0xff] }
 0x26b   : > { %14162 = vst [vmem:[#allocation241_spill] sm:$0xff] %v10690_v9  ;;  %3782 = vmatpush1.msra.mxu1 %v2152_v33  ;;  %3260 = vmatprep.mubr.f32.mxu0 %v14163_v60  ;;  %v10694_v61 = vpop.f32.mrf.mxu1  ;;  %v10696_v43 = vpop.f32.mrf.mxu0  ;;  %v2148_v33 = vld [vmem:[#allocation7 + $0x5d0] sm:$0xff]  ;;  %v13604_v23 = vmax.f32 %v10690_v9, 0.0  ;;  %v14174_v58 = vmax.f32 %v14173_v20, 0.0 }
 0x26c   : > { %3583 = vmatpush2.msra.mxu0 %v2036_v6  ;;  %3783 = vmatprep.subr.mxu1 %v2149_v42  ;;  %v2028_v42 = vld [vmem:[#allocation7 + $0x210] sm:$0xff]  ;;  %v10716_v6 = vadd.f32 %v10197_v8, %v10581_v30 }
 0x26d   : > { %3338 = vmatmul.mubr.f32.gmra.mxu1 %v14165_v52  ;;  %3584 = vmatprep.subr.mxu0 %v2033_v47  ;;  %v10705_v25 = vpop.f32.mrf.mxu1  ;;  %v10707_v60 = vpop.f32.mrf.mxu0  ;;  %v14168_v47 = vld [vmem:[#allocation28_spill] sm:$0xff] }
 0x26e   : > { %3261 = vmatmul.mubr.f32.gmra.mxu0 %v14166_v56  ;;  %3343 = vmatprep.mubr.f32.mxu1 %v13601_v13  ;;  %14167 = vst [vmem:[#allocation243_spill] sm:$0xff] %v10716_v6  ;;  %v14169_v52 = vmax.f32 %v14168_v47, 0.0  ;;  %v10726_v56 = vadd.f32 %v10244_v37, %v10568_v15  ;;  %v13607_v13 = vmax.f32 %v10701_v22, 0.0  ;;  %v2144_v8 = vld [vmem:[#allocation7 + $0x5b0] sm:$0xff]  ;;  %v2141_v37 = vld [vmem:[#allocation7 + $0x598] sm:$0xff] }
 0x26f   : > { %3585 = vmatpush2.msra.mxu0 %v2032_v3  ;;  %v10720_v31 = vpop.f32.mrf.mxu1  ;;  %v10722_v55 = vpop.f32.mrf.mxu0  ;;  %3784 = vmatpush1.msra.mxu1 %v2148_v33  ;;  %v13610_v33 = vmax.f32 %v10716_v6, 0.0  ;;  %v2140_v20 = vld [vmem:[#allocation7 + $0x590] sm:$0xff]  ;;  %v14181_v22 = vld [vmem:[#allocation29_spill] sm:$0xff] }
 0x270   : > { %3588 = vmatprep.mubr.f32.mxu0 %v14169_v52  ;;  %14170 = vst [vmem:[#allocation28_spill] sm:$0xff] %v10722_v55  ;;  %14171 = vst [vmem:[#allocation244_spill] sm:$0xff] %v10726_v56  ;;  %3586 = vmatprep.subr.mxu0 %v2029_v59  ;;  %v2281_v52 = vld [vmem:[#allocation7 + $0x9f8] sm:$0xff]  ;;  %v10740_v59 = vadd.f32 %v10233_v21, %v10581_v30  ;;  %v14182_v27 = vmax.f32 %v14181_v22, 0.0  ;;  %v10779_v22 = vadd.f32 %v10316_v41, %v10568_v15 }
 0x271   : > { %3587 = vmatpush2.msra.mxu0 %v2028_v42  ;;  %3344 = vmatmul.mubr.f32.gmra.mxu1 %v13604_v23  ;;  %v10731_v3 = vpop.f32.mrf.mxu1  ;;  %v10733_v47 = vpop.f32.mrf.mxu0  ;;  %v14176_v42 = vld [vmem:[#allocation31_spill] sm:$0xff]  ;;  %v2273_v41 = vld [vmem:[#allocation7 + $0x9b8] sm:$0xff] }
 0x272   : > { %14172 = vst [vmem:[#allocation245_spill] sm:$0xff] %v10733_v47  ;;  %3589 = vmatmul.mubr.f32.vlgmr.msra.gmra.mxu0 %v14174_v58  ;;  %3785 = vmatprep.subr.mxu1 %v2145_v46  ;;  %14175 = vst [vmem:[#allocation26_spill] sm:$0xff] %v10740_v59  ;;  %v14177_v23 = vmax.f32 %v14176_v42, 0.0  ;;  %v13612_v58 = vmax.f32 %v10726_v56, 0.0  ;;  %v10753_v46 = vadd.f32 %v10280_v2, %v10568_v15  ;;  %v2137_v42 = vld [vmem:[#allocation7 + $0x578] sm:$0xff]  ;;  %v14189_v56 = vld [vmem:[#allocation32_spill] sm:$0xff] }
 0x273   : > { %3349 = vmatprep.mubr.f32.mxu1 %v13607_v13  ;;  %v10746_v9 = vpop.f32.mrf.mxu1  ;;  %v10748_v1 = vpop.f32.mrf.mxu0  ;;  %3786 = vmatpush1.msra.mxu1 %v2144_v8  ;;  %v2280_v13 = vld [vmem:[#allocation7 + $0x9f0] sm:$0xff]  ;;  %v2277_v2 = vld [vmem:[#allocation7 + $0x9d8] sm:$0xff]  ;;  %v13614_v8 = vmax.f32 %v10740_v59, 0.0  ;;  %14187 = vst [vmem:[#allocation248_spill] sm:$0xff] %v10779_v22 }
 0x274   : > { %3594 = vmatprep.mubr.f32.mxu0 %v14177_v23  ;;  %14178 = vst [vmem:[#allocation31_spill] sm:$0xff] %v10748_v1  ;;  %14179 = vst [vmem:[#allocation246_spill] sm:$0xff] %v10753_v46  ;;  %4038 = vmatprep.subr.mxu0 %v2281_v52  ;;  %v10768_v52 = vadd.f32 %v10269_v38, %v10581_v30 }
 0x275   : > { %3350 = vmatmul.mubr.f32.gmra.mxu1 %v13610_v33  ;;  %3787 = vmatprep.subr.mxu1 %v2141_v37  ;;  %v10757_v21 = vpop.f32.mrf.mxu1  ;;  %v10759_v23 = vpop.f32.mrf.mxu0  ;;  %v14184_v37 = vld [vmem:[#allocation34_spill] sm:$0xff] }
 0x276   : > { %14180 = vst [vmem:[#allocation247_spill] sm:$0xff] %v10759_v23  ;;  %3595 = vmatmul.mubr.f32.gmra.mxu0 %v14182_v27  ;;  %3355 = vmatprep.mubr.f32.mxu1 %v13612_v58  ;;  %14183 = vst [vmem:[#allocation29_spill] sm:$0xff] %v10768_v52  ;;  %v14185_v33 = vmax.f32 %v14184_v37, 0.0  ;;  %v13616_v27 = vmax.f32 %v10753_v46, 0.0  ;;  %v2136_v58 = vld [vmem:[#allocation7 + $0x570] sm:$0xff]  ;;  %v14197_v46 = vld [vmem:[#allocation35_spill] sm:$0xff] }
 0x277   : > { %3788 = vmatpush1.msra.mxu1 %v2140_v20  ;;  %v10772_v6 = vpop.f32.mrf.mxu1  ;;  %v10774_v23 = vpop.f32.mrf.mxu0  ;;  %4039 = vmatpush1.msra.mxu0 %v2280_v13  ;;  %v2133_v20 = vld [vmem:[#allocation7 + $0x558] sm:$0xff]  ;;  %v2276_v37 = vld [vmem:[#allocation7 + $0x9d0] sm:$0xff]  ;;  %v10794_v13 = vadd.f32 %v10305_v40, %v10581_v30 }
 0x278   : > { %3600 = vmatprep.mubr.f32.mxu0 %v14185_v33  ;;  %14186 = vst [vmem:[#allocation34_spill] sm:$0xff] %v10774_v23  ;;  %3789 = vmatprep.subr.mxu1 %v2137_v42  ;;  %v14190_v23 = vmax.f32 %v14189_v56, 0.0  ;;  %v13618_v42 = vmax.f32 %v10768_v52, 0.0  ;;  %v13620_v56 = vmax.f32 %v10779_v22, 0.0  ;;  %v14205_v22 = vld [vmem:[#allocation38_spill] sm:$0xff] }
 0x279   : > { %3356 = vmatmul.mubr.f32.gmra.mxu1 %v13614_v8  ;;  %v10783_v38 = vpop.f32.mrf.mxu1  ;;  %v10785_v33 = vpop.f32.mrf.mxu0  ;;  %4040 = vmatprep.subr.mxu0 %v2277_v2  ;;  %14191 = vst [vmem:[#allocation32_spill] sm:$0xff] %v10794_v13  ;;  %v14192_v8 = vld [vmem:[#allocation37_spill] sm:$0xff] }
 0x27a   : > { %14188 = vst [vmem:[#allocation249_spill] sm:$0xff] %v10785_v33  ;;  %3601 = vmatmul.mubr.f32.gmra.mxu0 %v14190_v23  ;;  %3361 = vmatprep.mubr.f32.mxu1 %v13616_v27  ;;  %v14193_v59 = vmax.f32 %v14192_v8, 0.0  ;;  %v10805_v23 = vadd.f32 %v10352_v12, %v10568_v15  ;;  %v2132_v27 = vld [vmem:[#allocation7 + $0x550] sm:$0xff]  ;;  %v2269_v12 = vld [vmem:[#allocation7 + $0x998] sm:$0xff] }
 0x27b   : > { %3790 = vmatpush1.msra.mxu1 %v2136_v58  ;;  %v10798_v33 = vpop.f32.mrf.mxu1  ;;  %v10800_v2 = vpop.f32.mrf.mxu0  ;;  %4041 = vmatpush1.msra.mxu0 %v2276_v37  ;;  %v2129_v58 = vld [vmem:[#allocation7 + $0x538] sm:$0xff]  ;;  %v2272_v8 = vld [vmem:[#allocation7 + $0x9b0] sm:$0xff]  ;;  %v10820_v37 = vadd.f32 %v10341_v16, %v10581_v30 }
 0x27c   : > { %3606 = vmatprep.mubr.f32.mxu0 %v14193_v59  ;;  %14194 = vst [vmem:[#allocation37_spill] sm:$0xff] %v10800_v2  ;;  %14195 = vst [vmem:[#allocation250_spill] sm:$0xff] %v10805_v23  ;;  %3791 = vmatprep.subr.mxu1 %v2133_v20  ;;  %v14198_v2 = vmax.f32 %v14197_v46, 0.0  ;;  %v13622_v20 = vmax.f32 %v10794_v13, 0.0  ;;  %v13624_v46 = vmax.f32 %v10805_v23, 0.0  ;;  %v14213_v23 = vld [vmem:[#allocation41_spill] sm:$0xff] }
 0x27d   : > { %3362 = vmatmul.mubr.f32.gmra.mxu1 %v13618_v42  ;;  %v10809_v40 = vpop.f32.mrf.mxu1  ;;  %v10811_v59 = vpop.f32.mrf.mxu0  ;;  %4042 = vmatprep.subr.mxu0 %v2273_v41  ;;  %14199 = vst [vmem:[#allocation35_spill] sm:$0xff] %v10820_v37  ;;  %v14200_v42 = vld [vmem:[#allocation40_spill] sm:$0xff] }
 0x27e   : > { %14196 = vst [vmem:[#allocation251_spill] sm:$0xff] %v10811_v59  ;;  %3607 = vmatmul.mubr.f32.gmra.mxu0 %v14198_v2  ;;  %3367 = vmatprep.mubr.f32.mxu1 %v13620_v56  ;;  %v14201_v52 = vmax.f32 %v14200_v42, 0.0  ;;  %v10831_v2 = vadd.f32 %v10388_v50, %v10568_v15  ;;  %v2128_v56 = vld [vmem:[#allocation7 + $0x530] sm:$0xff]  ;;  %v2265_v50 = vld [vmem:[#allocation7 + $0x978] sm:$0xff] }
 0x27f   : > { %3792 = vmatpush1.msra.mxu1 %v2132_v27  ;;  %v10824_v59 = vpop.f32.mrf.mxu1  ;;  %v10826_v41 = vpop.f32.mrf.mxu0  ;;  %4043 = vmatpush1.msra.mxu0 %v2272_v8  ;;  %v2125_v27 = vld [vmem:[#allocation7 + $0x518] sm:$0xff]  ;;  %v2268_v42 = vld [vmem:[#allocation7 + $0x990] sm:$0xff]  ;;  %v10846_v8 = vadd.f32 %v10377_v7, %v10581_v30 }
 0x280   : > { %3612 = vmatprep.mubr.f32.mxu0 %v14201_v52  ;;  %14202 = vst [vmem:[#allocation40_spill] sm:$0xff] %v10826_v41  ;;  %14203 = vst [vmem:[#allocation252_spill] sm:$0xff] %v10831_v2  ;;  %3793 = vmatprep.subr.mxu1 %v2129_v58  ;;  %v14206_v41 = vmax.f32 %v14205_v22, 0.0  ;;  %v13626_v58 = vmax.f32 %v10820_v37, 0.0  ;;  %v13628_v22 = vmax.f32 %v10831_v2, 0.0  ;;  %v14221_v2 = vld [vmem:[#allocation44_spill] sm:$0xff] }
 0x281   : > { %3368 = vmatmul.mubr.f32.gmra.mxu1 %v13622_v20  ;;  %v10835_v16 = vpop.f32.mrf.mxu1  ;;  %v10837_v52 = vpop.f32.mrf.mxu0  ;;  %4044 = vmatprep.subr.mxu0 %v2269_v12  ;;  %14207 = vst [vmem:[#allocation38_spill] sm:$0xff] %v10846_v8  ;;  %v14208_v20 = vld [vmem:[#allocation43_spill] sm:$0xff] }
 0x282   : > { %14204 = vst [vmem:[#allocation253_spill] sm:$0xff] %v10837_v52  ;;  %3613 = vmatmul.mubr.f32.gmra.mxu0 %v14206_v41  ;;  %3373 = vmatprep.mubr.f32.mxu1 %v13624_v46  ;;  %v14209_v13 = vmax.f32 %v14208_v20, 0.0  ;;  %v10857_v41 = vadd.f32 %v10424_v11, %v10568_v15  ;;  %v2124_v46 = vld [vmem:[#allocation7 + $0x510] sm:$0xff]  ;;  %v2261_v11 = vld [vmem:[#allocation7 + $0x958] sm:$0xff] }
 0x283   : > { %3794 = vmatpush1.msra.mxu1 %v2128_v56  ;;  %v10850_v52 = vpop.f32.mrf.mxu1  ;;  %v10852_v12 = vpop.f32.mrf.mxu0  ;;  %4045 = vmatpush1.msra.mxu0 %v2268_v42  ;;  %v2121_v56 = vld [vmem:[#allocation7 + $0x4f8] sm:$0xff]  ;;  %v2264_v20 = vld [vmem:[#allocation7 + $0x970] sm:$0xff]  ;;  %v10872_v42 = vadd.f32 %v10413_v35, %v10581_v30 }
 0x284   : > { %3618 = vmatprep.mubr.f32.mxu0 %v14209_v13  ;;  %14210 = vst [vmem:[#allocation43_spill] sm:$0xff] %v10852_v12  ;;  %14211 = vst [vmem:[#allocation254_spill] sm:$0xff] %v10857_v41  ;;  %3795 = vmatprep.subr.mxu1 %v2125_v27  ;;  %v14214_v12 = vmax.f32 %v14213_v23, 0.0  ;;  %v13630_v27 = vmax.f32 %v10846_v8, 0.0  ;;  %v13632_v23 = vmax.f32 %v10857_v41, 0.0  ;;  %v14229_v41 = vld [vmem:[#allocation47_spill] sm:$0xff] }
 0x285   : > { %3374 = vmatmul.mubr.f32.gmra.mxu1 %v13626_v58  ;;  %v10861_v7 = vpop.f32.mrf.mxu1  ;;  %v10863_v13 = vpop.f32.mrf.mxu0  ;;  %4046 = vmatprep.subr.mxu0 %v2265_v50  ;;  %14215 = vst [vmem:[#allocation41_spill] sm:$0xff] %v10872_v42  ;;  %v14216_v58 = vld [vmem:[#allocation46_spill] sm:$0xff] }
 0x286   : > { %14212 = vst [vmem:[#allocation255_spill] sm:$0xff] %v10863_v13  ;;  %3619 = vmatmul.mubr.f32.gmra.mxu0 %v14214_v12  ;;  %3379 = vmatprep.mubr.f32.mxu1 %v13628_v22  ;;  %v14217_v37 = vmax.f32 %v14216_v58, 0.0  ;;  %v10883_v12 = vadd.f32 %v10460_v14, %v10568_v15  ;;  %v2120_v22 = vld [vmem:[#allocation7 + $0x4f0] sm:$0xff]  ;;  %v2257_v14 = vld [vmem:[#allocation7 + $0x938] sm:$0xff] }
 0x287   : > { %3796 = vmatpush1.msra.mxu1 %v2124_v46  ;;  %v10876_v13 = vpop.f32.mrf.mxu1  ;;  %v10878_v50 = vpop.f32.mrf.mxu0  ;;  %4047 = vmatpush1.msra.mxu0 %v2264_v20  ;;  %v2117_v46 = vld [vmem:[#allocation7 + $0x4d8] sm:$0xff]  ;;  %v2260_v58 = vld [vmem:[#allocation7 + $0x950] sm:$0xff]  ;;  %v10898_v20 = vadd.f32 %v10449_v63, %v10581_v30 }
 0x288   : > { %3624 = vmatprep.mubr.f32.mxu0 %v14217_v37  ;;  %14218 = vst [vmem:[#allocation46_spill] sm:$0xff] %v10878_v50  ;;  %14219 = vst [vmem:[#allocation256_spill] sm:$0xff] %v10883_v12  ;;  %3797 = vmatprep.subr.mxu1 %v2121_v56  ;;  %v14222_v50 = vmax.f32 %v14221_v2, 0.0  ;;  %v13634_v56 = vmax.f32 %v10872_v42, 0.0  ;;  %v13636_v2 = vmax.f32 %v10883_v12, 0.0  ;;  %v14237_v12 = vld [vmem:[#allocation50_spill] sm:$0xff] }
 0x289   : > { %3380 = vmatmul.mubr.f32.gmra.mxu1 %v13630_v27  ;;  %v10887_v35 = vpop.f32.mrf.mxu1  ;;  %v10889_v37 = vpop.f32.mrf.mxu0  ;;  %4048 = vmatprep.subr.mxu0 %v2261_v11  ;;  %14223 = vst [vmem:[#allocation44_spill] sm:$0xff] %v10898_v20  ;;  %v14224_v27 = vld [vmem:[#allocation49_spill] sm:$0xff] }
 0x28a   : > { %14220 = vst [vmem:[#allocation257_spill] sm:$0xff] %v10889_v37  ;;  %3625 = vmatmul.mubr.f32.gmra.mxu0 %v14222_v50  ;;  %3385 = vmatprep.mubr.f32.mxu1 %v13632_v23  ;;  %v14225_v8 = vmax.f32 %v14224_v27, 0.0  ;;  %v10909_v50 = vadd.f32 %v10496_v0, %v10568_v15  ;;  %v2116_v23 = vld [vmem:[#allocation7 + $0x4d0] sm:$0xff]  ;;  %v2253_v0 = vld [vmem:[#allocation7 + $0x918] sm:$0xff] }
 0x28b   : > { %3798 = vmatpush1.msra.mxu1 %v2120_v22  ;;  %v10902_v37 = vpop.f32.mrf.mxu1  ;;  %v10904_v11 = vpop.f32.mrf.mxu0  ;;  %4049 = vmatpush1.msra.mxu0 %v2260_v58  ;;  %v2113_v22 = vld [vmem:[#allocation7 + $0x4b8] sm:$0xff]  ;;  %v2256_v27 = vld [vmem:[#allocation7 + $0x930] sm:$0xff]  ;;  %v10924_v58 = vadd.f32 %v10485_v28, %v10581_v30 }
 0x28c   : > { %3630 = vmatprep.mubr.f32.mxu0 %v14225_v8  ;;  %14226 = vst [vmem:[#allocation49_spill] sm:$0xff] %v10904_v11  ;;  %14227 = vst [vmem:[#allocation258_spill] sm:$0xff] %v10909_v50  ;;  %3799 = vmatprep.subr.mxu1 %v2117_v46  ;;  %v14230_v11 = vmax.f32 %v14229_v41, 0.0  ;;  %v13638_v46 = vmax.f32 %v10898_v20, 0.0  ;;  %v13640_v41 = vmax.f32 %v10909_v50, 0.0  ;;  %v14245_v50 = vld [vmem:[#allocation53_spill] sm:$0xff] }
 0x28d   : > { %3386 = vmatmul.mubr.f32.gmra.mxu1 %v13634_v56  ;;  %v10913_v63 = vpop.f32.mrf.mxu1  ;;  %v10915_v8 = vpop.f32.mrf.mxu0  ;;  %4050 = vmatprep.subr.mxu0 %v2257_v14  ;;  %14231 = vst [vmem:[#allocation47_spill] sm:$0xff] %v10924_v58  ;;  %v14232_v56 = vld [vmem:[#allocation52_spill] sm:$0xff] }
 0x28e   : > { %14228 = vst [vmem:[#allocation259_spill] sm:$0xff] %v10915_v8  ;;  %3631 = vmatmul.mubr.f32.gmra.mxu0 %v14230_v11  ;;  %3391 = vmatprep.mubr.f32.mxu1 %v13636_v2  ;;  %v14233_v42 = vmax.f32 %v14232_v56, 0.0  ;;  %v10935_v11 = vadd.f32 %v10533_v29, %v10568_v15  ;;  %v2112_v2 = vld [vmem:[#allocation7 + $0x4b0] sm:$0xff]  ;;  %v2249_v29 = vld [vmem:[#allocation7 + $0x8f8] sm:$0xff] }
 0x28f   : > { %3800 = vmatpush1.msra.mxu1 %v2116_v23  ;;  %v10928_v8 = vpop.f32.mrf.mxu1  ;;  %v10930_v14 = vpop.f32.mrf.mxu0  ;;  %4051 = vmatpush1.msra.mxu0 %v2256_v27  ;;  %v2109_v23 = vld [vmem:[#allocation7 + $0x498] sm:$0xff]  ;;  %v2252_v56 = vld [vmem:[#allocation7 + $0x910] sm:$0xff]  ;;  %v10950_v27 = vadd.f32 %v10521_v26, %v10581_v30 }
 0x290   : > { %3636 = vmatprep.mubr.f32.mxu0 %v14233_v42  ;;  %14234 = vst [vmem:[#allocation52_spill] sm:$0xff] %v10930_v14  ;;  %14235 = vst [vmem:[#allocation260_spill] sm:$0xff] %v10935_v11  ;;  %3801 = vmatprep.subr.mxu1 %v2113_v22  ;;  %v14238_v14 = vmax.f32 %v14237_v12, 0.0  ;;  %v13642_v22 = vmax.f32 %v10924_v58, 0.0  ;;  %v13644_v12 = vmax.f32 %v10935_v11, 0.0  ;;  %v14253_v11 = vld [vmem:[#allocation56_spill] sm:$0xff] }
 0x291   : > { %3392 = vmatmul.mubr.f32.gmra.mxu1 %v13638_v46  ;;  %v10939_v28 = vpop.f32.mrf.mxu1  ;;  %v10941_v42 = vpop.f32.mrf.mxu0  ;;  %4052 = vmatprep.subr.mxu0 %v2253_v0  ;;  %14239 = vst [vmem:[#allocation50_spill] sm:$0xff] %v10950_v27  ;;  %v14240_v46 = vld [vmem:[#allocation55_spill] sm:$0xff] }
 0x292   : > { %14236 = vst [vmem:[#allocation261_spill] sm:$0xff] %v10941_v42  ;;  %3637 = vmatmul.mubr.f32.gmra.mxu0 %v14238_v14  ;;  %3397 = vmatprep.mubr.f32.mxu1 %v13640_v41  ;;  %v14241_v20 = vmax.f32 %v14240_v46, 0.0  ;;  %v10961_v14 = vadd.f32 %v10572_v62, %v10568_v15  ;;  %v2108_v41 = vld [vmem:[#allocation7 + $0x490] sm:$0xff]  ;;  %v2245_v62 = vld [vmem:[#allocation7 + $0x8d8] sm:$0xff] }
 0x293   : > { %3802 = vmatpush1.msra.mxu1 %v2112_v2  ;;  %v10954_v42 = vpop.f32.mrf.mxu1  ;;  %v10956_v0 = vpop.f32.mrf.mxu0  ;;  %4053 = vmatpush1.msra.mxu0 %v2252_v56  ;;  %v2105_v2 = vld [vmem:[#allocation7 + $0x478] sm:$0xff]  ;;  %v2248_v46 = vld [vmem:[#allocation7 + $0x8f0] sm:$0xff]  ;;  %v10976_v56 = vadd.f32 %v10559_v57, %v10581_v30 }
 0x294   : > { %3642 = vmatprep.mubr.f32.mxu0 %v14241_v20  ;;  %14242 = vst [vmem:[#allocation55_spill] sm:$0xff] %v10956_v0  ;;  %14243 = vst [vmem:[#allocation262_spill] sm:$0xff] %v10961_v14  ;;  %3803 = vmatprep.subr.mxu1 %v2109_v23  ;;  %v14246_v0 = vmax.f32 %v14245_v50, 0.0  ;;  %v13646_v23 = vmax.f32 %v10950_v27, 0.0  ;;  %v13648_v50 = vmax.f32 %v10961_v14, 0.0  ;;  %v14261_v14 = vld [vmem:[#allocation59_spill] sm:$0xff] }
 0x295   : > { %3398 = vmatmul.mubr.f32.gmra.mxu1 %v13642_v22  ;;  %v10965_v26 = vpop.f32.mrf.mxu1  ;;  %v10967_v20 = vpop.f32.mrf.mxu0  ;;  %4054 = vmatprep.subr.mxu0 %v2249_v29  ;;  %14247 = vst [vmem:[#allocation53_spill] sm:$0xff] %v10976_v56  ;;  %v14248_v22 = vld [vmem:[#allocation58_spill] sm:$0xff] }
 0x296   : > { %14244 = vst [vmem:[#allocation263_spill] sm:$0xff] %v10967_v20  ;;  %3643 = vmatmul.mubr.f32.gmra.mxu0 %v14246_v0  ;;  %3403 = vmatprep.mubr.f32.mxu1 %v13644_v12  ;;  %v14249_v58 = vmax.f32 %v14248_v22, 0.0  ;;  %v10987_v0 = vadd.f32 %v10610_v24, %v10568_v15  ;;  %v2104_v12 = vld [vmem:[#allocation7 + $0x470] sm:$0xff]  ;;  %v2241_v24 = vld [vmem:[#allocation7 + $0x8b8] sm:$0xff] }
 0x297   : > { %3804 = vmatpush1.msra.mxu1 %v2108_v41  ;;  %v10980_v20 = vpop.f32.mrf.mxu1  ;;  %v10982_v29 = vpop.f32.mrf.mxu0  ;;  %4055 = vmatpush1.msra.mxu0 %v2248_v46  ;;  %v2101_v41 = vld [vmem:[#allocation7 + $0x458] sm:$0xff]  ;;  %v2244_v22 = vld [vmem:[#allocation7 + $0x8d0] sm:$0xff]  ;;  %v11002_v46 = vadd.f32 %v10599_v49, %v10581_v30 }
 0x298   : > { %3648 = vmatprep.mubr.f32.mxu0 %v14249_v58  ;;  %14250 = vst [vmem:[#allocation58_spill] sm:$0xff] %v10982_v29  ;;  %14251 = vst [vmem:[#allocation264_spill] sm:$0xff] %v10987_v0  ;;  %3805 = vmatprep.subr.mxu1 %v2105_v2  ;;  %v14254_v29 = vmax.f32 %v14253_v11, 0.0  ;;  %v13650_v2 = vmax.f32 %v10976_v56, 0.0  ;;  %v13652_v11 = vmax.f32 %v10987_v0, 0.0  ;;  %v2236_v0 = vld [vmem:[#allocation7 + $0x890] sm:$0xff] }
 0x299   : > { %3404 = vmatmul.mubr.f32.gmra.mxu1 %v13646_v23  ;;  %v10991_v57 = vpop.f32.mrf.mxu1  ;;  %v10993_v58 = vpop.f32.mrf.mxu0  ;;  %4056 = vmatprep.subr.mxu0 %v2245_v62  ;;  %14255 = vst [vmem:[#allocation56_spill] sm:$0xff] %v11002_v46  ;;  %v14256_v23 = vld [vmem:[#allocation61_spill] sm:$0xff] }
 0x29a   : > { %14252 = vst [vmem:[#allocation265_spill] sm:$0xff] %v10993_v58  ;;  %3649 = vmatmul.mubr.f32.gmra.mxu0 %v14254_v29  ;;  %3409 = vmatprep.mubr.f32.mxu1 %v13648_v50  ;;  %v14257_v27 = vmax.f32 %v14256_v23, 0.0  ;;  %v11013_v29 = vadd.f32 %v10646_v34, %v10568_v15  ;;  %v2100_v50 = vld [vmem:[#allocation7 + $0x450] sm:$0xff]  ;;  %v2237_v34 = vld [vmem:[#allocation7 + $0x898] sm:$0xff] }
 0x29b   : > { %3806 = vmatpush1.msra.mxu1 %v2104_v12  ;;  %v11006_v58 = vpop.f32.mrf.mxu1  ;;  %v11008_v62 = vpop.f32.mrf.mxu0  ;;  %4057 = vmatpush1.msra.mxu0 %v2244_v22  ;;  %v2097_v12 = vld [vmem:[#allocation7 + $0x438] sm:$0xff]  ;;  %v2240_v23 = vld [vmem:[#allocation7 + $0x8b0] sm:$0xff]  ;;  %v11028_v22 = vadd.f32 %v10635_v5, %v10581_v30  ;;  %v14268_v5 = vmax.f32 %v11002_v46, 0.0  ;;  %v11054_v46 = vadd.f32 %v10667_v10, %v10581_v30 }
 0x29c   : > { %3654 = vmatprep.mubr.f32.mxu0 %v14257_v27  ;;  %14258 = vst [vmem:[#allocation61_spill] sm:$0xff] %v11008_v62  ;;  %14259 = vst [vmem:[#allocation266_spill] sm:$0xff] %v11013_v29  ;;  %3807 = vmatprep.subr.mxu1 %v2101_v41  ;;  %v14262_v62 = vmax.f32 %v14261_v14, 0.0  ;;  %v2474_v41 = vld [vmem:[#allocation8] sm:$0xf]  ;;  %v2092_v10 = vld [vmem:[#allocation7 + $0x410] sm:$0xff] }
 0x29d   : > { %3410 = vmatmul.mubr.f32.gmra.mxu1 %v13650_v2  ;;  %v11017_v49 = vpop.f32.mrf.mxu1  ;;  %v11019_v27 = vpop.f32.mrf.mxu0  ;;  %4058 = vmatprep.subr.mxu0 %v2241_v24  ;;  %14263 = vst [vmem:[#allocation59_spill] sm:$0xff] %v11028_v22  ;;  %v14264_v2 = vld [vmem:[#allocation64_spill] sm:$0xff] }
 0x29e   : > { %14260 = vst [vmem:[#allocation267_spill] sm:$0xff] %v11019_v27  ;;  %3655 = vmatmul.mubr.f32.gmra.mxu0 %v14262_v62  ;;  %3415 = vmatprep.mubr.f32.mxu1 %v13652_v11  ;;  %v14265_v56 = vmax.f32 %v14264_v2, 0.0  ;;  %v11039_v62 = vadd.f32 %v10678_v19, %v10568_v15  ;;  %v2096_v11 = vld [vmem:[#allocation7 + $0x430] sm:$0xff]  ;;  %v14272_v19 = vmax.f32 %v11013_v29, 0.0 }
 0x29f   : > { %3808 = vmatpush1.msra.mxu1 %v2100_v50  ;;  %v11032_v27 = vpop.f32.mrf.mxu1  ;;  %v11034_v24 = vpop.f32.mrf.mxu0  ;;  %4059 = vmatpush1.msra.mxu0 %v2240_v23  ;;  %v2093_v50 = vld [vmem:[#allocation7 + $0x418] sm:$0xff]  ;;  %v13656_v23 = vmax.f32 %v11028_v22, 0.0  ;;  %v2216_v22 = vld [vmem:[#allocation7 + $0x7f0] sm:$0xff] }
 0x2a0   : > { %3660 = vmatprep.mubr.f32.mxu0 %v14265_v56  ;;  %14266 = vst [vmem:[#allocation64_spill] sm:$0xff] %v11034_v24  ;;  %14267 = vst [vmem:[#allocation268_spill] sm:$0xff] %v11039_v62  ;;  %3809 = vmatprep.subr.mxu1 %v2097_v12  ;;  %v14270_v24 = vld [vmem:[#allocation62_spill] sm:$0xff]  ;;  %v2233_v12 = vld [vmem:[#allocation7 + $0x878] sm:$0xff] }
 0x2a1   : > { %3416 = vmatmul.mubr.f32.gmra.mxu1 %v14268_v5  ;;  %v11043_v2 = vpop.f32.mrf.mxu1  ;;  %v11045_v56 = vpop.f32.mrf.mxu0  ;;  %4060 = vmatprep.subr.mxu0 %v2237_v34  ;;  %v14271_v14 = vmax.f32 %v14270_v24, 0.0  ;;  %14273 = vst [vmem:[#allocation62_spill] sm:$0xff] %v11054_v46  ;;  %v14274_v5 = vld [vmem:[#allocation67_spill] sm:$0xff]  ;;  %v14276_v34 = vld [vmem:[#allocation24_spill] sm:$0xff] }
 0x2a2   : > { %14269 = vst [vmem:[#allocation269_spill] sm:$0xff] %v11045_v56  ;;  %3421 = vmatprep.mubr.f32.mxu1 %v14272_v19  ;;  %v14275_v1 = vmax.f32 %v14274_v5, 0.0  ;;  %3810 = vmatpush1.msra.mxu1 %v2096_v11  ;;  %v11061_v47 = vrot.slane %v2474_v41, %v14276_v34  ;;  %v2217_v11 = vld [vmem:[#allocation7 + $0x7f8] sm:$0xff]  ;;  %v2232_v5 = vld [vmem:[#allocation7 + $0x870] sm:$0xff] }
 0x2a3   : > { %3661 = vmatmul.mubr.f32.gmra.mxu0 %v14271_v14  ;;  %v11058_v56 = vpop.f32.mrf.mxu1  ;;  %v11066_v14 = vadd.f32 %v10705_v25, %v10568_v15  ;;  %3811 = vmatprep.subr.mxu1 %v2093_v50  ;;  %v14279_v34 = vld [vmem:[#allocation25_spill] sm:$0xff]  ;;  %v14282_v50 = vmax.f32 %v11039_v62, 0.0  ;;  %v2228_v62 = vld [vmem:[#allocation7 + $0x850] sm:$0xff] }
 0x2a4   : > { %3666 = vmatprep.mubr.f32.mxu0 %v14275_v1  ;;  %v11068_v19 = vpop.f32.mrf.mxu0  ;;  %4061 = vmatpush1.msra.mxu0 %v2236_v0  ;;  %v2563_v24 = vadd.f32 %v10163_v4, %v11061_v47  ;;  %v11077_v29 = vrot.slane %v2474_v41, %v14279_v34  ;;  %v14280_v25 = vld [vmem:[#allocation65_spill] sm:$0xff] }
 0x2a5   : > { %14277 = vst [vmem:[#allocation67_spill] sm:$0xff] %v11066_v14  ;;  %14278 = vst [vmem:[#allocation270_spill] sm:$0xff] %v11068_v19  ;;  %3422 = vmatmul.mubr.f32.gmra.mxu1 %v13656_v23  ;;  %v11072_v1 = vpop.f32.mrf.mxu1  ;;  %4062 = vmatprep.subr.mxu0 %v2233_v12  ;;  %v14281_v55 = vmax.f32 %v14280_v25, 0.0  ;;  %v2229_v23 = vld [vmem:[#allocation7 + $0x858] sm:$0xff]  ;;  %v11088_v12 = vadd.f32 %v10694_v61, %v10581_v30  ;;  %v14285_v19 = vld [vmem:[#allocation70_spill] sm:$0xff]  ;;  %v13659_v25 = vmax.f32 %v11066_v14, 0.0 }
 0x2a6   : > { %3427 = vmatprep.mubr.f32.mxu1 %v14282_v50  ;;  %v11083_v0 = vpop.f32.mrf.mxu0  ;;  %v14286_v4 = vmax.f32 %v14285_v19, 0.0  ;;  %3812 = vmatpush1.msra.mxu1 %v2092_v10  ;;  %v11097_v50 = vadd.f32 %v10731_v3, %v10568_v15  ;;  %v14288_v19 = vmax.f32 %v11054_v46, 0.0  ;;  %v2208_v46 = vld [vmem:[#allocation7 + $0x7b0] sm:$0xff] }
 0x2a7   : > { %3667 = vmatmul.mubr.f32.gmra.mxu0 %v14281_v55  ;;  %14283 = vst [vmem:[#allocation65_spill] sm:$0xff] %v11083_v0  ;;  %14284 = vst [vmem:[#allocation271_spill] sm:$0xff] %v11088_v12  ;;  %v2819_v41 = vpop.f32.mrf.mxu1  ;;  %v2565_v55 = vadd.f32 %v10174_v32, %v11077_v29  ;;  %3813 = vmatprep.subr.mxu1 %v2217_v11  ;;  %v14289_v32 = vld [vmem:[#allocation68_spill] sm:$0xff]  ;;  %v2569_v11 = vadd.f32 %v10199_v53, %v11061_v47 }
 0x2a8   : > { %3672 = vmatprep.mubr.f32.mxu0 %v14286_v4  ;;  %14287 = vst [vmem:[#allocation70_spill] sm:$0xff] %v11097_v50  ;;  %v2820_v34 = vadd.f32 %v2819_v41, %v2563_v24  ;;  %4063 = vmatpush1.msra.mxu0 %v2232_v5  ;;  %v2213_v4 = vld [vmem:[#allocation7 + $0x7d8] sm:$0xff]  ;;  %v14290_v0 = vmax.f32 %v14289_v32, 0.0  ;;  %v13662_v5 = vmax.f32 %v11088_v12, 0.0  ;;  %v11112_v41 = vadd.f32 %v10720_v31, %v10581_v30  ;;  %v2212_v53 = vld [vmem:[#allocation7 + $0x7d0] sm:$0xff] }
 0x2a9   : > { %v11099_v61 = vpop.f32.mrf.mxu0  ;;  %3428 = vmatmul.mubr.f32.gmra.mxu1 %v14288_v19  ;;  %v2821_v10 = vpop.f32.mrf.mxu1  ;;  %4064 = vmatprep.subr.mxu0 %v2229_v23  ;;  %v2225_v24 = vld [vmem:[#allocation7 + $0x838] sm:$0xff]  ;;  %v14292_v19 = vld [vmem:[#allocation74_spill] sm:$0xff]  ;;  %v2571_v31 = vadd.f32 %v10210_v51, %v11077_v29  ;;  %v11136_v51 = vadd.f32 %v10746_v9, %v10581_v30 }
 0x2aa   : > { %3433 = vmatprep.mubr.f32.mxu1 %v13659_v25  ;;  %v2822_v3 = vadd.f32 %v2821_v10, %v2565_v55  ;;  %14291 = vst [vmem:[#allocation68_spill] sm:$0xff] %v11112_v41  ;;  %v14293_v23 = vmax.f32 %v14292_v19, 0.0  ;;  %3814 = vmatpush2.msra.mxu1 %v2216_v22  ;;  %v11121_v55 = vadd.f32 %v10757_v21, %v10568_v15  ;;  %v2209_v22 = vld [vmem:[#allocation7 + $0x7b8] sm:$0xff]  ;;  %v14297_v21 = vmax.f32 %v11097_v50, 0.0 }
 0x2ab   : > { %3673 = vmatmul.mubr.f32.gmra.mxu0 %v14290_v0  ;;  %v11116_v32 = vpop.f32.mrf.mxu0  ;;  %3815 = vmatprep.subr.mxu1 %v2213_v4  ;;  %v14295_v0 = vld [vmem:[#allocation71_spill] sm:$0xff] }
 0x2ac   : > { %3678 = vmatprep.mubr.f32.mxu0 %v14293_v23  ;;  %14294 = vst [vmem:[#allocation74_spill] sm:$0xff] %v11121_v55  ;;  %v2825_v10 = vpop.f32.mrf.mxu1  ;;  %4065 = vmatpush1.msra.mxu0 %v2228_v62  ;;  %v2224_v23 = vld [vmem:[#allocation7 + $0x830] sm:$0xff]  ;;  %v14296_v14 = vmax.f32 %v14295_v0, 0.0  ;;  %v2221_v62 = vld [vmem:[#allocation7 + $0x818] sm:$0xff]  ;;  %14298 = vst [vmem:[#allocation71_spill] sm:$0xff] %v11136_v51 }
 0x2ad   : > { %v11125_v25 = vpop.f32.mrf.mxu0  ;;  %v2826_v19 = vadd.f32 %v2825_v10, %v2569_v11  ;;  %3434 = vmatmul.mubr.f32.gmra.mxu1 %v13662_v5  ;;  %4066 = vmatprep.subr.mxu0 %v2225_v24  ;;  %v14299_v11 = vld [vmem:[#allocation73_spill] sm:$0xff]  ;;  %v14305_v0 = vld [vmem:[#allocation27_spill] sm:$0xff] }
 0x2ae   : > { %3439 = vmatprep.mubr.f32.mxu1 %v14297_v21  ;;  %v2827_v4 = vpop.f32.mrf.mxu1  ;;  %v14300_v10 = vmax.f32 %v14299_v11, 0.0  ;;  %3816 = vmatpush2.msra.mxu1 %v2212_v53  ;;  %v11147_v21 = vadd.f32 %v10783_v38, %v10568_v15  ;;  %v14303_v11 = vmax.f32 %v11112_v41, 0.0  ;;  %v2205_v53 = vld [vmem:[#allocation7 + $0x798] sm:$0xff]  ;;  %v14306_v12 = vmax.f32 %v14305_v0, 0.0  ;;  %v14310_v41 = vld [vmem:[#allocation75_spill] sm:$0xff] }
 0x2af   : > { %3679 = vmatmul.mubr.f32.gmra.mxu0 %v14296_v14  ;;  %v11140_v24 = vpop.f32.mrf.mxu0  ;;  %v2828_v5 = vadd.f32 %v2827_v4, %v2571_v31  ;;  %v2575_v14 = vadd.f32 %v10235_v17, %v11061_v47  ;;  %3817 = vmatprep.subr.mxu1 %v2209_v22  ;;  %v14304_v31 = vld [vmem:[#allocation193_spill] sm:$0xff]  ;;  %v14307_v38 = vmax.f32 %v11121_v55, 0.0 }
 0x2b0   : > { %3684 = vmatprep.mubr.f32.mxu0 %v14300_v10  ;;  %14301 = vst [vmem:[#allocation73_spill] sm:$0xff] %v11140_v24  ;;  %14302 = vst [vmem:[#allocation272_spill] sm:$0xff] %v11147_v21  ;;  %4067 = vmatpush1.msra.mxu0 %v2224_v23  ;;  %v2220_v10 = vld [vmem:[#allocation7 + $0x810] sm:$0xff]  ;;  %v2577_v4 = vadd.f32 %v14304_v31, %v11077_v29  ;;  %v2345_v22 = vld [vmem:[#allocation7 + $0xbf8] sm:$0xff]  ;;  %v14311_v24 = vmax.f32 %v14310_v41, 0.0  ;;  %v11171_v31 = vadd.f32 %v10809_v40, %v10568_v15 }
 0x2b1   : > { %v2831_v9 = vpop.f32.mrf.mxu1  ;;  %3440 = vmatmul.mubr.f32.gmra.mxu1 %v14303_v11  ;;  %4068 = vmatprep.subr.mxu0 %v2221_v62  ;;  %v11160_v11 = vadd.f32 %v10772_v6, %v10581_v30  ;;  %v14312_v0 = vld [vmem:[#allocation197_spill] sm:$0xff]  ;;  %v2204_v6 = vld [vmem:[#allocation7 + $0x790] sm:$0xff] }
 0x2b2   : > { %v2832_v17 = vadd.f32 %v2831_v9, %v2575_v14  ;;  %v3076_v50 = vpop.f32.mrf.mxu0  ;;  %3445 = vmatprep.mubr.f32.mxu1 %v14307_v38  ;;  %3818 = vmatpush2.msra.mxu1 %v2208_v46  ;;  %14313 = vst [vmem:[#allocation75_spill] sm:$0xff] %v11171_v31  ;;  %v14314_v46 = vmax.f32 %v11136_v51, 0.0  ;;  %v2201_v41 = vld [vmem:[#allocation7 + $0x778] sm:$0xff] }
 0x2b3   : > { %3685 = vmatmul.mubr.f32.gmra.mxu0 %v14306_v12  ;;  %14308 = vst [vmem:[#allocation193_spill] sm:$0xff] %v11160_v11  ;;  %v11162_v62 = vadd.f32 %v3076_v50, %v2820_v34  ;;  %v2833_v14 = vpop.f32.mrf.mxu1  ;;  %v2581_v12 = vadd.f32 %v14312_v0, %v11061_v47  ;;  %3819 = vmatprep.subr.mxu1 %v2205_v53  ;;  %v14315_v0 = vld [vmem:[#allocation199_spill] sm:$0xff]  ;;  %v14318_v53 = vmax.f32 %v11147_v21, 0.0  ;;  %v14326_v51 = vld [vmem:[#allocation33_spill] sm:$0xff] }
 0x2b4   : > { %3690 = vmatprep.mubr.f32.mxu0 %v14311_v24  ;;  %v2834_v38 = vadd.f32 %v2833_v14, %v2577_v4  ;;  %v3078_v23 = vpop.f32.mrf.mxu0  ;;  %4069 = vmatpush1.msra.mxu0 %v2220_v10  ;;  %v2344_v24 = vld [vmem:[#allocation7 + $0xbf0] sm:$0xff]  ;;  %v2583_v9 = vadd.f32 %v14315_v0, %v11077_v29 }
 0x2b5   : > { %14309 = vst [vmem:[#allocation27_spill] sm:$0xff] %v11162_v62  ;;  %v11173_v34 = vadd.f32 %v3078_v23, %v2822_v3  ;;  %v2837_v50 = vpop.f32.mrf.mxu1  ;;  %3446 = vmatmul.mubr.f32.gmra.mxu1 %v14314_v46  ;;  %4070 = vmatprep.subr.mxu0 %v2345_v22  ;;  %v14316_v62 = vld [vmem:[#allocation30_spill] sm:$0xff]  ;;  %v2341_v3 = vld [vmem:[#allocation7 + $0xbd8] sm:$0xff]  ;;  %v11186_v23 = vadd.f32 %v10798_v33, %v10581_v30  ;;  %v14320_v14 = vld [vmem:[#allocation76_spill] sm:$0xff] }
 0x2b6   : > { %v2838_v55 = vadd.f32 %v2837_v50, %v2581_v12  ;;  %v3082_v40 = vpop.f32.mrf.mxu0  ;;  %v14317_v4 = vmax.f32 %v14316_v62, 0.0  ;;  %3451 = vmatprep.mubr.f32.mxu1 %v14318_v53  ;;  %v14321_v46 = vmax.f32 %v14320_v14, 0.0  ;;  %3820 = vmatpush2.msra.mxu1 %v2204_v6  ;;  %v14322_v62 = vld [vmem:[#allocation203_spill] sm:$0xff]  ;;  %v2200_v33 = vld [vmem:[#allocation7 + $0x770] sm:$0xff]  ;;  %v14324_v6 = vmax.f32 %v11160_v11, 0.0  ;;  %v2197_v14 = vld [vmem:[#allocation7 + $0x758] sm:$0xff] }
 0x2b7   : > { %14319 = vst [vmem:[#allocation197_spill] sm:$0xff] %v11186_v23  ;;  %v11188_v22 = vadd.f32 %v3082_v40, %v2826_v19  ;;  %v2839_v12 = vpop.f32.mrf.mxu1  ;;  %v2587_v50 = vadd.f32 %v14322_v62, %v11061_v47  ;;  %3821 = vmatprep.subr.mxu1 %v2201_v41  ;;  %4071 = vmatpush2.msra.mxu0 %v2344_v24  ;;  %v14325_v62 = vld [vmem:[#allocation205_spill] sm:$0xff]  ;;  %v14328_v41 = vmax.f32 %v11171_v31, 0.0  ;;  %v14336_v11 = vld [vmem:[#allocation36_spill] sm:$0xff] }
 0x2b8   : > { %3691 = vmatmul.mubr.f32.gmra.mxu0 %v14317_v4  ;;  %v11197_v4 = vadd.f32 %v10835_v16, %v10568_v15  ;;  %v2840_v53 = vadd.f32 %v2839_v12, %v2583_v9  ;;  %v3084_v10 = vpop.f32.mrf.mxu0  ;;  %4072 = vmatprep.subr.mxu0 %v2341_v3  ;;  %v2589_v0 = vadd.f32 %v14325_v62, %v11077_v29  ;;  %v14327_v9 = vmax.f32 %v14326_v51, 0.0  ;;  %v14330_v12 = vld [vmem:[#allocation77_spill] sm:$0xff] }
 0x2b9   : > { %3696 = vmatprep.mubr.f32.mxu0 %v14321_v46  ;;  %v11199_v19 = vadd.f32 %v3084_v10, %v2828_v5  ;;  %v2843_v40 = vpop.f32.mrf.mxu1  ;;  %3452 = vmatmul.mubr.f32.gmra.mxu1 %v14324_v6  ;;  %v2340_v46 = vld [vmem:[#allocation7 + $0xbd0] sm:$0xff]  ;;  %v2337_v5 = vld [vmem:[#allocation7 + $0xbb8] sm:$0xff]  ;;  %v11212_v10 = vadd.f32 %v10824_v59, %v10581_v30  ;;  %v14331_v6 = vmax.f32 %v14330_v12, 0.0 }
 0x2ba   : > { %14323 = vst [vmem:[#allocation199_spill] sm:$0xff] %v11197_v4  ;;  %v2844_v21 = vadd.f32 %v2843_v40, %v2587_v50  ;;  %v3088_v16 = vpop.f32.mrf.mxu0  ;;  %3457 = vmatprep.mubr.f32.mxu1 %v14328_v41  ;;  %3822 = vmatpush2.msra.mxu1 %v2200_v33  ;;  %v14332_v51 = vld [vmem:[#allocation209_spill] sm:$0xff]  ;;  %v2196_v59 = vld [vmem:[#allocation7 + $0x750] sm:$0xff]  ;;  %v14334_v33 = vmax.f32 %v11186_v23, 0.0  ;;  %v14346_v23 = vld [vmem:[#allocation39_spill] sm:$0xff] }
 0x2bb   : > { %14329 = vst [vmem:[#allocation30_spill] sm:$0xff] %v11212_v10  ;;  %v11214_v3 = vadd.f32 %v3088_v16, %v2832_v17  ;;  %v2845_v50 = vpop.f32.mrf.mxu1  ;;  %v2593_v40 = vadd.f32 %v14332_v51, %v11061_v47  ;;  %3823 = vmatprep.subr.mxu1 %v2197_v14  ;;  %4073 = vmatpush2.msra.mxu0 %v2340_v46  ;;  %v2193_v12 = vld [vmem:[#allocation7 + $0x738] sm:$0xff]  ;;  %v14335_v51 = vld [vmem:[#allocation211_spill] sm:$0xff]  ;;  %v14338_v14 = vmax.f32 %v11197_v4, 0.0 }
 0x2bc   : > { %3697 = vmatmul.mubr.f32.gmra.mxu0 %v14327_v9  ;;  %v11223_v9 = vadd.f32 %v10861_v7, %v10568_v15  ;;  %v2846_v41 = vadd.f32 %v2845_v50, %v2589_v0  ;;  %v3090_v24 = vpop.f32.mrf.mxu0  ;;  %4074 = vmatprep.subr.mxu0 %v2337_v5  ;;  %v2595_v62 = vadd.f32 %v14335_v51, %v11077_v29  ;;  %v14337_v0 = vmax.f32 %v14336_v11, 0.0  ;;  %v14340_v50 = vld [vmem:[#allocation78_spill] sm:$0xff]  ;;  %v14342_v11 = vld [vmem:[#allocation213_spill] sm:$0xff] }
 0x2bd   : > { %3702 = vmatprep.mubr.f32.mxu0 %v14331_v6  ;;  %v11225_v17 = vadd.f32 %v3090_v24, %v2834_v38  ;;  %v2849_v16 = vpop.f32.mrf.mxu1  ;;  %3458 = vmatmul.mubr.f32.gmra.mxu1 %v14334_v33  ;;  %v2336_v6 = vld [vmem:[#allocation7 + $0xbb0] sm:$0xff]  ;;  %v2333_v38 = vld [vmem:[#allocation7 + $0xb98] sm:$0xff]  ;;  %v11238_v24 = vadd.f32 %v10850_v52, %v10581_v30  ;;  %v14341_v33 = vmax.f32 %v14340_v50, 0.0 }
 0x2be   : > { %14333 = vst [vmem:[#allocation76_spill] sm:$0xff] %v11223_v9  ;;  %v2850_v31 = vadd.f32 %v2849_v16, %v2593_v40  ;;  %v3094_v7 = vpop.f32.mrf.mxu0  ;;  %3463 = vmatprep.mubr.f32.mxu1 %v14338_v14  ;;  %3824 = vmatpush2.msra.mxu1 %v2196_v59  ;;  %v2599_v16 = vadd.f32 %v14342_v11, %v11061_v47  ;;  %v2192_v52 = vld [vmem:[#allocation7 + $0x730] sm:$0xff]  ;;  %v14344_v59 = vmax.f32 %v11212_v10, 0.0  ;;  %v2189_v50 = vld [vmem:[#allocation7 + $0x718] sm:$0xff]  ;;  %v14345_v11 = vld [vmem:[#allocation214_spill] sm:$0xff] }
 0x2bf   : > { %14339 = vst [vmem:[#allocation203_spill] sm:$0xff] %v11238_v24  ;;  %v11240_v5 = vadd.f32 %v3094_v7, %v2838_v55  ;;  %v2851_v40 = vpop.f32.mrf.mxu1  ;;  %3825 = vmatprep.subr.mxu1 %v2193_v12  ;;  %4075 = vmatpush2.msra.mxu0 %v2336_v6  ;;  %v2601_v51 = vadd.f32 %v14345_v11, %v11077_v29  ;;  %v14348_v12 = vmax.f32 %v11223_v9, 0.0  ;;  %v14356_v10 = vld [vmem:[#allocation42_spill] sm:$0xff] }
 0x2c0   : > { %3703 = vmatmul.mubr.f32.gmra.mxu0 %v14337_v0  ;;  %v11249_v0 = vadd.f32 %v10887_v35, %v10568_v15  ;;  %v2852_v14 = vadd.f32 %v2851_v40, %v2595_v62  ;;  %v3096_v46 = vpop.f32.mrf.mxu0  ;;  %4076 = vmatprep.subr.mxu0 %v2333_v38  ;;  %v14347_v62 = vmax.f32 %v14346_v23, 0.0  ;;  %v14350_v40 = vld [vmem:[#allocation79_spill] sm:$0xff] }
 0x2c1   : > { %3708 = vmatprep.mubr.f32.mxu0 %v14341_v33  ;;  %v11251_v55 = vadd.f32 %v3096_v46, %v2840_v53  ;;  %v2855_v7 = vpop.f32.mrf.mxu1  ;;  %3464 = vmatmul.mubr.f32.gmra.mxu1 %v14344_v59  ;;  %v2332_v33 = vld [vmem:[#allocation7 + $0xb90] sm:$0xff]  ;;  %v2329_v53 = vld [vmem:[#allocation7 + $0xb78] sm:$0xff]  ;;  %v11264_v46 = vadd.f32 %v10876_v13, %v10581_v30  ;;  %v14351_v59 = vmax.f32 %v14350_v40, 0.0  ;;  %v14352_v23 = vld [vmem:[#allocation215_spill] sm:$0xff] }
 0x2c2   : > { %14343 = vst [vmem:[#allocation205_spill] sm:$0xff] %v11249_v0  ;;  %v2856_v4 = vadd.f32 %v2855_v7, %v2599_v16  ;;  %v3100_v35 = vpop.f32.mrf.mxu0  ;;  %3469 = vmatprep.mubr.f32.mxu1 %v14348_v12  ;;  %3826 = vmatpush2.msra.mxu1 %v2192_v52  ;;  %v2605_v7 = vadd.f32 %v14352_v23, %v11061_v47  ;;  %v2188_v13 = vld [vmem:[#allocation7 + $0x710] sm:$0xff]  ;;  %v14354_v52 = vmax.f32 %v11238_v24, 0.0  ;;  %v2185_v40 = vld [vmem:[#allocation7 + $0x6f8] sm:$0xff] }
 0x2c3   : > { %14349 = vst [vmem:[#allocation33_spill] sm:$0xff] %v11264_v46  ;;  %v11266_v38 = vadd.f32 %v3100_v35, %v2844_v21  ;;  %v2857_v16 = vpop.f32.mrf.mxu1  ;;  %3827 = vmatprep.subr.mxu1 %v2189_v50  ;;  %4077 = vmatpush2.msra.mxu0 %v2332_v33  ;;  %v14355_v23 = vld [vmem:[#allocation217_spill] sm:$0xff]  ;;  %v14358_v50 = vmax.f32 %v11249_v0, 0.0 }
 0x2c4   : > { %3709 = vmatmul.mubr.f32.gmra.mxu0 %v14347_v62  ;;  %v11275_v62 = vadd.f32 %v10913_v63, %v10568_v15  ;;  %v2858_v12 = vadd.f32 %v2857_v16, %v2601_v51  ;;  %v3102_v6 = vpop.f32.mrf.mxu0  ;;  %4078 = vmatprep.subr.mxu0 %v2329_v53  ;;  %v2607_v11 = vadd.f32 %v14355_v23, %v11077_v29  ;;  %v14357_v51 = vmax.f32 %v14356_v10, 0.0  ;;  %v14360_v16 = vld [vmem:[#allocation80_spill] sm:$0xff]  ;;  %v14362_v10 = vld [vmem:[#allocation218_spill] sm:$0xff]  ;;  %v14366_v24 = vld [vmem:[#allocation45_spill] sm:$0xff] }
 0x2c5   : > { %3714 = vmatprep.mubr.f32.mxu0 %v14351_v59  ;;  %v11277_v21 = vadd.f32 %v3102_v6, %v2846_v41  ;;  %v2861_v35 = vpop.f32.mrf.mxu1  ;;  %3470 = vmatmul.mubr.f32.gmra.mxu1 %v14354_v52  ;;  %v2328_v59 = vld [vmem:[#allocation7 + $0xb70] sm:$0xff]  ;;  %v2325_v41 = vld [vmem:[#allocation7 + $0xb58] sm:$0xff]  ;;  %v11290_v6 = vadd.f32 %v10902_v37, %v10581_v30  ;;  %v14361_v52 = vmax.f32 %v14360_v16, 0.0 }
 0x2c6   : > { %14353 = vst [vmem:[#allocation77_spill] sm:$0xff] %v11275_v62  ;;  %v2862_v9 = vadd.f32 %v2861_v35, %v2605_v7  ;;  %v3106_v63 = vpop.f32.mrf.mxu0  ;;  %3475 = vmatprep.mubr.f32.mxu1 %v14358_v50  ;;  %3828 = vmatpush2.msra.mxu1 %v2188_v13  ;;  %v2611_v35 = vadd.f32 %v14362_v10, %v11061_v47  ;;  %v2184_v37 = vld [vmem:[#allocation7 + $0x6f0] sm:$0xff]  ;;  %v14364_v13 = vmax.f32 %v11264_v46, 0.0  ;;  %v2181_v16 = vld [vmem:[#allocation7 + $0x6d8] sm:$0xff] }
 0x2c7   : > { %14359 = vst [vmem:[#allocation209_spill] sm:$0xff] %v11290_v6  ;;  %v11292_v53 = vadd.f32 %v3106_v63, %v2850_v31  ;;  %v2863_v7 = vpop.f32.mrf.mxu1  ;;  %3829 = vmatprep.subr.mxu1 %v2185_v40  ;;  %4079 = vmatpush2.msra.mxu0 %v2328_v59  ;;  %v14365_v10 = vld [vmem:[#allocation220_spill] sm:$0xff]  ;;  %v14368_v40 = vmax.f32 %v11275_v62, 0.0 }
 0x2c8   : > { %3715 = vmatmul.mubr.f32.gmra.mxu0 %v14357_v51  ;;  %v11301_v51 = vadd.f32 %v10939_v28, %v10568_v15  ;;  %v2864_v50 = vadd.f32 %v2863_v7, %v2607_v11  ;;  %v3108_v33 = vpop.f32.mrf.mxu0  ;;  %4080 = vmatprep.subr.mxu0 %v2325_v41  ;;  %v2613_v23 = vadd.f32 %v14365_v10, %v11077_v29  ;;  %v14367_v11 = vmax.f32 %v14366_v24, 0.0  ;;  %v14370_v7 = vld [vmem:[#allocation81_spill] sm:$0xff]  ;;  %v14376_v46 = vld [vmem:[#allocation48_spill] sm:$0xff] }
 0x2c9   : > { %3720 = vmatprep.mubr.f32.mxu0 %v14361_v52  ;;  %v11303_v31 = vadd.f32 %v3108_v33, %v2852_v14  ;;  %v2867_v63 = vpop.f32.mrf.mxu1  ;;  %3476 = vmatmul.mubr.f32.gmra.mxu1 %v14364_v13  ;;  %v2324_v52 = vld [vmem:[#allocation7 + $0xb50] sm:$0xff]  ;;  %v2321_v14 = vld [vmem:[#allocation7 + $0xb38] sm:$0xff]  ;;  %v11316_v33 = vadd.f32 %v10928_v8, %v10581_v30  ;;  %v14371_v13 = vmax.f32 %v14370_v7, 0.0 }
 0x2ca   : > { %14363 = vst [vmem:[#allocation211_spill] sm:$0xff] %v11301_v51  ;;  %v2868_v0 = vadd.f32 %v2867_v63, %v2611_v35  ;;  %v3112_v28 = vpop.f32.mrf.mxu0  ;;  %3481 = vmatprep.mubr.f32.mxu1 %v14368_v40  ;;  %3830 = vmatpush2.msra.mxu1 %v2184_v37  ;;  %v14372_v24 = vld [vmem:[#allocation221_spill] sm:$0xff]  ;;  %v2180_v8 = vld [vmem:[#allocation7 + $0x6d0] sm:$0xff]  ;;  %v14374_v37 = vmax.f32 %v11290_v6, 0.0  ;;  %v14386_v6 = vld [vmem:[#allocation51_spill] sm:$0xff] }
 0x2cb   : > { %14369 = vst [vmem:[#allocation36_spill] sm:$0xff] %v11316_v33  ;;  %v11318_v41 = vadd.f32 %v3112_v28, %v2856_v4  ;;  %v2869_v35 = vpop.f32.mrf.mxu1  ;;  %v2617_v63 = vadd.f32 %v14372_v24, %v11061_v47  ;;  %3831 = vmatprep.subr.mxu1 %v2181_v16  ;;  %4081 = vmatpush2.msra.mxu0 %v2324_v52  ;;  %v2177_v7 = vld [vmem:[#allocation7 + $0x6b8] sm:$0xff]  ;;  %v14375_v24 = vld [vmem:[#allocation223_spill] sm:$0xff]  ;;  %v14378_v16 = vmax.f32 %v11301_v51, 0.0 }
 0x2cc   : > { %3721 = vmatmul.mubr.f32.gmra.mxu0 %v14367_v11  ;;  %v11327_v11 = vadd.f32 %v10965_v26, %v10568_v15  ;;  %v2870_v40 = vadd.f32 %v2869_v35, %v2613_v23  ;;  %v3114_v59 = vpop.f32.mrf.mxu0  ;;  %4082 = vmatprep.subr.mxu0 %v2321_v14  ;;  %v2619_v10 = vadd.f32 %v14375_v24, %v11077_v29  ;;  %v14377_v23 = vmax.f32 %v14376_v46, 0.0  ;;  %v14380_v35 = vld [vmem:[#allocation84_spill] sm:$0xff]  ;;  %v14382_v46 = vld [vmem:[#allocation225_spill] sm:$0xff] }
 0x2cd   : > { %3726 = vmatprep.mubr.f32.mxu0 %v14371_v13  ;;  %v11329_v4 = vadd.f32 %v3114_v59, %v2858_v12  ;;  %v2873_v28 = vpop.f32.mrf.mxu1  ;;  %3482 = vmatmul.mubr.f32.gmra.mxu1 %v14374_v37  ;;  %v2320_v13 = vld [vmem:[#allocation7 + $0xb30] sm:$0xff]  ;;  %v2317_v12 = vld [vmem:[#allocation7 + $0xb18] sm:$0xff]  ;;  %v11342_v59 = vadd.f32 %v10954_v42, %v10581_v30  ;;  %v14381_v37 = vmax.f32 %v14380_v35, 0.0 }
 0x2ce   : > { %14373 = vst [vmem:[#allocation78_spill] sm:$0xff] %v11327_v11  ;;  %v2874_v62 = vadd.f32 %v2873_v28, %v2617_v63  ;;  %v3118_v26 = vpop.f32.mrf.mxu0  ;;  %3487 = vmatprep.mubr.f32.mxu1 %v14378_v16  ;;  %3832 = vmatpush2.msra.mxu1 %v2180_v8  ;;  %v2623_v28 = vadd.f32 %v14382_v46, %v11061_v47  ;;  %v2176_v42 = vld [vmem:[#allocation7 + $0x6b0] sm:$0xff]  ;;  %v14384_v8 = vmax.f32 %v11316_v33, 0.0  ;;  %v2173_v35 = vld [vmem:[#allocation7 + $0x698] sm:$0xff]  ;;  %v14385_v46 = vld [vmem:[#allocation227_spill] sm:$0xff] }
 0x2cf   : > { %14379 = vst [vmem:[#allocation213_spill] sm:$0xff] %v11342_v59  ;;  %v11344_v14 = vadd.f32 %v3118_v26, %v2862_v9  ;;  %v2875_v63 = vpop.f32.mrf.mxu1  ;;  %3833 = vmatprep.subr.mxu1 %v2177_v7  ;;  %4083 = vmatpush2.msra.mxu0 %v2320_v13  ;;  %v2625_v24 = vadd.f32 %v14385_v46, %v11077_v29  ;;  %v14388_v7 = vmax.f32 %v11327_v11, 0.0  ;;  %v14395_v11 = vld [vmem:[#allocation54_spill] sm:$0xff] }
 0x2d0   : > { %3727 = vmatmul.mubr.f32.gmra.mxu0 %v14377_v23  ;;  %v11353_v23 = vadd.f32 %v10991_v57, %v10568_v15  ;;  %v2876_v16 = vadd.f32 %v2875_v63, %v2619_v10  ;;  %v3120_v52 = vpop.f32.mrf.mxu0  ;;  %4084 = vmatprep.subr.mxu0 %v2317_v12  ;;  %v14387_v10 = vmax.f32 %v14386_v6, 0.0  ;;  %v14390_v63 = vld [vmem:[#allocation86_spill] sm:$0xff]  ;;  %v14392_v6 = vld [vmem:[#allocation229_spill] sm:$0xff] }
 0x2d1   : > { %3732 = vmatprep.mubr.f32.mxu0 %v14381_v37  ;;  %v11355_v9 = vadd.f32 %v3120_v52, %v2864_v50  ;;  %v2879_v26 = vpop.f32.mrf.mxu1  ;;  %3488 = vmatmul.mubr.f32.gmra.mxu1 %v14384_v8  ;;  %v2316_v37 = vld [vmem:[#allocation7 + $0xb10] sm:$0xff]  ;;  %v2313_v50 = vld [vmem:[#allocation7 + $0xaf8] sm:$0xff]  ;;  %v11368_v52 = vadd.f32 %v10980_v20, %v10581_v30  ;;  %v14391_v8 = vmax.f32 %v14390_v63, 0.0 }
 0x2d2   : > { %14383 = vst [vmem:[#allocation214_spill] sm:$0xff] %v11353_v23  ;;  %v2880_v51 = vadd.f32 %v2879_v26, %v2623_v28  ;;  %v3124_v57 = vpop.f32.mrf.mxu0  ;;  %3493 = vmatprep.mubr.f32.mxu1 %v14388_v7  ;;  %3834 = vmatpush2.msra.mxu1 %v2176_v42  ;;  %v2629_v26 = vadd.f32 %v14392_v6, %v11061_v47  ;;  %v2172_v20 = vld [vmem:[#allocation7 + $0x690] sm:$0xff]  ;;  %v14394_v42 = vmax.f32 %v11342_v59, 0.0  ;;  %v2169_v63 = vld [vmem:[#allocation7 + $0x678] sm:$0xff] }
 0x2d3   : > { %14389 = vst [vmem:[#allocation39_spill] sm:$0xff] %v11368_v52  ;;  %v11370_v12 = vadd.f32 %v3124_v57, %v2868_v0  ;;  %v2881_v28 = vpop.f32.mrf.mxu1  ;;  %3835 = vmatprep.subr.mxu1 %v2173_v35  ;;  %4085 = vmatpush2.msra.mxu0 %v2316_v37  ;;  %v2631_v6 = vadd.f32 %v10574_v36, %v11077_v29  ;;  %v14397_v35 = vmax.f32 %v11353_v23, 0.0  ;;  %v13682_v37 = vmax.f32 %v11368_v52, 0.0 }
 0x2d4   : > { %3733 = vmatmul.mubr.f32.gmra.mxu0 %v14387_v10  ;;  %v11379_v10 = vadd.f32 %v11017_v49, %v10568_v15  ;;  %v2882_v7 = vadd.f32 %v2881_v28, %v2625_v24  ;;  %v3126_v13 = vpop.f32.mrf.mxu0  ;;  %4086 = vmatprep.subr.mxu0 %v2313_v50  ;;  %v14396_v24 = vmax.f32 %v14395_v11, 0.0  ;;  %v14399_v28 = vld [vmem:[#allocation88_spill] sm:$0xff]  ;;  %v2635_v11 = vadd.f32 %v10601_v48, %v11061_v47 }
 0x2d5   : > { %3738 = vmatprep.mubr.f32.mxu0 %v14391_v8  ;;  %v11381_v0 = vadd.f32 %v3126_v13, %v2870_v40  ;;  %v2885_v57 = vpop.f32.mrf.mxu1  ;;  %3494 = vmatmul.mubr.f32.gmra.mxu1 %v14394_v42  ;;  %v2312_v8 = vld [vmem:[#allocation7 + $0xaf0] sm:$0xff]  ;;  %v2309_v40 = vld [vmem:[#allocation7 + $0xad8] sm:$0xff]  ;;  %v11394_v13 = vadd.f32 %v11006_v58, %v10581_v30  ;;  %v14400_v42 = vmax.f32 %v14399_v28, 0.0  ;;  %v2637_v28 = vadd.f32 %v10612_v39, %v11077_v29 }
 0x2d6   : > { %14393 = vst [vmem:[#allocation79_spill] sm:$0xff] %v11379_v10  ;;  %v2886_v46 = vadd.f32 %v2885_v57, %v2629_v26  ;;  %v3130_v49 = vpop.f32.mrf.mxu0  ;;  %3499 = vmatprep.mubr.f32.mxu1 %v14397_v35  ;;  %3836 = vmatpush2.msra.mxu1 %v2172_v20  ;;  %v11405_v57 = vadd.f32 %v11043_v2, %v10568_v15  ;;  %v2168_v58 = vld [vmem:[#allocation7 + $0x670] sm:$0xff]  ;;  %v2165_v20 = vld [vmem:[#allocation7 + $0x658] sm:$0xff] }
 0x2d7   : > { %14398 = vst [vmem:[#allocation215_spill] sm:$0xff] %v11394_v13  ;;  %v11396_v50 = vadd.f32 %v3130_v49, %v2874_v62  ;;  %v2887_v36 = vpop.f32.mrf.mxu1  ;;  %3837 = vmatprep.subr.mxu1 %v2169_v63  ;;  %4087 = vmatpush2.msra.mxu0 %v2312_v8  ;;  %v2308_v48 = vld [vmem:[#allocation7 + $0xad0] sm:$0xff]  ;;  %v14402_v26 = vld [vmem:[#allocation57_spill] sm:$0xff]  ;;  %v14404_v63 = vmax.f32 %v11379_v10, 0.0  ;;  %v13684_v8 = vmax.f32 %v11394_v13, 0.0  ;;  %v14448_v10 = vld [vmem:[#allocation115_spill] sm:$0xff] }
 0x2d8   : > { %3739 = vmatmul.mubr.f32.gmra.mxu0 %v14396_v24  ;;  %14401 = vst [vmem:[#allocation217_spill] sm:$0xff] %v11405_v57  ;;  %v2888_v24 = vadd.f32 %v2887_v36, %v2631_v6  ;;  %v3132_v35 = vpop.f32.mrf.mxu0  ;;  %4088 = vmatprep.subr.mxu0 %v2309_v40  ;;  %v14403_v6 = vmax.f32 %v14402_v26, 0.0  ;;  %v11420_v36 = vadd.f32 %v11032_v27, %v10581_v30  ;;  %v13683_v26 = vmax.f32 %v11405_v57, 0.0  ;;  %v2164_v27 = vld [vmem:[#allocation7 + $0x650] sm:$0xff]  ;;  %v14444_v57 = vld [vmem:[#allocation34_spill] sm:$0xff] }
 0x2d9   : > { %3744 = vmatprep.mubr.f32.mxu0 %v14400_v42  ;;  %v11407_v62 = vadd.f32 %v3132_v35, %v2876_v16  ;;  %v2891_v49 = vpop.f32.mrf.mxu1  ;;  %3500 = vmatmul.mubr.f32.gmra.mxu1 %v13682_v37  ;;  %v2305_v16 = vld [vmem:[#allocation7 + $0xab8] sm:$0xff]  ;;  %v14406_v35 = vld [vmem:[#allocation91_spill] sm:$0xff] }
 0x2da   : > { %v2892_v42 = vadd.f32 %v2891_v49, %v2635_v11  ;;  %v3136_v2 = vpop.f32.mrf.mxu0  ;;  %3505 = vmatprep.mubr.f32.mxu1 %v14404_v63  ;;  %14405 = vst [vmem:[#allocation42_spill] sm:$0xff] %v11420_v36  ;;  %v14407_v37 = vmax.f32 %v14406_v35, 0.0  ;;  %3838 = vmatpush2.msra.mxu1 %v2168_v58  ;;  %v2641_v11 = vadd.f32 %v10637_v44, %v11061_v47  ;;  %v2304_v44 = vld [vmem:[#allocation7 + $0xab0] sm:$0xff] }
 0x2db   : > { %v11422_v40 = vadd.f32 %v3136_v2, %v2880_v51  ;;  %v2893_v39 = vpop.f32.mrf.mxu1  ;;  %v11431_v49 = vadd.f32 %v11072_v1, %v10568_v15  ;;  %3839 = vmatprep.subr.mxu1 %v2165_v20  ;;  %4089 = vmatpush2.msra.mxu0 %v2308_v48  ;;  %v2643_v58 = vadd.f32 %v10648_v18, %v11077_v29  ;;  %v14409_v1 = vld [vmem:[#allocation60_spill] sm:$0xff]  ;;  %v13687_v20 = vmax.f32 %v11420_v36, 0.0 }
 0x2dc   : > { %3745 = vmatmul.mubr.f32.gmra.mxu0 %v14403_v6  ;;  %v2894_v6 = vadd.f32 %v2893_v39, %v2637_v28  ;;  %v3138_v63 = vpop.f32.mrf.mxu0  ;;  %4090 = vmatprep.subr.mxu0 %v2305_v16  ;;  %v14410_v28 = vmax.f32 %v14409_v1, 0.0  ;;  %v11446_v48 = vadd.f32 %v11058_v56, %v10581_v30  ;;  %v14412_v39 = vld [vmem:[#allocation95_spill] sm:$0xff]  ;;  %v2157_v56 = vld [vmem:[#allocation7 + $0x618] sm:$0xff] }
 0x2dd   : > { %3750 = vmatprep.mubr.f32.mxu0 %v14407_v37  ;;  %14408 = vst [vmem:[#allocation80_spill] sm:$0xff] %v11431_v49  ;;  %v11433_v51 = vadd.f32 %v3138_v63, %v2882_v7  ;;  %v2897_v2 = vpop.f32.mrf.mxu1  ;;  %3506 = vmatmul.mubr.f32.gmra.mxu1 %v13684_v8  ;;  %v2161_v37 = vld [vmem:[#allocation7 + $0x638] sm:$0xff]  ;;  %v14413_v63 = vmax.f32 %v14412_v39, 0.0  ;;  %v14414_v39 = vld [vmem:[#allocation63_spill] sm:$0xff] }
 0x2de   : > { %v2898_v35 = vadd.f32 %v2897_v2, %v2641_v11  ;;  %v3142_v15 = vpop.f32.mrf.mxu0  ;;  %3511 = vmatprep.mubr.f32.mxu1 %v13683_v26  ;;  %v2301_v7 = vld [vmem:[#allocation7 + $0xa98] sm:$0xff]  ;;  %14411 = vst [vmem:[#allocation218_spill] sm:$0xff] %v11446_v48  ;;  %3840 = vmatpush2.msra.mxu1 %v2164_v27  ;;  %v2647_v11 = vadd.f32 %v10669_v54, %v11061_v47  ;;  %v13685_v2 = vmax.f32 %v11431_v49, 0.0  ;;  %v2160_v26 = vld [vmem:[#allocation7 + $0x630] sm:$0xff] }
 0x2df   : > { %v11448_v16 = vadd.f32 %v3142_v15, %v2886_v46  ;;  %v2899_v18 = vpop.f32.mrf.mxu1  ;;  %3841 = vmatprep.subr.mxu1 %v2161_v37  ;;  %4091 = vmatpush2.msra.mxu0 %v2304_v44  ;;  %v2300_v46 = vld [vmem:[#allocation7 + $0xa90] sm:$0xff]  ;;  %v2649_v27 = vadd.f32 %v10680_v45, %v11077_v29  ;;  %v13686_v37 = vmax.f32 %v11446_v48, 0.0  ;;  %v2653_v45 = vadd.f32 %v10696_v43, %v11061_v47 }
 0x2e0   : > { %3751 = vmatmul.mubr.f32.gmra.mxu0 %v14410_v28  ;;  %v2900_v1 = vadd.f32 %v2899_v18, %v2643_v58  ;;  %v3144_v28 = vpop.f32.mrf.mxu0  ;;  %4092 = vmatprep.subr.mxu0 %v2301_v7  ;;  %v14415_v58 = vmax.f32 %v14414_v39, 0.0 }
 0x2e1   : > { %3756 = vmatprep.mubr.f32.mxu0 %v14413_v63  ;;  %v11455_v8 = vadd.f32 %v3144_v28, %v2888_v24  ;;  %v2903_v30 = vpop.f32.mrf.mxu1  ;;  %3512 = vmatmul.mubr.f32.gmra.mxu1 %v13687_v20  ;;  %v2297_v24 = vld [vmem:[#allocation7 + $0xa78] sm:$0xff]  ;;  %v14416_v63 = vld [vmem:[#allocation100_spill] sm:$0xff] }
 0x2e2   : > { %v2904_v54 = vadd.f32 %v2903_v30, %v2647_v11  ;;  %v3148_v15 = vpop.f32.mrf.mxu0  ;;  %3517 = vmatprep.mubr.f32.mxu1 %v13685_v2  ;;  %v14417_v18 = vmax.f32 %v14416_v63, 0.0  ;;  %3842 = vmatpush2.msra.mxu1 %v2160_v26  ;;  %v2156_v28 = vld [vmem:[#allocation7 + $0x610] sm:$0xff]  ;;  %v2655_v26 = vadd.f32 %v10707_v60, %v11077_v29  ;;  %v14418_v2 = vld [vmem:[#allocation66_spill] sm:$0xff] }
 0x2e3   : > { %v11466_v44 = vadd.f32 %v3148_v15, %v2892_v42  ;;  %v2905_v7 = vpop.f32.mrf.mxu1  ;;  %3843 = vmatprep.subr.mxu1 %v2157_v56  ;;  %4093 = vmatpush2.msra.mxu0 %v2300_v46  ;;  %v2409_v42 = vld [vmem:[#allocation7 + $0xdf8] sm:$0xff]  ;;  %v2296_v15 = vld [vmem:[#allocation7 + $0xa70] sm:$0xff]  ;;  %v14419_v43 = vmax.f32 %v14418_v2, 0.0 }
 0x2e4   : > { %3757 = vmatmul.mubr.f32.gmra.mxu0 %v14415_v58  ;;  %v2906_v11 = vadd.f32 %v2905_v7, %v2649_v27  ;;  %v3150_v30 = vpop.f32.mrf.mxu0  ;;  %4094 = vmatprep.subr.mxu0 %v2297_v24  ;;  %v2293_v56 = vld [vmem:[#allocation7 + $0xa58] sm:$0xff]  ;;  %v2408_v2 = vld [vmem:[#allocation7 + $0xdf0] sm:$0xff] }
 0x2e5   : > { %3762 = vmatprep.mubr.f32.mxu0 %v14417_v18  ;;  %v11472_v39 = vadd.f32 %v3150_v30, %v2894_v6  ;;  %v2909_v58 = vpop.f32.mrf.mxu1  ;;  %3518 = vmatmul.mubr.f32.gmra.mxu1 %v13686_v37  ;;  %v14420_v6 = vld [vmem:[#allocation104_spill] sm:$0xff]  ;;  %v14422_v7 = vld [vmem:[#allocation105_spill] sm:$0xff] }
 0x2e6   : > { %v2910_v63 = vadd.f32 %v2909_v58, %v2653_v45  ;;  %v3154_v18 = vpop.f32.mrf.mxu0  ;;  %3844 = vmatpush2.msra.mxu1 %v2156_v28  ;;  %v14421_v27 = vmax.f32 %v14420_v6, 0.0  ;;  %v14423_v30 = vmax.f32 %v14422_v7, 0.0  ;;  %v14424_v37 = vld [vmem:[#allocation28_spill] sm:$0xff]  ;;  %4095 = vmatpush2.msra.mxu0 %v2296_v15  ;;  %v2405_v6 = vld [vmem:[#allocation7 + $0xdd8] sm:$0xff] }
 0x2e7   : > { %v11480_v46 = vadd.f32 %v3154_v18, %v2898_v35  ;;  %v2911_v24 = vpop.f32.mrf.mxu1  ;;  %v2659_v20 = vadd.f32 %v14424_v37, %v11061_v47  ;;  %4295 = vmatprep.subr.mxu1 %v2409_v42  ;;  %v14425_v35 = vld [vmem:[#allocation108_spill] sm:$0xff]  ;;  %4096 = vmatprep.subr.mxu0 %v2293_v56  ;;  %v14428_v37 = vld [vmem:[#allocation69_spill] sm:$0xff]  ;;  %v14430_v42 = vld [vmem:[#allocation110_spill] sm:$0xff] }
 0x2e8   : > { %3763 = vmatmul.mubr.f32.gmra.mxu0 %v14419_v43  ;;  %3845 = vmatprep.mubr.f32.mxu1 %v14423_v30  ;;  %v2912_v60 = vadd.f32 %v2911_v24, %v2655_v26  ;;  %v3156_v45 = vpop.f32.mrf.mxu0  ;;  %v14426_v18 = vmax.f32 %v14425_v35, 0.0  ;;  %v2292_v43 = vld [vmem:[#allocation7 + $0xa50] sm:$0xff]  ;;  %v14429_v26 = vmax.f32 %v14428_v37, 0.0  ;;  %v14431_v15 = vmax.f32 %v14430_v42, 0.0 }
 0x2e9   : > { %3768 = vmatprep.mubr.f32.mxu0 %v14421_v27  ;;  %v11488_v58 = vadd.f32 %v3156_v45, %v2900_v1  ;;  %v2915_v28 = vpop.f32.mrf.mxu1  ;;  %v14427_v27 = vld [vmem:[#allocation245_spill] sm:$0xff]  ;;  %v14432_v45 = vld [vmem:[#allocation111_spill] sm:$0xff]  ;;  %4097 = vmatpush2.msra.mxu0 %v2292_v43  ;;  %v14435_v42 = vld [vmem:[#allocation112_spill] sm:$0xff] }
 0x2ea   : > { %3846 = vmatmul.mubr.f32.vlgmr.msra.gmra.mxu1 %v14426_v18  ;;  %v2661_v7 = vadd.f32 %v14427_v27, %v11077_v29  ;;  %v2916_v30 = vadd.f32 %v2915_v28, %v2659_v20  ;;  %v3160_v48 = vpop.f32.mrf.mxu0  ;;  %v2289_v1 = vld [vmem:[#allocation7 + $0xa38] sm:$0xff]  ;;  %v14433_v35 = vmax.f32 %v14432_v45, 0.0  ;;  %v14434_v18 = vld [vmem:[#allocation31_spill] sm:$0xff]  ;;  %v2288_v28 = vld [vmem:[#allocation7 + $0xa30] sm:$0xff] }
 0x2eb   : > { %3851 = vmatprep.mubr.f32.mxu1 %v14431_v15  ;;  %v11498_v24 = vadd.f32 %v3160_v48, %v2904_v54  ;;  %4296 = vmatpush1.msra.mxu1 %v2408_v2  ;;  %v2917_v56 = vpop.f32.mrf.mxu1  ;;  %v2665_v49 = vadd.f32 %v14434_v18, %v11061_v47  ;;  %v14436_v15 = vmax.f32 %v14435_v42, 0.0  ;;  %v2404_v48 = vld [vmem:[#allocation7 + $0xdd0] sm:$0xff]  ;;  %v2285_v54 = vld [vmem:[#allocation7 + $0xa18] sm:$0xff]  ;;  %v14437_v2 = vld [vmem:[#allocation247_spill] sm:$0xff] }
 0x2ec   : > { %3769 = vmatmul.mubr.f32.gmra.mxu0 %v14429_v26  ;;  %v2918_v27 = vadd.f32 %v2917_v56, %v2661_v7  ;;  %v3162_v20 = vpop.f32.mrf.mxu0  ;;  %4297 = vmatprep.subr.mxu1 %v2405_v6  ;;  %v2667_v45 = vadd.f32 %v14437_v2, %v11077_v29  ;;  %v14438_v18 = vld [vmem:[#allocation72_spill] sm:$0xff]  ;;  %v14440_v43 = vld [vmem:[#allocation113_spill] sm:$0xff]  ;;  %v2671_v2 = vadd.f32 %v14444_v57, %v11061_v47  ;;  %v14449_v57 = vmax.f32 %v14448_v10, 0.0 }
 0x2ed   : > { %3774 = vmatprep.mubr.f32.mxu0 %v14433_v35  ;;  %v11504_v37 = vadd.f32 %v3162_v20, %v2906_v11  ;;  %v2921_v26 = vpop.f32.mrf.mxu1  ;;  %4098 = vmatprep.subr.mxu0 %v2289_v1  ;;  %v14439_v7 = vmax.f32 %v14438_v18, 0.0  ;;  %v14441_v6 = vmax.f32 %v14440_v43, 0.0  ;;  %v2284_v11 = vld [vmem:[#allocation7 + $0xa10] sm:$0xff]  ;;  %v14442_v20 = vld [vmem:[#allocation114_spill] sm:$0xff] }
 0x2ee   : > { %3852 = vmatmul.mubr.f32.gmra.mxu1 %v14436_v15  ;;  %v2922_v35 = vadd.f32 %v2921_v26, %v2665_v49  ;;  %v3166_v36 = vpop.f32.mrf.mxu0  ;;  %4099 = vmatpush2.msra.mxu0 %v2288_v28  ;;  %v14443_v42 = vmax.f32 %v14442_v20, 0.0  ;;  %v2401_v15 = vld [vmem:[#allocation7 + $0xdb8] sm:$0xff]  ;;  %v14445_v43 = vld [vmem:[#allocation116_spill] sm:$0xff] }
 0x2ef   : > { %3857 = vmatprep.mubr.f32.mxu1 %v14441_v6  ;;  %v11514_v56 = vadd.f32 %v3166_v36, %v2910_v63  ;;  %v2923_v1 = vpop.f32.mrf.mxu1  ;;  %4298 = vmatpush1.msra.mxu1 %v2404_v48  ;;  %v14446_v36 = vmax.f32 %v14445_v43, 0.0  ;;  %v2400_v63 = vld [vmem:[#allocation7 + $0xdb0] sm:$0xff]  ;;  %v5351_v28 = vld [vmem:[#allocation10 + $0xf8] sm:$0xff] }
 0x2f0   : > { %3775 = vmatmul.mubr.f32.gmra.mxu0 %v14439_v7  ;;  %v2924_v49 = vadd.f32 %v2923_v1, %v2667_v45  ;;  %v3168_v26 = vpop.f32.mrf.mxu0  ;;  %4100 = vmatprep.subr.mxu0 %v2285_v54  ;;  %v14447_v6 = vld [vmem:[#allocation249_spill] sm:$0xff] }
 0x2f1   : > { %4102 = vmatprep.mubr.f32.mxu0 %v14443_v42  ;;  %v11520_v18 = vadd.f32 %v3168_v26, %v2912_v60  ;;  %4101 = vmatpush2.msra.mxu0 %v2284_v11  ;;  %v2927_v7 = vpop.f32.mrf.mxu1  ;;  %v2673_v20 = vadd.f32 %v14447_v6, %v11077_v29  ;;  %v2397_v48 = vld [vmem:[#allocation7 + $0xd98] sm:$0xff]  ;;  %v14450_v60 = vld [vmem:[#allocation119_spill] sm:$0xff]  ;;  %v14452_v11 = vld [vmem:[#allocation118_spill] sm:$0xff] }
 0x2f2   : > { %3858 = vmatmul.mubr.f32.gmra.mxu1 %v14446_v36  ;;  %v2928_v42 = vadd.f32 %v2927_v7, %v2671_v2  ;;  %v3172_v13 = vpop.f32.mrf.mxu0  ;;  %4299 = vmatprep.subr.mxu1 %v2401_v15  ;;  %v14451_v45 = vmax.f32 %v14450_v60, 0.0  ;;  %v14453_v1 = vmax.f32 %v14452_v11, 0.0  ;;  %v14454_v43 = vld [vmem:[#allocation37_spill] sm:$0xff]  ;;  %v2396_v6 = vld [vmem:[#allocation7 + $0xd90] sm:$0xff] }
 0x2f3   : > { %v11528_v54 = vadd.f32 %v3172_v13, %v2916_v30  ;;  %v2929_v26 = vpop.f32.mrf.mxu1  ;;  %v2677_v36 = vadd.f32 %v14454_v43, %v11061_v47  ;;  %4300 = vmatpush1.msra.mxu1 %v2400_v63  ;;  %5460 = vmatprep.subr.mxu0 %v5351_v28  ;;  %v14455_v13 = vld [vmem:[#allocation121_spill] sm:$0xff]  ;;  %v14458_v43 = vld [vmem:[#allocation120_spill] sm:$0xff] }
 0x2f4   : > { %4103 = vmatmul.mubr.f32.vlgmr.msra.gmra.mxu0 %v14449_v57  ;;  %3863 = vmatprep.mubr.f32.mxu1 %v14451_v45  ;;  %v2930_v2 = vadd.f32 %v2929_v26, %v2673_v20  ;;  %v3174_v7 = vpop.f32.mrf.mxu0  ;;  %v14456_v30 = vmax.f32 %v14455_v13, 0.0  ;;  %v2393_v57 = vld [vmem:[#allocation7 + $0xd78] sm:$0xff]  ;;  %v14457_v45 = vld [vmem:[#allocation251_spill] sm:$0xff]  ;;  %v14459_v63 = vmax.f32 %v14458_v43, 0.0  ;;  %v14460_v20 = vld [vmem:[#allocation124_spill] sm:$0xff] }
 0x2f5   : > { %4108 = vmatprep.mubr.f32.mxu0 %v14453_v1  ;;  %v11536_v10 = vadd.f32 %v3174_v7, %v2918_v27  ;;  %v2933_v15 = vpop.f32.mrf.mxu1  ;;  %4301 = vmatprep.subr.mxu1 %v2397_v48  ;;  %v5350_v60 = vld [vmem:[#allocation10 + $0xf0] sm:$0xff]  ;;  %v2679_v11 = vadd.f32 %v14457_v45, %v11077_v29  ;;  %v14461_v26 = vmax.f32 %v14460_v20, 0.0  ;;  %v5349_v27 = vld [vmem:[#allocation10 + $0xe8] sm:$0xff]  ;;  %v14462_v7 = vld [vmem:[#allocation122_spill] sm:$0xff] }
 0x2f6   : > { %3864 = vmatmul.mubr.f32.gmra.mxu1 %v14456_v30  ;;  %v2934_v1 = vadd.f32 %v2933_v15, %v2677_v36  ;;  %v3178_v52 = vpop.f32.mrf.mxu0  ;;  %v14463_v13 = vmax.f32 %v14462_v7, 0.0  ;;  %v14464_v30 = vld [vmem:[#allocation40_spill] sm:$0xff]  ;;  %5461 = vmatpush1.msra.mxu0 %v5350_v60  ;;  %v14465_v20 = vld [vmem:[#allocation126_spill] sm:$0xff] }
 0x2f7   : > { %3869 = vmatprep.mubr.f32.mxu1 %v14461_v26  ;;  %v11546_v28 = vadd.f32 %v3178_v52, %v2922_v35  ;;  %4302 = vmatpush1.msra.mxu1 %v2396_v6  ;;  %v2935_v48 = vpop.f32.mrf.mxu1  ;;  %v2683_v23 = vadd.f32 %v14464_v30, %v11061_v47  ;;  %v2392_v15 = vld [vmem:[#allocation7 + $0xd70] sm:$0xff]  ;;  %v14466_v26 = vmax.f32 %v14465_v20, 0.0  ;;  %v2389_v52 = vld [vmem:[#allocation7 + $0xd58] sm:$0xff]  ;;  %v5348_v35 = vld [vmem:[#allocation10 + $0xe0] sm:$0xff] }
 0x2f8   : > { %4109 = vmatmul.mubr.f32.gmra.mxu0 %v14459_v63  ;;  %v2936_v45 = vadd.f32 %v2935_v48, %v2679_v11  ;;  %v3180_v36 = vpop.f32.mrf.mxu0  ;;  %4303 = vmatprep.subr.mxu1 %v2393_v57  ;;  %v14467_v6 = vld [vmem:[#allocation253_spill] sm:$0xff]  ;;  %v14470_v57 = vld [vmem:[#allocation128_spill] sm:$0xff] }
 0x2f9   : > { %4114 = vmatprep.mubr.f32.mxu0 %v14463_v13  ;;  %v11552_v43 = vadd.f32 %v3180_v36, %v2924_v49  ;;  %v2939_v63 = vpop.f32.mrf.mxu1  ;;  %5462 = vmatprep.subr.mxu0 %v5349_v27  ;;  %v2685_v7 = vadd.f32 %v14467_v6, %v11077_v29  ;;  %v14468_v30 = vld [vmem:[#allocation125_spill] sm:$0xff]  ;;  %v14471_v48 = vmax.f32 %v14470_v57, 0.0  ;;  %v14473_v36 = vld [vmem:[#allocation127_spill] sm:$0xff]  ;;  %v14477_v57 = vld [vmem:[#allocation130_spill] sm:$0xff] }
 0x2fa   : > { %3870 = vmatmul.mubr.f32.gmra.mxu1 %v14466_v26  ;;  %v2940_v13 = vadd.f32 %v2939_v63, %v2683_v23  ;;  %v3184_v59 = vpop.f32.mrf.mxu0  ;;  %v14469_v11 = vmax.f32 %v14468_v30, 0.0  ;;  %v5347_v49 = vld [vmem:[#allocation10 + $0xd8] sm:$0xff]  ;;  %v14474_v20 = vmax.f32 %v14473_v36, 0.0  ;;  %v14475_v26 = vld [vmem:[#allocation43_spill] sm:$0xff]  ;;  %v2388_v63 = vld [vmem:[#allocation7 + $0xd50] sm:$0xff]  ;;  %5463 = vmatpush1.msra.mxu0 %v5348_v35 }
 0x2fb   : > { %3875 = vmatprep.mubr.f32.mxu1 %v14471_v48  ;;  %v11562_v60 = vadd.f32 %v3184_v59, %v2928_v42  ;;  %4304 = vmatpush1.msra.mxu1 %v2392_v15  ;;  %v2941_v27 = vpop.f32.mrf.mxu1  ;;  %v2689_v33 = vadd.f32 %v14475_v26, %v11061_v47  ;;  %v14478_v48 = vmax.f32 %v14477_v57, 0.0  ;;  %v2385_v59 = vld [vmem:[#allocation7 + $0xd38] sm:$0xff]  ;;  %v14479_v15 = vld [vmem:[#allocation255_spill] sm:$0xff] }
 0x2fc   : > { %4115 = vmatmul.mubr.f32.gmra.mxu0 %v14469_v11  ;;  %v2942_v6 = vadd.f32 %v2941_v27, %v2685_v7  ;;  %v3186_v23 = vpop.f32.mrf.mxu0  ;;  %4305 = vmatprep.subr.mxu1 %v2389_v52  ;;  %v5346_v42 = vld [vmem:[#allocation10 + $0xd0] sm:$0xff]  ;;  %v2691_v36 = vadd.f32 %v14479_v15, %v11077_v29 }
 0x2fd   : > { %14472 = vst [vmem:[#allocation220_spill] sm:$0xff] %v11562_v60  ;;  %4120 = vmatprep.mubr.f32.mxu0 %v14474_v20  ;;  %v11568_v30 = vadd.f32 %v3186_v23, %v2930_v2  ;;  %v2945_v11 = vpop.f32.mrf.mxu1  ;;  %5464 = vmatprep.subr.mxu0 %v5347_v49  ;;  %v14480_v26 = vld [vmem:[#allocation129_spill] sm:$0xff]  ;;  %v14482_v52 = vld [vmem:[#allocation132_spill] sm:$0xff]  ;;  %v14485_v23 = vld [vmem:[#allocation131_spill] sm:$0xff] }
 0x2fe   : > { %3876 = vmatmul.mubr.f32.gmra.mxu1 %v14478_v48  ;;  %v2946_v20 = vadd.f32 %v2945_v11, %v2689_v33  ;;  %v3190_v60 = vpop.f32.mrf.mxu0  ;;  %v14481_v7 = vmax.f32 %v14480_v26, 0.0  ;;  %v14483_v27 = vmax.f32 %v14482_v52, 0.0  ;;  %v5345_v2 = vld [vmem:[#allocation10 + $0xc8] sm:$0xff]  ;;  %v14486_v57 = vmax.f32 %v14485_v23, 0.0  ;;  %v14487_v48 = vld [vmem:[#allocation46_spill] sm:$0xff]  ;;  %5465 = vmatpush1.msra.mxu0 %v5346_v42 }
 0x2ff   : > { %14476 = vst [vmem:[#allocation45_spill] sm:$0xff] %v11568_v30  ;;  %v11578_v35 = vadd.f32 %v3190_v60, %v2934_v1  ;;  %4306 = vmatpush1.msra.mxu1 %v2388_v63  ;;  %v2947_v49 = vpop.f32.mrf.mxu1  ;;  %v2695_v30 = vadd.f32 %v14487_v48, %v11061_v47  ;;  %v2384_v11 = vld [vmem:[#allocation7 + $0xd30] sm:$0xff]  ;;  %v14489_v52 = vld [vmem:[#allocation134_spill] sm:$0xff]  ;;  %v2381_v1 = vld [vmem:[#allocation7 + $0xd18] sm:$0xff]  ;;  %5466 = vmatprep.subr.mxu0 %v5345_v2 }
 0x300   : > { %4121 = vmatmul.mubr.f32.gmra.mxu0 %v14481_v7  ;;  %3881 = vmatprep.mubr.f32.mxu1 %v14483_v27  ;;  %v2948_v15 = vadd.f32 %v2947_v49, %v2691_v36  ;;  %v3192_v33 = vpop.f32.mrf.mxu0  ;;  %v14490_v27 = vmax.f32 %v14489_v52, 0.0  ;;  %v5344_v60 = vld [vmem:[#allocation10 + $0xc0] sm:$0xff]  ;;  %v14491_v63 = vld [vmem:[#allocation257_spill] sm:$0xff] }
 0x301   : > { %14484 = vst [vmem:[#allocation81_spill] sm:$0xff] %v11578_v35  ;;  %4126 = vmatprep.mubr.f32.mxu0 %v14486_v57  ;;  %4307 = vmatprep.subr.mxu1 %v2385_v59  ;;  %v11584_v26 = vadd.f32 %v3192_v33, %v2936_v45  ;;  %v2951_v7 = vpop.f32.mrf.mxu1  ;;  %v2697_v23 = vadd.f32 %v14491_v63, %v11077_v29  ;;  %v14492_v48 = vld [vmem:[#allocation133_spill] sm:$0xff]  ;;  %v14494_v59 = vld [vmem:[#allocation136_spill] sm:$0xff]  ;;  %v14497_v33 = vld [vmem:[#allocation135_spill] sm:$0xff] }
 0x302   : > { %3882 = vmatmul.mubr.f32.gmra.mxu1 %v14490_v27  ;;  %v2952_v57 = vadd.f32 %v2951_v7, %v2695_v30  ;;  %v3196_v35 = vpop.f32.mrf.mxu0  ;;  %v14493_v36 = vmax.f32 %v14492_v48, 0.0  ;;  %v14495_v49 = vmax.f32 %v14494_v59, 0.0  ;;  %v5343_v45 = vld [vmem:[#allocation10 + $0xb8] sm:$0xff]  ;;  %v14498_v52 = vmax.f32 %v14497_v33, 0.0  ;;  %v2380_v7 = vld [vmem:[#allocation7 + $0xd10] sm:$0xff]  ;;  %5467 = vmatpush1.msra.mxu0 %v5344_v60 }
 0x303   : > { %14488 = vst [vmem:[#allocation221_spill] sm:$0xff] %v11584_v26  ;;  %v11594_v42 = vadd.f32 %v3196_v35, %v2940_v13  ;;  %4308 = vmatpush1.msra.mxu1 %v2384_v11  ;;  %v2953_v2 = vpop.f32.mrf.mxu1  ;;  %v14499_v27 = vld [vmem:[#allocation49_spill] sm:$0xff]  ;;  %v14501_v59 = vld [vmem:[#allocation138_spill] sm:$0xff]  ;;  %5468 = vmatprep.subr.mxu0 %v5343_v45  ;;  %v14503_v11 = vld [vmem:[#allocation259_spill] sm:$0xff] }
 0x304   : > { %4127 = vmatmul.mubr.f32.gmra.mxu0 %v14493_v36  ;;  %3887 = vmatprep.mubr.f32.mxu1 %v14495_v49  ;;  %v2701_v26 = vadd.f32 %v14499_v27, %v11061_v47  ;;  %v2954_v63 = vadd.f32 %v2953_v2, %v2697_v23  ;;  %v3198_v30 = vpop.f32.mrf.mxu0  ;;  %v14502_v49 = vmax.f32 %v14501_v59, 0.0  ;;  %v2377_v13 = vld [vmem:[#allocation7 + $0xcf8] sm:$0xff]  ;;  %v2703_v33 = vadd.f32 %v14503_v11, %v11077_v29 }
 0x305   : > { %14496 = vst [vmem:[#allocation223_spill] sm:$0xff] %v11594_v42  ;;  %4132 = vmatprep.mubr.f32.mxu0 %v14498_v52  ;;  %4309 = vmatprep.subr.mxu1 %v2381_v1  ;;  %v11600_v48 = vadd.f32 %v3198_v30, %v2942_v6  ;;  %v2957_v36 = vpop.f32.mrf.mxu1  ;;  %v5342_v35 = vld [vmem:[#allocation10 + $0xb0] sm:$0xff]  ;;  %v5341_v6 = vld [vmem:[#allocation10 + $0xa8] sm:$0xff] }
 0x306   : > { %3888 = vmatmul.mubr.f32.gmra.mxu1 %v14502_v49  ;;  %v2958_v52 = vadd.f32 %v2957_v36, %v2701_v26  ;;  %v3202_v42 = vpop.f32.mrf.mxu0  ;;  %v14504_v27 = vld [vmem:[#allocation137_spill] sm:$0xff]  ;;  %v14506_v1 = vld [vmem:[#allocation140_spill] sm:$0xff]  ;;  %v14509_v30 = vld [vmem:[#allocation139_spill] sm:$0xff]  ;;  %5469 = vmatpush1.msra.mxu0 %v5342_v35 }
 0x307   : > { %14500 = vst [vmem:[#allocation48_spill] sm:$0xff] %v11600_v48  ;;  %v14505_v23 = vmax.f32 %v14504_v27, 0.0  ;;  %v14507_v2 = vmax.f32 %v14506_v1, 0.0  ;;  %v11610_v60 = vadd.f32 %v3202_v42, %v2946_v20  ;;  %v14510_v59 = vmax.f32 %v14509_v30, 0.0  ;;  %4310 = vmatpush1.msra.mxu1 %v2380_v7  ;;  %v2959_v45 = vpop.f32.mrf.mxu1  ;;  %v14511_v49 = vld [vmem:[#allocation52_spill] sm:$0xff]  ;;  %v14513_v1 = vld [vmem:[#allocation142_spill] sm:$0xff]  ;;  %5470 = vmatprep.subr.mxu0 %v5341_v6 }
 0x308   : > { %v2707_v48 = vadd.f32 %v14511_v49, %v11061_v47  ;;  %v2960_v11 = vadd.f32 %v2959_v45, %v2703_v33  ;;  %v3204_v26 = vpop.f32.mrf.mxu0  ;;  %4311 = vmatprep.subr.mxu1 %v2377_v13  ;;  %v2376_v36 = vld [vmem:[#allocation7 + $0xcf0] sm:$0xff]  ;;  %v2373_v20 = vld [vmem:[#allocation7 + $0xcd8] sm:$0xff]  ;;  %v5340_v42 = vld [vmem:[#allocation10 + $0xa0] sm:$0xff] }
 0x309   : > { %4133 = vmatmul.mubr.f32.gmra.mxu0 %v14505_v23  ;;  %3893 = vmatprep.mubr.f32.mxu1 %v14507_v2  ;;  %14508 = vst [vmem:[#allocation84_spill] sm:$0xff] %v11610_v60  ;;  %v11616_v27 = vadd.f32 %v3204_v26, %v2948_v15  ;;  %v2963_v23 = vpop.f32.mrf.mxu1  ;;  %v14514_v2 = vmax.f32 %v14513_v1, 0.0  ;;  %v14515_v7 = vld [vmem:[#allocation261_spill] sm:$0xff]  ;;  %v14518_v13 = vld [vmem:[#allocation144_spill] sm:$0xff]  ;;  %v14521_v26 = vld [vmem:[#allocation83_spill] sm:$0xff] }
 0x30a   : > { %4138 = vmatprep.mubr.f32.mxu0 %v14510_v59  ;;  %v2709_v30 = vadd.f32 %v14515_v7, %v11077_v29  ;;  %v2964_v59 = vadd.f32 %v2963_v23, %v2707_v48  ;;  %v3208_v60 = vpop.f32.mrf.mxu0  ;;  %v14516_v49 = vld [vmem:[#allocation141_spill] sm:$0xff]  ;;  %v14519_v45 = vmax.f32 %v14518_v13, 0.0  ;;  %v14522_v1 = vmax.f32 %v14521_v26, 0.0  ;;  %4312 = vmatpush1.msra.mxu1 %v2376_v36  ;;  %v2372_v23 = vld [vmem:[#allocation7 + $0xcd0] sm:$0xff]  ;;  %v14527_v36 = vld [vmem:[#allocation263_spill] sm:$0xff] }
 0x30b   : > { %14512 = vst [vmem:[#allocation225_spill] sm:$0xff] %v11616_v27  ;;  %3894 = vmatmul.mubr.f32.gmra.mxu1 %v14514_v2  ;;  %v14517_v33 = vmax.f32 %v14516_v49, 0.0  ;;  %v5339_v15 = vld [vmem:[#allocation10 + $0x98] sm:$0xff]  ;;  %v11626_v35 = vadd.f32 %v3208_v60, %v2952_v57  ;;  %v2965_v6 = vpop.f32.mrf.mxu1  ;;  %v14523_v2 = vld [vmem:[#allocation55_spill] sm:$0xff]  ;;  %4313 = vmatprep.subr.mxu1 %v2373_v20  ;;  %v5338_v60 = vld [vmem:[#allocation10 + $0x90] sm:$0xff]  ;;  %v2715_v26 = vadd.f32 %v14527_v36, %v11077_v29 }
 0x30c   : > { %3899 = vmatprep.mubr.f32.mxu1 %v14519_v45  ;;  %v2713_v27 = vadd.f32 %v14523_v2, %v11061_v47  ;;  %v2966_v7 = vadd.f32 %v2965_v6, %v2709_v30  ;;  %v3210_v48 = vpop.f32.mrf.mxu0  ;;  %5471 = vmatpush1.msra.mxu0 %v5340_v42  ;;  %v14525_v13 = vld [vmem:[#allocation145_spill] sm:$0xff]  ;;  %v14528_v2 = vld [vmem:[#allocation82_spill] sm:$0xff]  ;;  %v14530_v20 = vld [vmem:[#allocation148_spill] sm:$0xff] }
 0x30d   : > { %4139 = vmatmul.mubr.f32.gmra.mxu0 %v14517_v33  ;;  %14520 = vst [vmem:[#allocation227_spill] sm:$0xff] %v11626_v35  ;;  %v11632_v49 = vadd.f32 %v3210_v48, %v2954_v63  ;;  %v2969_v33 = vpop.f32.mrf.mxu1  ;;  %v14526_v45 = vmax.f32 %v14525_v13, 0.0  ;;  %v2369_v57 = vld [vmem:[#allocation7 + $0xcb8] sm:$0xff]  ;;  %5472 = vmatprep.subr.mxu0 %v5339_v15  ;;  %v14529_v30 = vmax.f32 %v14528_v2, 0.0  ;;  %v14531_v6 = vmax.f32 %v14530_v20, 0.0  ;;  %v5337_v63 = vld [vmem:[#allocation10 + $0x88] sm:$0xff] }
 0x30e   : > { %4144 = vmatprep.mubr.f32.mxu0 %v14522_v1  ;;  %v2970_v1 = vadd.f32 %v2969_v33, %v2713_v27  ;;  %v3214_v35 = vpop.f32.mrf.mxu0  ;;  %v14533_v48 = vld [vmem:[#allocation146_spill] sm:$0xff]  ;;  %4314 = vmatpush1.msra.mxu1 %v2372_v23  ;;  %v2368_v33 = vld [vmem:[#allocation7 + $0xcb0] sm:$0xff]  ;;  %v14539_v23 = vld [vmem:[#allocation265_spill] sm:$0xff] }
 0x30f   : > { %14524 = vst [vmem:[#allocation51_spill] sm:$0xff] %v11632_v49  ;;  %3900 = vmatmul.mubr.f32.gmra.mxu1 %v14526_v45  ;;  %v11642_v42 = vadd.f32 %v3214_v35, %v2958_v52  ;;  %v14534_v13 = vmax.f32 %v14533_v48, 0.0  ;;  %v2971_v15 = vpop.f32.mrf.mxu1  ;;  %v14535_v45 = vld [vmem:[#allocation58_spill] sm:$0xff]  ;;  %4315 = vmatprep.subr.mxu1 %v2369_v57  ;;  %v2365_v52 = vld [vmem:[#allocation7 + $0xc98] sm:$0xff]  ;;  %v2721_v48 = vadd.f32 %v14539_v23, %v11077_v29 }
 0x310   : > { %3905 = vmatprep.mubr.f32.mxu1 %v14531_v6  ;;  %v2719_v49 = vadd.f32 %v14535_v45, %v11061_v47  ;;  %v2972_v36 = vadd.f32 %v2971_v15, %v2715_v26  ;;  %v3216_v27 = vpop.f32.mrf.mxu0  ;;  %5473 = vmatpush1.msra.mxu0 %v5338_v60  ;;  %v14537_v20 = vld [vmem:[#allocation150_spill] sm:$0xff]  ;;  %v14540_v45 = vld [vmem:[#allocation85_spill] sm:$0xff] }
 0x311   : > { %4145 = vmatmul.mubr.f32.gmra.mxu0 %v14529_v30  ;;  %14532 = vst [vmem:[#allocation86_spill] sm:$0xff] %v11642_v42  ;;  %v11648_v2 = vadd.f32 %v3216_v27, %v2960_v11  ;;  %v2975_v30 = vpop.f32.mrf.mxu1  ;;  %v14538_v6 = vmax.f32 %v14537_v20, 0.0  ;;  %5474 = vmatprep.subr.mxu0 %v5337_v63  ;;  %v5336_v35 = vld [vmem:[#allocation10 + $0x80] sm:$0xff]  ;;  %v14541_v26 = vmax.f32 %v14540_v45, 0.0  ;;  %v14542_v57 = vld [vmem:[#allocation153_spill] sm:$0xff] }
 0x312   : > { %4150 = vmatprep.mubr.f32.mxu0 %v14534_v13  ;;  %v2976_v13 = vadd.f32 %v2975_v30, %v2719_v49  ;;  %v3220_v42 = vpop.f32.mrf.mxu0  ;;  %v14543_v15 = vmax.f32 %v14542_v57, 0.0  ;;  %v5335_v11 = vld [vmem:[#allocation10 + $0x78] sm:$0xff]  ;;  %v14545_v27 = vld [vmem:[#allocation151_spill] sm:$0xff]  ;;  %4316 = vmatpush1.msra.mxu1 %v2368_v33  ;;  %v2364_v30 = vld [vmem:[#allocation7 + $0xc90] sm:$0xff] }
 0x313   : > { %14536 = vst [vmem:[#allocation229_spill] sm:$0xff] %v11648_v2  ;;  %3906 = vmatmul.mubr.f32.gmra.mxu1 %v14538_v6  ;;  %v11658_v60 = vadd.f32 %v3220_v42, %v2964_v59  ;;  %v14546_v20 = vmax.f32 %v14545_v27, 0.0  ;;  %v2977_v63 = vpop.f32.mrf.mxu1  ;;  %v14547_v6 = vld [vmem:[#allocation61_spill] sm:$0xff]  ;;  %4317 = vmatprep.subr.mxu1 %v2365_v52  ;;  %v14549_v57 = vld [vmem:[#allocation92_spill] sm:$0xff]  ;;  %v14551_v33 = vld [vmem:[#allocation267_spill] sm:$0xff] }
 0x314   : > { %3911 = vmatprep.mubr.f32.mxu1 %v14543_v15  ;;  %v2725_v2 = vadd.f32 %v14547_v6, %v11061_v47  ;;  %v2978_v23 = vadd.f32 %v2977_v63, %v2721_v48  ;;  %v3222_v49 = vpop.f32.mrf.mxu0  ;;  %5475 = vmatpush1.msra.mxu0 %v5336_v35  ;;  %v14550_v15 = vmax.f32 %v14549_v57, 0.0  ;;  %v2361_v59 = vld [vmem:[#allocation7 + $0xc78] sm:$0xff]  ;;  %v2727_v27 = vadd.f32 %v14551_v33, %v11077_v29  ;;  %v14552_v6 = vld [vmem:[#allocation87_spill] sm:$0xff]  ;;  %v14554_v52 = vld [vmem:[#allocation98_spill] sm:$0xff] }
 0x315   : > { %4151 = vmatmul.mubr.f32.gmra.mxu0 %v14541_v26  ;;  %14544 = vst [vmem:[#allocation54_spill] sm:$0xff] %v11658_v60  ;;  %v11664_v45 = vadd.f32 %v3222_v49, %v2966_v7  ;;  %v2981_v26 = vpop.f32.mrf.mxu1  ;;  %5476 = vmatprep.subr.mxu0 %v5335_v11  ;;  %v5334_v42 = vld [vmem:[#allocation10 + $0x70] sm:$0xff]  ;;  %v14553_v48 = vmax.f32 %v14552_v6, 0.0  ;;  %v14555_v63 = vmax.f32 %v14554_v52, 0.0  ;;  %v5333_v7 = vld [vmem:[#allocation10 + $0x68] sm:$0xff]  ;;  %v14557_v49 = vld [vmem:[#allocation90_spill] sm:$0xff] }
 0x316   : > { %4156 = vmatprep.mubr.f32.mxu0 %v14546_v20  ;;  %v2982_v20 = vadd.f32 %v2981_v26, %v2725_v2  ;;  %v3226_v60 = vpop.f32.mrf.mxu0  ;;  %v14558_v57 = vmax.f32 %v14557_v49, 0.0  ;;  %4318 = vmatpush1.msra.mxu1 %v2364_v30  ;;  %v2360_v26 = vld [vmem:[#allocation7 + $0xc70] sm:$0xff]  ;;  %v14563_v30 = vld [vmem:[#allocation269_spill] sm:$0xff] }
 0x317   : > { %14548 = vst [vmem:[#allocation88_spill] sm:$0xff] %v11664_v45  ;;  %3912 = vmatmul.mubr.f32.gmra.mxu1 %v14550_v15  ;;  %v11674_v35 = vadd.f32 %v3226_v60, %v2970_v1  ;;  %v2983_v11 = vpop.f32.mrf.mxu1  ;;  %v14559_v15 = vld [vmem:[#allocation64_spill] sm:$0xff]  ;;  %4319 = vmatprep.subr.mxu1 %v2361_v59  ;;  %v2357_v1 = vld [vmem:[#allocation7 + $0xc58] sm:$0xff]  ;;  %v5332_v60 = vld [vmem:[#allocation10 + $0x60] sm:$0xff]  ;;  %v2733_v49 = vadd.f32 %v14563_v30, %v11077_v29 }
 0x318   : > { %3917 = vmatprep.mubr.f32.mxu1 %v14555_v63  ;;  %v2731_v45 = vadd.f32 %v14559_v15, %v11061_v47  ;;  %v2984_v33 = vadd.f32 %v2983_v11, %v2727_v27  ;;  %v3228_v2 = vpop.f32.mrf.mxu0  ;;  %5477 = vmatpush1.msra.mxu0 %v5334_v42  ;;  %v14561_v52 = vld [vmem:[#allocation96_spill] sm:$0xff]  ;;  %v14564_v15 = vld [vmem:[#allocation89_spill] sm:$0xff] }
 0x319   : > { %4157 = vmatmul.mubr.f32.gmra.mxu0 %v14553_v48  ;;  %14556 = vst [vmem:[#allocation57_spill] sm:$0xff] %v11674_v35  ;;  %v11680_v6 = vadd.f32 %v3228_v2, %v2972_v36  ;;  %v2987_v48 = vpop.f32.mrf.mxu1  ;;  %v14562_v63 = vmax.f32 %v14561_v52, 0.0  ;;  %5478 = vmatprep.subr.mxu0 %v5333_v7  ;;  %v14565_v27 = vmax.f32 %v14564_v15, 0.0  ;;  %v14566_v59 = vld [vmem:[#allocation161_spill] sm:$0xff]  ;;  %v14569_v2 = vld [vmem:[#allocation94_spill] sm:$0xff] }
 0x31a   : > { %4162 = vmatprep.mubr.f32.mxu0 %v14558_v57  ;;  %v2988_v57 = vadd.f32 %v2987_v48, %v2731_v45  ;;  %v3232_v35 = vpop.f32.mrf.mxu0  ;;  %v14567_v11 = vmax.f32 %v14566_v59, 0.0  ;;  %v5331_v36 = vld [vmem:[#allocation10 + $0x58] sm:$0xff]  ;;  %v14570_v52 = vmax.f32 %v14569_v2, 0.0  ;;  %4320 = vmatpush1.msra.mxu1 %v2360_v26  ;;  %v2356_v48 = vld [vmem:[#allocation7 + $0xc50] sm:$0xff] }
 0x31b   : > { %14560 = vst [vmem:[#allocation91_spill] sm:$0xff] %v11680_v6  ;;  %3918 = vmatmul.mubr.f32.gmra.mxu1 %v14562_v63  ;;  %v11690_v42 = vadd.f32 %v3232_v35, %v2976_v13  ;;  %v2989_v7 = vpop.f32.mrf.mxu1  ;;  %v14571_v63 = vld [vmem:[#allocation270_spill] sm:$0xff]  ;;  %4321 = vmatprep.subr.mxu1 %v2357_v1  ;;  %v14573_v59 = vld [vmem:[#allocation101_spill] sm:$0xff] }
 0x31c   : > { %3923 = vmatprep.mubr.f32.mxu1 %v14567_v11  ;;  %v2737_v6 = vadd.f32 %v14571_v63, %v11061_v47  ;;  %v2990_v30 = vadd.f32 %v2989_v7, %v2733_v49  ;;  %v3234_v45 = vpop.f32.mrf.mxu0  ;;  %5479 = vmatpush1.msra.mxu0 %v5332_v60  ;;  %v14574_v11 = vmax.f32 %v14573_v59, 0.0  ;;  %v2353_v13 = vld [vmem:[#allocation7 + $0xc38] sm:$0xff] }
 0x31d   : > { %4163 = vmatmul.mubr.f32.gmra.mxu0 %v14565_v27  ;;  %14568 = vst [vmem:[#allocation60_spill] sm:$0xff] %v11690_v42  ;;  %v11696_v15 = vadd.f32 %v3234_v45, %v2978_v23  ;;  %v2993_v27 = vpop.f32.mrf.mxu1  ;;  %5480 = vmatprep.subr.mxu0 %v5331_v36  ;;  %v5330_v35 = vld [vmem:[#allocation10 + $0x50] sm:$0xff]  ;;  %v5329_v23 = vld [vmem:[#allocation10 + $0x48] sm:$0xff] }
 0x31e   : > { %4168 = vmatprep.mubr.f32.mxu0 %v14570_v52  ;;  %v14575_v26 = vld [vmem:[#allocation65_spill] sm:$0xff]  ;;  %v2994_v52 = vadd.f32 %v2993_v27, %v2737_v6  ;;  %v3238_v42 = vpop.f32.mrf.mxu0  ;;  %v14581_v45 = vld [vmem:[#allocation99_spill] sm:$0xff]  ;;  %4322 = vmatpush1.msra.mxu1 %v2356_v48  ;;  %v2352_v27 = vld [vmem:[#allocation7 + $0xc30] sm:$0xff]  ;;  %v2745_v48 = vadd.f32 %v11116_v32, %v11077_v29 }
 0x31f   : > { %14572 = vst [vmem:[#allocation95_spill] sm:$0xff] %v11696_v15  ;;  %3924 = vmatmul.mubr.f32.gmra.mxu1 %v14574_v11  ;;  %v2739_v2 = vadd.f32 %v14575_v26, %v11077_v29  ;;  %v14576_v63 = vld [vmem:[#allocation93_spill] sm:$0xff]  ;;  %v11706_v60 = vadd.f32 %v3238_v42, %v2982_v20  ;;  %v14582_v59 = vmax.f32 %v14581_v45, 0.0  ;;  %v2995_v36 = vpop.f32.mrf.mxu1  ;;  %v2743_v11 = vadd.f32 %v11099_v61, %v11061_v47  ;;  %v5328_v42 = vld [vmem:[#allocation10 + $0x40] sm:$0xff] }
 0x320   : > { %v14577_v49 = vmax.f32 %v14576_v63, 0.0  ;;  %v14578_v1 = vld [vmem:[#allocation165_spill] sm:$0xff]  ;;  %v3240_v6 = vpop.f32.mrf.mxu0  ;;  %4323 = vmatprep.subr.mxu1 %v2353_v13  ;;  %5481 = vmatpush1.msra.mxu0 %v5330_v35  ;;  %v14588_v13 = vld [vmem:[#allocation168_spill] sm:$0xff] }
 0x321   : > { %v14579_v7 = vmax.f32 %v14578_v1, 0.0  ;;  %14580 = vst [vmem:[#allocation63_spill] sm:$0xff] %v11706_v60  ;;  %v2996_v26 = vadd.f32 %v2995_v36, %v2739_v2  ;;  %v11712_v63 = vadd.f32 %v3240_v6, %v2984_v33  ;;  %v14584_v1 = vld [vmem:[#allocation106_spill] sm:$0xff]  ;;  %v2349_v20 = vld [vmem:[#allocation7 + $0xc18] sm:$0xff]  ;;  %5482 = vmatprep.subr.mxu0 %v5329_v23  ;;  %v14589_v36 = vmax.f32 %v14588_v13, 0.0  ;;  %v14591_v6 = vld [vmem:[#allocation103_spill] sm:$0xff]  ;;  %4324 = vmatpush1.msra.mxu1 %v2352_v27 }
 0x322   : > { %4169 = vmatmul.mubr.f32.gmra.mxu0 %v14577_v49  ;;  %v2999_v49 = vpop.f32.mrf.mxu1  ;;  %v14586_v61 = vld [vmem:[#allocation97_spill] sm:$0xff]  ;;  %4325 = vmatprep.subr.mxu1 %v2349_v20  ;;  %v14594_v13 = vld [vmem:[#allocation170_spill] sm:$0xff]  ;;  %v14599_v20 = vld [vmem:[#allocation171_spill] sm:$0xff] }
 0x323   : > { %3929 = vmatprep.mubr.f32.mxu1 %v14579_v7  ;;  %4174 = vmatprep.mubr.f32.mxu0 %v14582_v59  ;;  %14583 = vst [vmem:[#allocation100_spill] sm:$0xff] %v11712_v63  ;;  %v14585_v7 = vmax.f32 %v14584_v1, 0.0  ;;  %v3000_v45 = vadd.f32 %v2999_v49, %v2743_v11  ;;  %v3244_v59 = vpop.f32.mrf.mxu0  ;;  %v14587_v2 = vmax.f32 %v14586_v61, 0.0  ;;  %v5327_v33 = vld [vmem:[#allocation10 + $0x38] sm:$0xff]  ;;  %v14592_v1 = vmax.f32 %v14591_v6, 0.0  ;;  %v2348_v49 = vld [vmem:[#allocation7 + $0xc10] sm:$0xff] }
 0x324   : > { %v11722_v35 = vadd.f32 %v3244_v59, %v2988_v57  ;;  %v3001_v23 = vpop.f32.mrf.mxu1  ;;  %5483 = vmatpush1.msra.mxu0 %v5328_v42  ;;  %v2473_v57 = vld [vmem:[#allocation7 + $0xff8] sm:$0xff]  ;;  %4326 = vmatpush1.msra.mxu1 %v2348_v49  ;;  %v14609_v49 = vld [vmem:[#allocation174_spill] sm:$0xff] }
 0x325   : > { %3930 = vmatmul.mubr.f32.gmra.mxu1 %v14585_v7  ;;  %v2749_v7 = vadd.f32 %v11125_v25, %v11061_v47  ;;  %v3002_v32 = vadd.f32 %v3001_v23, %v2745_v48  ;;  %v3246_v11 = vpop.f32.mrf.mxu0  ;;  %5484 = vmatprep.subr.mxu0 %v5327_v33  ;;  %v5326_v59 = vld [vmem:[#allocation10 + $0x30] sm:$0xff]  ;;  %v14597_v47 = vld [vmem:[#allocation102_spill] sm:$0xff]  ;;  %v14600_v48 = vmax.f32 %v14599_v20, 0.0  ;;  %v14607_v20 = vld [vmem:[#allocation107_spill] sm:$0xff] }
 0x326   : > { %4175 = vmatmul.mubr.f32.gmra.mxu0 %v14587_v2  ;;  %3935 = vmatprep.mubr.f32.mxu1 %v14589_v36  ;;  %14590 = vst [vmem:[#allocation66_spill] sm:$0xff] %v11722_v35  ;;  %v11728_v61 = vadd.f32 %v3246_v11, %v2990_v30  ;;  %v3005_v2 = vpop.f32.mrf.mxu1  ;;  %v14595_v36 = vmax.f32 %v14594_v13, 0.0  ;;  %v14596_v27 = vld [vmem:[#allocation73_spill] sm:$0xff]  ;;  %v14598_v25 = vmax.f32 %v14597_v47, 0.0  ;;  %v5325_v30 = vld [vmem:[#allocation10 + $0x28] sm:$0xff] }
 0x327   : > { %4180 = vmatprep.mubr.f32.mxu0 %v14592_v1  ;;  %v2751_v6 = vadd.f32 %v14596_v27, %v11077_v29  ;;  %v3006_v1 = vadd.f32 %v3005_v2, %v2749_v7  ;;  %v3250_v35 = vpop.f32.mrf.mxu0  ;;  %v14602_v23 = vld [vmem:[#allocation109_spill] sm:$0xff]  ;;  %4327 = vmatprep.subr.mxu1 %v2473_v57  ;;  %v2472_v29 = vld [vmem:[#allocation7 + $0xff0] sm:$0xff] }
 0x328   : > { %14593 = vst [vmem:[#allocation104_spill] sm:$0xff] %v11728_v61  ;;  %v11738_v42 = vadd.f32 %v3250_v35, %v2994_v52  ;;  %v14603_v11 = vmax.f32 %v14602_v23, 0.0  ;;  %v3007_v33 = vpop.f32.mrf.mxu1  ;;  %5485 = vmatpush1.msra.mxu0 %v5326_v59  ;;  %v14605_v27 = vld [vmem:[#allocation172_spill] sm:$0xff]  ;;  %v5324_v52 = vld [vmem:[#allocation10 + $0x20] sm:$0xff]  ;;  %v5323_v57 = vld [vmem:[#allocation10 + $0x18] sm:$0xff]  ;;  %4328 = vmatpush2.msra.mxu1 %v2472_v29 }
 0x329   : > { %3936 = vmatmul.mubr.f32.gmra.mxu1 %v14595_v36  ;;  %v3008_v13 = vadd.f32 %v3007_v33, %v2751_v6  ;;  %v3252_v36 = vpop.f32.mrf.mxu0  ;;  %v14606_v47 = vmax.f32 %v14605_v27, 0.0  ;;  %5486 = vmatprep.subr.mxu0 %v5325_v30  ;;  %v14610_v6 = vmax.f32 %v14609_v49, 0.0  ;;  %v2468_v30 = vld [vmem:[#allocation7 + $0xfd0] sm:$0xff]  ;;  %v14617_v49 = vld [vmem:[#allocation175_spill] sm:$0xff]  ;;  %v14619_v29 = vld [vmem:[#allocation178_spill] sm:$0xff] }
 0x32a   : > { %4181 = vmatmul.mubr.f32.gmra.mxu0 %v14598_v25  ;;  %3941 = vmatprep.mubr.f32.mxu1 %v14600_v48  ;;  %14601 = vst [vmem:[#allocation105_spill] sm:$0xff] %v11738_v42  ;;  %v11742_v7 = vadd.f32 %v3252_v36, %v2996_v26  ;;  %v11744_v2 = vpop.f32.mrf.mxu1  ;;  %v2469_v25 = vld [vmem:[#allocation7 + $0xfd8] sm:$0xff]  ;;  %v14608_v48 = vmax.f32 %v14607_v20, 0.0 }
 0x32b   : > { %4186 = vmatprep.mubr.f32.mxu0 %v14603_v11  ;;  %v3256_v35 = vpop.f32.mrf.mxu0  ;;  %v14612_v26 = vld [vmem:[#allocation173_spill] sm:$0xff]  ;;  %4329 = vmatprep.subr.mxu1 %v2469_v25  ;;  %v5321_v25 = vld [vmem:[#allocation10 + $0x8] sm:$0xff] }
 0x32c   : > { %14604 = vst [vmem:[#allocation28_spill] sm:$0xff] %v11742_v7  ;;  %v11752_v23 = vadd.f32 %v3256_v35, %v3000_v45  ;;  %v14613_v59 = vmax.f32 %v14612_v26, 0.0  ;;  %v11756_v11 = vpop.f32.mrf.mxu1  ;;  %5487 = vmatpush1.msra.mxu0 %v5324_v52  ;;  %v5322_v45 = vld [vmem:[#allocation10 + $0x10] sm:$0xff]  ;;  %v14620_v26 = vmax.f32 %v14619_v29, 0.0  ;;  %4330 = vmatpush2.msra.mxu1 %v2468_v30  ;;  %v14644_v7 = vld [vmem:[#allocation186_spill] sm:$0xff] }
 0x32d   : > { %3942 = vmatmul.mubr.f32.gmra.mxu1 %v14606_v47  ;;  %v3258_v33 = vpop.f32.mrf.mxu0  ;;  %v14615_v47 = vld [vmem:[#allocation176_spill] sm:$0xff]  ;;  %5488 = vmatprep.subr.mxu0 %v5323_v57  ;;  %v5379_v60 = vld [vmem:[#allocation10 + $0x1d8] sm:$0xff] }
 0x32e   : > { %4187 = vmatmul.mubr.f32.gmra.mxu0 %v14608_v48  ;;  %3947 = vmatprep.mubr.f32.mxu1 %v14610_v6  ;;  %14611 = vst [vmem:[#allocation108_spill] sm:$0xff] %v11752_v23  ;;  %v11758_v36 = vadd.f32 %v3258_v33, %v3002_v32  ;;  %v11760_v27 = vpop.f32.mrf.mxu1  ;;  %v14616_v20 = vmax.f32 %v14615_v47, 0.0  ;;  %v2465_v48 = vld [vmem:[#allocation7 + $0xfb8] sm:$0xff]  ;;  %v14618_v6 = vmax.f32 %v14617_v49, 0.0  ;;  %v2464_v57 = vld [vmem:[#allocation7 + $0xfb0] sm:$0xff] }
 0x32f   : > { %4192 = vmatprep.mubr.f32.mxu0 %v14613_v59  ;;  %v3262_v35 = vpop.f32.mrf.mxu0  ;;  %v14622_v32 = vld [vmem:[#allocation177_spill] sm:$0xff]  ;;  %4331 = vmatprep.subr.mxu1 %v2465_v48 }
 0x330   : > { %14614 = vst [vmem:[#allocation245_spill] sm:$0xff] %v11758_v36  ;;  %v11768_v59 = vadd.f32 %v3262_v35, %v3006_v1  ;;  %v14623_v52 = vmax.f32 %v14622_v32, 0.0  ;;  %v11772_v33 = vpop.f32.mrf.mxu1  ;;  %5489 = vmatpush1.msra.mxu0 %v5322_v45  ;;  %v5320_v1 = vld [vmem:[#allocation10] sm:$0xff]  ;;  %v5383_v48 = vld [vmem:[#allocation10 + $0x1f8] sm:$0xff]  ;;  %4332 = vmatpush2.msra.mxu1 %v2464_v57  ;;  %v5381_v36 = vld [vmem:[#allocation10 + $0x1e8] sm:$0xff] }
 0x331   : > { %3948 = vmatmul.mubr.f32.gmra.mxu1 %v14616_v20  ;;  %v3264_v47 = vpop.f32.mrf.mxu0  ;;  %5490 = vmatprep.subr.mxu0 %v5321_v25  ;;  %v14627_v32 = vld [vmem:[#allocation179_spill] sm:$0xff]  ;;  %v14631_v45 = vld [vmem:[#allocation181_spill] sm:$0xff]  ;;  %v2460_v25 = vld [vmem:[#allocation7 + $0xf90] sm:$0xff] }
 0x332   : > { %4193 = vmatmul.mubr.f32.gmra.mxu0 %v14618_v6  ;;  %3953 = vmatprep.mubr.f32.mxu1 %v14620_v26  ;;  %14621 = vst [vmem:[#allocation69_spill] sm:$0xff] %v11768_v59  ;;  %v11774_v20 = vadd.f32 %v3264_v47, %v3008_v13  ;;  %v11776_v49 = vpop.f32.mrf.mxu1  ;;  %v14625_v6 = vld [vmem:[#allocation180_spill] sm:$0xff]  ;;  %v2461_v26 = vld [vmem:[#allocation7 + $0xf98] sm:$0xff]  ;;  %v14628_v30 = vmax.f32 %v14627_v32, 0.0  ;;  %v14632_v13 = vmax.f32 %v14631_v45, 0.0 }
 0x333   : > { %4198 = vmatprep.mubr.f32.mxu0 %v14623_v52  ;;  %v14626_v29 = vmax.f32 %v14625_v6, 0.0  ;;  %v11780_v35 = vpop.f32.mrf.mxu0  ;;  %v14629_v52 = vld [vmem:[#allocation182_spill] sm:$0xff]  ;;  %4333 = vmatprep.subr.mxu1 %v2461_v26  ;;  %v14637_v45 = vld [vmem:[#allocation117_spill] sm:$0xff]  ;;  %v14641_v26 = vld [vmem:[#allocation184_spill] sm:$0xff] }
 0x334   : > { %14624 = vst [vmem:[#allocation110_spill] sm:$0xff] %v11774_v20  ;;  %v14630_v59 = vmax.f32 %v14629_v52, 0.0  ;;  %v11788_v47 = vpop.f32.mrf.mxu1  ;;  %5491 = vmatpush1.msra.mxu0 %v5320_v1  ;;  %v14634_v20 = vld [vmem:[#allocation183_spill] sm:$0xff]  ;;  %v14639_v57 = vld [vmem:[#allocation185_spill] sm:$0xff]  ;;  %v14642_v42 = vmax.f32 %v14641_v26, 0.0  ;;  %4334 = vmatpush2.msra.mxu1 %v2460_v25  ;;  %v14649_v25 = vld [vmem:[#allocation188_spill] sm:$0xff] }
 0x335   : > { %3954 = vmatmul.mubr.f32.gmra.mxu1 %v14626_v29  ;;  %v11790_v6 = vpop.f32.mrf.mxu0  ;;  %v14635_v32 = vmax.f32 %v14634_v20, 0.0  ;;  %5492 = vmatprep.subr.mxu0 %v5383_v48  ;;  %v14640_v23 = vmax.f32 %v14639_v57, 0.0  ;;  %v2456_v48 = vld [vmem:[#allocation7 + $0xf70] sm:$0xff]  ;;  %v14647_v26 = vld [vmem:[#allocation123_spill] sm:$0xff]  ;;  %v14650_v61 = vmax.f32 %v14649_v25, 0.0 }
 0x336   : > { %4199 = vmatmul.mubr.f32.gmra.mxu0 %v14628_v30  ;;  %3959 = vmatprep.mubr.f32.mxu1 %v14630_v59  ;;  %14633 = vst [vmem:[#allocation111_spill] sm:$0xff] %v11790_v6  ;;  %v11792_v29 = vpop.f32.mrf.mxu1  ;;  %v2457_v30 = vld [vmem:[#allocation7 + $0xf78] sm:$0xff]  ;;  %v14656_v25 = vld [vmem:[#allocation27_spill] sm:$0xff]  ;;  %v14672_v6 = vld [vmem:[#allocation196_spill] sm:$0xff] }
 0x337   : > { %4204 = vmatprep.mubr.f32.mxu0 %v14632_v13  ;;  %v5382_v59 = vld [vmem:[#allocation10 + $0x1f0] sm:$0xff]  ;;  %v11796_v52 = vpop.f32.mrf.mxu0  ;;  %v14638_v13 = vmax.f32 %v14637_v45, 0.0  ;;  %4335 = vmatprep.subr.mxu1 %v2457_v30  ;;  %v14645_v45 = vmax.f32 %v14644_v7, 0.0  ;;  %v14651_v30 = vld [vmem:[#allocation187_spill] sm:$0xff] }
 0x338   : > { %14636 = vst [vmem:[#allocation31_spill] sm:$0xff] %v11796_v52  ;;  %v11804_v1 = vpop.f32.mrf.mxu1  ;;  %5493 = vmatpush2.msra.mxu0 %v5382_v59  ;;  %v14652_v63 = vmax.f32 %v14651_v30, 0.0  ;;  %4336 = vmatpush2.msra.mxu1 %v2456_v48  ;;  %v3334_v30 = vadd.f32 %v11744_v2, %v14656_v25  ;;  %v14658_v48 = vld [vmem:[#allocation189_spill] sm:$0xff]  ;;  %v3336_v52 = vadd.f32 %v11756_v11, %v11173_v34  ;;  %v2448_v2 = vld [vmem:[#allocation7 + $0xf30] sm:$0xff] }
 0x339   : > { %3960 = vmatmul.mubr.f32.gmra.mxu1 %v14635_v32  ;;  %v11806_v20 = vpop.f32.mrf.mxu0  ;;  %5494 = vmatprep.subr.mxu0 %v5381_v36  ;;  %v2452_v36 = vld [vmem:[#allocation7 + $0xf50] sm:$0xff] }
 0x33a   : > { %4205 = vmatmul.mubr.f32.gmra.mxu0 %v14638_v13  ;;  %3965 = vmatprep.mubr.f32.mxu1 %v14640_v23  ;;  %14643 = vst [vmem:[#allocation112_spill] sm:$0xff] %v11806_v20  ;;  %v11808_v32 = vpop.f32.mrf.mxu1  ;;  %v2453_v13 = vld [vmem:[#allocation7 + $0xf58] sm:$0xff]  ;;  %v5380_v23 = vld [vmem:[#allocation10 + $0x1e0] sm:$0xff]  ;;  %v14659_v20 = vmax.f32 %v14658_v48, 0.0  ;;  %v4552_v34 = vsub.f32 0.0, %v3334_v30 }
 0x33b   : > { %4210 = vmatprep.mubr.f32.mxu0 %v14642_v42  ;;  %v11812_v57 = vpop.f32.mrf.mxu0  ;;  %v14648_v42 = vmax.f32 %v14647_v26, 0.0  ;;  %4337 = vmatprep.subr.mxu1 %v2453_v13  ;;  %v2445_v48 = vld [vmem:[#allocation7 + $0xf18] sm:$0xff] }
 0x33c   : > { %14646 = vst [vmem:[#allocation247_spill] sm:$0xff] %v11812_v57  ;;  %v11820_v59 = vpop.f32.mrf.mxu1  ;;  %5495 = vmatpush2.msra.mxu0 %v5380_v23  ;;  %v14654_v57 = vld [vmem:[#allocation190_spill] sm:$0xff]  ;;  %v5377_v23 = vld [vmem:[#allocation10 + $0x1c8] sm:$0xff]  ;;  %4338 = vmatpush2.msra.mxu1 %v2452_v36 }
 0x33d   : > { %3966 = vmatmul.mubr.f32.gmra.mxu1 %v14645_v45  ;;  %v11822_v7 = vpop.f32.mrf.mxu0  ;;  %v14655_v26 = vmax.f32 %v14654_v57, 0.0  ;;  %5496 = vmatprep.subr.mxu0 %v5379_v60  ;;  %v14662_v57 = vld [vmem:[#allocation191_spill] sm:$0xff] }
 0x33e   : > { %4211 = vmatmul.mubr.f32.gmra.mxu0 %v14648_v42  ;;  %3971 = vmatprep.mubr.f32.mxu1 %v14650_v61  ;;  %14653 = vst [vmem:[#allocation72_spill] sm:$0xff] %v11822_v7  ;;  %v11824_v45 = vpop.f32.mrf.mxu1  ;;  %v2449_v42 = vld [vmem:[#allocation7 + $0xf38] sm:$0xff]  ;;  %v14660_v7 = vld [vmem:[#allocation192_spill] sm:$0xff] }
 0x33f   : > { %4216 = vmatprep.mubr.f32.mxu0 %v14652_v63  ;;  %v5378_v61 = vld [vmem:[#allocation10 + $0x1d0] sm:$0xff]  ;;  %v11830_v63 = vpop.f32.mrf.mxu0  ;;  %v14661_v13 = vmax.f32 %v14660_v7, 0.0  ;;  %4339 = vmatprep.subr.mxu1 %v2449_v42  ;;  %v5375_v42 = vld [vmem:[#allocation10 + $0x1b8] sm:$0xff] }
 0x340   : > { %14657 = vst [vmem:[#allocation113_spill] sm:$0xff] %v11830_v63  ;;  %v11840_v60 = vpop.f32.mrf.mxu1  ;;  %5497 = vmatpush2.msra.mxu0 %v5378_v61  ;;  %v3340_v61 = vadd.f32 %v11760_v27, %v11188_v22  ;;  %4340 = vmatpush2.msra.mxu1 %v2448_v2  ;;  %v2441_v22 = vld [vmem:[#allocation7 + $0xef8] sm:$0xff]  ;;  %v3346_v2 = vadd.f32 %v11776_v49, %v11214_v3 }
 0x341   : > { %3972 = vmatmul.mubr.f32.gmra.mxu1 %v14655_v26  ;;  %v14663_v26 = vmax.f32 %v14662_v57, 0.0  ;;  %v11842_v15 = vpop.f32.mrf.mxu0  ;;  %5498 = vmatprep.subr.mxu0 %v5377_v23  ;;  %v14668_v57 = vld [vmem:[#allocation194_spill] sm:$0xff]  ;;  %v5374_v27 = vld [vmem:[#allocation10 + $0x1b0] sm:$0xff]  ;;  %v3348_v3 = vadd.f32 %v11788_v47, %v11225_v17 }
 0x342   : > { %4217 = vmatmul.mubr.f32.gmra.mxu0 %v14659_v20  ;;  %3977 = vmatprep.mubr.f32.mxu1 %v14661_v13  ;;  %14664 = vst [vmem:[#allocation114_spill] sm:$0xff] %v11842_v15  ;;  %v11844_v25 = vpop.f32.mrf.mxu1  ;;  %v14665_v20 = vld [vmem:[#allocation195_spill] sm:$0xff]  ;;  %v14669_v36 = vmax.f32 %v14668_v57, 0.0  ;;  %v4553_v15 = vsub.f32 0.0, %v3336_v52  ;;  %v3342_v57 = vadd.f32 %v11772_v33, %v11199_v19  ;;  %v14675_v52 = vld [vmem:[#allocation201_spill] sm:$0xff]  ;;  %v14688_v47 = vld [vmem:[#allocation210_spill] sm:$0xff] }
 0x343   : > { %4222 = vmatprep.mubr.f32.mxu0 %v14663_v26  ;;  %v14666_v7 = vmax.f32 %v14665_v20, 0.0  ;;  %v5376_v13 = vld [vmem:[#allocation10 + $0x1c0] sm:$0xff]  ;;  %v11848_v11 = vpop.f32.mrf.mxu0  ;;  %v14673_v20 = vmax.f32 %v14672_v6, 0.0  ;;  %4341 = vmatprep.subr.mxu1 %v2445_v48  ;;  %v4680_v6 = vmul.f32 1.442695, %v4552_v34  ;;  %v14677_v48 = vld [vmem:[#allocation200_spill] sm:$0xff] }
 0x344   : > { %14667 = vst [vmem:[#allocation34_spill] sm:$0xff] %v11848_v11  ;;  %v14670_v26 = vld [vmem:[#allocation198_spill] sm:$0xff]  ;;  %v11858_v23 = vpop.f32.mrf.mxu1  ;;  %5499 = vmatpush2.msra.mxu0 %v5376_v13  ;;  %v14679_v13 = vld [vmem:[#allocation204_spill] sm:$0xff]  ;;  %v4682_v33 = vmul.f32 1.442695, %v4553_v15  ;;  %v4556_v11 = vsub.f32 0.0, %v3340_v61 }
 0x345   : > { %3978 = vmatmul.mubr.f32.gmra.mxu1 %v14666_v7  ;;  %v14671_v63 = vmax.f32 %v14670_v26, 0.0  ;;  %v11860_v30 = vpop.f32.mrf.mxu0  ;;  %v2444_v7 = vld [vmem:[#allocation7 + $0xf10] sm:$0xff]  ;;  %5500 = vmatprep.subr.mxu0 %v5375_v42  ;;  %v2437_v61 = vld [vmem:[#allocation7 + $0xed8] sm:$0xff]  ;;  %7114 = vpow2.f32 %v4680_v6 }
 0x346   : > { %4223 = vmatmul.mubr.f32.gmra.mxu0 %v14669_v36  ;;  %14674 = vst [vmem:[#allocation116_spill] sm:$0xff] %v11860_v30  ;;  %v14676_v36 = vmax.f32 %v14675_v52, 0.0  ;;  %v14680_v30 = vmax.f32 %v14679_v13, 0.0  ;;  %v5373_v19 = vld [vmem:[#allocation10 + $0x1a8] sm:$0xff]  ;;  %v14681_v52 = vld [vmem:[#allocation202_spill] sm:$0xff]  ;;  %4342 = vmatpush2.msra.mxu1 %v2444_v7  ;;  %v4560_v7 = vsub.f32 0.0, %v3346_v2  ;;  %7116 = vpow2.f32 %v4682_v33 }
 0x347   : > { %3983 = vmatprep.mubr.f32.mxu1 %v14671_v63  ;;  %4228 = vmatprep.mubr.f32.mxu0 %v14673_v20  ;;  %v11864_v63 = vpop.f32.mrf.mxu1  ;;  %v11870_v26 = vpop.f32.mrf.mxu0  ;;  %v14678_v20 = vmax.f32 %v14677_v48, 0.0  ;;  %v2440_v34 = vld [vmem:[#allocation7 + $0xef0] sm:$0xff]  ;;  %v4557_v48 = vsub.f32 0.0, %v3342_v57  ;;  %v5372_v13 = vld [vmem:[#allocation10 + $0x1a0] sm:$0xff]  ;;  %v4688_v57 = vmul.f32 1.442695, %v4556_v11  ;;  %v3354_v33 = vadd.f32 %v11804_v1, %v11251_v55 }
 0x348   : > { %4343 = vmatprep.subr.mxu1 %v2441_v22  ;;  %5501 = vmatpush2.msra.mxu0 %v5374_v27  ;;  %v14689_v22 = vmax.f32 %v14688_v47, 0.0  ;;  %v5371_v27 = vld [vmem:[#allocation10 + $0x198] sm:$0xff]  ;;  %v4561_v2 = vsub.f32 0.0, %v3348_v3  ;;  %v14693_v47 = vld [vmem:[#allocation212_spill] sm:$0xff]  ;;  %v14695_v3 = vld [vmem:[#allocation143_spill] sm:$0xff] }
 0x349   : > { %3984 = vmatmul.mubr.f32.gmra.mxu1 %v14676_v36  ;;  %v14682_v36 = vmax.f32 %v14681_v52, 0.0  ;;  %v11878_v42 = vpop.f32.mrf.mxu1  ;;  %v11882_v49 = vpop.f32.mrf.mxu0  ;;  %5502 = vmatprep.subr.mxu0 %v5373_v19  ;;  %7118 = vpow2.f32 %v4688_v57  ;;  %v14699_v1 = vld [vmem:[#allocation149_spill] sm:$0xff]  ;;  %v3360_v57 = vadd.f32 %v11820_v59, %v11277_v21  ;;  %v14707_v21 = vld [vmem:[#allocation154_spill] sm:$0xff] }
 0x34a   : > { %4229 = vmatmul.mubr.f32.gmra.mxu0 %v14678_v20  ;;  %3989 = vmatprep.mubr.f32.mxu1 %v14680_v30  ;;  %14683 = vst [vmem:[#allocation249_spill] sm:$0xff] %v11882_v49  ;;  %v14684_v30 = vld [vmem:[#allocation207_spill] sm:$0xff]  ;;  %v14708_v59 = vmax.f32 %v14707_v21, 0.0  ;;  %v14717_v21 = vld [vmem:[#allocation158_spill] sm:$0xff] }
 0x34b   : > { %4234 = vmatprep.mubr.f32.mxu0 %v14682_v36  ;;  %v11884_v20 = vpop.f32.mrf.mxu1  ;;  %v14685_v15 = vmax.f32 %v14684_v30, 0.0  ;;  %v11888_v52 = vpop.f32.mrf.mxu0  ;;  %v14686_v36 = vld [vmem:[#allocation206_spill] sm:$0xff]  ;;  %v3352_v30 = vadd.f32 %v11792_v29, %v11240_v5  ;;  %4344 = vmatpush2.msra.mxu1 %v2440_v34  ;;  %v14694_v5 = vmax.f32 %v14693_v47, 0.0  ;;  %v2433_v29 = vld [vmem:[#allocation7 + $0xeb8] sm:$0xff]  ;;  %v4696_v34 = vmul.f32 1.442695, %v4560_v7 }
 0x34c   : > { %v14687_v17 = vmax.f32 %v14686_v36, 0.0  ;;  %4345 = vmatprep.subr.mxu1 %v2437_v61  ;;  %v2436_v36 = vld [vmem:[#allocation7 + $0xed0] sm:$0xff]  ;;  %5503 = vmatpush2.msra.mxu0 %v5372_v13  ;;  %v14697_v61 = vld [vmem:[#allocation157_spill] sm:$0xff]  ;;  %v3358_v7 = vadd.f32 %v11808_v32, %v11266_v38  ;;  %v14703_v32 = vld [vmem:[#allocation147_spill] sm:$0xff] }
 0x34d   : > { %3990 = vmatmul.mubr.f32.gmra.mxu1 %v14685_v15  ;;  %v14690_v15 = vld [vmem:[#allocation208_spill] sm:$0xff]  ;;  %v11898_v6 = vpop.f32.mrf.mxu1  ;;  %v11900_v19 = vpop.f32.mrf.mxu0  ;;  %5504 = vmatprep.subr.mxu0 %v5371_v27  ;;  %v14698_v13 = vmax.f32 %v14697_v61, 0.0  ;;  %v4564_v55 = vsub.f32 0.0, %v3352_v30  ;;  %v4698_v27 = vmul.f32 1.442695, %v4561_v2  ;;  %v2429_v61 = vld [vmem:[#allocation7 + $0xe98] sm:$0xff] }
 0x34e   : > { %4235 = vmatmul.mubr.f32.gmra.mxu0 %v14687_v17  ;;  %3995 = vmatprep.mubr.f32.mxu1 %v14689_v22  ;;  %v14691_v49 = vmax.f32 %v14690_v15, 0.0  ;;  %14692 = vst [vmem:[#allocation115_spill] sm:$0xff] %v11900_v19  ;;  %v4690_v17 = vmul.f32 1.442695, %v4557_v48  ;;  %v14696_v15 = vmax.f32 %v14695_v3, 0.0  ;;  %v5369_v48 = vld [vmem:[#allocation10 + $0x188] sm:$0xff] }
 0x34f   : > { %v11904_v11 = vpop.f32.mrf.mxu1  ;;  %v11908_v22 = vpop.f32.mrf.mxu0  ;;  %v14700_v19 = vmax.f32 %v14699_v1, 0.0  ;;  %4346 = vmatpush2.msra.mxu1 %v2436_v36  ;;  %v2432_v3 = vld [vmem:[#allocation7 + $0xeb0] sm:$0xff]  ;;  %v5368_v2 = vld [vmem:[#allocation10 + $0x180] sm:$0xff] }
 0x350   : > { %4240 = vmatprep.mubr.f32.mxu0 %v14691_v49  ;;  %v5370_v49 = vld [vmem:[#allocation10 + $0x190] sm:$0xff]  ;;  %4347 = vmatprep.subr.mxu1 %v2433_v29  ;;  %7120 = vpow2.f32 %v4690_v17  ;;  %v14704_v29 = vmax.f32 %v14703_v32, 0.0 }
 0x351   : > { %3996 = vmatmul.mubr.f32.gmra.mxu1 %v14694_v5  ;;  %v11916_v47 = vpop.f32.mrf.mxu1  ;;  %v11920_v5 = vpop.f32.mrf.mxu0  ;;  %5505 = vmatpush2.msra.mxu0 %v5370_v49  ;;  %7122 = vpow2.f32 %v4696_v34  ;;  %v14705_v49 = vld [vmem:[#allocation216_spill] sm:$0xff]  ;;  %v3364_v34 = vadd.f32 %v11824_v45, %v11292_v53  ;;  %v3370_v53 = vadd.f32 %v11844_v25, %v11318_v41  ;;  %v3372_v25 = vadd.f32 %v11858_v23, %v11329_v4 }
 0x352   : > { %4241 = vmatmul.mubr.f32.gmra.mxu0 %v14696_v15  ;;  %4001 = vmatprep.mubr.f32.mxu1 %v14698_v13  ;;  %v4565_v15 = vsub.f32 0.0, %v3354_v33  ;;  %v14706_v17 = vmax.f32 %v14705_v49, 0.0  ;;  %v5367_v33 = vld [vmem:[#allocation10 + $0x178] sm:$0xff]  ;;  %v4704_v13 = vmul.f32 1.442695, %v4564_v55  ;;  %7124 = vpow2.f32 %v4698_v27  ;;  %v14722_v4 = vld [vmem:[#allocation156_spill] sm:$0xff] }
 0x353   : > { %4246 = vmatprep.mubr.f32.mxu0 %v14700_v19  ;;  %v11924_v30 = vpop.f32.mrf.mxu1  ;;  %v14701_v19 = vld [vmem:[#allocation155_spill] sm:$0xff]  ;;  %5506 = vmatprep.subr.mxu0 %v5369_v48  ;;  %v11928_v38 = vpop.f32.mrf.mxu0  ;;  %v4568_v48 = vsub.f32 0.0, %v3358_v7  ;;  %v3366_v55 = vadd.f32 %v11840_v60, %v11303_v31  ;;  %v2425_v27 = vld [vmem:[#allocation7 + $0xe78] sm:$0xff]  ;;  %v4572_v41 = vsub.f32 0.0, %v3364_v34  ;;  %v14723_v23 = vmax.f32 %v14722_v4, 0.0 }
 0x354   : > { %v14702_v36 = vmax.f32 %v14701_v19, 0.0  ;;  %4348 = vmatpush2.msra.mxu1 %v2432_v3  ;;  %5507 = vmatpush2.msra.mxu0 %v5368_v2  ;;  %v4706_v32 = vmul.f32 1.442695, %v4565_v15  ;;  %v14710_v3 = vld [vmem:[#allocation159_spill] sm:$0xff]  ;;  %v5366_v7 = vld [vmem:[#allocation10 + $0x170] sm:$0xff]  ;;  %v7115_v60 = vpop.eup %7114  ;;  %7126 = vpow2.f32 %v4704_v13 }
 0x355   : > { %v11936_v1 = vpop.f32.mrf.mxu1  ;;  %v11940_v19 = vpop.f32.mrf.mxu0  ;;  %4349 = vmatprep.subr.mxu1 %v2429_v61  ;;  %5508 = vmatprep.subr.mxu0 %v5367_v33  ;;  %v14713_v61 = vld [vmem:[#allocation152_spill] sm:$0xff]  ;;  %v14715_v15 = vld [vmem:[#allocation219_spill] sm:$0xff]  ;;  %v4573_v13 = vsub.f32 0.0, %v3366_v55  ;;  %v4936_v34 = vadd.f32 1.0, %v7115_v60  ;;  %v3376_v55 = vadd.f32 %v11864_v63, %v11344_v14  ;;  %v4720_v60 = vmul.f32 1.442695, %v4572_v41 }
 0x356   : > { %4002 = vmatmul.mubr.f32.gmra.mxu1 %v14702_v36  ;;  %4247 = vmatmul.mubr.f32.gmra.mxu0 %v14704_v29  ;;  %14709 = vst [vmem:[#allocation119_spill] sm:$0xff] %v11940_v19  ;;  %v2428_v36 = vld [vmem:[#allocation7 + $0xe90] sm:$0xff]  ;;  %v4569_v29 = vsub.f32 0.0, %v3360_v57  ;;  %v14714_v2 = vmax.f32 %v14713_v61, 0.0  ;;  %v14716_v57 = vmax.f32 %v14715_v15, 0.0  ;;  %7128 = vpow2.f32 %v4706_v32  ;;  %v5363_v32 = vld [vmem:[#allocation10 + $0x158] sm:$0xff] }
 0x357   : > { %4007 = vmatprep.mubr.f32.mxu1 %v14706_v17  ;;  %4252 = vmatprep.mubr.f32.mxu0 %v14708_v59  ;;  %v11944_v49 = vpop.f32.mrf.mxu1  ;;  %v14711_v17 = vmax.f32 %v14710_v3, 0.0  ;;  %v11950_v45 = vpop.f32.mrf.mxu0  ;;  %v5365_v31 = vld [vmem:[#allocation10 + $0x168] sm:$0xff]  ;;  %v14718_v59 = vmax.f32 %v14717_v21, 0.0  ;;  %v4576_v19 = vsub.f32 0.0, %v3370_v53  ;;  %v3378_v14 = vadd.f32 %v11878_v42, %v11355_v9  ;;  %v14733_v9 = vld [vmem:[#allocation226_spill] sm:$0xff] }
 0x358   : > { %14712 = vst [vmem:[#allocation118_spill] sm:$0xff] %v11950_v45  ;;  %4350 = vmatpush2.msra.mxu1 %v2428_v36  ;;  %v7117_v3 = vpop.eup %7116  ;;  %5509 = vmatpush2.msra.mxu0 %v5366_v7  ;;  %v4714_v15 = vmul.f32 1.442695, %v4569_v29  ;;  %v14720_v21 = vld [vmem:[#allocation163_spill] sm:$0xff]  ;;  %v14734_v42 = vmax.f32 %v14733_v9, 0.0  ;;  %v2413_v9 = vld [vmem:[#allocation7 + $0xe18] sm:$0xff] }
 0x359   : > { %v11958_v33 = vpop.f32.mrf.mxu1  ;;  %v11962_v61 = vpop.f32.mrf.mxu0  ;;  %4351 = vmatprep.subr.mxu1 %v2425_v27  ;;  %v14721_v36 = vmax.f32 %v14720_v21, 0.0  ;;  %5510 = vmatprep.subr.mxu0 %v5365_v31  ;;  %v14724_v27 = vld [vmem:[#allocation222_spill] sm:$0xff]  ;;  %v4937_v29 = vadd.f32 1.0, %v7117_v3  ;;  %v4722_v3 = vmul.f32 1.442695, %v4573_v13 }
 0x35a   : > { %4008 = vmatmul.mubr.f32.gmra.mxu1 %v14711_v17  ;;  %4253 = vmatmul.mubr.f32.gmra.mxu0 %v14714_v2  ;;  %v4712_v17 = vmul.f32 1.442695, %v4568_v48  ;;  %14719 = vst [vmem:[#allocation37_spill] sm:$0xff] %v11962_v61  ;;  %v2424_v2 = vld [vmem:[#allocation7 + $0xe70] sm:$0xff]  ;;  %v5364_v48 = vld [vmem:[#allocation10 + $0x160] sm:$0xff]  ;;  %v14725_v7 = vmax.f32 %v14724_v27, 0.0  ;;  %v7119_v53 = vpop.eup %7118 }
 0x35b   : > { %4013 = vmatprep.mubr.f32.mxu1 %v14716_v57  ;;  %4258 = vmatprep.mubr.f32.mxu0 %v14718_v59  ;;  %v11964_v57 = vpop.f32.mrf.mxu1  ;;  %v2421_v59 = vld [vmem:[#allocation7 + $0xe58] sm:$0xff]  ;;  %v11968_v45 = vpop.f32.mrf.mxu0  ;;  %v14726_v21 = vld [vmem:[#allocation162_spill] sm:$0xff]  ;;  %v4577_v61 = vsub.f32 0.0, %v3372_v25  ;;  %v14729_v27 = vld [vmem:[#allocation224_spill] sm:$0xff]  ;;  %v4728_v25 = vmul.f32 1.442695, %v4576_v19 }
 0x35c   : > { %4352 = vmatpush2.msra.mxu1 %v2424_v2  ;;  %7130 = vpow2.f32 %v4712_v17  ;;  %5511 = vmatpush2.msra.mxu0 %v5364_v48  ;;  %v14730_v2 = vmax.f32 %v14729_v27, 0.0  ;;  %v5362_v17 = vld [vmem:[#allocation10 + $0x150] sm:$0xff]  ;;  %v4940_v27 = vadd.f32 1.0, %v7119_v53 }
 0x35d   : > { %v11978_v31 = vpop.f32.mrf.mxu1  ;;  %v11980_v4 = vpop.f32.mrf.mxu0  ;;  %4353 = vmatprep.subr.mxu1 %v2421_v59  ;;  %7132 = vpow2.f32 %v4714_v15  ;;  %5512 = vmatprep.subr.mxu0 %v5363_v32  ;;  %v3382_v59 = vadd.f32 %v11884_v20, %v11370_v12  ;;  %v14731_v15 = vld [vmem:[#allocation160_spill] sm:$0xff]  ;;  %v4580_v32 = vsub.f32 0.0, %v3376_v55  ;;  %v4730_v12 = vmul.f32 1.442695, %v4577_v61  ;;  %v5360_v61 = vld [vmem:[#allocation10 + $0x140] sm:$0xff] }
 0x35e   : > { %4014 = vmatmul.mubr.f32.gmra.mxu1 %v14721_v36  ;;  %4259 = vmatmul.mubr.f32.gmra.mxu0 %v14723_v23  ;;  %v14727_v36 = vmax.f32 %v14726_v21, 0.0  ;;  %14728 = vst [vmem:[#allocation121_spill] sm:$0xff] %v11980_v4  ;;  %v2420_v23 = vld [vmem:[#allocation7 + $0xe50] sm:$0xff]  ;;  %v7121_v41 = vpop.eup %7120  ;;  %7134 = vrcp.f32 %v4936_v34  ;;  %v14732_v13 = vmax.f32 %v14731_v15, 0.0  ;;  %v3384_v20 = vadd.f32 %v11898_v6, %v11381_v0 }
 0x35f   : > { %4019 = vmatprep.mubr.f32.mxu1 %v14725_v7  ;;  %v11984_v63 = vpop.f32.mrf.mxu1  ;;  %v2417_v7 = vld [vmem:[#allocation7 + $0xe38] sm:$0xff]  ;;  %v11990_v48 = vpop.f32.mrf.mxu0  ;;  %v5361_v21 = vld [vmem:[#allocation10 + $0x148] sm:$0xff]  ;;  %7136 = vrcp.f32 %v4937_v29  ;;  %4354 = vmatpush2.msra.mxu1 %v2420_v23  ;;  %v4941_v29 = vadd.f32 1.0, %v7121_v41  ;;  %v4581_v55 = vsub.f32 0.0, %v3378_v14  ;;  %v4584_v0 = vsub.f32 0.0, %v3382_v59 }
 0x360   : > { %4264 = vmatprep.mubr.f32.mxu0 %v14727_v36  ;;  %v7123_v36 = vpop.eup %7122  ;;  %7138 = vpow2.f32 %v4720_v60  ;;  %4355 = vmatprep.subr.mxu1 %v2417_v7  ;;  %v2416_v15 = vld [vmem:[#allocation7 + $0xe30] sm:$0xff]  ;;  %v3388_v6 = vadd.f32 %v11904_v11, %v11396_v50 }
 0x361   : > { %v11998_v19 = vpop.f32.mrf.mxu1  ;;  %v12002_v34 = vpop.f32.mrf.mxu0  ;;  %5513 = vmatpush2.msra.mxu0 %v5362_v17  ;;  %7140 = vpow2.f32 %v4722_v3  ;;  %v4944_v60 = vadd.f32 1.0, %v7123_v36  ;;  %v14740_v17 = vld [vmem:[#allocation164_spill] sm:$0xff]  ;;  %v14742_v3 = vld [vmem:[#allocation230_spill] sm:$0xff]  ;;  %v14744_v36 = vld [vmem:[#allocation169_spill] sm:$0xff]  ;;  %4356 = vmatpush2.msra.mxu1 %v2416_v15 }
 0x362   : > { %4020 = vmatmul.mubr.f32.gmra.mxu1 %v14730_v2  ;;  %4265 = vmatmul.mubr.f32.gmra.mxu0 %v14732_v13  ;;  %v14735_v2 = vld [vmem:[#allocation166_spill] sm:$0xff]  ;;  %14737 = vst [vmem:[#allocation251_spill] sm:$0xff] %v12002_v34  ;;  %v7125_v13 = vpop.eup %7124  ;;  %7142 = vpow2.f32 %v4728_v25  ;;  %v14741_v41 = vmax.f32 %v14740_v17, 0.0  ;;  %v14743_v14 = vmax.f32 %v14742_v3, 0.0  ;;  %v14745_v25 = vmax.f32 %v14744_v36, 0.0  ;;  %v2412_v50 = vld [vmem:[#allocation7 + $0xe10] sm:$0xff] }
 0x363   : > { %4025 = vmatprep.mubr.f32.mxu1 %v14734_v42  ;;  %v14736_v4 = vmax.f32 %v14735_v2, 0.0  ;;  %v12004_v53 = vpop.f32.mrf.mxu1  ;;  %5514 = vmatprep.subr.mxu0 %v5361_v21  ;;  %v12010_v7 = vpop.f32.mrf.mxu0  ;;  %v5359_v42 = vld [vmem:[#allocation10 + $0x138] sm:$0xff]  ;;  %7144 = vrcp.f32 %v4940_v27  ;;  %v4736_v2 = vmul.f32 1.442695, %v4580_v32  ;;  %v3390_v21 = vadd.f32 %v11916_v47, %v11407_v62  ;;  %v14747_v62 = vld [vmem:[#allocation231_spill] sm:$0xff]  ;;  %v5358_v15 = vld [vmem:[#allocation10 + $0x130] sm:$0xff] }
 0x364   : > { %v7127_v11 = vpop.eup %7126  ;;  %7146 = vpow2.f32 %v4730_v12  ;;  %4357 = vmatprep.subr.mxu1 %v2413_v9  ;;  %5515 = vmatpush2.msra.mxu0 %v5360_v61  ;;  %v4738_v27 = vmul.f32 1.442695, %v4581_v55  ;;  %v14748_v47 = vmax.f32 %v14747_v62, 0.0  ;;  %v3394_v12 = vadd.f32 %v11924_v30, %v11422_v40  ;;  %v14749_v9 = vld [vmem:[#allocation167_spill] sm:$0xff] }
 0x365   : > { %4270 = vmatprep.mubr.f32.mxu0 %v14736_v4  ;;  %v14738_v4 = vld [vmem:[#allocation228_spill] sm:$0xff]  ;;  %v12020_v59 = vpop.f32.mrf.mxu1  ;;  %v12022_v17 = vpop.f32.mrf.mxu0  ;;  %7148 = vrcp.f32 %v4941_v29  ;;  %5516 = vmatprep.subr.mxu0 %v5359_v42  ;;  %v14750_v29 = vmax.f32 %v14749_v9, 0.0  ;;  %v4948_v61 = vadd.f32 1.0, %v7127_v11  ;;  %v4589_v36 = vsub.f32 0.0, %v3390_v21 }
 0x366   : > { %v14739_v23 = vmax.f32 %v14738_v4, 0.0  ;;  %4271 = vmatmul.mubr.f32.gmra.mxu0 %v14741_v41  ;;  %v4945_v4 = vadd.f32 1.0, %v7125_v13  ;;  %14746 = vst [vmem:[#allocation120_spill] sm:$0xff] %v12022_v17  ;;  %v5415_v41 = vld [vmem:[#allocation10 + $0x2f8] sm:$0xff]  ;;  %v7129_v3 = vpop.eup %7128  ;;  %7150 = vrcp.f32 %v4944_v60  ;;  %v4588_v13 = vsub.f32 0.0, %v3388_v6  ;;  %4358 = vmatpush2.msra.mxu1 %v2412_v50  ;;  %v5357_v55 = vld [vmem:[#allocation10 + $0x128] sm:$0xff] }
 0x367   : > { %4276 = vmatprep.mubr.f32.mxu0 %v14745_v25  ;;  %v12024_v32 = vpop.f32.mrf.mxu1  ;;  %7152 = vpow2.f32 %v4736_v2  ;;  %v3396_v42 = vadd.f32 %v11936_v1, %v11433_v51  ;;  %v14751_v25 = vld [vmem:[#allocation232_spill] sm:$0xff]  ;;  %5517 = vmatpush2.msra.mxu0 %v5358_v15  ;;  %v5356_v50 = vld [vmem:[#allocation10 + $0x120] sm:$0xff]  ;;  %v4949_v21 = vadd.f32 1.0, %v7129_v3 }
 0x368   : > { %4026 = vmatmul.mubr.f32.gmra.mxu1 %v14739_v23  ;;  %v4585_v23 = vsub.f32 0.0, %v3384_v20  ;;  %v12030_v20 = vpop.f32.mrf.mxu0  ;;  %v14752_v60 = vmax.f32 %v14751_v25, 0.0  ;;  %7154 = vrcp.f32 %v4945_v4  ;;  %5717 = vmatprep.subr.mxu1 %v5415_v41  ;;  %v14756_v51 = vld [vmem:[#allocation235_spill] sm:$0xff]  ;;  %v5414_v9 = vld [vmem:[#allocation10 + $0x2f0] sm:$0xff]  ;;  %v4752_v4 = vmul.f32 1.442695, %v4588_v13 }
 0x369   : > { %4031 = vmatprep.mubr.f32.mxu1 %v14743_v14  ;;  %v4744_v14 = vmul.f32 1.442695, %v4584_v0  ;;  %v14753_v0 = vld [vmem:[#allocation233_spill] sm:$0xff]  ;;  %v12040_v40 = vpop.f32.mrf.mxu1  ;;  %v7131_v2 = vpop.eup %7130  ;;  %7156 = vpow2.f32 %v4738_v27  ;;  %v14757_v1 = vmax.f32 %v14756_v51, 0.0  ;;  %5518 = vmatprep.subr.mxu0 %v5357_v55  ;;  %v14758_v15 = vld [vmem:[#allocation234_spill] sm:$0xff]  ;;  %v4593_v51 = vsub.f32 0.0, %v3396_v42 }
 0x36a   : > { %4277 = vmatmul.mubr.f32.gmra.mxu0 %v14750_v29  ;;  %v14754_v6 = vmax.f32 %v14753_v0, 0.0  ;;  %v4746_v30 = vmul.f32 1.442695, %v4585_v23  ;;  %v12042_v62 = vpop.f32.mrf.mxu0  ;;  %v7133_v29 = vpop.eup %7132  ;;  %v4592_v23 = vsub.f32 0.0, %v3394_v12  ;;  %v14760_v41 = vld [vmem:[#allocation237_spill] sm:$0xff]  ;;  %v3400_v55 = vadd.f32 %v11944_v49, %v11448_v16  ;;  %v14765_v42 = vld [vmem:[#allocation239_spill] sm:$0xff] }
 0x36b   : > { %4282 = vmatprep.mubr.f32.mxu0 %v14752_v60  ;;  %14755 = vst [vmem:[#allocation124_spill] sm:$0xff] %v12042_v62  ;;  %v12044_v11 = vpop.f32.mrf.mxu1  ;;  %7158 = vpow2.f32 %v4744_v14  ;;  %v14759_v60 = vmax.f32 %v14758_v15, 0.0  ;;  %v14761_v3 = vmax.f32 %v14760_v41, 0.0  ;;  %v5354_v27 = vld [vmem:[#allocation10 + $0x110] sm:$0xff]  ;;  %v7135_v0 = vpop.eup %7134  ;;  %5519 = vmatpush2.msra.mxu0 %v5356_v50  ;;  %v4952_v15 = vadd.f32 1.0, %v7131_v2  ;;  %v5353_v41 = vld [vmem:[#allocation10 + $0x108] sm:$0xff] }
 0x36c   : > { %4032 = vmatmul.mubr.f32.gmra.mxu1 %v14748_v47  ;;  %v5355_v47 = vld [vmem:[#allocation10 + $0x118] sm:$0xff]  ;;  %v12048_v25 = vpop.f32.mrf.mxu0  ;;  %7160 = vrcp.f32 %v4948_v61  ;;  %v7137_v12 = vpop.eup %7136  ;;  %v3402_v16 = vadd.f32 %v11958_v33, %v11455_v8  ;;  %v5352_v50 = vld [vmem:[#allocation10 + $0x100] sm:$0xff]  ;;  %v5413_v2 = vld [vmem:[#allocation10 + $0x2e8] sm:$0xff] }
 0x36d   : > { %4359 = vmatprep.mubr.f32.mxu1 %v14754_v6  ;;  %v4754_v6 = vmul.f32 1.442695, %v4589_v36  ;;  %v12058_v13 = vpop.f32.mrf.mxu1  ;;  %7162 = vpow2.f32 %v4746_v30  ;;  %5520 = vmatprep.subr.mxu0 %v5355_v47  ;;  %v7139_v61 = vpop.eup %7138  ;;  %v4953_v36 = vadd.f32 1.0, %v7133_v29  ;;  %v3406_v47 = vadd.f32 %v11964_v57, %v11466_v44  ;;  %v14769_v8 = vld [vmem:[#allocation240_spill] sm:$0xff] }
 0x36e   : > { %4283 = vmatmul.mubr.f32.gmra.mxu0 %v14759_v60  ;;  %v12060_v60 = vpop.f32.mrf.mxu0  ;;  %7164 = vrcp.f32 %v4949_v21  ;;  %v7141_v30 = vpop.eup %7140  ;;  %v14767_v21 = vld [vmem:[#allocation238_spill] sm:$0xff]  ;;  %v14770_v33 = vmax.f32 %v14769_v8, 0.0  ;;  %v3408_v44 = vadd.f32 %v11978_v31, %v11472_v39 }
 0x36f   : > { %14764 = vst [vmem:[#allocation122_spill] sm:$0xff] %v12060_v60  ;;  %v12064_v49 = vpop.f32.mrf.mxu1  ;;  %5521 = vmatpush2.msra.mxu0 %v5354_v27  ;;  %7166 = vpow2.f32 %v4752_v4  ;;  %v14768_v29 = vmax.f32 %v14767_v21, 0.0  ;;  %v4596_v27 = vsub.f32 0.0, %v3400_v55  ;;  %v5412_v21 = vld [vmem:[#allocation10 + $0x2e0] sm:$0xff]  ;;  %v4600_v39 = vsub.f32 0.0, %v3406_v47 }
 0x370   : > { %4360 = vmatmul.mubr.f32.vlgmr.msra.gmra.mxu1 %v14757_v1  ;;  %v14762_v1 = vld [vmem:[#allocation236_spill] sm:$0xff]  ;;  %7168 = vpow2.f32 %v4754_v6  ;;  %5522 = vmatprep.subr.mxu0 %v5353_v41  ;;  %v4957_v6 = vadd.f32 1.0, %v7141_v30  ;;  %v5411_v41 = vld [vmem:[#allocation10 + $0x2d8] sm:$0xff]  ;;  %v3412_v30 = vadd.f32 %v11984_v63, %v11480_v46  ;;  %v4601_v47 = vsub.f32 0.0, %v3408_v44  ;;  %v14778_v46 = vld [vmem:[#allocation243_spill] sm:$0xff] }
 0x371   : > { %4365 = vmatprep.mubr.f32.mxu1 %v14761_v3  ;;  %v14763_v14 = vmax.f32 %v14762_v1, 0.0  ;;  %5718 = vmatpush1.msra.mxu1 %v5414_v9  ;;  %v14766_v3 = vmax.f32 %v14765_v42, 0.0  ;;  %v4760_v1 = vmul.f32 1.442695, %v4592_v23  ;;  %v12070_v9 = vpop.f32.mrf.mxu0  ;;  %v4762_v42 = vmul.f32 1.442695, %v4593_v51 }
 0x372   : > { %7170 = vrcp.f32 %v4952_v15  ;;  %v4956_v23 = vadd.f32 1.0, %v7139_v61  ;;  %5523 = vmatpush2.msra.mxu0 %v5352_v50  ;;  %5719 = vmatprep.subr.mxu1 %v5413_v2  ;;  %v4597_v51 = vsub.f32 0.0, %v3402_v16  ;;  %v14774_v15 = vmov 0.0   ;;  %v14775_v50 = vld [vmem:[#allocation242_spill] sm:$0xff] }
 0x373   : > { %4288 = vmatprep.mubr.f32.mxu0 %v14763_v14  ;;  %v7143_v14 = vpop.eup %7142  ;;  %v12080_v57 = vpop.f32.mrf.mxu0  ;;  %7172 = vrcp.f32 %v4953_v36  ;;  %6397 = vmatprep.subr.mxu0 %v14774_v15  ;;  %v14776_v2 = vmax.f32 %v14775_v50, 0.0  ;;  %v4768_v16 = vmul.f32 1.442695, %v4596_v27  ;;  %v14779_v63 = vmax.f32 %v14778_v46, 0.0 }
 0x374   : > { %4366 = vmatmul.mubr.f32.gmra.mxu1 %v14766_v3  ;;  %4289 = vmatmul.mubr.f32.gmra.mxu0 %v14768_v29  ;;  %v12076_v3 = vpop.f32.mrf.mxu1  ;;  %v7145_v4 = vpop.eup %7144  ;;  %14771 = vst [vmem:[#allocation40_spill] sm:$0xff] %v12080_v57  ;;  %7174 = vpow2.f32 %v4760_v1  ;;  %v4778_v46 = vmul.f32 1.442695, %v4601_v47 }
 0x375   : > { %4371 = vmatprep.mubr.f32.mxu1 %v14770_v33  ;;  %5524 = vmatprep.mubr.f32.mxu0 %v7137_v12  ;;  %v7147_v29 = vpop.eup %7146  ;;  %v14772_v12 = vld [vmem:[#allocation241_spill] sm:$0xff]  ;;  %v4960_v33 = vadd.f32 1.0, %v7143_v14  ;;  %v12087_v31 = vpop.f32.mrf.mxu0  ;;  %7176 = vpow2.f32 %v4762_v42  ;;  %v3414_v42 = vadd.f32 %v11998_v19, %v11488_v58 }
 0x376   : > { %v12082_v55 = vpop.f32.mrf.mxu1  ;;  %v14773_v8 = vmax.f32 %v14772_v12, 0.0  ;;  %v7149_v61 = vpop.eup %7148  ;;  %5720 = vmatpush1.msra.mxu1 %v5412_v21  ;;  %7178 = vrcp.f32 %v4956_v23  ;;  %v4961_v1 = vadd.f32 1.0, %v7147_v29  ;;  %v5409_v21 = vld [vmem:[#allocation10 + $0x2c8] sm:$0xff]  ;;  %v4776_v23 = vmul.f32 1.442695, %v4600_v39 }
 0x377   : > { %v7151_v36 = vpop.eup %7150  ;;  %v12095_v14 = vpop.f32.mrf.mxu0  ;;  %5721 = vmatprep.subr.mxu1 %v5411_v41  ;;  %7180 = vrcp.f32 %v4957_v6  ;;  %v14780_v29 = vld [vmem:[#allocation244_spill] sm:$0xff] }
 0x378   : > { %4372 = vmatmul.mubr.f32.gmra.mxu1 %v14773_v8  ;;  %5525 = vmatmul.mubr.f32.vlgmr.msra.gmra.mxu0 %v7135_v0  ;;  %v12093_v12 = vpop.f32.mrf.mxu1  ;;  %v7153_v8 = vpop.eup %7152  ;;  %14777 = vst [vmem:[#allocation126_spill] sm:$0xff] %v12095_v14  ;;  %v5410_v0 = vld [vmem:[#allocation10 + $0x2d0] sm:$0xff]  ;;  %7182 = vrcp.f32 %v4960_v33  ;;  %v14781_v41 = vmax.f32 %v14780_v29, 0.0  ;;  %v4604_v14 = vsub.f32 0.0, %v3412_v30  ;;  %v3420_v33 = vadd.f32 %v12020_v59, %v11504_v37  ;;  %v14785_v59 = vld [vmem:[#allocation246_spill] sm:$0xff] }
 0x379   : > { %4377 = vmatprep.mubr.f32.mxu1 %v14776_v2  ;;  %5530 = vmatprep.mubr.f32.mxu0 %v7149_v61  ;;  %v7155_v50 = vpop.eup %7154  ;;  %v4770_v2 = vmul.f32 1.442695, %v4597_v51  ;;  %v12103_v44 = vpop.f32.mrf.mxu0  ;;  %v4964_v51 = vadd.f32 1.0, %v7153_v8  ;;  %7184 = vpow2.f32 %v4768_v16  ;;  %v4605_v8 = vsub.f32 0.0, %v3414_v42 }
 0x37a   : > { %v12099_v27 = vpop.f32.mrf.mxu1  ;;  %v7157_v61 = vpop.eup %7156  ;;  %5722 = vmatpush1.msra.mxu1 %v5410_v0  ;;  %7186 = vrcp.f32 %v4961_v1  ;;  %v3418_v16 = vadd.f32 %v12004_v53, %v11498_v24  ;;  %v14783_v0 = vld [vmem:[#allocation26_spill] sm:$0xff]  ;;  %v4784_v42 = vmul.f32 1.442695, %v4604_v14  ;;  %v3426_v14 = vadd.f32 %v12040_v40, %v11520_v18 }
 0x37b   : > { %v7159_v6 = vpop.eup %7158  ;;  %v12111_v39 = vpop.f32.mrf.mxu0  ;;  %5723 = vmatprep.subr.mxu1 %v5409_v21  ;;  %v4965_v29 = vadd.f32 1.0, %v7157_v61  ;;  %7188 = vpow2.f32 %v4770_v2  ;;  %v5407_v1 = vld [vmem:[#allocation10 + $0x2b8] sm:$0xff]  ;;  %v14786_v21 = vmax.f32 %v14785_v59, 0.0  ;;  %v4786_v59 = vmul.f32 1.442695, %v4605_v8 }
 0x37c   : > { %4378 = vmatmul.mubr.f32.gmra.mxu1 %v14779_v63  ;;  %5531 = vmatmul.mubr.f32.gmra.mxu0 %v7145_v4  ;;  %v12107_v58 = vpop.f32.mrf.mxu1  ;;  %v7161_v19 = vpop.eup %7160  ;;  %14782 = vst [vmem:[#allocation253_spill] sm:$0xff] %v12111_v39  ;;  %v5408_v4 = vld [vmem:[#allocation10 + $0x2c0] sm:$0xff]  ;;  %7190 = vpow2.f32 %v4776_v23  ;;  %v3424_v23 = vadd.f32 %v12024_v32, %v11514_v56  ;;  %v3430_v32 = vadd.f32 %v12044_v11, %v11528_v54 }
 0x37d   : > { %4383 = vmatprep.mubr.f32.mxu1 %v14781_v41  ;;  %5536 = vmatprep.mubr.f32.mxu0 %v7155_v50  ;;  %v7163_v63 = vpop.eup %7162  ;;  %v14784_v50 = vmax.f32 %v14783_v0, 0.0  ;;  %v4968_v41 = vadd.f32 1.0, %v7159_v6  ;;  %v12119_v37 = vpop.f32.mrf.mxu0  ;;  %7192 = vrcp.f32 %v4964_v51  ;;  %v4609_v0 = vsub.f32 0.0, %v3420_v33 }
 0x37e   : > { %v12115_v30 = vpop.f32.mrf.mxu1  ;;  %v7165_v47 = vpop.eup %7164  ;;  %5724 = vmatpush1.msra.mxu1 %v5408_v4  ;;  %v4969_v61 = vadd.f32 1.0, %v7163_v63  ;;  %7194 = vpow2.f32 %v4778_v46  ;;  %v4608_v51 = vsub.f32 0.0, %v3418_v16  ;;  %v14788_v4 = vld [vmem:[#allocation29_spill] sm:$0xff]  ;;  %v5405_v46 = vld [vmem:[#allocation10 + $0x2a8] sm:$0xff]  ;;  %v3432_v54 = vadd.f32 %v12058_v13, %v11536_v10  ;;  %v14795_v10 = vld [vmem:[#allocation250_spill] sm:$0xff] }
 0x37f   : > { %v7167_v2 = vpop.eup %7166  ;;  %v12127_v6 = vpop.f32.mrf.mxu0  ;;  %5725 = vmatprep.subr.mxu1 %v5407_v1  ;;  %7196 = vrcp.f32 %v4965_v29  ;;  %v14789_v63 = vmax.f32 %v14788_v4, 0.0  ;;  %v14790_v29 = vld [vmem:[#allocation248_spill] sm:$0xff]  ;;  %v14796_v13 = vmax.f32 %v14795_v10, 0.0 }
 0x380   : > { %4384 = vmatmul.mubr.f32.gmra.mxu1 %v14784_v50  ;;  %5537 = vmatmul.mubr.f32.gmra.mxu0 %v7151_v36  ;;  %v12123_v24 = vpop.f32.mrf.mxu1  ;;  %v7169_v53 = vpop.eup %7168  ;;  %14787 = vst [vmem:[#allocation125_spill] sm:$0xff] %v12127_v6  ;;  %v5406_v36 = vld [vmem:[#allocation10 + $0x2b0] sm:$0xff]  ;;  %7198 = vrcp.f32 %v4968_v41  ;;  %v4972_v56 = vadd.f32 1.0, %v7167_v2  ;;  %v14791_v8 = vmax.f32 %v14790_v29, 0.0  ;;  %v4794_v41 = vmul.f32 1.442695, %v4609_v0 }
 0x381   : > { %4389 = vmatprep.mubr.f32.mxu1 %v14786_v21  ;;  %5542 = vmatprep.mubr.f32.mxu0 %v7165_v47  ;;  %v7171_v50 = vpop.eup %7170  ;;  %v12137_v1 = vpop.f32.mrf.mxu0  ;;  %v4973_v18 = vadd.f32 1.0, %v7169_v53  ;;  %7200 = vpow2.f32 %v4784_v42  ;;  %v4612_v2 = vsub.f32 0.0, %v3424_v23  ;;  %v4613_v53 = vsub.f32 0.0, %v3426_v14 }
 0x382   : > { %v12131_v47 = vpop.f32.mrf.mxu1  ;;  %v7173_v33 = vpop.eup %7172  ;;  %5726 = vmatpush1.msra.mxu1 %v5406_v36  ;;  %7202 = vrcp.f32 %v4969_v61  ;;  %v5403_v36 = vld [vmem:[#allocation10 + $0x298] sm:$0xff]  ;;  %v4616_v23 = vsub.f32 0.0, %v3430_v32  ;;  %v4617_v32 = vsub.f32 0.0, %v3432_v54 }
 0x383   : > { %v7175_v16 = vpop.eup %7174  ;;  %v12145_v11 = vpop.f32.mrf.mxu0  ;;  %5727 = vmatprep.subr.mxu1 %v5405_v46  ;;  %7204 = vpow2.f32 %v4786_v59  ;;  %v4802_v10 = vmul.f32 1.442695, %v4613_v53 }
 0x384   : > { %4390 = vmatmul.mubr.f32.gmra.mxu1 %v14789_v63  ;;  %5543 = vmatmul.mubr.f32.gmra.mxu0 %v7161_v19  ;;  %v12141_v40 = vpop.f32.mrf.mxu1  ;;  %v7177_v21 = vpop.eup %7176  ;;  %14792 = vst [vmem:[#allocation128_spill] sm:$0xff] %v12145_v11  ;;  %v5404_v19 = vld [vmem:[#allocation10 + $0x2a0] sm:$0xff]  ;;  %v4792_v63 = vmul.f32 1.442695, %v4608_v51  ;;  %7206 = vrcp.f32 %v4972_v56  ;;  %v4976_v0 = vadd.f32 1.0, %v7175_v16  ;;  %v3436_v51 = vadd.f32 %v12064_v49, %v11546_v28  ;;  %v14807_v11 = vld [vmem:[#allocation81_spill] sm:$0xff] }
 0x385   : > { %4395 = vmatprep.mubr.f32.mxu1 %v14791_v8  ;;  %5548 = vmatprep.mubr.f32.mxu0 %v7173_v33  ;;  %v7179_v4 = vpop.eup %7178  ;;  %v14793_v33 = vld [vmem:[#allocation32_spill] sm:$0xff]  ;;  %v12151_v8 = vpop.f32.mrf.mxu0  ;;  %7208 = vrcp.f32 %v4973_v18  ;;  %v4977_v59 = vadd.f32 1.0, %v7177_v21  ;;  %v4800_v56 = vmul.f32 1.442695, %v4612_v2  ;;  %v3438_v18 = vadd.f32 %v12076_v3, %v11552_v43  ;;  %v14798_v28 = vld [vmem:[#allocation35_spill] sm:$0xff] }
 0x386   : > { %v12147_v42 = vpop.f32.mrf.mxu1  ;;  %v14794_v29 = vmax.f32 %v14793_v33, 0.0  ;;  %v7181_v61 = vpop.eup %7180  ;;  %5728 = vmatpush1.msra.mxu1 %v5404_v19  ;;  %7210 = vpow2.f32 %v4794_v41  ;;  %v14799_v49 = vmax.f32 %v14798_v28, 0.0  ;;  %v5401_v19 = vld [vmem:[#allocation10 + $0x288] sm:$0xff]  ;;  %v4808_v41 = vmul.f32 1.442695, %v4616_v23  ;;  %v14803_v23 = vld [vmem:[#allocation45_spill] sm:$0xff] }
 0x387   : > { %v7183_v46 = vpop.eup %7182  ;;  %v12159_v16 = vpop.f32.mrf.mxu0  ;;  %5729 = vmatprep.subr.mxu1 %v5403_v36  ;;  %7212 = vpow2.f32 %v4792_v63  ;;  %v14800_v2 = vld [vmem:[#allocation220_spill] sm:$0xff]  ;;  %v4620_v3 = vsub.f32 0.0, %v3436_v51  ;;  %v14805_v51 = vld [vmem:[#allocation38_spill] sm:$0xff] }
 0x388   : > { %4396 = vmatmul.mubr.f32.gmra.mxu1 %v14794_v29  ;;  %5549 = vmatmul.mubr.f32.gmra.mxu0 %v7171_v50  ;;  %v12157_v14 = vpop.f32.mrf.mxu1  ;;  %v7185_v33 = vpop.eup %7184  ;;  %14797 = vst [vmem:[#allocation127_spill] sm:$0xff] %v12159_v16  ;;  %v5402_v50 = vld [vmem:[#allocation10 + $0x290] sm:$0xff]  ;;  %7214 = vrcp.f32 %v4976_v0  ;;  %v3442_v54 = vadd.f32 %v12082_v55, %v14800_v2  ;;  %v4810_v0 = vmul.f32 1.442695, %v4617_v32  ;;  %v3444_v55 = vadd.f32 %v12093_v12, %v14803_v23 }
 0x389   : > { %4401 = vmatprep.mubr.f32.mxu1 %v14796_v13  ;;  %5554 = vmatprep.mubr.f32.mxu0 %v7181_v61  ;;  %v7187_v29 = vpop.eup %7186  ;;  %v12169_v36 = vpop.f32.mrf.mxu0  ;;  %v14801_v63 = vld [vmem:[#allocation252_spill] sm:$0xff]  ;;  %7216 = vrcp.f32 %v4977_v59  ;;  %v4980_v43 = vadd.f32 1.0, %v7185_v33  ;;  %v4621_v59 = vsub.f32 0.0, %v3438_v18  ;;  %v3448_v12 = vadd.f32 %v12099_v27, %v14807_v11 }
 0x38a   : > { %v12163_v21 = vpop.f32.mrf.mxu1  ;;  %v7189_v61 = vpop.eup %7188  ;;  %v14802_v53 = vmax.f32 %v14801_v63, 0.0  ;;  %5730 = vmatpush1.msra.mxu1 %v5402_v50  ;;  %7218 = vpow2.f32 %v4800_v56  ;;  %v5399_v50 = vld [vmem:[#allocation10 + $0x278] sm:$0xff]  ;;  %v4624_v32 = vsub.f32 0.0, %v3442_v54  ;;  %v4816_v18 = vmul.f32 1.442695, %v4620_v3 }
 0x38b   : > { %v7191_v13 = vpop.eup %7190  ;;  %v12177_v2 = vpop.f32.mrf.mxu0  ;;  %5731 = vmatprep.subr.mxu1 %v5401_v19  ;;  %7220 = vpow2.f32 %v4802_v10  ;;  %v14808_v19 = vld [vmem:[#allocation254_spill] sm:$0xff]  ;;  %v4625_v27 = vsub.f32 0.0, %v3444_v55  ;;  %v4628_v55 = vsub.f32 0.0, %v3448_v12 }
 0x38c   : > { %4402 = vmatmul.mubr.f32.gmra.mxu1 %v14799_v49  ;;  %5555 = vmatmul.mubr.f32.gmra.mxu0 %v7179_v4  ;;  %v12173_v28 = vpop.f32.mrf.mxu1  ;;  %v7193_v49 = vpop.eup %7192  ;;  %14804 = vst [vmem:[#allocation43_spill] sm:$0xff] %v12177_v2  ;;  %v5400_v4 = vld [vmem:[#allocation10 + $0x280] sm:$0xff]  ;;  %v4984_v56 = vadd.f32 1.0, %v7191_v13  ;;  %7222 = vpow2.f32 %v4808_v41  ;;  %v14810_v2 = vld [vmem:[#allocation221_spill] sm:$0xff] }
 0x38d   : > { %4407 = vmatprep.mubr.f32.mxu1 %v14802_v53  ;;  %5560 = vmatprep.mubr.f32.mxu0 %v7187_v29  ;;  %v7195_v63 = vpop.eup %7194  ;;  %v4981_v53 = vadd.f32 1.0, %v7189_v61  ;;  %v14806_v29 = vmax.f32 %v14805_v51, 0.0  ;;  %v12185_v23 = vpop.f32.mrf.mxu0  ;;  %v14809_v61 = vmax.f32 %v14808_v19, 0.0  ;;  %7224 = vrcp.f32 %v4980_v43  ;;  %v14812_v43 = vld [vmem:[#allocation223_spill] sm:$0xff] }
 0x38e   : > { %v12179_v33 = vpop.f32.mrf.mxu1  ;;  %v7197_v16 = vpop.eup %7196  ;;  %v3450_v51 = vadd.f32 %v12107_v58, %v14810_v2  ;;  %5732 = vmatpush1.msra.mxu1 %v5400_v4  ;;  %v4985_v54 = vadd.f32 1.0, %v7195_v63  ;;  %7226 = vpow2.f32 %v4810_v0  ;;  %v4818_v19 = vmul.f32 1.442695, %v4621_v59  ;;  %v14813_v58 = vld [vmem:[#allocation41_spill] sm:$0xff]  ;;  %v5397_v2 = vld [vmem:[#allocation10 + $0x268] sm:$0xff] }
 0x38f   : > { %v7199_v10 = vpop.eup %7198  ;;  %v12193_v11 = vpop.f32.mrf.mxu0  ;;  %5733 = vmatprep.subr.mxu1 %v5399_v50  ;;  %7228 = vrcp.f32 %v4981_v53  ;;  %v3454_v3 = vadd.f32 %v12115_v30, %v14812_v43  ;;  %v4824_v0 = vmul.f32 1.442695, %v4624_v32  ;;  %v14815_v50 = vld [vmem:[#allocation256_spill] sm:$0xff]  ;;  %v4826_v32 = vmul.f32 1.442695, %v4625_v27 }
 0x390   : > { %4408 = vmatmul.mubr.f32.gmra.mxu1 %v14806_v29  ;;  %5561 = vmatmul.mubr.f32.gmra.mxu0 %v7183_v46  ;;  %v12191_v29 = vpop.f32.mrf.mxu1  ;;  %v7201_v41 = vpop.eup %7200  ;;  %14811 = vst [vmem:[#allocation130_spill] sm:$0xff] %v12193_v11  ;;  %v5398_v46 = vld [vmem:[#allocation10 + $0x270] sm:$0xff]  ;;  %7230 = vrcp.f32 %v4984_v56  ;;  %v14816_v11 = vmax.f32 %v14815_v50, 0.0  ;;  %v4629_v30 = vsub.f32 0.0, %v3450_v51 }
 0x391   : > { %4413 = vmatprep.mubr.f32.mxu1 %v14809_v61  ;;  %5566 = vmatprep.mubr.f32.mxu0 %v7197_v16  ;;  %v7203_v13 = vpop.eup %7202  ;;  %v14814_v16 = vmax.f32 %v14813_v58, 0.0  ;;  %v12201_v63 = vpop.f32.mrf.mxu0  ;;  %v4988_v59 = vadd.f32 1.0, %v7201_v41  ;;  %7232 = vpow2.f32 %v4816_v18  ;;  %v14817_v43 = vld [vmem:[#allocation48_spill] sm:$0xff]  ;;  %v4632_v41 = vsub.f32 0.0, %v3454_v3 }
 0x392   : > { %v12197_v61 = vpop.f32.mrf.mxu1  ;;  %v7205_v4 = vpop.eup %7204  ;;  %v3456_v6 = vadd.f32 %v12123_v24, %v14817_v43  ;;  %5734 = vmatpush1.msra.mxu1 %v5398_v46  ;;  %7234 = vrcp.f32 %v4985_v54  ;;  %v14819_v51 = vld [vmem:[#allocation44_spill] sm:$0xff]  ;;  %v5395_v24 = vld [vmem:[#allocation10 + $0x258] sm:$0xff]  ;;  %v4832_v46 = vmul.f32 1.442695, %v4628_v55 }
 0x393   : > { %v7207_v53 = vpop.eup %7206  ;;  %v12209_v12 = vpop.f32.mrf.mxu0  ;;  %5735 = vmatprep.subr.mxu1 %v5397_v2  ;;  %7236 = vpow2.f32 %v4818_v19  ;;  %v14820_v50 = vmax.f32 %v14819_v51, 0.0  ;;  %v14821_v54 = vld [vmem:[#allocation258_spill] sm:$0xff]  ;;  %v14823_v3 = vld [vmem:[#allocation84_spill] sm:$0xff] }
 0x394   : > { %4414 = vmatmul.mubr.f32.gmra.mxu1 %v14814_v16  ;;  %5567 = vmatmul.mubr.f32.gmra.mxu0 %v7193_v49  ;;  %v12207_v58 = vpop.f32.mrf.mxu1  ;;  %v7209_v56 = vpop.eup %7208  ;;  %14818 = vst [vmem:[#allocation255_spill] sm:$0xff] %v12209_v12  ;;  %v5396_v49 = vld [vmem:[#allocation10 + $0x260] sm:$0xff]  ;;  %7238 = vpow2.f32 %v4824_v0  ;;  %v14822_v27 = vmax.f32 %v14821_v54, 0.0  ;;  %v4633_v19 = vsub.f32 0.0, %v3456_v6  ;;  %v3460_v12 = vadd.f32 %v12131_v47, %v14823_v3  ;;  %v5393_v3 = vld [vmem:[#allocation10 + $0x248] sm:$0xff] }
 0x395   : > { %4419 = vmatprep.mubr.f32.mxu1 %v14816_v11  ;;  %5572 = vmatprep.mubr.f32.mxu0 %v7203_v13  ;;  %v7211_v16 = vpop.eup %7210  ;;  %v4989_v11 = vadd.f32 1.0, %v7205_v4  ;;  %v12215_v43 = vpop.f32.mrf.mxu0  ;;  %7240 = vrcp.f32 %v4988_v59  ;;  %v4834_v4 = vmul.f32 1.442695, %v4629_v30  ;;  %v14825_v59 = vld [vmem:[#allocation225_spill] sm:$0xff]  ;;  %v14826_v47 = vld [vmem:[#allocation47_spill] sm:$0xff] }
 0x396   : > { %v12211_v18 = vpop.f32.mrf.mxu1  ;;  %v7213_v13 = vpop.eup %7212  ;;  %5736 = vmatpush1.msra.mxu1 %v5396_v49  ;;  %v4993_v0 = vadd.f32 1.0, %v7211_v16  ;;  %7242 = vpow2.f32 %v4826_v32  ;;  %v3462_v6 = vadd.f32 %v12141_v40, %v14825_v59  ;;  %v14828_v32 = vld [vmem:[#allocation227_spill] sm:$0xff]  ;;  %v4842_v40 = vmul.f32 1.442695, %v4633_v19 }
 0x397   : > { %v7215_v2 = vpop.eup %7214  ;;  %v12223_v55 = vpop.f32.mrf.mxu0  ;;  %5737 = vmatprep.subr.mxu1 %v5395_v24  ;;  %7244 = vrcp.f32 %v4989_v11  ;;  %v4992_v39 = vadd.f32 1.0, %v7213_v13  ;;  %v3466_v16 = vadd.f32 %v12147_v42, %v14828_v32  ;;  %v14830_v11 = vld [vmem:[#allocation260_spill] sm:$0xff]  ;;  %v4636_v59 = vsub.f32 0.0, %v3460_v12  ;;  %v14834_v12 = vld [vmem:[#allocation50_spill] sm:$0xff] }
 0x398   : > { %4420 = vmatmul.mubr.f32.gmra.mxu1 %v14820_v50  ;;  %5573 = vmatmul.mubr.f32.gmra.mxu0 %v7199_v10  ;;  %v12221_v51 = vpop.f32.mrf.mxu1  ;;  %v7217_v50 = vpop.eup %7216  ;;  %14824 = vst [vmem:[#allocation129_spill] sm:$0xff] %v12223_v55  ;;  %v5394_v10 = vld [vmem:[#allocation10 + $0x250] sm:$0xff]  ;;  %7246 = vpow2.f32 %v4832_v46  ;;  %v14832_v46 = vld [vmem:[#allocation51_spill] sm:$0xff] }
 0x399   : > { %4425 = vmatprep.mubr.f32.mxu1 %v14822_v27  ;;  %5578 = vmatprep.mubr.f32.mxu0 %v7209_v56  ;;  %v7219_v54 = vpop.eup %7218  ;;  %v4840_v27 = vmul.f32 1.442695, %v4632_v41  ;;  %v14827_v56 = vmax.f32 %v14826_v47, 0.0  ;;  %v12233_v24 = vpop.f32.mrf.mxu0  ;;  %v14831_v41 = vmax.f32 %v14830_v11, 0.0  ;;  %7248 = vpow2.f32 %v4834_v4 }
 0x39a   : > { %v12227_v30 = vpop.f32.mrf.mxu1  ;;  %v7221_v49 = vpop.eup %7220  ;;  %14829 = vst [vmem:[#allocation132_spill] sm:$0xff] %v12233_v24  ;;  %5738 = vmatpush1.msra.mxu1 %v5394_v10  ;;  %7250 = vrcp.f32 %v4993_v0  ;;  %v4996_v13 = vadd.f32 1.0, %v7219_v54  ;;  %v3468_v42 = vadd.f32 %v12157_v14, %v14832_v46  ;;  %v4637_v4 = vsub.f32 0.0, %v3462_v6  ;;  %v5391_v10 = vld [vmem:[#allocation10 + $0x238] sm:$0xff] }
 0x39b   : > { %v7223_v55 = vpop.eup %7222  ;;  %v12241_v32 = vpop.f32.mrf.mxu0  ;;  %5739 = vmatprep.subr.mxu1 %v5393_v3  ;;  %7252 = vpow2.f32 %v4840_v27  ;;  %v4640_v54 = vsub.f32 0.0, %v3466_v16  ;;  %v14837_v14 = vld [vmem:[#allocation262_spill] sm:$0xff]  ;;  %v4848_v27 = vmul.f32 1.442695, %v4636_v59  ;;  %v14839_v6 = vld [vmem:[#allocation229_spill] sm:$0xff] }
 0x39c   : > { %4426 = vmatmul.mubr.f32.gmra.mxu1 %v14827_v56  ;;  %5579 = vmatmul.mubr.f32.gmra.mxu0 %v7207_v53  ;;  %v12237_v47 = vpop.f32.mrf.mxu1  ;;  %v7225_v56 = vpop.eup %7224  ;;  %14833 = vst [vmem:[#allocation131_spill] sm:$0xff] %v12241_v32  ;;  %v5392_v53 = vld [vmem:[#allocation10 + $0x240] sm:$0xff]  ;;  %7254 = vrcp.f32 %v4992_v39  ;;  %v5000_v0 = vadd.f32 1.0, %v7223_v55  ;;  %v14838_v3 = vmax.f32 %v14837_v14, 0.0  ;;  %v4641_v55 = vsub.f32 0.0, %v3468_v42 }
 0x39d   : > { %4431 = vmatprep.mubr.f32.mxu1 %v14831_v41  ;;  %5584 = vmatprep.mubr.f32.mxu0 %v7217_v50  ;;  %v7227_v11 = vpop.eup %7226  ;;  %v4997_v41 = vadd.f32 1.0, %v7221_v49  ;;  %v14835_v50 = vmax.f32 %v14834_v12, 0.0  ;;  %v12247_v60 = vpop.f32.mrf.mxu0  ;;  %7256 = vpow2.f32 %v4842_v40  ;;  %v3474_v49 = vadd.f32 %v12173_v28, %v14839_v6  ;;  %v14841_v40 = vld [vmem:[#allocation86_spill] sm:$0xff] }
 0x39e   : > { %v12243_v19 = vpop.f32.mrf.mxu1  ;;  %v7229_v57 = vpop.eup %7228  ;;  %14836 = vst [vmem:[#allocation46_spill] sm:$0xff] %v12247_v60  ;;  %5740 = vmatpush1.msra.mxu1 %v5392_v53  ;;  %7258 = vrcp.f32 %v4996_v13  ;;  %v5001_v39 = vadd.f32 1.0, %v7227_v11  ;;  %v3472_v59 = vadd.f32 %v12163_v21, %v14841_v40  ;;  %v5389_v53 = vld [vmem:[#allocation10 + $0x228] sm:$0xff]  ;;  %v4856_v13 = vmul.f32 1.442695, %v4640_v54 }
 0x39f   : > { %v7231_v46 = vpop.eup %7230  ;;  %v12255_v16 = vpop.f32.mrf.mxu0  ;;  %5741 = vmatprep.subr.mxu1 %v5391_v10  ;;  %7260 = vrcp.f32 %v4997_v41  ;;  %v14845_v11 = vld [vmem:[#allocation264_spill] sm:$0xff] }
 0x3a0   : > { %4432 = vmatmul.mubr.f32.gmra.mxu1 %v14835_v50  ;;  %5585 = vmatmul.mubr.f32.gmra.mxu0 %v7215_v2  ;;  %v12253_v12 = vpop.f32.mrf.mxu1  ;;  %v7233_v50 = vpop.eup %7232  ;;  %14840 = vst [vmem:[#allocation134_spill] sm:$0xff] %v12255_v16  ;;  %v5390_v2 = vld [vmem:[#allocation10 + $0x230] sm:$0xff]  ;;  %7262 = vrcp.f32 %v5000_v0  ;;  %v14846_v10 = vmax.f32 %v14845_v11, 0.0  ;;  %v4645_v16 = vsub.f32 0.0, %v3474_v49 }
 0x3a1   : > { %4437 = vmatprep.mubr.f32.mxu1 %v14838_v3  ;;  %5590 = vmatprep.mubr.f32.mxu0 %v7229_v57  ;;  %v7235_v14 = vpop.eup %7234  ;;  %v4850_v3 = vmul.f32 1.442695, %v4637_v4  ;;  %v14842_v57 = vld [vmem:[#allocation53_spill] sm:$0xff]  ;;  %v12263_v42 = vpop.f32.mrf.mxu0  ;;  %v5004_v4 = vadd.f32 1.0, %v7233_v50  ;;  %7264 = vpow2.f32 %v4848_v27  ;;  %v4644_v50 = vsub.f32 0.0, %v3472_v59  ;;  %v14849_v49 = vld [vmem:[#allocation56_spill] sm:$0xff] }
 0x3a2   : > { %v12259_v32 = vpop.f32.mrf.mxu1  ;;  %v14843_v28 = vmax.f32 %v14842_v57, 0.0  ;;  %v7237_v6 = vpop.eup %7236  ;;  %14844 = vst [vmem:[#allocation257_spill] sm:$0xff] %v12263_v42  ;;  %5742 = vmatpush1.msra.mxu1 %v5390_v2  ;;  %7266 = vrcp.f32 %v5001_v39  ;;  %v4858_v57 = vmul.f32 1.442695, %v4641_v55  ;;  %v5387_v2 = vld [vmem:[#allocation10 + $0x218] sm:$0xff]  ;;  %v14877_v60 = vld [vmem:[#allocation60_spill] sm:$0xff] }
 0x3a3   : > { %v7239_v41 = vpop.eup %7238  ;;  %v12271_v54 = vpop.f32.mrf.mxu0  ;;  %5743 = vmatprep.subr.mxu1 %v5389_v53  ;;  %7268 = vpow2.f32 %v4850_v3  ;;  %v14851_v55 = vld [vmem:[#allocation54_spill] sm:$0xff]  ;;  %v12333_v24 = vadd.f32 %v12211_v18, %v14877_v60  ;;  %v14880_v18 = vld [vmem:[#allocation100_spill] sm:$0xff] }
 0x3a4   : > { %4438 = vmatmul.mubr.f32.gmra.mxu1 %v14843_v28  ;;  %5591 = vmatmul.mubr.f32.gmra.mxu0 %v7225_v56  ;;  %v12267_v21 = vpop.f32.mrf.mxu1  ;;  %v7241_v40 = vpop.eup %7240  ;;  %v14847_v28 = vld [vmem:[#allocation88_spill] sm:$0xff]  ;;  %14848 = vst [vmem:[#allocation133_spill] sm:$0xff] %v12271_v54  ;;  %v5388_v56 = vld [vmem:[#allocation10 + $0x220] sm:$0xff]  ;;  %v5008_v39 = vadd.f32 1.0, %v7239_v41  ;;  %7270 = vpow2.f32 %v4856_v13  ;;  %v7909_v59 = vld [vmem:[#allocation8] sm:$0xf] }
 0x3a5   : > { %4443 = vmatprep.mubr.f32.mxu1 %v14846_v10  ;;  %5596 = vmatprep.mubr.f32.mxu0 %v7235_v14  ;;  %v3480_v0 = vadd.f32 %v12191_v29, %v14847_v28  ;;  %v7243_v11 = vpop.eup %7242  ;;  %v5005_v10 = vadd.f32 1.0, %v7237_v6  ;;  %v14850_v14 = vmax.f32 %v14849_v49, 0.0  ;;  %v3478_v29 = vadd.f32 %v12179_v33, %v14851_v55  ;;  %v12279_v28 = vpop.f32.mrf.mxu0  ;;  %v14853_v53 = vld [vmem:[#allocation266_spill] sm:$0xff]  ;;  %v14855_v6 = vld [vmem:[#allocation23_spill] sm:$0xff] }
 0x3a6   : > { %v12273_v27 = vpop.f32.mrf.mxu1  ;;  %v7245_v62 = vpop.eup %7244  ;;  %14852 = vst [vmem:[#allocation136_spill] sm:$0xff] %v12279_v28  ;;  %v14854_v54 = vmax.f32 %v14853_v53, 0.0  ;;  %v14856_v17 = vsub.s32 2, %v14855_v6  ;;  %v14857_v49 = vsub.s32 3, %v14855_v6  ;;  %7272 = vrcp.f32 %v5004_v4  ;;  %5744 = vmatpush1.msra.mxu1 %v5388_v56  ;;  %v14858_v55 = vld [vmem:[#allocation91_spill] sm:$0xff]  ;;  %v14860_v4 = vld [vmem:[#allocation57_spill] sm:$0xff] }
 0x3a7   : > { %v7247_v3 = vpop.eup %7246  ;;  %v4866_v13 = vmul.f32 1.442695, %v4645_v16  ;;  %v5009_v41 = vadd.f32 1.0, %v7243_v11  ;;  %7274 = vpow2.f32 %v4858_v57  ;;  %v3486_v53 = vadd.f32 %v12207_v58, %v14858_v55  ;;  %v12295_v15 = vpop.f32.mrf.mxu0  ;;  %5745 = vmatprep.subr.mxu1 %v5387_v2  ;;  %v14861_v56 = vld [vmem:[#allocation59_spill] sm:$0xff]  ;;  %v14864_v2 = vld [vmem:[#allocation268_spill] sm:$0xff] }
 0x3a8   : > { %4444 = vmatmul.mubr.f32.gmra.mxu1 %v14850_v14  ;;  %5597 = vmatmul.mubr.f32.gmra.mxu0 %v7231_v46  ;;  %v12285_v34 = vrot.slane %v7909_v59, %v14856_v17  ;;  %v12289_v14 = vrot.slane %v7909_v59, %v14857_v49  ;;  %v12291_v33 = vpop.f32.mrf.mxu1  ;;  %v7249_v46 = vpop.eup %7248  ;;  %14859 = vst [vmem:[#allocation135_spill] sm:$0xff] %v12295_v15  ;;  %v5386_v17 = vld [vmem:[#allocation10 + $0x210] sm:$0xff]  ;;  %7276 = vrcp.f32 %v5005_v10  ;;  %v4864_v59 = vmul.f32 1.442695, %v4644_v50  ;;  %v5385_v57 = vld [vmem:[#allocation10 + $0x208] sm:$0xff] }
 0x3a9   : > { %4449 = vmatprep.mubr.f32.mxu1 %v14854_v54  ;;  %5602 = vmatprep.mubr.f32.mxu0 %v7245_v62  ;;  %v4649_v54 = vsub.f32 0.0, %v3480_v0  ;;  %v7251_v6 = vpop.eup %7250  ;;  %v3484_v62 = vadd.f32 %v12197_v61, %v14860_v4  ;;  %v14862_v49 = vmax.f32 %v14861_v56, 0.0  ;;  %7278 = vrcp.f32 %v5008_v39  ;;  %v12303_v55 = vpop.f32.mrf.mxu0  ;;  %v14866_v50 = vld [vmem:[#allocation111_spill] sm:$0xff] }
 0x3aa   : > { %v12299_v16 = vpop.f32.mrf.mxu1  ;;  %v7253_v0 = vpop.eup %7252  ;;  %v5012_v11 = vadd.f32 1.0, %v7247_v3  ;;  %v4648_v58 = vsub.f32 0.0, %v3478_v29  ;;  %14863 = vst [vmem:[#allocation49_spill] sm:$0xff] %v12303_v55  ;;  %v14865_v15 = vmax.f32 %v14864_v2, 0.0  ;;  %v3591_v61 = vadd.f32 %v11780_v35, %v12285_v34  ;;  %5746 = vmatpush1.msra.mxu1 %v5386_v17  ;;  %v14867_v3 = vld [vmem:[#allocation95_spill] sm:$0xff]  ;;  %v14870_v17 = vld [vmem:[#allocation62_spill] sm:$0xff] }
 0x3ab   : > { %v7255_v10 = vpop.eup %7254  ;;  %v3593_v4 = vadd.f32 %v14866_v50, %v12289_v14  ;;  %v5013_v56 = vadd.f32 1.0, %v7249_v46  ;;  %7280 = vpow2.f32 %v4866_v13  ;;  %v4874_v29 = vmul.f32 1.442695, %v4649_v54  ;;  %v12315_v2 = vpop.f32.mrf.mxu0  ;;  %5747 = vmatprep.subr.mxu1 %v5385_v57  ;;  %v5384_v35 = vld [vmem:[#allocation10 + $0x200] sm:$0xff] }
 0x3ac   : > { %4450 = vmatmul.mubr.f32.gmra.mxu1 %v14862_v49  ;;  %5603 = vmatmul.mubr.f32.gmra.mxu0 %v7241_v40  ;;  %v12311_v49 = vpop.f32.mrf.mxu1  ;;  %v7257_v39 = vpop.eup %7256  ;;  %7282 = vrcp.f32 %v5009_v41  ;;  %v4653_v40 = vsub.f32 0.0, %v3486_v53  ;;  %14868 = vst [vmem:[#allocation138_spill] sm:$0xff] %v12315_v2  ;;  %v14869_v50 = vld [vmem:[#allocation31_spill] sm:$0xff]  ;;  %v5016_v13 = vadd.f32 1.0, %v7253_v0  ;;  %v14871_v42 = vmax.f32 %v14870_v17, 0.0  ;;  %v5447_v41 = vld [vmem:[#allocation10 + $0x3f8] sm:$0xff] }
 0x3ad   : > { %4455 = vmatprep.mubr.f32.mxu1 %v14865_v15  ;;  %5608 = vmatprep.mubr.f32.mxu0 %v7251_v6  ;;  %v3492_v15 = vadd.f32 %v12221_v51, %v14867_v3  ;;  %v7259_v55 = vpop.eup %7258  ;;  %v3597_v46 = vadd.f32 %v14869_v50, %v12285_v34  ;;  %7284 = vpow2.f32 %v4864_v59  ;;  %v4652_v6 = vsub.f32 0.0, %v3484_v62  ;;  %v14872_v53 = vld [vmem:[#allocation112_spill] sm:$0xff]  ;;  %v12323_v57 = vpop.f32.mrf.mxu0  ;;  %v14874_v50 = vld [vmem:[#allocation67_spill] sm:$0xff] }
 0x3ae   : > { %v3847_v28 = vpop.f32.mrf.mxu1  ;;  %v7261_v54 = vpop.eup %7260  ;;  %v3599_v51 = vadd.f32 %v14872_v53, %v12289_v14  ;;  %7286 = vrcp.f32 %v5012_v11  ;;  %v4872_v3 = vmul.f32 1.442695, %v4648_v58  ;;  %14873 = vst [vmem:[#allocation259_spill] sm:$0xff] %v12323_v57  ;;  %v14875_v0 = vmax.f32 %v14874_v50, 0.0  ;;  %v14876_v62 = vld [vmem:[#allocation247_spill] sm:$0xff]  ;;  %5748 = vmatpush1.msra.mxu1 %v5384_v35  ;;  %v5446_v50 = vld [vmem:[#allocation10 + $0x3f0] sm:$0xff] }
 0x3af   : > { %v12325_v2 = vadd.f32 %v3847_v28, %v3591_v61  ;;  %v7263_v59 = vpop.eup %7262  ;;  %v3603_v17 = vadd.f32 %v14876_v62, %v12285_v34  ;;  %7288 = vrcp.f32 %v5013_v56  ;;  %v4882_v28 = vmul.f32 1.442695, %v4653_v40  ;;  %v12335_v61 = vpop.f32.mrf.mxu0  ;;  %5749 = vmatprep.subr.mxu1 %v5447_v41  ;;  %v14879_v56 = vld [vmem:[#allocation72_spill] sm:$0xff]  ;;  %v14881_v62 = vld [vmem:[#allocation271_spill] sm:$0xff] }
 0x3b0   : > { %4456 = vmatmul.mubr.f32.gmra.mxu1 %v14871_v42  ;;  %5609 = vmatmul.mubr.f32.gmra.mxu0 %v7255_v10  ;;  %v5017_v42 = vadd.f32 1.0, %v7257_v39  ;;  %v3849_v11 = vpop.f32.mrf.mxu1  ;;  %v7265_v58 = vpop.eup %7264  ;;  %7290 = vpow2.f32 %v4874_v29  ;;  %v4657_v10 = vsub.f32 0.0, %v3492_v15  ;;  %14878 = vst [vmem:[#allocation137_spill] sm:$0xff] %v12335_v61  ;;  %v3605_v39 = vadd.f32 %v14879_v56, %v12289_v14  ;;  %v5445_v40 = vld [vmem:[#allocation10 + $0x3e8] sm:$0xff] }
 0x3b1   : > { %4461 = vmatprep.mubr.f32.mxu1 %v14875_v0  ;;  %5614 = vmatprep.mubr.f32.mxu0 %v7261_v54  ;;  %v12337_v53 = vadd.f32 %v3849_v11, %v3593_v4  ;;  %v7267_v0 = vpop.eup %7266  ;;  %7292 = vrcp.f32 %v5016_v13  ;;  %v4880_v60 = vmul.f32 1.442695, %v4652_v6  ;;  %v3498_v54 = vadd.f32 %v12237_v47, %v14880_v18  ;;  %v14883_v4 = vld [vmem:[#allocation113_spill] sm:$0xff]  ;;  %v14884_v41 = vld [vmem:[#allocation63_spill] sm:$0xff]  ;;  %v12353_v13 = vpop.f32.mrf.mxu0  ;;  %v14886_v47 = vld [vmem:[#allocation70_spill] sm:$0xff] }
 0x3b2   : > { %v3853_v35 = vpop.f32.mrf.mxu1  ;;  %v14882_v29 = vmax.f32 %v14881_v62, 0.0  ;;  %v7269_v15 = vpop.eup %7268  ;;  %v12347_v11 = vadd.f32 %v14883_v4, %v12285_v34  ;;  %7294 = vpow2.f32 %v4872_v3  ;;  %v12351_v61 = vadd.f32 %v12227_v30, %v14884_v41  ;;  %14885 = vst [vmem:[#allocation140_spill] sm:$0xff] %v12353_v13  ;;  %v14888_v62 = vld [vmem:[#allocation114_spill] sm:$0xff]  ;;  %5750 = vmatpush2.msra.mxu1 %v5446_v50 }
 0x3b3   : > { %v12355_v6 = vadd.f32 %v3853_v35, %v3597_v46  ;;  %v14887_v56 = vmax.f32 %v14886_v47, 0.0  ;;  %v7271_v18 = vpop.eup %7270  ;;  %7296 = vrcp.f32 %v5017_v42  ;;  %v5020_v4 = vadd.f32 1.0, %v7265_v58  ;;  %v14889_v35 = vld [vmem:[#allocation104_spill] sm:$0xff]  ;;  %v12368_v47 = vpop.f32.mrf.mxu0  ;;  %5751 = vmatprep.subr.mxu1 %v5445_v40  ;;  %v14891_v58 = vld [vmem:[#allocation34_spill] sm:$0xff] }
 0x3b4   : > { %4462 = vmatmul.mubr.f32.gmra.mxu1 %v14882_v29  ;;  %5615 = vmatmul.mubr.f32.gmra.mxu0 %v7259_v55  ;;  %v12361_v29 = vadd.f32 %v14888_v62, %v12289_v14  ;;  %v4656_v3 = vsub.f32 0.0, %v12333_v24  ;;  %v3855_v30 = vpop.f32.mrf.mxu1  ;;  %v7273_v41 = vpop.eup %7272  ;;  %7298 = vpow2.f32 %v4882_v28  ;;  %v4890_v46 = vmul.f32 1.442695, %v4657_v10  ;;  %14890 = vst [vmem:[#allocation139_spill] sm:$0xff] %v12368_v47  ;;  %v5444_v62 = vld [vmem:[#allocation10 + $0x3e0] sm:$0xff]  ;;  %v14892_v10 = vld [vmem:[#allocation68_spill] sm:$0xff] }
 0x3b5   : > { %4467 = vmatprep.mubr.f32.mxu1 %v14887_v56  ;;  %5620 = vmatprep.mubr.f32.mxu0 %v7267_v0  ;;  %v12366_v55 = vadd.f32 %v12253_v12, %v14889_v35  ;;  %v12370_v56 = vadd.f32 %v3855_v30, %v3599_v51  ;;  %v7275_v42 = vpop.eup %7274  ;;  %v12374_v24 = vadd.f32 %v14891_v58, %v12285_v34  ;;  %v5021_v0 = vadd.f32 1.0, %v7269_v15  ;;  %v5443_v12 = vld [vmem:[#allocation10 + $0x3d8] sm:$0xff]  ;;  %v4104_v58 = vpop.f32.mrf.mxu0 }
 0x3b6   : > { %7300 = vpow2.f32 %v4880_v60  ;;  %v4661_v50 = vsub.f32 0.0, %v3498_v54  ;;  %v3859_v28 = vpop.f32.mrf.mxu1  ;;  %v14893_v13 = vmax.f32 %v14892_v10, 0.0  ;;  %v7277_v35 = vpop.eup %7276  ;;  %v5024_v57 = vadd.f32 1.0, %v7271_v18  ;;  %v14894_v30 = vld [vmem:[#allocation66_spill] sm:$0xff]  ;;  %v14897_v10 = vld [vmem:[#allocation116_spill] sm:$0xff]  ;;  %5752 = vmatpush2.msra.mxu1 %v5444_v62 }
 0x3b7   : > { %v4660_v51 = vsub.f32 0.0, %v12351_v61  ;;  %v12381_v40 = vadd.f32 %v12243_v19, %v14894_v30  ;;  %v12383_v47 = vadd.f32 %v3859_v28, %v3603_v17  ;;  %v14895_v15 = vld [vmem:[#allocation74_spill] sm:$0xff]  ;;  %v7279_v54 = vpop.eup %7278  ;;  %7302 = vrcp.f32 %v5020_v4  ;;  %5753 = vmatprep.subr.mxu1 %v5443_v12 }
 0x3b8   : > { %4468 = vmatmul.mubr.f32.gmra.mxu1 %v14893_v13  ;;  %5621 = vmatmul.mubr.f32.gmra.mxu0 %v7263_v59  ;;  %v14896_v60 = vmax.f32 %v14895_v15, 0.0  ;;  %v12389_v13 = vadd.f32 %v14897_v10, %v12289_v14  ;;  %v4888_v18 = vmul.f32 1.442695, %v4656_v3  ;;  %v12392_v61 = vadd.f32 %v4104_v58, %v12325_v2  ;;  %v3861_v19 = vpop.f32.mrf.mxu1  ;;  %v7281_v17 = vpop.eup %7280  ;;  %v14898_v3 = vld [vmem:[#allocation28_spill] sm:$0xff]  ;;  %v14899_v58 = vld [vmem:[#allocation71_spill] sm:$0xff] }
 0x3b9   : > { %5626 = vmatprep.mubr.f32.mxu0 %v7277_v35  ;;  %v5025_v28 = vadd.f32 1.0, %v7275_v42  ;;  %7304 = vpow2.f32 %v4890_v46  ;;  %v4665_v59 = vsub.f32 0.0, %v12366_v55  ;;  %v12395_v30 = vadd.f32 %v3861_v19, %v3605_v39  ;;  %v4106_v15 = vpop.f32.mrf.mxu0  ;;  %v7283_v10 = vpop.eup %7282  ;;  %v5441_v46 = vld [vmem:[#allocation10 + $0x3c8] sm:$0xff] }
 0x3ba   : > { %4473 = vmatprep.mubr.f32.mxu1 %v14896_v60  ;;  %v5442_v60 = vld [vmem:[#allocation10 + $0x3d0] sm:$0xff]  ;;  %7306 = vrcp.f32 %v5021_v0  ;;  %v4898_v4 = vmul.f32 1.442695, %v4661_v50  ;;  %v3510_v2 = vadd.f32 %v12267_v21, %v14898_v3  ;;  %v12400_v35 = vadd.f32 %v4106_v15, %v12337_v53  ;;  %v3865_v62 = vpop.f32.mrf.mxu1  ;;  %v7285_v55 = vpop.eup %7284 }
 0x3bb   : > { %v14900_v42 = vmax.f32 %v14899_v58, 0.0  ;;  %7308 = vrcp.f32 %v5024_v57  ;;  %v4896_v39 = vmul.f32 1.442695, %v4660_v51  ;;  %v4664_v12 = vsub.f32 0.0, %v12381_v40  ;;  %v4110_v0 = vpop.f32.mrf.mxu0  ;;  %v14901_v50 = vld [vmem:[#allocation272_spill] sm:$0xff]  ;;  %v7287_v53 = vpop.eup %7286  ;;  %v14903_v3 = vld [vmem:[#allocation105_spill] sm:$0xff]  ;;  %5754 = vmatpush2.msra.mxu1 %v5442_v60 }
 0x3bc   : > { %v12406_v19 = vadd.f32 %v3865_v62, %v12347_v11  ;;  %5627 = vmatmul.mubr.f32.gmra.mxu0 %v7273_v41  ;;  %v14902_v21 = vmax.f32 %v14901_v50, 0.0  ;;  %v5029_v15 = vadd.f32 1.0, %v7281_v17  ;;  %7310 = vpow2.f32 %v4888_v18  ;;  %v3867_v57 = vpop.f32.mrf.mxu1  ;;  %v7289_v51 = vpop.eup %7288  ;;  %5755 = vmatprep.subr.mxu1 %v5441_v46  ;;  %v5440_v18 = vld [vmem:[#allocation10 + $0x3c0] sm:$0xff]  ;;  %v14905_v50 = vld [vmem:[#allocation193_spill] sm:$0xff] }
 0x3bd   : > { %4474 = vmatmul.mubr.f32.gmra.mxu1 %v14900_v42  ;;  %v3508_v58 = vadd.f32 %v12259_v32, %v14903_v3  ;;  %v12413_v42 = vadd.f32 %v4110_v0, %v12355_v6  ;;  %5632 = vmatprep.mubr.f32.mxu0 %v7283_v10  ;;  %v3621_v11 = vadd.f32 %v11870_v26, %v12285_v34  ;;  %7312 = vrcp.f32 %v5025_v28  ;;  %v4112_v17 = vpop.f32.mrf.mxu0  ;;  %v7291_v62 = vpop.eup %7290  ;;  %v14904_v6 = vld [vmem:[#allocation245_spill] sm:$0xff] }
 0x3be   : > { %4479 = vmatprep.mubr.f32.mxu1 %v14902_v21  ;;  %v4906_v41 = vmul.f32 1.442695, %v4665_v59  ;;  %v12418_v40 = vadd.f32 %v3867_v57, %v12361_v29  ;;  %7314 = vpow2.f32 %v4898_v4  ;;  %v4669_v32 = vsub.f32 0.0, %v3510_v2  ;;  %v3871_v0 = vpop.f32.mrf.mxu1  ;;  %v5439_v28 = vld [vmem:[#allocation10 + $0x3b8] sm:$0xff]  ;;  %v12427_v59 = vpop.eup %7292  ;;  %v14907_v2 = vld [vmem:[#allocation75_spill] sm:$0xff]  ;;  %v14909_v57 = vld [vmem:[#allocation108_spill] sm:$0xff]  ;;  %5756 = vmatpush2.msra.mxu1 %v5440_v18 }
 0x3bf   : > { %v3516_v10 = vadd.f32 %v12291_v33, %v14904_v6  ;;  %v12423_v60 = vadd.f32 %v4112_v17, %v12370_v56  ;;  %v14906_v26 = vmax.f32 %v14905_v50, 0.0  ;;  %v5028_v29 = vadd.f32 1.0, %v7285_v55  ;;  %v4116_v4 = vpop.f32.mrf.mxu0  ;;  %v7295_v56 = vpop.eup %7294  ;;  %5757 = vmatprep.subr.mxu1 %v5439_v28 }
 0x3c0   : > { %7316 = vpow2.f32 %v4896_v39  ;;  %v4904_v46 = vmul.f32 1.442695, %v4664_v12  ;;  %v12430_v21 = vadd.f32 %v3871_v0, %v12374_v24  ;;  %5633 = vmatmul.mubr.f32.gmra.mxu0 %v7279_v54  ;;  %v14908_v33 = vmax.f32 %v14907_v2, 0.0  ;;  %v3873_v55 = vpop.f32.mrf.mxu1  ;;  %v7297_v24 = vpop.eup %7296  ;;  %v14910_v39 = vld [vmem:[#allocation249_spill] sm:$0xff] }
 0x3c1   : > { %4480 = vmatmul.mubr.f32.gmra.mxu1 %v14906_v26  ;;  %7318 = vrcp.f32 %v5029_v15  ;;  %v4668_v3 = vsub.f32 0.0, %v3508_v58  ;;  %v12436_v17 = vadd.f32 %v12273_v27, %v14909_v57  ;;  %v12439_v6 = vadd.f32 %v4116_v4, %v12383_v47  ;;  %5638 = vmatprep.mubr.f32.mxu0 %v7289_v51  ;;  %v4118_v15 = vpop.f32.mrf.mxu0  ;;  %v5438_v58 = vld [vmem:[#allocation10 + $0x3b0] sm:$0xff]  ;;  %v7299_v27 = vpop.eup %7298  ;;  %v14911_v47 = vld [vmem:[#allocation110_spill] sm:$0xff] }
 0x3c2   : > { %4485 = vmatprep.mubr.f32.mxu1 %v14908_v33  ;;  %v3623_v54 = vadd.f32 %v14910_v39, %v12289_v14  ;;  %v5033_v12 = vadd.f32 1.0, %v7291_v62  ;;  %7320 = vpow2.f32 %v4906_v41  ;;  %v12444_v0 = vadd.f32 %v3873_v55, %v12389_v13  ;;  %v3877_v4 = vpop.f32.mrf.mxu1  ;;  %v14912_v2 = vld [vmem:[#allocation197_spill] sm:$0xff]  ;;  %v5437_v41 = vld [vmem:[#allocation10 + $0x3a8] sm:$0xff]  ;;  %5758 = vmatpush2.msra.mxu1 %v5438_v58  ;;  %v14917_v58 = vld [vmem:[#allocation30_spill] sm:$0xff] }
 0x3c3   : > { %v4914_v50 = vmul.f32 1.442695, %v4669_v32  ;;  %v4673_v26 = vsub.f32 0.0, %v3516_v10  ;;  %v3522_v51 = vadd.f32 %v12311_v49, %v14911_v47  ;;  %v12449_v18 = vadd.f32 %v4118_v15, %v12395_v30  ;;  %v7301_v62 = vpop.eup %7300  ;;  %v4122_v32 = vpop.f32.mrf.mxu0  ;;  %v14914_v10 = vld [vmem:[#allocation199_spill] sm:$0xff]  ;;  %5759 = vmatprep.subr.mxu1 %v5437_v41 }
 0x3c4   : > { %v14913_v33 = vmax.f32 %v14912_v2, 0.0  ;;  %v3627_v13 = vadd.f32 %v11888_v52, %v12285_v34  ;;  %7322 = vrcp.f32 %v5028_v29  ;;  %v5032_v28 = vadd.f32 1.0, %v7295_v56  ;;  %5639 = vmatmul.mubr.f32.gmra.mxu0 %v7287_v53  ;;  %v3879_v15 = vpop.f32.mrf.mxu1  ;;  %v7303_v52 = vpop.eup %7302 }
 0x3c5   : > { %v12455_v57 = vadd.f32 %v3877_v4, %v3621_v11  ;;  %v14915_v49 = vmax.f32 %v14914_v10, 0.0  ;;  %7324 = vpow2.f32 %v4904_v46  ;;  %v4912_v30 = vmul.f32 1.442695, %v4668_v3  ;;  %5644 = vmatprep.mubr.f32.mxu0 %v7297_v24  ;;  %v14916_v11 = vld [vmem:[#allocation69_spill] sm:$0xff]  ;;  %v4124_v47 = vpop.f32.mrf.mxu0  ;;  %v5436_v46 = vld [vmem:[#allocation10 + $0x3a0] sm:$0xff] }
 0x3c6   : > { %4486 = vmatmul.mubr.f32.gmra.mxu1 %v14913_v33  ;;  %v4672_v55 = vsub.f32 0.0, %v12436_v17  ;;  %v12461_v39 = vadd.f32 %v4122_v32, %v12406_v19  ;;  %7326 = vrcp.f32 %v5033_v12  ;;  %v5037_v29 = vadd.f32 1.0, %v7299_v27  ;;  %v7305_v3 = vpop.eup %7304  ;;  %v3883_v24 = vpop.f32.mrf.mxu1  ;;  %v5435_v12 = vld [vmem:[#allocation10 + $0x398] sm:$0xff] }
 0x3c7   : > { %4491 = vmatprep.mubr.f32.mxu1 %v14915_v49  ;;  %v3520_v56 = vadd.f32 %v12299_v16, %v14916_v11  ;;  %v12465_v53 = vadd.f32 %v3879_v15, %v3623_v54  ;;  %7328 = vpow2.f32 %v4914_v50  ;;  %v4922_v17 = vmul.f32 1.442695, %v4673_v26  ;;  %v7307_v27 = vpop.eup %7306  ;;  %v14919_v16 = vld [vmem:[#allocation115_spill] sm:$0xff]  ;;  %v4128_v32 = vpop.f32.mrf.mxu0  ;;  %v14920_v50 = vld [vmem:[#allocation76_spill] sm:$0xff]  ;;  %5760 = vmatpush2.msra.mxu1 %v5436_v46 }
 0x3c8   : > { %v4677_v4 = vsub.f32 0.0, %v3522_v51  ;;  %v12468_v19 = vadd.f32 %v4124_v47, %v12418_v40  ;;  %v14918_v2 = vmax.f32 %v14917_v58, 0.0  ;;  %v3629_v54 = vadd.f32 %v14919_v16, %v12289_v14  ;;  %5645 = vmatmul.mubr.f32.gmra.mxu0 %v12427_v59  ;;  %v7309_v40 = vpop.eup %7308  ;;  %v3885_v15 = vpop.f32.mrf.mxu1  ;;  %5761 = vmatprep.subr.mxu1 %v5435_v12  ;;  %v5434_v47 = vld [vmem:[#allocation10 + $0x390] sm:$0xff] }
 0x3c9   : > { %7330 = vrcp.f32 %v5032_v28  ;;  %v5036_v33 = vadd.f32 1.0, %v7301_v62  ;;  %v3884_v41 = vadd.f32 %v3883_v24, %v3627_v13  ;;  %v14921_v26 = vmax.f32 %v14920_v50, 0.0  ;;  %5650 = vmatprep.mubr.f32.mxu0 %v7307_v27  ;;  %v7311_v62 = vpop.eup %7310  ;;  %v4130_v11 = vpop.f32.mrf.mxu0  ;;  %v14924_v12 = vld [vmem:[#allocation205_spill] sm:$0xff]  ;;  %5762 = vmatpush2.msra.mxu1 %v5434_v47  ;;  %v5432_v50 = vld [vmem:[#allocation10 + $0x380] sm:$0xff] }
 0x3ca   : > { %4492 = vmatmul.mubr.f32.gmra.mxu1 %v14918_v2  ;;  %v3633_v51 = vadd.f32 %v11908_v22, %v12285_v34  ;;  %7332 = vpow2.f32 %v4912_v30  ;;  %v4920_v10 = vmul.f32 1.442695, %v4672_v55  ;;  %v12480_v49 = vadd.f32 %v4128_v32, %v12430_v21  ;;  %v7313_v24 = vpop.eup %7312  ;;  %v3889_v30 = vpop.f32.mrf.mxu1  ;;  %v14922_v21 = vld [vmem:[#allocation203_spill] sm:$0xff] }
 0x3cb   : > { %4497 = vmatprep.mubr.f32.mxu1 %v14921_v26  ;;  %7334 = vrcp.f32 %v5037_v29  ;;  %v5041_v13 = vadd.f32 1.0, %v7305_v3  ;;  %v4676_v28 = vsub.f32 0.0, %v3520_v56  ;;  %v3886_v59 = vadd.f32 %v3885_v15, %v3629_v54  ;;  %v5433_v2 = vld [vmem:[#allocation10 + $0x388] sm:$0xff]  ;;  %v7315_v46 = vpop.eup %7314  ;;  %v4134_v3 = vpop.f32.mrf.mxu0  ;;  %v14926_v15 = vld [vmem:[#allocation33_spill] sm:$0xff] }
 0x3cc   : > { %7336 = vpow2.f32 %v4922_v17  ;;  %v4930_v58 = vmul.f32 1.442695, %v4677_v4  ;;  %v12483_v22 = vadd.f32 %v4130_v11, %v12444_v0  ;;  %v14923_v55 = vmax.f32 %v14922_v21, 0.0  ;;  %5651 = vmatmul.mubr.f32.gmra.mxu0 %v7303_v52  ;;  %v3891_v16 = vpop.f32.mrf.mxu1  ;;  %5763 = vmatprep.subr.mxu1 %v5433_v2  ;;  %v5431_v11 = vld [vmem:[#allocation10 + $0x378] sm:$0xff] }
 0x3cd   : > { %v3635_v29 = vadd.f32 %v11920_v5, %v12289_v14  ;;  %7338 = vrcp.f32 %v5036_v33  ;;  %v3890_v56 = vadd.f32 %v3889_v30, %v3633_v51  ;;  %v14925_v27 = vmax.f32 %v14924_v12, 0.0  ;;  %v7317_v17 = vpop.eup %7316  ;;  %5656 = vmatprep.mubr.f32.mxu0 %v7313_v24  ;;  %v4136_v52 = vpop.f32.mrf.mxu0  ;;  %5764 = vmatpush2.msra.mxu1 %v5432_v50  ;;  %v14930_v21 = vld [vmem:[#allocation118_spill] sm:$0xff] }
 0x3ce   : > { %4498 = vmatmul.mubr.f32.gmra.mxu1 %v14923_v55  ;;  %v5040_v4 = vadd.f32 1.0, %v7311_v62  ;;  %7340 = vpow2.f32 %v4920_v10  ;;  %v12492_v0 = vadd.f32 %v4134_v3, %v12455_v57  ;;  %v7319_v54 = vpop.eup %7318  ;;  %v3639_v5 = vadd.f32 %v11928_v38, %v12285_v34  ;;  %v3895_v57 = vpop.f32.mrf.mxu1  ;;  %5765 = vmatprep.subr.mxu1 %v5431_v11  ;;  %v5428_v11 = vld [vmem:[#allocation10 + $0x360] sm:$0xff] }
 0x3cf   : > { %4503 = vmatprep.mubr.f32.mxu1 %v14925_v27  ;;  %7342 = vrcp.f32 %v5041_v13  ;;  %v4928_v33 = vmul.f32 1.442695, %v4676_v28  ;;  %v3892_v32 = vadd.f32 %v3891_v16, %v3635_v29  ;;  %v7321_v26 = vpop.eup %7320  ;;  %v5045_v51 = vadd.f32 1.0, %v7315_v46  ;;  %v4140_v38 = vpop.f32.mrf.mxu0  ;;  %v14928_v13 = vld [vmem:[#allocation77_spill] sm:$0xff]  ;;  %v5429_v16 = vld [vmem:[#allocation10 + $0x368] sm:$0xff] }
 0x3d0   : > { %7344 = vpow2.f32 %v4930_v58  ;;  %v12497_v10 = vadd.f32 %v4136_v52, %v12465_v53  ;;  %v14927_v62 = vmax.f32 %v14926_v15, 0.0  ;;  %v12501_v47 = vadd.f32 %v3895_v57, %v3639_v5  ;;  %5657 = vmatmul.mubr.f32.gmra.mxu0 %v7309_v40  ;;  %v12507_v58 = vpop.f32.mrf.mxu1  ;;  %v5430_v40 = vld [vmem:[#allocation10 + $0x370] sm:$0xff] }
 0x3d1   : > { %v14929_v28 = vmax.f32 %v14928_v13, 0.0  ;;  %v7323_v24 = vpop.eup %7322  ;;  %7346 = vrcp.f32 %v5040_v4  ;;  %v12505_v30 = vadd.f32 %v4140_v38, %v3884_v41  ;;  %5662 = vmatprep.mubr.f32.mxu0 %v7319_v54  ;;  %v3645_v55 = vadd.f32 %v14930_v21, %v12285_v34  ;;  %v4142_v46 = vpop.f32.mrf.mxu0  ;;  %v14931_v27 = vld [vmem:[#allocation209_spill] sm:$0xff]  ;;  %5766 = vmatpush2.msra.mxu1 %v5430_v40 }
 0x3d2   : > { %4504 = vmatmul.mubr.f32.gmra.mxu1 %v14927_v62  ;;  %v7325_v53 = vpop.eup %7324  ;;  %v5044_v2 = vadd.f32 1.0, %v7317_v17  ;;  %7348 = vpow2.f32 %v4928_v33  ;;  %v5049_v3 = vadd.f32 1.0, %v7321_v26  ;;  %v12511_v12 = vadd.f32 %v4142_v46, %v3886_v59  ;;  %v3901_v41 = vpop.f32.mrf.mxu1  ;;  %v14933_v17 = vld [vmem:[#allocation211_spill] sm:$0xff]  ;;  %5767 = vmatprep.subr.mxu1 %v5429_v16  ;;  %v5426_v16 = vld [vmem:[#allocation10 + $0x350] sm:$0xff] }
 0x3d3   : > { %4509 = vmatprep.mubr.f32.mxu1 %v14929_v28  ;;  %v7327_v29 = vpop.eup %7326  ;;  %7350 = vrcp.f32 %v5045_v51  ;;  %v14932_v4 = vmax.f32 %v14931_v27, 0.0  ;;  %v12515_v5 = vadd.f32 %v3901_v41, %v3645_v55  ;;  %v4146_v52 = vpop.f32.mrf.mxu0  ;;  %v14934_v33 = vmax.f32 %v14933_v17, 0.0  ;;  %v5427_v55 = vld [vmem:[#allocation10 + $0x358] sm:$0xff]  ;;  %5768 = vmatpush2.msra.mxu1 %v5428_v11 }
 0x3d4   : > { %v7329_v54 = vpop.eup %7328  ;;  %5663 = vmatmul.mubr.f32.gmra.mxu0 %v7323_v24  ;;  %v12519_v57 = vadd.f32 %v4146_v52, %v3890_v56  ;;  %v12521_v26 = vpop.f32.mrf.mxu1  ;;  %v3651_v51 = vadd.f32 %v11968_v45, %v12285_v34  ;;  %7352 = vrcp.f32 %v5044_v2  ;;  %v5048_v15 = vadd.f32 1.0, %v7325_v53  ;;  %v14935_v24 = vld [vmem:[#allocation36_spill] sm:$0xff]  ;;  %v14937_v45 = vld [vmem:[#allocation78_spill] sm:$0xff]  ;;  %5769 = vmatprep.subr.mxu1 %v5427_v55 }
 0x3d5   : > { %5668 = vmatprep.mubr.f32.mxu0 %v7327_v29  ;;  %v4148_v62 = vpop.f32.mrf.mxu0  ;;  %7354 = vrcp.f32 %v5049_v3  ;;  %v5053_v13 = vadd.f32 1.0, %v7329_v54  ;;  %v14936_v21 = vmax.f32 %v14935_v24, 0.0  ;;  %v14938_v53 = vmax.f32 %v14937_v45, 0.0  ;;  %5770 = vmatpush2.msra.mxu1 %v5426_v16 }
 0x3d6   : > { %4510 = vmatmul.mubr.f32.gmra.mxu1 %v14932_v4  ;;  %v7331_v50 = vpop.eup %7330  ;;  %v12525_v28 = vadd.f32 %v4148_v62, %v3892_v32  ;;  %v3907_v56 = vpop.f32.mrf.mxu1  ;;  %v3657_v41 = vadd.f32 %v11990_v48, %v12285_v34  ;;  %7356 = vrcp.f32 %v5048_v15 }
 0x3d7   : > { %4515 = vmatprep.mubr.f32.mxu1 %v14934_v33  ;;  %v7333_v59 = vpop.eup %7332  ;;  %v12529_v40 = vadd.f32 %v3907_v56, %v3651_v51  ;;  %v12531_v29 = vpop.f32.mrf.mxu0  ;;  %7358 = vrcp.f32 %v5053_v13  ;;  %v14939_v33 = vld [vmem:[#allocation213_spill] sm:$0xff]  ;;  %v5425_v51 = vld [vmem:[#allocation10 + $0x348] sm:$0xff]  ;;  %v3663_v13 = vadd.f32 %v12010_v7, %v12285_v34 }
 0x3d8   : > { %v7335_v38 = vpop.eup %7334  ;;  %5669 = vmatmul.mubr.f32.gmra.mxu0 %v7331_v50  ;;  %v12535_v3 = vpop.f32.mrf.mxu1  ;;  %v5052_v27 = vadd.f32 1.0, %v7333_v59  ;;  %v14940_v50 = vmax.f32 %v14939_v33, 0.0  ;;  %5771 = vmatprep.subr.mxu1 %v5425_v51 }
 0x3d9   : > { %v7337_v46 = vpop.eup %7336  ;;  %5674 = vmatprep.mubr.f32.mxu0 %v7335_v38  ;;  %v12539_v4 = vpop.f32.mrf.mxu0  ;;  %v14941_v38 = vld [vmem:[#allocation214_spill] sm:$0xff] }
 0x3da   : > { %4516 = vmatmul.mubr.f32.gmra.mxu1 %v14936_v21  ;;  %v7339_v2 = vpop.eup %7338  ;;  %v5057_v52 = vadd.f32 1.0, %v7337_v46  ;;  %v3913_v17 = vpop.f32.mrf.mxu1  ;;  %v14942_v48 = vmax.f32 %v14941_v38, 0.0  ;;  %7360 = vrcp.f32 %v5052_v27  ;;  %v5424_v21 = vld [vmem:[#allocation10 + $0x340] sm:$0xff]  ;;  %v3669_v27 = vadd.f32 %v12030_v20, %v12285_v34 }
 0x3db   : > { %4521 = vmatprep.mubr.f32.mxu1 %v14938_v53  ;;  %v7341_v32 = vpop.eup %7340  ;;  %v12543_v11 = vadd.f32 %v3913_v17, %v3657_v41  ;;  %v12551_v24 = vpop.f32.mrf.mxu0  ;;  %v14943_v53 = vld [vmem:[#allocation39_spill] sm:$0xff]  ;;  %v5423_v41 = vld [vmem:[#allocation10 + $0x338] sm:$0xff]  ;;  %5772 = vmatpush2.msra.mxu1 %v5424_v21 }
 0x3dc   : > { %v7343_v54 = vpop.eup %7342  ;;  %5675 = vmatmul.mubr.f32.gmra.mxu0 %v7339_v2  ;;  %v12547_v59 = vpop.f32.mrf.mxu1  ;;  %v5056_v56 = vadd.f32 1.0, %v7341_v32  ;;  %7362 = vrcp.f32 %v5057_v52  ;;  %v14944_v2 = vmax.f32 %v14943_v53, 0.0  ;;  %v14945_v17 = vld [vmem:[#allocation79_spill] sm:$0xff]  ;;  %5773 = vmatprep.subr.mxu1 %v5423_v41  ;;  %v14949_v21 = vld [vmem:[#allocation217_spill] sm:$0xff] }
 0x3dd   : > { %v7345_v62 = vpop.eup %7344  ;;  %5680 = vmatprep.mubr.f32.mxu0 %v7343_v54  ;;  %v14946_v7 = vmax.f32 %v14945_v17, 0.0  ;;  %v12563_v33 = vpop.f32.mrf.mxu0  ;;  %v14947_v38 = vld [vmem:[#allocation215_spill] sm:$0xff]  ;;  %v14950_v53 = vmax.f32 %v14949_v21, 0.0 }
 0x3de   : > { %4522 = vmatmul.mubr.f32.gmra.mxu1 %v14940_v50  ;;  %v7347_v15 = vpop.eup %7346  ;;  %v5061_v46 = vadd.f32 1.0, %v7345_v62  ;;  %v3919_v45 = vpop.f32.mrf.mxu1  ;;  %7364 = vrcp.f32 %v5056_v56  ;;  %v5422_v50 = vld [vmem:[#allocation10 + $0x330] sm:$0xff]  ;;  %v3675_v56 = vadd.f32 %v12048_v25, %v12285_v34 }
 0x3df   : > { %4527 = vmatprep.mubr.f32.mxu1 %v14942_v48  ;;  %v7349_v55 = vpop.eup %7348  ;;  %v12555_v16 = vadd.f32 %v3919_v45, %v3663_v13  ;;  %v14948_v48 = vmax.f32 %v14947_v38, 0.0  ;;  %5774 = vmatpush2.msra.mxu1 %v5422_v50  ;;  %v3681_v38 = vadd.f32 %v12070_v9, %v12285_v34  ;;  %v3687_v9 = vadd.f32 %v12087_v31, %v12285_v34 }
 0x3e0   : > { %v7351_v54 = vpop.eup %7350  ;;  %5681 = vmatmul.mubr.f32.gmra.mxu0 %v7347_v15  ;;  %v12559_v32 = vpop.f32.mrf.mxu1  ;;  %v5060_v52 = vadd.f32 1.0, %v7349_v55  ;;  %7366 = vrcp.f32 %v5061_v46  ;;  %v5421_v15 = vld [vmem:[#allocation10 + $0x328] sm:$0xff]  ;;  %v5420_v46 = vld [vmem:[#allocation10 + $0x320] sm:$0xff] }
 0x3e1   : > { %5686 = vmatprep.mubr.f32.mxu0 %v7351_v54  ;;  %v7353_v51 = vpop.eup %7352  ;;  %v12575_v55 = vpop.f32.mrf.mxu0  ;;  %5775 = vmatprep.subr.mxu1 %v5421_v15  ;;  %v14951_v54 = vld [vmem:[#allocation42_spill] sm:$0xff]  ;;  %v5417_v15 = vld [vmem:[#allocation10 + $0x308] sm:$0xff] }
 0x3e2   : > { %4528 = vmatmul.mubr.f32.gmra.mxu1 %v14944_v2  ;;  %v3925_v62 = vpop.f32.mrf.mxu1  ;;  %v7355_v13 = vpop.eup %7354  ;;  %7368 = vrcp.f32 %v5060_v52  ;;  %v14952_v17 = vmax.f32 %v14951_v54, 0.0  ;;  %v5418_v52 = vld [vmem:[#allocation10 + $0x310] sm:$0xff] }
 0x3e3   : > { %4533 = vmatprep.mubr.f32.mxu1 %v14946_v7  ;;  %v12567_v45 = vadd.f32 %v3925_v62, %v3669_v27  ;;  %v7357_v2 = vpop.eup %7356  ;;  %v5419_v7 = vld [vmem:[#allocation10 + $0x318] sm:$0xff]  ;;  %v14953_v62 = vld [vmem:[#allocation80_spill] sm:$0xff]  ;;  %5776 = vmatpush2.msra.mxu1 %v5420_v46 }
 0x3e4   : > { %5687 = vmatmul.mubr.f32.gmra.mxu0 %v7353_v51  ;;  %v12571_v20 = vpop.f32.mrf.mxu1  ;;  %v7359_v27 = vpop.eup %7358  ;;  %v14954_v50 = vmax.f32 %v14953_v62, 0.0  ;;  %5777 = vmatprep.subr.mxu1 %v5419_v7 }
 0x3e5   : > { %5692 = vmatprep.mubr.f32.mxu0 %v7355_v13  ;;  %5778 = vmatpush2.msra.mxu1 %v5418_v52  ;;  %v3693_v52 = vadd.f32 %v12103_v44, %v12285_v34  ;;  %v3705_v44 = vadd.f32 %v12137_v1, %v12285_v34  ;;  %v3717_v1 = vadd.f32 %v12169_v36, %v12285_v34 }
 0x3e6   : > { %4534 = vmatmul.mubr.f32.gmra.mxu1 %v14948_v48  ;;  %v3931_v41 = vpop.f32.mrf.mxu1  ;;  %v12587_v48 = vpop.f32.mrf.mxu0  ;;  %5779 = vmatprep.subr.mxu1 %v5417_v15  ;;  %v3729_v36 = vadd.f32 %v12201_v63, %v12285_v34 }
 0x3e7   : > { %4539 = vmatprep.mubr.f32.mxu1 %v14950_v53  ;;  %v12579_v51 = vadd.f32 %v3931_v41, %v3675_v56  ;;  %v7361_v13 = vpop.eup %7360  ;;  %v14955_v53 = vld [vmem:[#allocation218_spill] sm:$0xff] }
 0x3e8   : > { %5693 = vmatmul.mubr.f32.gmra.mxu0 %v7357_v2  ;;  %v12583_v25 = vpop.f32.mrf.mxu1  ;;  %v14956_v56 = vmax.f32 %v14955_v53, 0.0  ;;  %v5416_v2 = vld [vmem:[#allocation10 + $0x300] sm:$0xff] }
 0x3e9   : > { %5698 = vmatprep.mubr.f32.mxu0 %v7359_v27  ;;  %v7363_v41 = vpop.eup %7362  ;;  %5780 = vmatpush2.msra.mxu1 %v5416_v2 }
 0x3ea   : > { %4540 = vmatmul.mubr.f32.gmra.mxu1 %v14952_v17  ;;  %v3937_v21 = vpop.f32.mrf.mxu1  ;;  %v12597_v17 = vpop.f32.mrf.mxu0 }
 0x3eb   : > { %4545 = vmatprep.mubr.f32.mxu1 %v14954_v50  ;;  %v12591_v54 = vadd.f32 %v3937_v21, %v3681_v38  ;;  %v7365_v7 = vpop.eup %7364 }
 0x3ec   : > { %5699 = vmatmul.mubr.f32.gmra.mxu0 %v7361_v13  ;;  %v12593_v46 = vpop.f32.mrf.mxu1  ;;  %v12605_v13 = vpop.f32.mrf.mxu0 }
 0x3ed   : > { %5704 = vmatprep.mubr.f32.mxu0 %v7363_v41  ;;  %v7367_v62 = vpop.eup %7366 }
 0x3ee   : > { %4546 = vmatmul.mubr.f32.gmra.mxu1 %v14956_v56  ;;  %v3943_v27 = vpop.f32.mrf.mxu1  ;;  %v3699_v56 = vadd.f32 %v12119_v37, %v12285_v34  ;;  %v12613_v2 = vpop.f32.mrf.mxu0  ;;  %v3711_v37 = vadd.f32 %v12151_v8, %v12285_v34  ;;  %v3723_v8 = vadd.f32 %v12185_v23, %v12285_v34  ;;  %v3735_v23 = vadd.f32 %v12215_v43, %v12285_v34 }
 0x3ef   : > { %v12599_v50 = vadd.f32 %v3943_v27, %v3687_v9  ;;  %v7369_v15 = vpop.eup %7368 }
 0x3f0   : > { %5705 = vmatmul.mubr.f32.gmra.mxu0 %v7365_v7  ;;  %v12601_v38 = vpop.f32.mrf.mxu1  ;;  %v12621_v27 = vpop.f32.mrf.mxu0 }
 0x3f1   : > { %14957 = vst [vmem:[#allocation52_spill] sm:$0xff] %v12599_v50  ;;  %5710 = vmatprep.mubr.f32.mxu0 %v7367_v62  ;;  %14958 = vst [vmem:[#allocation142_spill] sm:$0xff] %v12601_v38 }
 0x3f2   : > { %v3949_v21 = vpop.f32.mrf.mxu1 }
 0x3f3   : > { %v12607_v31 = vadd.f32 %v3949_v21, %v3693_v52  ;;  %v12629_v21 = vpop.f32.mrf.mxu0 }
 0x3f4   : > { %5711 = vmatmul.mubr.f32.gmra.mxu0 %v7369_v15  ;;  %v12609_v53 = vpop.f32.mrf.mxu1 }
 0x3f5   : > { %14959 = vst [vmem:[#allocation261_spill] sm:$0xff] %v12607_v31  ;;  %14960 = vst [vmem:[#allocation141_spill] sm:$0xff] %v12609_v53 }
 0x3f6   : > { %v3955_v41 = vpop.f32.mrf.mxu1 }
 0x3f7   : > { %v12615_v9 = vadd.f32 %v3955_v41, %v3699_v56 }
 0x3f8   : > { %v12617_v7 = vpop.f32.mrf.mxu1 }
 0x3f9   : > { %14961 = vst [vmem:[#allocation144_spill] sm:$0xff] %v12615_v9  ;;  %14962 = vst [vmem:[#allocation83_spill] sm:$0xff] %v12617_v7  ;;  %v12637_v9 = vpop.f32.mrf.mxu0 }
 0x3fa   : > { %v3961_v62 = vpop.f32.mrf.mxu1 }
 0x3fb   : > { %v12623_v52 = vadd.f32 %v3961_v62, %v3705_v44 }
 0x3fc   : > { %v12625_v15 = vpop.f32.mrf.mxu1 }
 0x3fd   : > { %14963 = vst [vmem:[#allocation55_spill] sm:$0xff] %v12623_v52  ;;  %14964 = vst [vmem:[#allocation145_spill] sm:$0xff] %v12625_v15  ;;  %v12645_v52 = vpop.f32.mrf.mxu0 }
 0x3fe   : > { %v3967_v31 = vpop.f32.mrf.mxu1 }
 0x3ff   : > { %v12631_v56 = vadd.f32 %v3967_v31, %v3711_v37 }
 0x400   : > { %v12633_v41 = vpop.f32.mrf.mxu1 }
 0x401   : > { %14965 = vst [vmem:[#allocation263_spill] sm:$0xff] %v12631_v56  ;;  %14966 = vst [vmem:[#allocation82_spill] sm:$0xff] %v12633_v41  ;;  %v12653_v56 = vpop.f32.mrf.mxu0 }
 0x402   : > { %v3973_v7 = vpop.f32.mrf.mxu1 }
 0x403   : > { %v12639_v44 = vadd.f32 %v3973_v7, %v3717_v1 }
 0x404   : > { %v12641_v62 = vpop.f32.mrf.mxu1 }
 0x405   : > { %14967 = vst [vmem:[#allocation148_spill] sm:$0xff] %v12639_v44  ;;  %14968 = vst [vmem:[#allocation146_spill] sm:$0xff] %v12641_v62  ;;  %v12661_v62 = vpop.f32.mrf.mxu0 }
 0x406   : > { %v3979_v15 = vpop.f32.mrf.mxu1 }
 0x407   : > { %v12647_v31 = vadd.f32 %v3979_v15, %v3723_v8 }
 0x408   : > { %v12649_v37 = vpop.f32.mrf.mxu1 }
 0x409   : > { %14969 = vst [vmem:[#allocation58_spill] sm:$0xff] %v12647_v31  ;;  %14970 = vst [vmem:[#allocation150_spill] sm:$0xff] %v12649_v37  ;;  %v14975_v31 = vld [vmem:[#allocation132_spill] sm:$0xff]  ;;  %v12669_v37 = vpop.f32.mrf.mxu0 }
 0x40a   : > { %v3985_v41 = vpop.f32.mrf.mxu1  ;;  %v3741_v63 = vadd.f32 %v14975_v31, %v12285_v34 }
 0x40b   : > { %v12655_v7 = vadd.f32 %v3985_v41, %v3729_v36 }
 0x40c   : > { %v12657_v1 = vpop.f32.mrf.mxu1 }
 0x40d   : > { %14971 = vst [vmem:[#allocation265_spill] sm:$0xff] %v12655_v7  ;;  %14972 = vst [vmem:[#allocation85_spill] sm:$0xff] %v12657_v1  ;;  %v14978_v7 = vld [vmem:[#allocation46_spill] sm:$0xff]  ;;  %v12677_v1 = vpop.f32.mrf.mxu0 }
 0x40e   : > { %v3991_v44 = vpop.f32.mrf.mxu1  ;;  %v3747_v43 = vadd.f32 %v14978_v7, %v12285_v34  ;;  %14979 = vst [vmem:[#allocation267_spill] sm:$0xff] %v12677_v1 }
 0x40f   : > { %v12663_v15 = vadd.f32 %v3991_v44, %v3735_v23 }
 0x410   : > { %v12665_v8 = vpop.f32.mrf.mxu1 }
 0x411   : > { %14973 = vst [vmem:[#allocation153_spill] sm:$0xff] %v12663_v15  ;;  %14974 = vst [vmem:[#allocation151_spill] sm:$0xff] %v12665_v8  ;;  %v14982_v8 = vld [vmem:[#allocation257_spill] sm:$0xff]  ;;  %v12685_v15 = vpop.f32.mrf.mxu0 }
 0x412   : > { %v3997_v53 = vpop.f32.mrf.mxu1  ;;  %v3753_v31 = vadd.f32 %v14982_v8, %v12285_v34  ;;  %14983 = vst [vmem:[#allocation90_spill] sm:$0xff] %v12685_v15 }
 0x413   : > { %v12671_v41 = vadd.f32 %v3997_v53, %v3741_v63 }
 0x414   : > { %v12673_v36 = vpop.f32.mrf.mxu1 }
 0x415   : > { %14976 = vst [vmem:[#allocation61_spill] sm:$0xff] %v12671_v41  ;;  %14977 = vst [vmem:[#allocation92_spill] sm:$0xff] %v12673_v36  ;;  %v14986_v41 = vld [vmem:[#allocation136_spill] sm:$0xff]  ;;  %v12693_v36 = vpop.f32.mrf.mxu0 }
 0x416   : > { %v4003_v38 = vpop.f32.mrf.mxu1  ;;  %v3759_v7 = vadd.f32 %v14986_v41, %v12285_v34  ;;  %14987 = vst [vmem:[#allocation269_spill] sm:$0xff] %v12693_v36 }
 0x417   : > { %v12679_v44 = vadd.f32 %v4003_v38, %v3747_v43 }
 0x418   : > { %v12681_v23 = vpop.f32.mrf.mxu1 }
 0x419   : > { %14980 = vst [vmem:[#allocation87_spill] sm:$0xff] %v12679_v44  ;;  %14981 = vst [vmem:[#allocation98_spill] sm:$0xff] %v12681_v23  ;;  %v14990_v44 = vld [vmem:[#allocation49_spill] sm:$0xff]  ;;  %v12701_v23 = vpop.f32.mrf.mxu0 }
 0x41a   : > { %v4009_v50 = vpop.f32.mrf.mxu1  ;;  %v3765_v8 = vadd.f32 %v14990_v44, %v12285_v34  ;;  %14991 = vst [vmem:[#allocation94_spill] sm:$0xff] %v12701_v23 }
 0x41b   : > { %v12687_v53 = vadd.f32 %v4009_v50, %v3753_v31 }
 0x41c   : > { %v12689_v63 = vpop.f32.mrf.mxu1 }
 0x41d   : > { %14984 = vst [vmem:[#allocation64_spill] sm:$0xff] %v12687_v53  ;;  %14985 = vst [vmem:[#allocation96_spill] sm:$0xff] %v12689_v63  ;;  %v14994_v53 = vld [vmem:[#allocation259_spill] sm:$0xff]  ;;  %v12709_v63 = vpop.f32.mrf.mxu0 }
 0x41e   : > { %v4015_v1 = vpop.f32.mrf.mxu1  ;;  %v3771_v41 = vadd.f32 %v14994_v53, %v12285_v34  ;;  %14995 = vst [vmem:[#allocation65_spill] sm:$0xff] %v12709_v63 }
 0x41f   : > { %v12695_v38 = vadd.f32 %v4015_v1, %v3759_v7 }
 0x420   : > { %v12697_v43 = vpop.f32.mrf.mxu1 }
 0x421   : > { %14988 = vst [vmem:[#allocation89_spill] sm:$0xff] %v12695_v38  ;;  %14989 = vst [vmem:[#allocation161_spill] sm:$0xff] %v12697_v43  ;;  %v14998_v38 = vld [vmem:[#allocation140_spill] sm:$0xff]  ;;  %v12717_v43 = vpop.f32.mrf.mxu0 }
 0x422   : > { %v4021_v15 = vpop.f32.mrf.mxu1  ;;  %v3777_v44 = vadd.f32 %v14998_v38, %v12285_v34  ;;  %14999 = vst [vmem:[#allocation99_spill] sm:$0xff] %v12717_v43 }
 0x423   : > { %v12703_v50 = vadd.f32 %v4021_v15, %v3765_v8 }
 0x424   : > { %v12705_v31 = vpop.f32.mrf.mxu1 }
 0x425   : > { %14992 = vst [vmem:[#allocation270_spill] sm:$0xff] %v12703_v50  ;;  %14993 = vst [vmem:[#allocation101_spill] sm:$0xff] %v12705_v31  ;;  %v12723_v31 = vpop.f32.mrf.mxu0 }
 0x426   : > { %15002 = vst [vmem:[#allocation168_spill] sm:$0xff] %v12723_v31 }
 0x428   : > { %v4027_v36 = vpop.f32.mrf.mxu1 }
 0x429   : > { %v12711_v1 = vadd.f32 %v4027_v36, %v3771_v41  ;;  %v12726_v36 = vpop.f32.mrf.mxu0 }
 0x42a   : > { %v12713_v7 = vpop.f32.mrf.mxu1  ;;  %15003 = vst [vmem:[#allocation103_spill] sm:$0xff] %v12726_v36 }
 0x42b   : > { %14996 = vst [vmem:[#allocation93_spill] sm:$0xff] %v12711_v1  ;;  %14997 = vst [vmem:[#allocation165_spill] sm:$0xff] %v12713_v7 }
 0x42c   : > { %v4033_v23 = vpop.f32.mrf.mxu1 }
 0x42d   : > { %v12719_v15 = vadd.f32 %v4033_v23, %v3777_v44  ;;  %v12730_v44 = vpop.f32.mrf.mxu0 }
 0x42e   : > { %v12721_v8 = vpop.f32.mrf.mxu1 }
 0x42f   : > { %15000 = vst [vmem:[#allocation106_spill] sm:$0xff] %v12719_v15  ;;  %15001 = vst [vmem:[#allocation97_spill] sm:$0xff] %v12721_v8 }
 0x430   : > { %v4361_v53 = vpop.f32.mrf.mxu1 }
 0x431   : > { %v4362_v50 = vadd.f32 %v4361_v53, %v12392_v61 }
 0x432   : > { %v4363_v63 = vpop.f32.mrf.mxu1 }
 0x433   : > { %v4554_v41 = vsub.f32 0.0, %v4362_v50  ;;  %v4364_v1 = vadd.f32 %v4363_v63, %v12400_v35  ;;  %v12734_v63 = vpop.f32.mrf.mxu0 }
 0x434   : > { %v4367_v7 = vpop.f32.mrf.mxu1 }
 0x435   : > { %v4684_v34 = vmul.f32 1.442695, %v4554_v41  ;;  %v4555_v38 = vsub.f32 0.0, %v4364_v1  ;;  %v4368_v43 = vadd.f32 %v4367_v7, %v12413_v42 }
 0x436   : > { %v4369_v23 = vpop.f32.mrf.mxu1 }
 0x437   : > { %7370 = vpow2.f32 %v4684_v34  ;;  %v4686_v15 = vmul.f32 1.442695, %v4555_v38  ;;  %v4558_v8 = vsub.f32 0.0, %v4368_v43  ;;  %v4370_v31 = vadd.f32 %v4369_v23, %v12423_v60 }
 0x438   : > { %v4373_v61 = vpop.f32.mrf.mxu1 }
 0x439   : > { %7372 = vpow2.f32 %v4686_v15  ;;  %v4692_v53 = vmul.f32 1.442695, %v4558_v8  ;;  %v4559_v36 = vsub.f32 0.0, %v4370_v31  ;;  %v4374_v50 = vadd.f32 %v4373_v61, %v12439_v6  ;;  %v12738_v15 = vpop.f32.mrf.mxu0 }
 0x43a   : > { %v4375_v35 = vpop.f32.mrf.mxu1 }
 0x43b   : > { %7374 = vpow2.f32 %v4692_v53  ;;  %v4694_v1 = vmul.f32 1.442695, %v4559_v36  ;;  %v4562_v42 = vsub.f32 0.0, %v4374_v50  ;;  %v4376_v7 = vadd.f32 %v4375_v35, %v12449_v18  ;;  %v12742_v50 = vpop.f32.mrf.mxu0 }
 0x43c   : > { %v4379_v41 = vpop.f32.mrf.mxu1 }
 0x43d   : > { %7376 = vpow2.f32 %v4694_v1  ;;  %v4700_v34 = vmul.f32 1.442695, %v4562_v42  ;;  %v4563_v43 = vsub.f32 0.0, %v4376_v7  ;;  %v4380_v60 = vadd.f32 %v4379_v41, %v12461_v39 }
 0x43e   : > { %v4381_v38 = vpop.f32.mrf.mxu1 }
 0x43f   : > { %7378 = vpow2.f32 %v4700_v34  ;;  %v4702_v31 = vmul.f32 1.442695, %v4563_v43  ;;  %v4566_v6 = vsub.f32 0.0, %v4380_v60  ;;  %v4382_v8 = vadd.f32 %v4381_v38, %v12468_v19 }
 0x440   : > { %v4385_v23 = vpop.f32.mrf.mxu1 }
 0x441   : > { %7380 = vpow2.f32 %v4702_v31  ;;  %v4708_v36 = vmul.f32 1.442695, %v4566_v6  ;;  %v4567_v61 = vsub.f32 0.0, %v4382_v8  ;;  %v4386_v18 = vadd.f32 %v4385_v23, %v12480_v49  ;;  %v6373_v31 = vld [vmem:[#allocation13 + $0x78] sm:$0xff]  ;;  %v6372_v49 = vld [vmem:[#allocation13 + $0x70] sm:$0xff]  ;;  %v12746_v6 = vpop.f32.mrf.mxu0 }
 0x442   : > { %v4387_v53 = vpop.f32.mrf.mxu1  ;;  %6398 = vmatpush1.msra.mxu0 %v6373_v31 }
 0x443   : > { %7382 = vpow2.f32 %v4708_v36  ;;  %v4710_v35 = vmul.f32 1.442695, %v4567_v61  ;;  %v4570_v39 = vsub.f32 0.0, %v4386_v18  ;;  %v4388_v1 = vadd.f32 %v4387_v53, %v12483_v22 }
 0x444   : > { %v7371_v42 = vpop.eup %7370  ;;  %v4391_v7 = vpop.f32.mrf.mxu1  ;;  %v15004_v53 = vmov 0.0  }
 0x445   : > { %v4938_v41 = vadd.f32 1.0, %v7371_v42  ;;  %7384 = vpow2.f32 %v4710_v35  ;;  %v4716_v34 = vmul.f32 1.442695, %v4570_v39  ;;  %v4571_v19 = vsub.f32 0.0, %v4388_v1  ;;  %6399 = vmatprep.subr.mxu0 %v15004_v53 }
 0x446   : > { %v7373_v43 = vpop.eup %7372  ;;  %v4392_v60 = vadd.f32 %v4391_v7, %v12492_v0  ;;  %v4393_v38 = vpop.f32.mrf.mxu1  ;;  %6400 = vmatpush1.msra.mxu0 %v6372_v49 }
 0x447   : > { %7386 = vrcp.f32 %v4938_v41  ;;  %v4939_v8 = vadd.f32 1.0, %v7373_v43  ;;  %v4718_v23 = vmul.f32 1.442695, %v4571_v19  ;;  %v4394_v36 = vadd.f32 %v4393_v38, %v12497_v10  ;;  %6401 = vmatprep.subr.mxu0 %v15004_v53  ;;  %v6371_v10 = vld [vmem:[#allocation13 + $0x68] sm:$0xff]  ;;  %v12752_v41 = vpop.f32.mrf.mxu0 }
 0x448   : > { %v7375_v22 = vpop.eup %7374  ;;  %7388 = vpow2.f32 %v4716_v34  ;;  %v4574_v61 = vsub.f32 0.0, %v4392_v60  ;;  %v4397_v18 = vpop.f32.mrf.mxu1  ;;  %6402 = vmatpush1.msra.mxu0 %v6371_v10  ;;  %v15005_v38 = vld [vmem:[#allocation119_spill] sm:$0xff] }
 0x449   : > { %7390 = vrcp.f32 %v4939_v8  ;;  %v4942_v35 = vadd.f32 1.0, %v7375_v22  ;;  %v4575_v0 = vsub.f32 0.0, %v4394_v36  ;;  %v4398_v39 = vadd.f32 %v4397_v18, %v12505_v30  ;;  %6403 = vmatprep.subr.mxu0 %v15004_v53 }
 0x44a   : > { %v7377_v1 = vpop.eup %7376  ;;  %7392 = vpow2.f32 %v4718_v23  ;;  %v4724_v42 = vmul.f32 1.442695, %v4574_v61  ;;  %v4399_v7 = vpop.f32.mrf.mxu1  ;;  %v3641_v31 = vadd.f32 %v15005_v38, %v12289_v14  ;;  %v15006_v61 = vld [vmem:[#allocation37_spill] sm:$0xff] }
 0x44b   : > { %7394 = vrcp.f32 %v4942_v35  ;;  %v4943_v34 = vadd.f32 1.0, %v7377_v1  ;;  %v4726_v19 = vmul.f32 1.442695, %v4575_v0  ;;  %v4578_v43 = vsub.f32 0.0, %v4398_v39  ;;  %v6370_v1 = vld [vmem:[#allocation13 + $0x60] sm:$0xff] }
 0x44c   : > { %v7379_v60 = vpop.eup %7378  ;;  %7396 = vpow2.f32 %v4724_v42  ;;  %v4400_v30 = vadd.f32 %v4399_v7, %v12511_v12  ;;  %v4403_v49 = vpop.f32.mrf.mxu1  ;;  %v3647_v18 = vadd.f32 %v15006_v61, %v12289_v14  ;;  %v3898_v35 = vadd.f32 %v12507_v58, %v3641_v31  ;;  %6404 = vmatpush1.msra.mxu0 %v6370_v1 }
 0x44d   : > { %7398 = vrcp.f32 %v4943_v34  ;;  %v4946_v8 = vadd.f32 1.0, %v7379_v60  ;;  %v4732_v23 = vmul.f32 1.442695, %v4578_v43  ;;  %v4404_v36 = vadd.f32 %v4403_v49, %v12519_v57  ;;  %v12762_v42 = vpop.f32.mrf.mxu0  ;;  %6405 = vmatprep.subr.mxu0 %v15004_v53 }
 0x44e   : > { %v7381_v22 = vpop.eup %7380  ;;  %7400 = vpow2.f32 %v4726_v19  ;;  %v4579_v0 = vsub.f32 0.0, %v4400_v30  ;;  %v4405_v39 = vpop.f32.mrf.mxu1  ;;  %v4153_v57 = vadd.f32 %v12531_v29, %v12501_v47  ;;  %v4155_v43 = vadd.f32 %v12539_v4, %v3898_v35  ;;  %v6369_v29 = vld [vmem:[#allocation13 + $0x58] sm:$0xff] }
 0x44f   : > { %7402 = vrcp.f32 %v4946_v8  ;;  %v4947_v12 = vadd.f32 1.0, %v7381_v22  ;;  %v4582_v7 = vsub.f32 0.0, %v4404_v36  ;;  %v4406_v10 = vadd.f32 %v4405_v39, %v12525_v28  ;;  %v12772_v4 = vpop.f32.mrf.mxu0  ;;  %6406 = vmatpush1.msra.mxu0 %v6369_v29  ;;  %v15007_v35 = vld [vmem:[#allocation121_spill] sm:$0xff] }
 0x450   : > { %v7383_v34 = vpop.eup %7382  ;;  %7404 = vpow2.f32 %v4732_v23  ;;  %v4734_v58 = vmul.f32 1.442695, %v4579_v0  ;;  %v4409_v19 = vpop.f32.mrf.mxu1  ;;  %v3904_v49 = vadd.f32 %v12521_v26, %v3647_v18  ;;  %v4159_v28 = vadd.f32 %v12551_v24, %v12515_v5  ;;  %6407 = vmatprep.subr.mxu0 %v15004_v53 }
 0x451   : > { %7406 = vrcp.f32 %v4947_v12  ;;  %v4950_v60 = vadd.f32 1.0, %v7383_v34  ;;  %v4740_v38 = vmul.f32 1.442695, %v4582_v7  ;;  %v4583_v31 = vsub.f32 0.0, %v4406_v10 }
 0x452   : > { %v7385_v30 = vpop.eup %7384  ;;  %7408 = vpow2.f32 %v4734_v58  ;;  %v4410_v8 = vadd.f32 %v4409_v19, %v4153_v57  ;;  %v4411_v47 = vpop.f32.mrf.mxu1  ;;  %v3653_v0 = vadd.f32 %v15007_v35, %v12289_v14  ;;  %v4161_v24 = vadd.f32 %v12563_v33, %v3904_v49  ;;  %v6367_v58 = vld [vmem:[#allocation13 + $0x48] sm:$0xff] }
 0x453   : > { %7410 = vrcp.f32 %v4950_v60  ;;  %v4951_v23 = vadd.f32 1.0, %v7385_v30  ;;  %v4742_v36 = vmul.f32 1.442695, %v4583_v31  ;;  %v4412_v22 = vadd.f32 %v4411_v47, %v4155_v43  ;;  %v6368_v43 = vld [vmem:[#allocation13 + $0x50] sm:$0xff] }
 0x454   : > { %v7387_v61 = vpop.eup %7386  ;;  %7412 = vpow2.f32 %v4740_v38  ;;  %v4586_v26 = vsub.f32 0.0, %v4410_v8  ;;  %v4415_v18 = vpop.f32.mrf.mxu1  ;;  %v3910_v7 = vadd.f32 %v12535_v3, %v3653_v0  ;;  %v4165_v60 = vadd.f32 %v12575_v55, %v12529_v40  ;;  %6408 = vmatpush1.msra.mxu0 %v6368_v43  ;;  %v15008_v3 = vld [vmem:[#allocation251_spill] sm:$0xff] }
 0x455   : > { %v7389_v5 = vpop.eup %7388  ;;  %7414 = vrcp.f32 %v4951_v23  ;;  %v4587_v39 = vsub.f32 0.0, %v4412_v22  ;;  %v4416_v1 = vadd.f32 %v4415_v18, %v4159_v28  ;;  %v12781_v38 = vpop.f32.mrf.mxu0  ;;  %v3659_v28 = vadd.f32 %v15008_v3, %v12289_v14  ;;  %6409 = vmatprep.subr.mxu0 %v15004_v53  ;;  %v6366_v40 = vld [vmem:[#allocation13 + $0x40] sm:$0xff] }
 0x456   : > { %v7391_v12 = vpop.eup %7390  ;;  %v4954_v10 = vadd.f32 1.0, %v7389_v5  ;;  %7416 = vpow2.f32 %v4742_v36  ;;  %v4748_v34 = vmul.f32 1.442695, %v4586_v26  ;;  %v4417_v57 = vpop.f32.mrf.mxu1  ;;  %v4167_v8 = vadd.f32 %v12587_v48, %v3910_v7  ;;  %6410 = vmatpush1.msra.mxu0 %v6367_v58 }
 0x457   : > { %v7393_v19 = vpop.eup %7392  ;;  %v4750_v31 = vmul.f32 1.442695, %v4587_v39  ;;  %v4590_v33 = vsub.f32 0.0, %v4416_v1  ;;  %v4418_v30 = vadd.f32 %v4417_v57, %v4161_v24  ;;  %5781 = vmatprep.mubr.f32.mxu1 %v7391_v12  ;;  %v3916_v0 = vadd.f32 %v12547_v59, %v3659_v28  ;;  %6411 = vmatprep.subr.mxu0 %v15004_v53  ;;  %v12791_v24 = vpop.f32.mrf.mxu0  ;;  %v15009_v59 = vld [vmem:[#allocation120_spill] sm:$0xff] }
 0x458   : > { %v7395_v49 = vpop.eup %7394  ;;  %7418 = vrcp.f32 %v4954_v10  ;;  %v4955_v47 = vadd.f32 1.0, %v7393_v19  ;;  %v4421_v29 = vpop.f32.mrf.mxu1  ;;  %5782 = vmatmul.mubr.f32.vlgmr.msra.gmra.mxu1 %v7387_v61  ;;  %v4171_v26 = vadd.f32 %v12597_v17, %v12543_v11  ;;  %v6365_v61 = vld [vmem:[#allocation13 + $0x38] sm:$0xff]  ;;  %6412 = vmatpush1.msra.mxu0 %v6366_v40  ;;  %v3665_v10 = vadd.f32 %v15009_v59, %v12289_v14  ;;  %v6364_v57 = vld [vmem:[#allocation13 + $0x30] sm:$0xff] }
 0x459   : > { %v7397_v55 = vpop.eup %7396  ;;  %7420 = vpow2.f32 %v4748_v34  ;;  %v4756_v23 = vmul.f32 1.442695, %v4590_v33  ;;  %v4591_v36 = vsub.f32 0.0, %v4418_v30  ;;  %v4422_v22 = vadd.f32 %v4421_v29, %v4165_v60  ;;  %6413 = vmatprep.subr.mxu0 %v15004_v53 }
 0x45a   : > { %v7399_v35 = vpop.eup %7398  ;;  %7422 = vrcp.f32 %v4955_v47  ;;  %v4958_v48 = vadd.f32 1.0, %v7397_v55  ;;  %v4423_v18 = vpop.f32.mrf.mxu1  ;;  %v4173_v11 = vadd.f32 %v12605_v13, %v3916_v0  ;;  %6414 = vmatpush1.msra.mxu0 %v6365_v61  ;;  %v3922_v33 = vadd.f32 %v12559_v32, %v3665_v10  ;;  %v15010_v32 = vld [vmem:[#allocation124_spill] sm:$0xff]  ;;  %v15011_v61 = vld [vmem:[#allocation122_spill] sm:$0xff] }
 0x45b   : > { %v7401_v5 = vpop.eup %7400  ;;  %7424 = vpow2.f32 %v4750_v31  ;;  %v4758_v39 = vmul.f32 1.442695, %v4591_v36  ;;  %v4594_v1 = vsub.f32 0.0, %v4422_v22  ;;  %v4424_v12 = vadd.f32 %v4423_v18, %v4167_v8  ;;  %5787 = vmatprep.mubr.f32.mxu1 %v7399_v35  ;;  %6415 = vmatprep.subr.mxu0 %v15004_v53  ;;  %v12801_v8 = vpop.f32.mrf.mxu0  ;;  %v6362_v22 = vld [vmem:[#allocation13 + $0x20] sm:$0xff] }
 0x45c   : > { %v7403_v7 = vpop.eup %7402  ;;  %7426 = vrcp.f32 %v4958_v48  ;;  %v4959_v17 = vadd.f32 1.0, %v7401_v5  ;;  %v4427_v34 = vpop.f32.mrf.mxu1  ;;  %5788 = vmatmul.mubr.f32.gmra.mxu1 %v7395_v49  ;;  %v4177_v30 = vadd.f32 %v12613_v2, %v12555_v16  ;;  %v6363_v49 = vld [vmem:[#allocation13 + $0x28] sm:$0xff]  ;;  %6416 = vmatpush1.msra.mxu0 %v6364_v57  ;;  %v4179_v16 = vadd.f32 %v12621_v27, %v3922_v33 }
 0x45d   : > { %v7405_v43 = vpop.eup %7404  ;;  %7428 = vpow2.f32 %v4756_v23  ;;  %v4764_v58 = vmul.f32 1.442695, %v4594_v1  ;;  %v4595_v19 = vsub.f32 0.0, %v4424_v12  ;;  %v4428_v60 = vadd.f32 %v4427_v34, %v4171_v26  ;;  %6417 = vmatprep.subr.mxu0 %v15004_v53  ;;  %v6361_v12 = vld [vmem:[#allocation13 + $0x18] sm:$0xff]  ;;  %v12812_v59 = vpop.f32.mrf.mxu0  ;;  %v15012_v34 = vld [vmem:[#allocation40_spill] sm:$0xff] }
 0x45e   : > { %v7407_v31 = vpop.eup %7406  ;;  %7430 = vrcp.f32 %v4959_v17  ;;  %v4962_v13 = vadd.f32 1.0, %v7405_v43  ;;  %v4429_v3 = vpop.f32.mrf.mxu1  ;;  %v3671_v23 = vadd.f32 %v15010_v32, %v12289_v14  ;;  %6418 = vmatpush1.msra.mxu0 %v6363_v49  ;;  %v3677_v5 = vadd.f32 %v15011_v61, %v12289_v14 }
 0x45f   : > { %v7409_v28 = vpop.eup %7408  ;;  %7432 = vpow2.f32 %v4758_v39  ;;  %v4766_v47 = vmul.f32 1.442695, %v4595_v19  ;;  %v4598_v29 = vsub.f32 0.0, %v4428_v60  ;;  %v4430_v40 = vadd.f32 %v4429_v3, %v4173_v11  ;;  %5793 = vmatprep.mubr.f32.mxu1 %v7407_v31  ;;  %6419 = vmatprep.subr.mxu0 %v15004_v53 }
 0x460   : > { %v7411_v55 = vpop.eup %7410  ;;  %7434 = vrcp.f32 %v4962_v13  ;;  %v4963_v2 = vadd.f32 1.0, %v7409_v28  ;;  %v4433_v36 = vpop.f32.mrf.mxu1  ;;  %5794 = vmatmul.mubr.f32.gmra.mxu1 %v7403_v7  ;;  %v4183_v27 = vadd.f32 %v12629_v21, %v12567_v45  ;;  %6420 = vmatpush1.msra.mxu0 %v6362_v22  ;;  %v3683_v57 = vadd.f32 %v15012_v34, %v12289_v14  ;;  %v6359_v28 = vld [vmem:[#allocation13 + $0x8] sm:$0xff] }
 0x461   : > { %v7413_v35 = vpop.eup %7412  ;;  %7436 = vpow2.f32 %v4764_v58  ;;  %v4772_v0 = vmul.f32 1.442695, %v4598_v29  ;;  %v4599_v26 = vsub.f32 0.0, %v4430_v40  ;;  %v4434_v48 = vadd.f32 %v4433_v36, %v4177_v30  ;;  %6421 = vmatprep.subr.mxu0 %v15004_v53  ;;  %v6360_v58 = vld [vmem:[#allocation13 + $0x10] sm:$0xff]  ;;  %v12823_v29 = vpop.f32.mrf.mxu0 }
 0x462   : > { %v7415_v18 = vpop.eup %7414  ;;  %7438 = vrcp.f32 %v4963_v2  ;;  %v4966_v39 = vadd.f32 1.0, %v7413_v35  ;;  %v4435_v1 = vpop.f32.mrf.mxu1  ;;  %v3928_v45 = vadd.f32 %v12571_v20, %v3671_v23  ;;  %6422 = vmatpush1.msra.mxu0 %v6361_v12  ;;  %v3934_v13 = vadd.f32 %v12583_v25, %v3677_v5  ;;  %v15013_v25 = vld [vmem:[#allocation126_spill] sm:$0xff] }
 0x463   : > { %v7417_v7 = vpop.eup %7416  ;;  %7440 = vpow2.f32 %v4766_v47  ;;  %v4774_v10 = vmul.f32 1.442695, %v4599_v26  ;;  %v4602_v11 = vsub.f32 0.0, %v4434_v48  ;;  %v4436_v17 = vadd.f32 %v4435_v1, %v4179_v16  ;;  %5799 = vmatprep.mubr.f32.mxu1 %v7415_v18  ;;  %6423 = vmatprep.subr.mxu0 %v15004_v53  ;;  %v6358_v2 = vld [vmem:[#allocation13] sm:$0xff]  ;;  %v15014_v48 = vld [vmem:[#allocation253_spill] sm:$0xff]  ;;  %v12833_v1 = vpop.f32.mrf.mxu0 }
 0x464   : > { %7442 = vrcp.f32 %v4966_v39  ;;  %v4967_v21 = vadd.f32 1.0, %v7417_v7  ;;  %v4439_v43 = vpop.f32.mrf.mxu1  ;;  %5800 = vmatmul.mubr.f32.gmra.mxu1 %v7411_v55  ;;  %v4185_v3 = vadd.f32 %v12637_v9, %v3928_v45  ;;  %v4189_v20 = vadd.f32 %v12645_v52, %v12579_v51  ;;  %6424 = vmatpush1.msra.mxu0 %v6360_v58  ;;  %v6388_v45 = vld [vmem:[#allocation13 + $0xf0] sm:$0xff] }
 0x465   : > { %v7419_v19 = vpop.eup %7418  ;;  %7444 = vpow2.f32 %v4772_v0  ;;  %v4780_v60 = vmul.f32 1.442695, %v4602_v11  ;;  %v4603_v31 = vsub.f32 0.0, %v4436_v17  ;;  %v4440_v33 = vadd.f32 %v4439_v43, %v4183_v27  ;;  %6425 = vmatprep.subr.mxu0 %v15004_v53  ;;  %v6389_v27 = vld [vmem:[#allocation13 + $0xf8] sm:$0xff] }
 0x466   : > { %v7421_v30 = vpop.eup %7420  ;;  %7446 = vrcp.f32 %v4967_v21  ;;  %v4441_v49 = vpop.f32.mrf.mxu1  ;;  %v3689_v9 = vadd.f32 %v15013_v25, %v12289_v14  ;;  %v4191_v16 = vadd.f32 %v12653_v56, %v3934_v13  ;;  %6426 = vmatpush1.msra.mxu0 %v6359_v28  ;;  %v3695_v18 = vadd.f32 %v15014_v48, %v12289_v14  ;;  %v15019_v25 = vld [vmem:[#allocation141_spill] sm:$0xff]  ;;  %v15020_v48 = vld [vmem:[#allocation90_spill] sm:$0xff] }
 0x467   : > { %v7423_v47 = vpop.eup %7422  ;;  %v4970_v40 = vadd.f32 1.0, %v7421_v30  ;;  %7448 = vpow2.f32 %v4774_v10  ;;  %v4782_v55 = vmul.f32 1.442695, %v4603_v31  ;;  %v4606_v32 = vsub.f32 0.0, %v4440_v33  ;;  %6427 = vmatprep.subr.mxu0 %v15004_v53  ;;  %v15015_v31 = vld [vmem:[#allocation125_spill] sm:$0xff] }
 0x468   : > { %v7425_v23 = vpop.eup %7424  ;;  %7450 = vpow2.f32 %v4780_v60  ;;  %v4442_v51 = vadd.f32 %v4441_v49, %v4185_v3  ;;  %5805 = vmatprep.mubr.f32.mxu1 %v7423_v47  ;;  %v4445_v52 = vpop.f32.mrf.mxu1  ;;  %v3940_v56 = vadd.f32 %v12593_v46, %v3683_v57  ;;  %6428 = vmatpush1.msra.mxu0 %v6358_v2  ;;  %v4195_v17 = vadd.f32 %v12661_v62, %v12591_v54  ;;  %v15016_v62 = vld [vmem:[#allocation52_spill] sm:$0xff]  ;;  %v6386_v2 = vld [vmem:[#allocation13 + $0xe0] sm:$0xff] }
 0x469   : > { %v7427_v36 = vpop.eup %7426  ;;  %7452 = vrcp.f32 %v4970_v40  ;;  %v4971_v22 = vadd.f32 1.0, %v7425_v23  ;;  %v4788_v35 = vmul.f32 1.442695, %v4606_v32  ;;  %v4446_v0 = vadd.f32 %v4445_v52, %v4189_v20  ;;  %5806 = vmatmul.mubr.f32.gmra.mxu1 %v7419_v19  ;;  %6429 = vmatprep.subr.mxu0 %v15004_v53  ;;  %v6387_v3 = vld [vmem:[#allocation13 + $0xe8] sm:$0xff]  ;;  %v12844_v49 = vpop.f32.mrf.mxu0  ;;  %v15018_v32 = vld [vmem:[#allocation142_spill] sm:$0xff] }
 0x46a   : > { %v7429_v26 = vpop.eup %7428  ;;  %7454 = vpow2.f32 %v4782_v55  ;;  %v4607_v61 = vsub.f32 0.0, %v4442_v51  ;;  %v4447_v5 = vpop.f32.mrf.mxu1  ;;  %v4197_v46 = vadd.f32 %v12669_v37, %v3940_v56  ;;  %6430 = vmatpush2.msra.mxu0 %v6389_v27  ;;  %v3701_v54 = vadd.f32 %v15015_v31, %v12289_v14  ;;  %v15017_v37 = vld [vmem:[#allocation267_spill] sm:$0xff] }
 0x46b   : > { %v7431_v39 = vpop.eup %7430  ;;  %7456 = vrcp.f32 %v4971_v22  ;;  %v4974_v12 = vadd.f32 1.0, %v7429_v26  ;;  %v4610_v7 = vsub.f32 0.0, %v4446_v0  ;;  %v4448_v10 = vadd.f32 %v4447_v5, %v4191_v16  ;;  %6431 = vmatprep.subr.mxu0 %v15004_v53 }
 0x46c   : > { %v7433_v11 = vpop.eup %7432  ;;  %7458 = vpow2.f32 %v4788_v35  ;;  %v4790_v34 = vmul.f32 1.442695, %v4607_v61  ;;  %5811 = vmatprep.mubr.f32.mxu1 %v7431_v39  ;;  %v4451_v57 = vpop.f32.mrf.mxu1  ;;  %v4201_v33 = vadd.f32 %v15017_v37, %v15016_v62  ;;  %6432 = vmatpush2.msra.mxu0 %v6388_v45  ;;  %v3946_v23 = vadd.f32 %v15018_v32, %v3689_v9  ;;  %v15021_v9 = vld [vmem:[#allocation261_spill] sm:$0xff]  ;;  %v15024_v45 = vld [vmem:[#allocation94_spill] sm:$0xff] }
 0x46d   : > { %v7435_v21 = vpop.eup %7434  ;;  %7460 = vrcp.f32 %v4974_v12  ;;  %v4975_v43 = vadd.f32 1.0, %v7433_v11  ;;  %v4796_v58 = vmul.f32 1.442695, %v4610_v7  ;;  %v4611_v19 = vsub.f32 0.0, %v4448_v10  ;;  %5812 = vmatmul.mubr.f32.gmra.mxu1 %v7427_v36  ;;  %6433 = vmatprep.subr.mxu0 %v15004_v53  ;;  %v15022_v61 = vld [vmem:[#allocation269_spill] sm:$0xff]  ;;  %v12853_v7 = vpop.f32.mrf.mxu0 }
 0x46e   : > { %v7437_v60 = vpop.eup %7436  ;;  %7462 = vpow2.f32 %v4790_v34  ;;  %v4452_v30 = vadd.f32 %v4451_v57, %v4195_v17  ;;  %v4453_v13 = vpop.f32.mrf.mxu1  ;;  %v3952_v16 = vadd.f32 %v15019_v25, %v3695_v18  ;;  %6434 = vmatpush2.msra.mxu0 %v6387_v3  ;;  %v4203_v56 = vadd.f32 %v15020_v48, %v3946_v23  ;;  %v6385_v39 = vld [vmem:[#allocation13 + $0xd8] sm:$0xff]  ;;  %v15023_v34 = vld [vmem:[#allocation128_spill] sm:$0xff] }
 0x46f   : > { %v7439_v20 = vpop.eup %7438  ;;  %7464 = vrcp.f32 %v4975_v43  ;;  %v4978_v28 = vadd.f32 1.0, %v7437_v60  ;;  %v4798_v47 = vmul.f32 1.442695, %v4611_v19  ;;  %v4454_v40 = vadd.f32 %v4453_v13, %v4197_v46  ;;  %6435 = vmatprep.subr.mxu0 %v15004_v53  ;;  %v6384_v19 = vld [vmem:[#allocation13 + $0xd0] sm:$0xff]  ;;  %v12863_v23 = vpop.f32.mrf.mxu0 }
 0x470   : > { %v7441_v55 = vpop.eup %7440  ;;  %7466 = vpow2.f32 %v4796_v58  ;;  %v4614_v51 = vsub.f32 0.0, %v4452_v30  ;;  %5817 = vmatprep.mubr.f32.mxu1 %v7439_v20  ;;  %v4457_v52 = vpop.f32.mrf.mxu1  ;;  %v4207_v18 = vadd.f32 %v15022_v61, %v15021_v9  ;;  %6436 = vmatpush2.msra.mxu0 %v6386_v2  ;;  %v3707_v57 = vadd.f32 %v15023_v34, %v12289_v14  ;;  %v15025_v30 = vld [vmem:[#allocation83_spill] sm:$0xff]  ;;  %v15029_v9 = vld [vmem:[#allocation145_spill] sm:$0xff] }
 0x471   : > { %v7443_v36 = vpop.eup %7442  ;;  %7468 = vrcp.f32 %v4978_v28  ;;  %v4979_v22 = vadd.f32 1.0, %v7441_v55  ;;  %v4615_v35 = vsub.f32 0.0, %v4454_v40  ;;  %v4458_v0 = vadd.f32 %v4457_v52, %v4201_v33  ;;  %5818 = vmatmul.mubr.f32.gmra.mxu1 %v7435_v21  ;;  %6437 = vmatprep.subr.mxu0 %v15004_v53  ;;  %v15026_v40 = vld [vmem:[#allocation144_spill] sm:$0xff]  ;;  %v15027_v55 = vld [vmem:[#allocation65_spill] sm:$0xff]  ;;  %v15028_v52 = vld [vmem:[#allocation99_spill] sm:$0xff] }
 0x472   : > { %v7445_v26 = vpop.eup %7444  ;;  %7470 = vpow2.f32 %v4798_v47  ;;  %v4804_v5 = vmul.f32 1.442695, %v4614_v51  ;;  %v4459_v27 = vpop.f32.mrf.mxu1  ;;  %v4209_v21 = vadd.f32 %v15024_v45, %v3952_v16  ;;  %6438 = vmatpush2.msra.mxu0 %v6385_v39  ;;  %v3958_v13 = vadd.f32 %v15025_v30, %v3701_v54 }
 0x473   : > { %v7447_v12 = vpop.eup %7446  ;;  %7472 = vrcp.f32 %v4979_v22  ;;  %v4982_v10 = vadd.f32 1.0, %v7445_v26  ;;  %v4806_v11 = vmul.f32 1.442695, %v4615_v35  ;;  %v4618_v17 = vsub.f32 0.0, %v4458_v0  ;;  %6439 = vmatprep.subr.mxu0 %v15004_v53 }
 0x474   : > { %v7449_v46 = vpop.eup %7448  ;;  %7474 = vpow2.f32 %v4804_v5  ;;  %v4460_v43 = vadd.f32 %v4459_v27, %v4203_v56  ;;  %5823 = vmatprep.mubr.f32.mxu1 %v7447_v12  ;;  %v4463_v58 = vpop.f32.mrf.mxu1  ;;  %v4213_v32 = vadd.f32 %v15027_v55, %v15026_v40  ;;  %6440 = vmatpush2.msra.mxu0 %v6384_v19  ;;  %v4215_v2 = vadd.f32 %v15028_v52, %v3958_v13  ;;  %v15031_v5 = vld [vmem:[#allocation168_spill] sm:$0xff]  ;;  %v15034_v13 = vld [vmem:[#allocation82_spill] sm:$0xff] }
 0x475   : > { %v7451_v60 = vpop.eup %7450  ;;  %7476 = vrcp.f32 %v4982_v10  ;;  %v4983_v31 = vadd.f32 1.0, %v7449_v46  ;;  %v4812_v62 = vmul.f32 1.442695, %v4618_v17  ;;  %v4464_v37 = vadd.f32 %v4463_v58, %v4207_v18  ;;  %5824 = vmatmul.mubr.f32.gmra.mxu1 %v7443_v36  ;;  %6441 = vmatprep.subr.mxu0 %v15004_v53  ;;  %v15030_v18 = vld [vmem:[#allocation55_spill] sm:$0xff] }
 0x476   : > { %v7453_v33 = vpop.eup %7452  ;;  %v4986_v3 = vadd.f32 1.0, %v7451_v60  ;;  %7478 = vpow2.f32 %v4806_v11  ;;  %v4619_v20 = vsub.f32 0.0, %v4460_v43  ;;  %v4465_v28 = vpop.f32.mrf.mxu1  ;;  %v3964_v61 = vadd.f32 %v15029_v9, %v3707_v57  ;;  %v15033_v58 = vld [vmem:[#allocation103_spill] sm:$0xff]  ;;  %v15037_v9 = vld [vmem:[#allocation130_spill] sm:$0xff] }
 0x477   : > { %v7455_v47 = vpop.eup %7454  ;;  %7480 = vrcp.f32 %v4983_v31  ;;  %v4622_v25 = vsub.f32 0.0, %v4464_v37  ;;  %v4466_v16 = vadd.f32 %v4465_v28, %v4209_v21  ;;  %v4219_v27 = vadd.f32 %v15031_v5, %v15030_v18  ;;  %v12870_v11 = vpop.f32.mrf.mxu0  ;;  %v15032_v21 = vld [vmem:[#allocation127_spill] sm:$0xff]  ;;  %v15038_v18 = vld [vmem:[#allocation148_spill] sm:$0xff] }
 0x478   : > { %v7457_v51 = vpop.eup %7456  ;;  %7482 = vrcp.f32 %v4986_v3  ;;  %v4987_v54 = vadd.f32 1.0, %v7455_v47  ;;  %v4814_v36 = vmul.f32 1.442695, %v4619_v20  ;;  %v4469_v22 = vpop.f32.mrf.mxu1  ;;  %v3713_v43 = vadd.f32 %v15032_v21, %v12289_v14  ;;  %v15035_v20 = vld [vmem:[#allocation263_spill] sm:$0xff] }
 0x479   : > { %v7459_v35 = vpop.eup %7458  ;;  %7484 = vpow2.f32 %v4812_v62  ;;  %v4820_v0 = vmul.f32 1.442695, %v4622_v25  ;;  %v4623_v26 = vsub.f32 0.0, %v4466_v16  ;;  %5829 = vmatprep.mubr.f32.mxu1 %v7457_v51  ;;  %v4470_v48 = vadd.f32 %v4469_v22, %v4213_v32  ;;  %v12878_v32 = vpop.f32.mrf.mxu0 }
 0x47a   : > { %v7461_v56 = vpop.eup %7460  ;;  %7486 = vrcp.f32 %v4987_v54  ;;  %v4990_v39 = vadd.f32 1.0, %v7459_v35  ;;  %5830 = vmatmul.mubr.f32.gmra.mxu1 %v7453_v33  ;;  %v4471_v12 = vpop.f32.mrf.mxu1  ;;  %v4221_v57 = vadd.f32 %v15033_v58, %v3964_v61  ;;  %v3970_v3 = vadd.f32 %v15034_v13, %v3713_v43  ;;  %v15040_v43 = vld [vmem:[#allocation146_spill] sm:$0xff] }
 0x47b   : > { %v7463_v10 = vpop.eup %7462  ;;  %7488 = vpow2.f32 %v4814_v36  ;;  %v4822_v17 = vmul.f32 1.442695, %v4623_v26  ;;  %v4626_v46 = vsub.f32 0.0, %v4470_v48  ;;  %v4472_v34 = vadd.f32 %v4471_v12, %v4215_v2  ;;  %v15036_v2 = vld [vmem:[#allocation43_spill] sm:$0xff]  ;;  %v12887_v12 = vpop.f32.mrf.mxu0 }
 0x47c   : > { %v7465_v45 = vpop.eup %7464  ;;  %7490 = vrcp.f32 %v4990_v39  ;;  %v4991_v19 = vadd.f32 1.0, %v7463_v10  ;;  %v4225_v28 = vadd.f32 %v12730_v44, %v15035_v20  ;;  %v3719_v54 = vadd.f32 %v15036_v2, %v12289_v14 }
 0x47d   : > { %v4475_v60 = vpop.f32.mrf.mxu1  ;;  %v7467_v31 = vpop.eup %7466  ;;  %7492 = vpow2.f32 %v4820_v0  ;;  %v4828_v62 = vmul.f32 1.442695, %v4626_v46  ;;  %v4627_v37 = vsub.f32 0.0, %v4472_v34  ;;  %5835 = vmatprep.mubr.f32.mxu1 %v7465_v45  ;;  %v4227_v36 = vadd.f32 %v12734_v63, %v3970_v3  ;;  %v15039_v45 = vld [vmem:[#allocation255_spill] sm:$0xff]  ;;  %v15042_v3 = vld [vmem:[#allocation58_spill] sm:$0xff] }
 0x47e   : > { %v4476_v33 = vadd.f32 %v4475_v60, %v4219_v27  ;;  %v7469_v30 = vpop.eup %7468  ;;  %7494 = vrcp.f32 %v4991_v19  ;;  %v4994_v47 = vadd.f32 1.0, %v7467_v31  ;;  %5836 = vmatmul.mubr.f32.gmra.mxu1 %v7461_v56  ;;  %v3725_v61 = vadd.f32 %v15037_v9, %v12289_v14 }
 0x47f   : > { %v4477_v40 = vpop.f32.mrf.mxu1  ;;  %v7471_v55 = vpop.eup %7470  ;;  %7496 = vpow2.f32 %v4822_v17  ;;  %v4830_v25 = vmul.f32 1.442695, %v4627_v37  ;;  %v4231_v5 = vadd.f32 %v12738_v15, %v15038_v18  ;;  %v3731_v21 = vadd.f32 %v15039_v45, %v12289_v14 }
 0x480   : > { %v4630_v16 = vsub.f32 0.0, %v4476_v33  ;;  %v4478_v51 = vadd.f32 %v4477_v40, %v4221_v57  ;;  %v7473_v52 = vpop.eup %7472  ;;  %7498 = vrcp.f32 %v4994_v47  ;;  %v4995_v22 = vadd.f32 1.0, %v7471_v55  ;;  %v15041_v33 = vld [vmem:[#allocation150_spill] sm:$0xff]  ;;  %v12896_v40 = vpop.f32.mrf.mxu0 }
 0x481   : > { %v4481_v44 = vpop.f32.mrf.mxu1  ;;  %v7475_v35 = vpop.eup %7474  ;;  %7500 = vpow2.f32 %v4828_v62  ;;  %5841 = vmatprep.mubr.f32.mxu1 %v7473_v52  ;;  %v3976_v58 = vadd.f32 %v15040_v43, %v3719_v54  ;;  %v4237_v20 = vadd.f32 %v12746_v6, %v15042_v3  ;;  %v15043_v52 = vld [vmem:[#allocation129_spill] sm:$0xff] }
 0x482   : > { %v4836_v0 = vmul.f32 1.442695, %v4630_v16  ;;  %v4631_v26 = vsub.f32 0.0, %v4478_v51  ;;  %v4482_v48 = vadd.f32 %v4481_v44, %v4225_v28  ;;  %v7477_v56 = vpop.eup %7476  ;;  %7502 = vrcp.f32 %v4995_v22  ;;  %5842 = vmatmul.mubr.f32.gmra.mxu1 %v7469_v30 }
 0x483   : > { %v4998_v27 = vadd.f32 1.0, %v7475_v35  ;;  %v4483_v63 = vpop.f32.mrf.mxu1  ;;  %v7479_v39 = vpop.eup %7478  ;;  %7504 = vpow2.f32 %v4830_v25  ;;  %v3982_v30 = vadd.f32 %v15041_v33, %v3725_v61  ;;  %v4233_v13 = vadd.f32 %v12742_v50, %v3976_v58 }
 0x484   : > { %v4838_v10 = vmul.f32 1.442695, %v4631_v26  ;;  %v4634_v17 = vsub.f32 0.0, %v4482_v48  ;;  %v4484_v46 = vadd.f32 %v4483_v63, %v4227_v36  ;;  %v7481_v34 = vpop.eup %7480  ;;  %v4999_v57 = vadd.f32 1.0, %v7479_v39  ;;  %v15044_v26 = vld [vmem:[#allocation131_spill] sm:$0xff] }
 0x485   : > { %7506 = vrcp.f32 %v4998_v27  ;;  %v7483_v19 = vpop.eup %7482  ;;  %5847 = vmatprep.mubr.f32.mxu1 %v7481_v34  ;;  %v3737_v2 = vadd.f32 %v15043_v52, %v12289_v14  ;;  %v4239_v54 = vadd.f32 %v12752_v41, %v3982_v30  ;;  %v3743_v48 = vadd.f32 %v15044_v26, %v12289_v14 }
 0x486   : > { %v4487_v15 = vpop.f32.mrf.mxu1  ;;  %7508 = vpow2.f32 %v4836_v0  ;;  %v4844_v60 = vmul.f32 1.442695, %v4634_v17  ;;  %v4635_v31 = vsub.f32 0.0, %v4484_v46  ;;  %v7485_v37 = vpop.eup %7484  ;;  %5848 = vmatmul.mubr.f32.gmra.mxu1 %v7477_v56  ;;  %v15045_v56 = vld [vmem:[#allocation85_spill] sm:$0xff] }
 0x487   : > { %v4488_v62 = vadd.f32 %v4487_v15, %v4231_v5  ;;  %7510 = vrcp.f32 %v4999_v57  ;;  %v7487_v47 = vpop.eup %7486  ;;  %v5002_v55 = vadd.f32 1.0, %v7485_v37  ;;  %v3988_v9 = vadd.f32 %v15045_v56, %v3731_v21  ;;  %v12904_v5 = vpop.f32.mrf.mxu0  ;;  %v15046_v17 = vld [vmem:[#allocation265_spill] sm:$0xff] }
 0x488   : > { %v4489_v28 = vpop.f32.mrf.mxu1  ;;  %7512 = vpow2.f32 %v4838_v10  ;;  %v4846_v25 = vmul.f32 1.442695, %v4635_v31  ;;  %v7489_v51 = vpop.eup %7488  ;;  %5853 = vmatprep.mubr.f32.mxu1 %v7487_v47  ;;  %v4243_v46 = vadd.f32 %v12762_v42, %v15046_v17  ;;  %v15049_v47 = vld [vmem:[#allocation151_spill] sm:$0xff] }
 0x489   : > { %v4638_v16 = vsub.f32 0.0, %v4488_v62  ;;  %7514 = vpow2.f32 %v4844_v60  ;;  %v4490_v50 = vadd.f32 %v4489_v28, %v4233_v13  ;;  %v7491_v36 = vpop.eup %7490  ;;  %v5003_v22 = vadd.f32 1.0, %v7489_v51  ;;  %v15047_v60 = vld [vmem:[#allocation134_spill] sm:$0xff]  ;;  %v15048_v62 = vld [vmem:[#allocation153_spill] sm:$0xff]  ;;  %v12913_v30 = vpop.f32.mrf.mxu0 }
 0x48a   : > { %v4493_v6 = vpop.f32.mrf.mxu1  ;;  %7516 = vrcp.f32 %v5002_v55  ;;  %v7493_v0 = vpop.eup %7492  ;;  %5854 = vmatmul.mubr.f32.gmra.mxu1 %v7483_v19  ;;  %v4245_v34 = vadd.f32 %v12772_v4, %v3988_v9  ;;  %v3749_v31 = vadd.f32 %v15047_v60, %v12289_v14  ;;  %v4249_v37 = vadd.f32 %v12781_v38, %v15048_v62 }
 0x48b   : > { %v4852_v44 = vmul.f32 1.442695, %v4638_v16  ;;  %v4494_v35 = vadd.f32 %v4493_v6, %v4237_v20  ;;  %7518 = vpow2.f32 %v4846_v25  ;;  %v4639_v61 = vsub.f32 0.0, %v4490_v50  ;;  %v7495_v41 = vpop.eup %7494  ;;  %v15050_v25 = vld [vmem:[#allocation92_spill] sm:$0xff] }
 0x48c   : > { %v4495_v18 = vpop.f32.mrf.mxu1  ;;  %7520 = vrcp.f32 %v5003_v22  ;;  %v5006_v27 = vadd.f32 1.0, %v7493_v0  ;;  %v7497_v10 = vpop.eup %7496  ;;  %5859 = vmatprep.mubr.f32.mxu1 %v7495_v41  ;;  %v3994_v55 = vadd.f32 %v15049_v47, %v3737_v2  ;;  %v4000_v16 = vadd.f32 %v15050_v25, %v3743_v48  ;;  %v15052_v41 = vld [vmem:[#allocation133_spill] sm:$0xff] }
 0x48d   : > { %v4642_v63 = vsub.f32 0.0, %v4494_v35  ;;  %v4496_v39 = vadd.f32 %v4495_v18, %v4239_v54  ;;  %7522 = vpow2.f32 %v4852_v44  ;;  %v4854_v45 = vmul.f32 1.442695, %v4639_v61  ;;  %v7499_v43 = vpop.eup %7498  ;;  %v15051_v44 = vld [vmem:[#allocation61_spill] sm:$0xff]  ;;  %v12920_v48 = vpop.f32.mrf.mxu0 }
 0x48e   : > { %v4499_v21 = vpop.f32.mrf.mxu1  ;;  %7524 = vrcp.f32 %v5006_v27  ;;  %v5007_v58 = vadd.f32 1.0, %v7497_v10  ;;  %v7501_v19 = vpop.eup %7500  ;;  %5860 = vmatmul.mubr.f32.gmra.mxu1 %v7491_v36  ;;  %v4251_v22 = vadd.f32 %v12791_v24, %v3994_v55  ;;  %v4255_v35 = vadd.f32 %v12801_v8, %v15051_v44  ;;  %v15057_v44 = vld [vmem:[#allocation135_spill] sm:$0xff] }
 0x48f   : > { %v4860_v57 = vmul.f32 1.442695, %v4642_v63  ;;  %v4643_v15 = vsub.f32 0.0, %v4496_v39  ;;  %7526 = vpow2.f32 %v4854_v45  ;;  %v4500_v42 = vadd.f32 %v4499_v21, %v4243_v46  ;;  %v7503_v33 = vpop.eup %7502  ;;  %v15053_v45 = vld [vmem:[#allocation98_spill] sm:$0xff]  ;;  %v12928_v60 = vpop.f32.mrf.mxu0 }
 0x490   : > { %v4501_v4 = vpop.f32.mrf.mxu1  ;;  %7528 = vrcp.f32 %v5007_v58  ;;  %v5010_v13 = vadd.f32 1.0, %v7501_v19  ;;  %v7505_v28 = vpop.eup %7504  ;;  %5865 = vmatprep.mubr.f32.mxu1 %v7503_v33  ;;  %v3755_v27 = vadd.f32 %v15052_v41, %v12289_v14  ;;  %v4257_v24 = vadd.f32 %v12812_v59, %v4000_v16  ;;  %v15054_v19 = vld [vmem:[#allocation87_spill] sm:$0xff]  ;;  %v15056_v16 = vld [vmem:[#allocation64_spill] sm:$0xff]  ;;  %v15058_v41 = vld [vmem:[#allocation161_spill] sm:$0xff] }
 0x491   : > { %v4862_v3 = vmul.f32 1.442695, %v4643_v15  ;;  %v4502_v20 = vadd.f32 %v4501_v4, %v4245_v34  ;;  %7530 = vpow2.f32 %v4860_v57  ;;  %v4646_v51 = vsub.f32 0.0, %v4500_v42 }
 0x492   : > { %v4505_v38 = vpop.f32.mrf.mxu1  ;;  %v7507_v52 = vpop.eup %7506  ;;  %7532 = vrcp.f32 %v5010_v13  ;;  %v5011_v54 = vadd.f32 1.0, %v7505_v28  ;;  %5866 = vmatmul.mubr.f32.gmra.mxu1 %v7499_v43  ;;  %v4006_v21 = vadd.f32 %v15053_v45, %v3749_v31  ;;  %v4261_v59 = vadd.f32 %v12823_v29, %v15054_v19  ;;  %v15055_v29 = vld [vmem:[#allocation96_spill] sm:$0xff] }
 0x493   : > { %v4647_v50 = vsub.f32 0.0, %v4502_v20  ;;  %v4506_v6 = vadd.f32 %v4505_v38, %v4249_v37  ;;  %v7509_v36 = vpop.eup %7508  ;;  %7534 = vpow2.f32 %v4862_v3  ;;  %v4868_v0 = vmul.f32 1.442695, %v4646_v51 }
 0x494   : > { %v4507_v2 = vpop.f32.mrf.mxu1  ;;  %v7511_v26 = vpop.eup %7510  ;;  %7536 = vrcp.f32 %v5011_v54  ;;  %v5014_v56 = vadd.f32 1.0, %v7509_v36  ;;  %v4263_v4 = vadd.f32 %v12833_v1, %v4006_v21  ;;  %v4012_v25 = vadd.f32 %v15055_v29, %v3755_v27 }
 0x495   : > { %v4870_v9 = vmul.f32 1.442695, %v4647_v50  ;;  %v4650_v61 = vsub.f32 0.0, %v4506_v6  ;;  %v7513_v18 = vpop.eup %7512  ;;  %7538 = vpow2.f32 %v4868_v0  ;;  %v4508_v63 = vadd.f32 %v4507_v2, %v4251_v22  ;;  %5871 = vmatprep.mubr.f32.mxu1 %v7511_v26  ;;  %v12934_v54 = vpop.f32.mrf.mxu0 }
 0x496   : > { %v4511_v8 = vpop.f32.mrf.mxu1  ;;  %v7515_v39 = vpop.eup %7514  ;;  %7540 = vrcp.f32 %v5014_v56  ;;  %v5015_v10 = vadd.f32 1.0, %v7513_v18  ;;  %5872 = vmatmul.mubr.f32.gmra.mxu1 %v7507_v52  ;;  %v4267_v51 = vadd.f32 %v12844_v49, %v15056_v16  ;;  %v4269_v0 = vadd.f32 %v12853_v7, %v4012_v25  ;;  %v15063_v25 = vld [vmem:[#allocation101_spill] sm:$0xff] }
 0x497   : > { %v4876_v17 = vmul.f32 1.442695, %v4650_v61  ;;  %v4512_v46 = vadd.f32 %v4511_v8, %v4255_v35  ;;  %v7517_v34 = vpop.eup %7516  ;;  %v5018_v43 = vadd.f32 1.0, %v7515_v39  ;;  %7542 = vpow2.f32 %v4870_v9 }
 0x498   : > { %v4651_v58 = vsub.f32 0.0, %v4508_v63  ;;  %v4513_v57 = vpop.f32.mrf.mxu1  ;;  %v7519_v15 = vpop.eup %7518  ;;  %7544 = vrcp.f32 %v5015_v10  ;;  %v3761_v35 = vadd.f32 %v15057_v44, %v12289_v14 }
 0x499   : > { %v4654_v62 = vsub.f32 0.0, %v4512_v46  ;;  %v4514_v37 = vadd.f32 %v4513_v57, %v4257_v24  ;;  %v7521_v42 = vpop.eup %7520  ;;  %7546 = vrcp.f32 %v5018_v43  ;;  %v5019_v33 = vadd.f32 1.0, %v7519_v15  ;;  %v15059_v24 = vld [vmem:[#allocation89_spill] sm:$0xff]  ;;  %v12942_v10 = vpop.f32.mrf.mxu0 }
 0x49a   : > { %v4878_v31 = vmul.f32 1.442695, %v4651_v58  ;;  %v4517_v13 = vpop.f32.mrf.mxu1  ;;  %v7523_v3 = vpop.eup %7522  ;;  %7548 = vpow2.f32 %v4876_v17  ;;  %5877 = vmatprep.mubr.f32.mxu1 %v7521_v42  ;;  %v4018_v27 = vadd.f32 %v15058_v41, %v3761_v35  ;;  %v4273_v63 = vadd.f32 %v12863_v23, %v15059_v24  ;;  %v15061_v42 = vld [vmem:[#allocation270_spill] sm:$0xff]  ;;  %v15065_v35 = vld [vmem:[#allocation93_spill] sm:$0xff]  ;;  %v15066_v41 = vld [vmem:[#allocation139_spill] sm:$0xff] }
 0x49b   : > { %v4884_v20 = vmul.f32 1.442695, %v4654_v62  ;;  %v4655_v28 = vsub.f32 0.0, %v4514_v37  ;;  %v4518_v47 = vadd.f32 %v4517_v13, %v4261_v59  ;;  %v7525_v55 = vpop.eup %7524  ;;  %7550 = vrcp.f32 %v5019_v33  ;;  %5878 = vmatmul.mubr.f32.gmra.mxu1 %v7517_v34  ;;  %v15060_v62 = vld [vmem:[#allocation138_spill] sm:$0xff]  ;;  %v12949_v13 = vpop.f32.mrf.mxu0 }
 0x49c   : > { %v5022_v38 = vadd.f32 1.0, %v7523_v3  ;;  %v4519_v1 = vpop.f32.mrf.mxu1  ;;  %v7527_v52 = vpop.eup %7526  ;;  %7552 = vpow2.f32 %v4878_v31  ;;  %v4275_v21 = vadd.f32 %v12870_v11, %v4018_v27  ;;  %v3767_v37 = vadd.f32 %v15060_v62, %v12289_v14 }
 0x49d   : > { %v4886_v50 = vmul.f32 1.442695, %v4655_v28  ;;  %v4658_v6 = vsub.f32 0.0, %v4518_v47  ;;  %v4520_v36 = vadd.f32 %v4519_v1, %v4263_v4  ;;  %v7529_v22 = vpop.eup %7528  ;;  %v5023_v2 = vadd.f32 1.0, %v7527_v52 }
 0x49e   : > { %7554 = vrcp.f32 %v5022_v38  ;;  %v4523_v49 = vpop.f32.mrf.mxu1  ;;  %v7531_v26 = vpop.eup %7530  ;;  %5883 = vmatprep.mubr.f32.mxu1 %v7529_v22  ;;  %v4279_v4 = vadd.f32 %v12878_v32, %v15061_v42  ;;  %v4024_v16 = vadd.f32 %v15063_v25, %v3767_v37  ;;  %v3779_v27 = vadd.f32 %v15066_v41, %v12289_v14 }
 0x49f   : > { %7556 = vpow2.f32 %v4884_v20  ;;  %v4892_v56 = vmul.f32 1.442695, %v4658_v6  ;;  %v4659_v9 = vsub.f32 0.0, %v4520_v36  ;;  %v4524_v61 = vadd.f32 %v4523_v49, %v4267_v51  ;;  %v7533_v18 = vpop.eup %7532  ;;  %5884 = vmatmul.mubr.f32.gmra.mxu1 %v7525_v55  ;;  %v15062_v55 = vld [vmem:[#allocation137_spill] sm:$0xff] }
 0x4a0   : > { %7558 = vrcp.f32 %v5023_v2  ;;  %v5026_v8 = vadd.f32 1.0, %v7531_v26  ;;  %v4525_v39 = vpop.f32.mrf.mxu1  ;;  %v7535_v7 = vpop.eup %7534  ;;  %v3773_v29 = vadd.f32 %v15062_v55, %v12289_v14  ;;  %v15064_v36 = vld [vmem:[#allocation165_spill] sm:$0xff]  ;;  %v4281_v44 = vadd.f32 %v12887_v12, %v4024_v16 }
 0x4a1   : > { %7560 = vpow2.f32 %v4886_v50  ;;  %v4894_v17 = vmul.f32 1.442695, %v4659_v9  ;;  %v4662_v46 = vsub.f32 0.0, %v4524_v61  ;;  %v4526_v34 = vadd.f32 %v4525_v39, %v4269_v0  ;;  %v7537_v45 = vpop.eup %7536  ;;  %v12958_v26 = vpop.f32.mrf.mxu0 }
 0x4a2   : > { %7562 = vrcp.f32 %v5026_v8  ;;  %v5027_v43 = vadd.f32 1.0, %v7535_v7  ;;  %v4529_v58 = vpop.f32.mrf.mxu1  ;;  %v7539_v57 = vpop.eup %7538  ;;  %5889 = vmatprep.mubr.f32.mxu1 %v7537_v45  ;;  %v4030_v22 = vadd.f32 %v15064_v36, %v3773_v29  ;;  %v4285_v0 = vadd.f32 %v12896_v40, %v15065_v35 }
 0x4a3   : > { %7564 = vpow2.f32 %v4892_v56  ;;  %v4900_v23 = vmul.f32 1.442695, %v4662_v46  ;;  %v4663_v15 = vsub.f32 0.0, %v4526_v34  ;;  %v4530_v19 = vadd.f32 %v4529_v58, %v4273_v63  ;;  %v7541_v59 = vpop.eup %7540  ;;  %5890 = vmatmul.mubr.f32.gmra.mxu1 %v7533_v18  ;;  %v15067_v46 = vld [vmem:[#allocation97_spill] sm:$0xff]  ;;  %v12964_v14 = vpop.f32.mrf.mxu0 }
 0x4a4   : > { %7566 = vrcp.f32 %v5027_v43  ;;  %v5030_v33 = vadd.f32 1.0, %v7539_v57  ;;  %v4531_v11 = vpop.f32.mrf.mxu1  ;;  %v7543_v31 = vpop.eup %7542  ;;  %v4287_v24 = vadd.f32 %v12904_v5, %v4030_v22  ;;  %v4036_v34 = vadd.f32 %v15067_v46, %v3779_v27 }
 0x4a5   : > { %7568 = vpow2.f32 %v4894_v17  ;;  %v4902_v3 = vmul.f32 1.442695, %v4663_v15  ;;  %v4666_v20 = vsub.f32 0.0, %v4530_v19  ;;  %v4532_v28 = vadd.f32 %v4531_v11, %v4275_v21  ;;  %v7545_v47 = vpop.eup %7544  ;;  %v15068_v15 = vld [vmem:[#allocation106_spill] sm:$0xff]  ;;  %v12969_v55 = vpop.f32.mrf.mxu0 }
 0x4a6   : > { %7570 = vrcp.f32 %v5030_v33  ;;  %v5031_v51 = vadd.f32 1.0, %v7543_v31  ;;  %v4535_v32 = vpop.f32.mrf.mxu1  ;;  %v7547_v38 = vpop.eup %7546  ;;  %5895 = vmatprep.mubr.f32.mxu1 %v7545_v47  ;;  %v4291_v19 = vadd.f32 %v12913_v30, %v15068_v15 }
 0x4a7   : > { %7572 = vpow2.f32 %v4900_v23  ;;  %v4908_v1 = vmul.f32 1.442695, %v4666_v20  ;;  %v4667_v52 = vsub.f32 0.0, %v4532_v28  ;;  %v4536_v50 = vadd.f32 %v4535_v32, %v4279_v4  ;;  %v7549_v6 = vpop.eup %7548  ;;  %5896 = vmatmul.mubr.f32.gmra.mxu1 %v7541_v59  ;;  %v6383_v28 = vld [vmem:[#allocation13 + $0xc8] sm:$0xff]  ;;  %v12973_v22 = vpop.f32.mrf.mxu0 }
 0x4a8   : > { %7574 = vrcp.f32 %v5031_v51  ;;  %v4537_v2 = vpop.f32.mrf.mxu1  ;;  %v7551_v49 = vpop.eup %7550  ;;  %v5034_v56 = vadd.f32 1.0, %v7549_v6  ;;  %v4293_v59 = vadd.f32 %v12920_v48, %v4036_v34  ;;  %6442 = vmatpush2.msra.mxu0 %v6383_v28  ;;  %v6382_v51 = vld [vmem:[#allocation13 + $0xc0] sm:$0xff]  ;;  %v6381_v6 = vld [vmem:[#allocation13 + $0xb8] sm:$0xff] }
 0x4a9   : > { %7576 = vpow2.f32 %v4902_v3  ;;  %v4910_v9 = vmul.f32 1.442695, %v4667_v52  ;;  %v4670_v61 = vsub.f32 0.0, %v4536_v50  ;;  %v7553_v18 = vpop.eup %7552  ;;  %v4538_v12 = vadd.f32 %v4537_v2, %v4281_v44  ;;  %5901 = vmatprep.mubr.f32.mxu1 %v7551_v49  ;;  %6443 = vmatprep.subr.mxu0 %v15004_v53  ;;  %v6380_v2 = vld [vmem:[#allocation13 + $0xb0] sm:$0xff]  ;;  %v12977_v41 = vpop.f32.mrf.mxu0 }
 0x4aa   : > { %7578 = vpow2.f32 %v4908_v1  ;;  %v4541_v40 = vpop.f32.mrf.mxu1  ;;  %v5035_v8 = vadd.f32 1.0, %v7553_v18  ;;  %6444 = vmatpush2.msra.mxu0 %v6382_v51 }
 0x4ab   : > { %v7555_v63 = vpop.eup %7554  ;;  %7580 = vrcp.f32 %v5034_v56  ;;  %v4916_v39 = vmul.f32 1.442695, %v4670_v61  ;;  %v4542_v7 = vadd.f32 %v4541_v40, %v4285_v0  ;;  %v4671_v45 = vsub.f32 0.0, %v4538_v12  ;;  %5902 = vmatmul.mubr.f32.gmra.mxu1 %v7547_v38  ;;  %6445 = vmatprep.subr.mxu0 %v15004_v53  ;;  %v6379_v61 = vld [vmem:[#allocation13 + $0xa8] sm:$0xff]  ;;  %v6378_v40 = vld [vmem:[#allocation13 + $0xa0] sm:$0xff] }
 0x4ac   : > { %v7557_v17 = vpop.eup %7556  ;;  %7582 = vpow2.f32 %v4910_v9  ;;  %v4543_v21 = vpop.f32.mrf.mxu1  ;;  %6446 = vmatpush2.msra.mxu0 %v6381_v6 }
 0x4ad   : > { %v7559_v43 = vpop.eup %7558  ;;  %7584 = vrcp.f32 %v5035_v8  ;;  %v5038_v5 = vadd.f32 1.0, %v7557_v17  ;;  %v4674_v58 = vsub.f32 0.0, %v4542_v7  ;;  %v4544_v57 = vadd.f32 %v4543_v21, %v4287_v24  ;;  %6447 = vmatprep.subr.mxu0 %v15004_v53  ;;  %v12981_v17 = vpop.f32.mrf.mxu0  ;;  %v6376_v21 = vld [vmem:[#allocation13 + $0x90] sm:$0xff] }
 0x4ae   : > { %v7561_v23 = vpop.eup %7560  ;;  %7586 = vpow2.f32 %v4916_v39  ;;  %v4918_v62 = vmul.f32 1.442695, %v4671_v45  ;;  %5907 = vmatprep.mubr.f32.mxu1 %v7559_v43  ;;  %v4547_v37 = vpop.f32.mrf.mxu1  ;;  %6448 = vmatpush2.msra.mxu0 %v6380_v2  ;;  %v6377_v39 = vld [vmem:[#allocation13 + $0x98] sm:$0xff] }
 0x4af   : > { %v7563_v42 = vpop.eup %7562  ;;  %7588 = vrcp.f32 %v5038_v5  ;;  %v5039_v4 = vadd.f32 1.0, %v7561_v23  ;;  %v4924_v33 = vmul.f32 1.442695, %v4674_v58  ;;  %v4675_v11 = vsub.f32 0.0, %v4544_v57  ;;  %5908 = vmatmul.mubr.f32.gmra.mxu1 %v7555_v63  ;;  %6449 = vmatprep.subr.mxu0 %v15004_v53  ;;  %v6375_v58 = vld [vmem:[#allocation13 + $0x88] sm:$0xff]  ;;  %v12985_v23 = vpop.f32.mrf.mxu0 }
 0x4b0   : > { %v7565_v31 = vpop.eup %7564  ;;  %7590 = vpow2.f32 %v4918_v62  ;;  %v4548_v3 = vadd.f32 %v4547_v37, %v4291_v19  ;;  %v4549_v20 = vpop.f32.mrf.mxu1  ;;  %6450 = vmatpush2.msra.mxu0 %v6379_v61  ;;  %v6374_v62 = vld [vmem:[#allocation13 + $0x80] sm:$0xff] }
 0x4b1   : > { %v7567_v47 = vpop.eup %7566  ;;  %7592 = vrcp.f32 %v5039_v4  ;;  %v5042_v30 = vadd.f32 1.0, %v7565_v31  ;;  %v4926_v48 = vmul.f32 1.442695, %v4675_v11  ;;  %v4550_v29 = vadd.f32 %v4549_v20, %v4293_v59  ;;  %6451 = vmatprep.subr.mxu0 %v15004_v53  ;;  %v12988_v4 = vpop.f32.mrf.mxu0 }
 0x4b2   : > { %v7569_v25 = vpop.eup %7568  ;;  %7594 = vpow2.f32 %v4924_v33  ;;  %v4678_v16 = vsub.f32 0.0, %v4548_v3  ;;  %5913 = vmatprep.mubr.f32.mxu1 %v7567_v47  ;;  %6452 = vmatpush2.msra.mxu0 %v6378_v40 }
 0x4b3   : > { %v7571_v32 = vpop.eup %7570  ;;  %7596 = vrcp.f32 %v5042_v30  ;;  %v5043_v38 = vadd.f32 1.0, %v7569_v25  ;;  %v4679_v1 = vsub.f32 0.0, %v4550_v29  ;;  %5914 = vmatmul.mubr.f32.gmra.mxu1 %v7563_v42  ;;  %6453 = vmatprep.subr.mxu0 %v15004_v53  ;;  %v12990_v28 = vpop.f32.mrf.mxu0 }
 0x4b4   : > { %v7573_v52 = vpop.eup %7572  ;;  %7598 = vpow2.f32 %v4926_v48  ;;  %v4932_v50 = vmul.f32 1.442695, %v4678_v16  ;;  %6454 = vmatpush2.msra.mxu0 %v6377_v39 }
 0x4b5   : > { %v7575_v36 = vpop.eup %7574  ;;  %7600 = vrcp.f32 %v5043_v38  ;;  %v4934_v44 = vmul.f32 1.442695, %v4679_v1  ;;  %v5046_v0 = vadd.f32 1.0, %v7573_v52  ;;  %6455 = vmatprep.subr.mxu0 %v15004_v53  ;;  %v12992_v30 = vpop.f32.mrf.mxu0 }
 0x4b6   : > { %v7577_v35 = vpop.eup %7576  ;;  %7602 = vpow2.f32 %v4932_v50  ;;  %5919 = vmatprep.mubr.f32.mxu1 %v7575_v36  ;;  %6456 = vmatpush2.msra.mxu0 %v6376_v21 }
 0x4b7   : > { %v7579_v49 = vpop.eup %7578  ;;  %v5047_v56 = vadd.f32 1.0, %v7577_v35  ;;  %7604 = vpow2.f32 %v4934_v44  ;;  %5920 = vmatmul.mubr.f32.gmra.mxu1 %v7571_v32  ;;  %6457 = vmatprep.subr.mxu0 %v15004_v53  ;;  %v12994_v25 = vpop.f32.mrf.mxu0 }
 0x4b8   : > { %v7581_v9 = vpop.eup %7580  ;;  %v5050_v24 = vadd.f32 1.0, %v7579_v49  ;;  %6458 = vmatpush2.msra.mxu0 %v6375_v58 }
 0x4b9   : > { %v7583_v18 = vpop.eup %7582  ;;  %7606 = vrcp.f32 %v5047_v56  ;;  %6459 = vmatprep.subr.mxu0 %v15004_v53  ;;  %v12996_v32 = vpop.f32.mrf.mxu0 }
 0x4ba   : > { %v7585_v27 = vpop.eup %7584  ;;  %7608 = vrcp.f32 %v5046_v0  ;;  %v5051_v12 = vadd.f32 1.0, %v7583_v18  ;;  %6460 = vmatpush2.msra.mxu0 %v6374_v62 }
 0x4bb   : > { %v7587_v63 = vpop.eup %7586  ;;  %5925 = vmatprep.mubr.f32.mxu1 %v7585_v27  ;;  %v12998_v1 = vpop.f32.mrf.mxu0 }
 0x4bc   : > { %v7589_v8 = vpop.eup %7588  ;;  %7610 = vrcp.f32 %v5051_v12  ;;  %5926 = vmatmul.mubr.f32.gmra.mxu1 %v7581_v9  ;;  %v5054_v34 = vadd.f32 1.0, %v7587_v63  ;;  %v15069_v12 = vld [vmem:[#allocation24_spill] sm:$0xff] }
 0x4bd   : > { %v7591_v7 = vpop.eup %7590  ;;  %7612 = vrcp.f32 %v5050_v24  ;;  %v13000_v52 = vpop.f32.mrf.mxu0  ;;  %v5448_v24 = vld [vmem:[#allocation11] sm:$0x3] }
 0x4be   : > { %v7593_v46 = vpop.eup %7592  ;;  %v5055_v45 = vadd.f32 1.0, %v7591_v7  ;;  %v13029_v40 = vrot.slane %v5448_v24, %v15069_v12 }
 0x4bf   : > { %v7595_v43 = vpop.eup %7594  ;;  %5931 = vmatprep.mubr.f32.mxu1 %v7593_v46  ;;  %v13002_v50 = vpop.f32.mrf.mxu0 }
 0x4c0   : > { %v7597_v5 = vpop.eup %7596  ;;  %7614 = vrcp.f32 %v5055_v45  ;;  %5932 = vmatmul.mubr.f32.gmra.mxu1 %v7589_v8  ;;  %v5058_v19 = vadd.f32 1.0, %v7595_v43  ;;  %v15070_v8 = vld [vmem:[#allocation25_spill] sm:$0xff]  ;;  %v5527_v7 = vadd.f32 %v12928_v60, %v13029_v40 }
 0x4c1   : > { %v7599_v57 = vpop.eup %7598  ;;  %7616 = vrcp.f32 %v5054_v34  ;;  %v13004_v6 = vpop.f32.mrf.mxu0  ;;  %v13034_v39 = vrot.slane %v5448_v24, %v15070_v8 }
 0x4c2   : > { %v7601_v15 = vpop.eup %7600  ;;  %v5059_v59 = vadd.f32 1.0, %v7599_v57 }
 0x4c3   : > { %v7603_v37 = vpop.eup %7602  ;;  %5937 = vmatprep.mubr.f32.mxu1 %v7601_v15  ;;  %v13006_v36 = vpop.f32.mrf.mxu0  ;;  %v5529_v45 = vadd.f32 %v12934_v54, %v13034_v39  ;;  %v5547_v24 = vadd.f32 %v12973_v22, %v13034_v39  ;;  %v5553_v22 = vadd.f32 %v12981_v17, %v13034_v39 }
 0x4c4   : > { %7618 = vrcp.f32 %v5059_v59  ;;  %5938 = vmatmul.mubr.f32.gmra.mxu1 %v7597_v5  ;;  %v7605_v42 = vpop.eup %7604  ;;  %v5062_v11 = vadd.f32 1.0, %v7603_v37  ;;  %v5533_v5 = vadd.f32 %v12942_v10, %v13029_v40  ;;  %v5535_v59 = vadd.f32 %v12949_v13, %v13034_v39 }
 0x4c5   : > { %7620 = vrcp.f32 %v5058_v19  ;;  %v5063_v31 = vadd.f32 1.0, %v7605_v42  ;;  %v13008_v44 = vpop.f32.mrf.mxu0  ;;  %v5539_v42 = vadd.f32 %v12958_v26, %v13029_v40 }
 0x4c6   : > { %v7607_v33 = vpop.eup %7606 }
 0x4c7   : > { %v7609_v3 = vpop.eup %7608  ;;  %5943 = vmatprep.mubr.f32.mxu1 %v7607_v33  ;;  %7622 = vrcp.f32 %v5063_v31  ;;  %v13010_v35 = vpop.f32.mrf.mxu0 }
 0x4c8   : > { %5944 = vmatmul.mubr.f32.gmra.mxu1 %v7609_v3  ;;  %7624 = vrcp.f32 %v5062_v11  ;;  %v5541_v3 = vadd.f32 %v12964_v14, %v13034_v39 }
 0x4c9   : > { %v7611_v20 = vpop.eup %7610  ;;  %v13012_v0 = vpop.f32.mrf.mxu0 }
 0x4ca   : > { %5949 = vmatprep.mubr.f32.mxu1 %v7611_v20  ;;  %v7613_v53 = vpop.eup %7612 }
 0x4cb   : > { %v13014_v2 = vpop.f32.mrf.mxu0 }
 0x4cc   : > { %5950 = vmatmul.mubr.f32.gmra.mxu1 %v7613_v53 }
 0x4cd   : > { %v7615_v47 = vpop.eup %7614  ;;  %v13016_v49 = vpop.f32.mrf.mxu0 }
 0x4ce   : > { %5955 = vmatprep.mubr.f32.mxu1 %v7615_v47  ;;  %v7617_v48 = vpop.eup %7616 }
 0x4cf   : > { %v13018_v56 = vpop.f32.mrf.mxu0 }
 0x4d0   : > { %5956 = vmatmul.mubr.f32.gmra.mxu1 %v7617_v48  ;;  %v5545_v48 = vadd.f32 %v12969_v55, %v13029_v40 }
 0x4d1   : > { %v7619_v29 = vpop.eup %7618  ;;  %v13020_v9 = vpop.f32.mrf.mxu0 }
 0x4d2   : > { %5961 = vmatprep.mubr.f32.mxu1 %v7619_v29  ;;  %v7621_v16 = vpop.eup %7620 }
 0x4d3   : > { %v13022_v61 = vpop.f32.mrf.mxu0 }
 0x4d4   : > { %5962 = vmatmul.mubr.f32.gmra.mxu1 %v7621_v16  ;;  %v7623_v51 = vpop.eup %7622 }
 0x4d5   : > { %5967 = vmatprep.mubr.f32.mxu1 %v7623_v51  ;;  %v7625_v38 = vpop.eup %7624  ;;  %v13024_v18 = vpop.f32.mrf.mxu0 }
 0x4d7   : > { %v13026_v27 = vpop.f32.mrf.mxu0 }
 0x4d8   : > { %5968 = vmatmul.mubr.f32.gmra.mxu1 %v7625_v38 }
 0x4d9   : > { %v13031_v63 = vpop.f32.mrf.mxu0 }
 0x4db   : > { %v13038_v46 = vpop.f32.mrf.mxu0 }
 0x4dd   : > { %v13044_v58 = vpop.f32.mrf.mxu0 }
 0x4df   : > { %v13050_v33 = vpop.f32.mrf.mxu0 }
 0x4e1   : > { %v13056_v26 = vpop.f32.mrf.mxu0 }
 0x518   : > { %v5783_v34 = vpop.f32.mrf.mxu1 }
 0x519   : > { %v5784_v21 = vadd.f32 %v5783_v34, %v5527_v7 }
 0x51a   : > { %v5785_v43 = vpop.f32.mrf.mxu1 }
 0x51b   : > { %v5974_v57 = vsub.f32 0.0, %v5784_v21  ;;  %v5786_v15 = vadd.f32 %v5785_v43, %v5529_v45  ;;  %v13060_v45 = vpop.f32.mrf.mxu0 }
 0x51c   : > { %v5789_v19 = vpop.f32.mrf.mxu1 }
 0x51d   : > { %v6038_v60 = vmul.f32 1.442695, %v5974_v57  ;;  %v5975_v62 = vsub.f32 0.0, %v5786_v15  ;;  %v5790_v37 = vadd.f32 %v5789_v19, %v5533_v5  ;;  %v5551_v5 = vadd.f32 %v12977_v41, %v13029_v40 }
 0x51e   : > { %v5791_v54 = vpop.f32.mrf.mxu1 }
 0x51f   : > { %7626 = vpow2.f32 %v6038_v60  ;;  %v6040_v11 = vmul.f32 1.442695, %v5975_v62  ;;  %v5976_v10 = vsub.f32 0.0, %v5790_v37  ;;  %v5792_v31 = vadd.f32 %v5791_v54, %v5535_v59  ;;  %v13066_v60 = vpop.f32.mrf.mxu0 }
 0x520   : > { %v5795_v20 = vpop.f32.mrf.mxu1  ;;  %v5557_v54 = vadd.f32 %v12985_v23, %v13029_v40 }
 0x521   : > { %7628 = vpow2.f32 %v6040_v11  ;;  %v6042_v53 = vmul.f32 1.442695, %v5976_v10  ;;  %v5977_v13 = vsub.f32 0.0, %v5792_v31  ;;  %v5796_v47 = vadd.f32 %v5795_v20, %v5539_v42 }
 0x522   : > { %v5797_v29 = vpop.f32.mrf.mxu1  ;;  %v5559_v20 = vadd.f32 %v12988_v4, %v13034_v39 }
 0x523   : > { %7630 = vpow2.f32 %v6042_v53  ;;  %v6044_v16 = vmul.f32 1.442695, %v5977_v13  ;;  %v5978_v51 = vsub.f32 0.0, %v5796_v47  ;;  %v5798_v38 = vadd.f32 %v5797_v29, %v5541_v3 }
 0x524   : > { %v5801_v12 = vpop.f32.mrf.mxu1  ;;  %v5563_v47 = vadd.f32 %v12990_v28, %v13029_v40 }
 0x525   : > { %7632 = vpow2.f32 %v6044_v16  ;;  %v6046_v14 = vmul.f32 1.442695, %v5978_v51  ;;  %v5979_v8 = vsub.f32 0.0, %v5798_v38  ;;  %v5802_v7 = vadd.f32 %v5801_v12, %v5545_v48  ;;  %v13074_v48 = vpop.f32.mrf.mxu0 }
 0x526   : > { %v5803_v34 = vpop.f32.mrf.mxu1  ;;  %v5565_v12 = vadd.f32 %v12992_v30, %v13034_v39 }
 0x527   : > { %7634 = vpow2.f32 %v6046_v14  ;;  %v6048_v55 = vmul.f32 1.442695, %v5979_v8  ;;  %v5980_v21 = vsub.f32 0.0, %v5802_v7  ;;  %v5804_v43 = vadd.f32 %v5803_v34, %v5547_v24 }
 0x529   : > { %7636 = vpow2.f32 %v6048_v55  ;;  %v6050_v57 = vmul.f32 1.442695, %v5980_v21  ;;  %v5981_v15 = vsub.f32 0.0, %v5804_v43  ;;  %v5807_v19 = vpop.f32.mrf.mxu1  ;;  %v5569_v55 = vadd.f32 %v12994_v25, %v13029_v40  ;;  %v13080_v21 = vpop.f32.mrf.mxu0 }
 0x52a   : > { %v5808_v59 = vadd.f32 %v5807_v19, %v5551_v5 }
 0x52b   : > { %7638 = vpow2.f32 %v6050_v57  ;;  %v6052_v62 = vmul.f32 1.442695, %v5981_v15  ;;  %v5809_v37 = vpop.f32.mrf.mxu1 }
 0x52c   : > { %v7627_v42 = vpop.eup %7626  ;;  %v5982_v11 = vsub.f32 0.0, %v5808_v59  ;;  %v5810_v10 = vadd.f32 %v5809_v37, %v5553_v22  ;;  %v5571_v22 = vadd.f32 %v12996_v32, %v13034_v39  ;;  %v5575_v32 = vadd.f32 %v12998_v1, %v13029_v40 }
 0x52d   : > { %v6166_v41 = vadd.f32 1.0, %v7627_v42  ;;  %7640 = vpow2.f32 %v6052_v62  ;;  %v5813_v31 = vpop.f32.mrf.mxu1 }
 0x52e   : > { %v7629_v3 = vpop.eup %7628  ;;  %v6054_v17 = vmul.f32 1.442695, %v5982_v11  ;;  %v5983_v53 = vsub.f32 0.0, %v5810_v10  ;;  %v5814_v13 = vadd.f32 %v5813_v31, %v5557_v54  ;;  %v13084_v11 = vpop.f32.mrf.mxu0 }
 0x52f   : > { %7642 = vrcp.f32 %v6166_v41  ;;  %v6167_v29 = vadd.f32 1.0, %v7629_v3  ;;  %v5815_v23 = vpop.f32.mrf.mxu1 }
 0x530   : > { %v7631_v16 = vpop.eup %7630  ;;  %7644 = vpow2.f32 %v6054_v17  ;;  %v6056_v51 = vmul.f32 1.442695, %v5983_v53  ;;  %v5984_v38 = vsub.f32 0.0, %v5814_v13  ;;  %v5816_v24 = vadd.f32 %v5815_v23, %v5559_v20 }
 0x531   : > { %7646 = vrcp.f32 %v6167_v29  ;;  %v6168_v4 = vadd.f32 1.0, %v7631_v16  ;;  %v5819_v14 = vpop.f32.mrf.mxu1  ;;  %v5577_v16 = vadd.f32 %v13000_v52, %v13034_v39 }
 0x532   : > { %v7633_v8 = vpop.eup %7632  ;;  %7648 = vpow2.f32 %v6056_v51  ;;  %v6058_v7 = vmul.f32 1.442695, %v5984_v38  ;;  %v5985_v28 = vsub.f32 0.0, %v5816_v24  ;;  %v5820_v34 = vadd.f32 %v5819_v14, %v5563_v47  ;;  %v13090_v51 = vpop.f32.mrf.mxu0 }
 0x533   : > { %7650 = vrcp.f32 %v6168_v4  ;;  %v6169_v43 = vadd.f32 1.0, %v7633_v8  ;;  %v5821_v5 = vpop.f32.mrf.mxu1  ;;  %v5581_v8 = vadd.f32 %v13002_v50, %v13029_v40  ;;  %v5587_v50 = vadd.f32 %v13006_v36, %v13029_v40 }
 0x534   : > { %v7635_v57 = vpop.eup %7634  ;;  %7652 = vpow2.f32 %v6058_v7  ;;  %v6060_v15 = vmul.f32 1.442695, %v5985_v28  ;;  %v5986_v30 = vsub.f32 0.0, %v5820_v34  ;;  %v5822_v19 = vadd.f32 %v5821_v5, %v5565_v12 }
 0x535   : > { %7654 = vrcp.f32 %v6169_v43  ;;  %v6170_v59 = vadd.f32 1.0, %v7635_v57  ;;  %v5825_v62 = vpop.f32.mrf.mxu1  ;;  %v5583_v5 = vadd.f32 %v13004_v6, %v13034_v39  ;;  %v13096_v57 = vpop.f32.mrf.mxu0 }
 0x536   : > { %v7637_v37 = vpop.eup %7636  ;;  %7656 = vpow2.f32 %v6060_v15  ;;  %v6062_v42 = vmul.f32 1.442695, %v5986_v30  ;;  %v5987_v25 = vsub.f32 0.0, %v5822_v19  ;;  %v5826_v54 = vadd.f32 %v5825_v62, %v5569_v55 }
 0x537   : > { %7658 = vrcp.f32 %v6170_v59  ;;  %v6171_v10 = vadd.f32 1.0, %v7637_v37  ;;  %v5827_v41 = vpop.f32.mrf.mxu1 }
 0x538   : > { %v7639_v31 = vpop.eup %7638  ;;  %7660 = vpow2.f32 %v6062_v42  ;;  %v6064_v3 = vmul.f32 1.442695, %v5987_v25  ;;  %v5988_v20 = vsub.f32 0.0, %v5826_v54  ;;  %v5828_v17 = vadd.f32 %v5827_v41, %v5571_v22 }
 0x539   : > { %7662 = vrcp.f32 %v6171_v10  ;;  %v6172_v53 = vadd.f32 1.0, %v7639_v31  ;;  %v5589_v10 = vadd.f32 %v13008_v44, %v13034_v39 }
 0x53a   : > { %v7641_v13 = vpop.eup %7640  ;;  %7664 = vpow2.f32 %v6064_v3  ;;  %v6066_v47 = vmul.f32 1.442695, %v5988_v20  ;;  %v5989_v29 = vsub.f32 0.0, %v5828_v17  ;;  %v5831_v23 = vpop.f32.mrf.mxu1 }
 0x53b   : > { %7666 = vrcp.f32 %v6172_v53  ;;  %v6173_v38 = vadd.f32 1.0, %v7641_v13  ;;  %v5832_v24 = vadd.f32 %v5831_v23, %v5575_v32  ;;  %v13102_v20 = vpop.f32.mrf.mxu0  ;;  %v5593_v13 = vadd.f32 %v13010_v35, %v13029_v40 }
 0x53c   : > { %v7643_v12 = vpop.eup %7642  ;;  %7668 = vpow2.f32 %v6066_v47  ;;  %v6068_v4 = vmul.f32 1.442695, %v5989_v29  ;;  %v5833_v14 = vpop.f32.mrf.mxu1 }
 0x53d   : > { %v7645_v1 = vpop.eup %7644  ;;  %7670 = vrcp.f32 %v6173_v38  ;;  %v5990_v7 = vsub.f32 0.0, %v5832_v24  ;;  %v5834_v28 = vadd.f32 %v5833_v14, %v5577_v16 }
 0x53e   : > { %v7647_v34 = vpop.eup %7646  ;;  %v6174_v55 = vadd.f32 1.0, %v7645_v1  ;;  %7672 = vpow2.f32 %v6068_v4  ;;  %v5837_v52 = vpop.f32.mrf.mxu1 }
 0x53f   : > { %v7649_v43 = vpop.eup %7648  ;;  %v6070_v15 = vmul.f32 1.442695, %v5990_v7  ;;  %v5991_v30 = vsub.f32 0.0, %v5834_v28  ;;  %v5838_v19 = vadd.f32 %v5837_v52, %v5581_v8  ;;  %6461 = vmatprep.mubr.f32.mxu0 %v7647_v34  ;;  %v13108_v8 = vpop.f32.mrf.mxu0 }
 0x540   : > { %v7651_v22 = vpop.eup %7650  ;;  %7674 = vrcp.f32 %v6174_v55  ;;  %v6175_v59 = vadd.f32 1.0, %v7649_v43  ;;  %v5839_v62 = vpop.f32.mrf.mxu1  ;;  %6462 = vmatmul.mubr.f32.vlgmr.msra.gmra.mxu0 %v7643_v12  ;;  %v5595_v12 = vadd.f32 %v13012_v0, %v13034_v39  ;;  %v5599_v55 = vadd.f32 %v13014_v2, %v13029_v40 }
 0x541   : > { %v7653_v37 = vpop.eup %7652  ;;  %7676 = vpow2.f32 %v6070_v15  ;;  %v6072_v42 = vmul.f32 1.442695, %v5991_v30  ;;  %v5992_v25 = vsub.f32 0.0, %v5838_v19  ;;  %v5840_v54 = vadd.f32 %v5839_v62, %v5583_v5 }
 0x542   : > { %v7655_v6 = vpop.eup %7654  ;;  %7678 = vrcp.f32 %v6175_v59  ;;  %v6176_v41 = vadd.f32 1.0, %v7653_v37  ;;  %v5843_v31 = vpop.f32.mrf.mxu1 }
 0x543   : > { %v7657_v3 = vpop.eup %7656  ;;  %7680 = vpow2.f32 %v6072_v42  ;;  %v6074_v36 = vmul.f32 1.442695, %v5992_v25  ;;  %v5993_v17 = vsub.f32 0.0, %v5840_v54  ;;  %v5844_v32 = vadd.f32 %v5843_v31, %v5587_v50  ;;  %6466 = vmatprep.mubr.f32.mxu0 %v7655_v6  ;;  %v13114_v37 = vpop.f32.mrf.mxu0 }
 0x544   : > { %v7659_v53 = vpop.eup %7658  ;;  %7682 = vrcp.f32 %v6176_v41  ;;  %v6177_v47 = vadd.f32 1.0, %v7657_v3  ;;  %v5845_v29 = vpop.f32.mrf.mxu1  ;;  %6467 = vmatmul.mubr.f32.gmra.mxu0 %v7651_v22  ;;  %v5601_v22 = vadd.f32 %v13016_v49, %v13034_v39 }
 0x545   : > { %v7661_v44 = vpop.eup %7660  ;;  %7684 = vpow2.f32 %v6074_v36  ;;  %v6076_v23 = vmul.f32 1.442695, %v5993_v17  ;;  %v5994_v16 = vsub.f32 0.0, %v5844_v32  ;;  %v5846_v38 = vadd.f32 %v5845_v29, %v5589_v10 }
 0x546   : > { %v7663_v24 = vpop.eup %7662  ;;  %7686 = vrcp.f32 %v6177_v47  ;;  %v6178_v4 = vadd.f32 1.0, %v7661_v44  ;;  %v5849_v14 = vpop.f32.mrf.mxu1  ;;  %v5605_v36 = vadd.f32 %v13018_v56, %v13029_v40  ;;  %v5607_v17 = vadd.f32 %v13020_v9, %v13034_v39 }
 0x547   : > { %v7665_v1 = vpop.eup %7664  ;;  %7688 = vpow2.f32 %v6076_v23  ;;  %v6078_v35 = vmul.f32 1.442695, %v5994_v16  ;;  %v5995_v7 = vsub.f32 0.0, %v5846_v38  ;;  %v5850_v28 = vadd.f32 %v5849_v14, %v5593_v13  ;;  %6471 = vmatprep.mubr.f32.mxu0 %v7663_v24  ;;  %v13120_v13 = vpop.f32.mrf.mxu0 }
 0x548   : > { %v7667_v34 = vpop.eup %7666  ;;  %7690 = vrcp.f32 %v6178_v4  ;;  %v6179_v52 = vadd.f32 1.0, %v7665_v1  ;;  %v5851_v43 = vpop.f32.mrf.mxu1  ;;  %6472 = vmatmul.mubr.f32.gmra.mxu0 %v7659_v53  ;;  %v5611_v16 = vadd.f32 %v13022_v61, %v13029_v40 }
 0x549   : > { %v7669_v0 = vpop.eup %7668  ;;  %7692 = vpow2.f32 %v6078_v35  ;;  %v6080_v5 = vmul.f32 1.442695, %v5995_v7  ;;  %v5996_v15 = vsub.f32 0.0, %v5850_v28  ;;  %v5852_v30 = vadd.f32 %v5851_v43, %v5595_v12  ;;  %v13124_v28 = vpop.f32.mrf.mxu0 }
 0x54a   : > { %v7671_v19 = vpop.eup %7670  ;;  %7694 = vrcp.f32 %v6179_v52  ;;  %v6180_v50 = vadd.f32 1.0, %v7669_v0  ;;  %v5855_v59 = vpop.f32.mrf.mxu1  ;;  %v5613_v43 = vadd.f32 %v13024_v18, %v13034_v39  ;;  %v5617_v0 = vadd.f32 %v13026_v27, %v13029_v40 }
 0x54b   : > { %v7673_v62 = vpop.eup %7672  ;;  %7696 = vpow2.f32 %v6080_v5  ;;  %v6082_v2 = vmul.f32 1.442695, %v5996_v15  ;;  %v5997_v42 = vsub.f32 0.0, %v5852_v30  ;;  %v5856_v25 = vadd.f32 %v5855_v59, %v5599_v55  ;;  %6476 = vmatprep.mubr.f32.mxu0 %v7671_v19 }
 0x54c   : > { %7698 = vrcp.f32 %v6180_v50  ;;  %v6181_v54 = vadd.f32 1.0, %v7673_v62  ;;  %v5857_v6 = vpop.f32.mrf.mxu1  ;;  %6477 = vmatmul.mubr.f32.gmra.mxu0 %v7667_v34  ;;  %v5619_v62 = vadd.f32 %v13031_v63, %v13034_v39 }
 0x54d   : > { %v7675_v10 = vpop.eup %7674  ;;  %7700 = vpow2.f32 %v6082_v2  ;;  %v6084_v41 = vmul.f32 1.442695, %v5997_v42  ;;  %v5998_v31 = vsub.f32 0.0, %v5856_v25  ;;  %v5858_v49 = vadd.f32 %v5857_v6, %v5601_v22  ;;  %v13132_v25 = vpop.f32.mrf.mxu0 }
 0x54e   : > { %v7677_v3 = vpop.eup %7676  ;;  %7702 = vrcp.f32 %v6181_v54  ;;  %v5861_v32 = vpop.f32.mrf.mxu1 }
 0x54f   : > { %v7679_v53 = vpop.eup %7678  ;;  %v6182_v47 = vadd.f32 1.0, %v7677_v3  ;;  %7704 = vpow2.f32 %v6084_v41  ;;  %v6086_v29 = vmul.f32 1.442695, %v5998_v31  ;;  %v5999_v44 = vsub.f32 0.0, %v5858_v49 }
 0x550   : > { %v7681_v23 = vpop.eup %7680  ;;  %v5862_v38 = vadd.f32 %v5861_v32, %v5605_v36  ;;  %v5863_v24 = vpop.f32.mrf.mxu1  ;;  %6481 = vmatprep.mubr.f32.mxu0 %v7679_v53  ;;  %v5623_v32 = vadd.f32 %v13038_v46, %v13029_v40  ;;  %v5625_v53 = vadd.f32 %v13044_v58, %v13034_v39 }
 0x551   : > { %v7683_v56 = vpop.eup %7682  ;;  %7706 = vrcp.f32 %v6182_v47  ;;  %v6183_v12 = vadd.f32 1.0, %v7681_v23  ;;  %v6088_v9 = vmul.f32 1.442695, %v5999_v44  ;;  %v5864_v4 = vadd.f32 %v5863_v24, %v5607_v17  ;;  %6482 = vmatmul.mubr.f32.gmra.mxu0 %v7675_v10  ;;  %v13138_v23 = vpop.f32.mrf.mxu0 }
 0x552   : > { %v7685_v14 = vpop.eup %7684  ;;  %7708 = vpow2.f32 %v6086_v29  ;;  %v6000_v1 = vsub.f32 0.0, %v5862_v38  ;;  %v5867_v35 = vpop.f32.mrf.mxu1 }
 0x553   : > { %v7687_v7 = vpop.eup %7686  ;;  %7710 = vrcp.f32 %v6183_v12  ;;  %v6184_v34 = vadd.f32 1.0, %v7685_v14  ;;  %v6001_v55 = vsub.f32 0.0, %v5864_v4  ;;  %v5868_v61 = vadd.f32 %v5867_v35, %v5611_v16 }
 0x554   : > { %v7689_v52 = vpop.eup %7688  ;;  %7712 = vpow2.f32 %v6088_v9  ;;  %v6090_v5 = vmul.f32 1.442695, %v6000_v1  ;;  %v5869_v15 = vpop.f32.mrf.mxu1  ;;  %6486 = vmatprep.mubr.f32.mxu0 %v7687_v7  ;;  %v5629_v12 = vadd.f32 %v13050_v33, %v13029_v40 }
 0x555   : > { %v7691_v30 = vpop.eup %7690  ;;  %7714 = vrcp.f32 %v6184_v34  ;;  %v6185_v19 = vadd.f32 1.0, %v7689_v52  ;;  %v6092_v22 = vmul.f32 1.442695, %v6001_v55  ;;  %v6002_v50 = vsub.f32 0.0, %v5868_v61  ;;  %6487 = vmatmul.mubr.f32.gmra.mxu0 %v7683_v56  ;;  %v13144_v61 = vpop.f32.mrf.mxu0 }
 0x556   : > { %v7693_v59 = vpop.eup %7692  ;;  %7716 = vpow2.f32 %v6090_v5  ;;  %v5870_v2 = vadd.f32 %v5869_v15, %v5613_v43  ;;  %v5873_v18 = vpop.f32.mrf.mxu1  ;;  %v5631_v55 = vadd.f32 %v13056_v26, %v13034_v39  ;;  %v5637_v26 = vadd.f32 %v13066_v60, %v13034_v39 }
 0x557   : > { %v7695_v42 = vpop.eup %7694  ;;  %7718 = vrcp.f32 %v6185_v19  ;;  %v6186_v27 = vadd.f32 1.0, %v7693_v59  ;;  %v6094_v54 = vmul.f32 1.442695, %v6002_v50  ;;  %v5874_v6 = vadd.f32 %v5873_v18, %v5617_v0 }
 0x558   : > { %v7697_v10 = vpop.eup %7696  ;;  %7720 = vpow2.f32 %v6092_v22  ;;  %v6003_v41 = vsub.f32 0.0, %v5870_v2  ;;  %v5875_v31 = vpop.f32.mrf.mxu1  ;;  %6491 = vmatprep.mubr.f32.mxu0 %v7695_v42  ;;  %v5635_v19 = vadd.f32 %v13060_v45, %v13029_v40 }
 0x559   : > { %v7699_v49 = vpop.eup %7698  ;;  %7722 = vrcp.f32 %v6186_v27  ;;  %v6187_v3 = vadd.f32 1.0, %v7697_v10  ;;  %v6004_v36 = vsub.f32 0.0, %v5874_v6  ;;  %v5876_v63 = vadd.f32 %v5875_v31, %v5619_v62  ;;  %6492 = vmatmul.mubr.f32.gmra.mxu0 %v7691_v30  ;;  %v13150_v27 = vpop.f32.mrf.mxu0 }
 0x55a   : > { %v7701_v17 = vpop.eup %7700  ;;  %7724 = vpow2.f32 %v6094_v54  ;;  %v6096_v47 = vmul.f32 1.442695, %v6003_v41  ;;  %v5641_v41 = vadd.f32 %v13074_v48, %v13029_v40 }
 0x55b   : > { %v5879_v29 = vpop.f32.mrf.mxu1  ;;  %v7703_v44 = vpop.eup %7702  ;;  %7726 = vrcp.f32 %v6187_v3  ;;  %v6188_v16 = vadd.f32 1.0, %v7701_v17  ;;  %v6098_v38 = vmul.f32 1.442695, %v6004_v36  ;;  %v6005_v24 = vsub.f32 0.0, %v5876_v63 }
 0x55c   : > { %v7705_v56 = vpop.eup %7704  ;;  %7728 = vpow2.f32 %v6096_v47  ;;  %v5880_v9 = vadd.f32 %v5879_v29, %v5623_v32  ;;  %6496 = vmatprep.mubr.f32.mxu0 %v7703_v44  ;;  %v5643_v32 = vadd.f32 %v13080_v21, %v13034_v39  ;;  %v13156_v44 = vpop.f32.mrf.mxu0 }
 0x55d   : > { %v5881_v46 = vpop.f32.mrf.mxu1  ;;  %7730 = vrcp.f32 %v6188_v16  ;;  %v6189_v58 = vadd.f32 1.0, %v7705_v56  ;;  %v6100_v4 = vmul.f32 1.442695, %v6005_v24  ;;  %6497 = vmatmul.mubr.f32.gmra.mxu0 %v7699_v49  ;;  %v5647_v56 = vadd.f32 %v13084_v11, %v13029_v40 }
 0x55e   : > { %v5882_v14 = vadd.f32 %v5881_v46, %v5625_v53  ;;  %v7707_v1 = vpop.eup %7706  ;;  %7732 = vpow2.f32 %v6098_v38  ;;  %v6006_v35 = vsub.f32 0.0, %v5880_v9 }
 0x55f   : > { %v5885_v7 = vpop.f32.mrf.mxu1  ;;  %v7709_v34 = vpop.eup %7708  ;;  %7734 = vrcp.f32 %v6189_v58 }
 0x560   : > { %v6007_v33 = vsub.f32 0.0, %v5882_v14  ;;  %v5886_v52 = vadd.f32 %v5885_v7, %v5629_v12  ;;  %v7711_v43 = vpop.eup %7710  ;;  %v6190_v0 = vadd.f32 1.0, %v7709_v34  ;;  %7736 = vpow2.f32 %v6100_v4 }
 0x561   : > { %v6102_v5 = vmul.f32 1.442695, %v6006_v35  ;;  %v5887_v15 = vpop.f32.mrf.mxu1  ;;  %v7713_v30 = vpop.eup %7712  ;;  %6501 = vmatprep.mubr.f32.mxu0 %v7711_v43 }
 0x562   : > { %v6104_v22 = vmul.f32 1.442695, %v6007_v33  ;;  %v6008_v50 = vsub.f32 0.0, %v5886_v52  ;;  %v5888_v59 = vadd.f32 %v5887_v15, %v5631_v55  ;;  %v7715_v62 = vpop.eup %7714  ;;  %7738 = vrcp.f32 %v6190_v0  ;;  %6502 = vmatmul.mubr.f32.gmra.mxu0 %v7707_v1  ;;  %v13162_v55 = vpop.f32.mrf.mxu0 }
 0x563   : > { %v6191_v2 = vadd.f32 1.0, %v7713_v30  ;;  %v5891_v18 = vpop.f32.mrf.mxu1  ;;  %v7717_v42 = vpop.eup %7716  ;;  %7740 = vpow2.f32 %v6102_v5  ;;  %v5649_v1 = vadd.f32 %v13090_v51, %v13034_v39  ;;  %v5653_v0 = vadd.f32 %v13096_v57, %v13029_v40 }
 0x564   : > { %v6106_v54 = vmul.f32 1.442695, %v6008_v50  ;;  %v6009_v6 = vsub.f32 0.0, %v5888_v59  ;;  %v5892_v10 = vadd.f32 %v5891_v18, %v5635_v19  ;;  %v7719_v45 = vpop.eup %7718  ;;  %v6192_v31 = vadd.f32 1.0, %v7717_v42 }
 0x565   : > { %7742 = vrcp.f32 %v6191_v2  ;;  %v5893_v49 = vpop.f32.mrf.mxu1  ;;  %v7721_v3 = vpop.eup %7720  ;;  %6506 = vmatprep.mubr.f32.mxu0 %v7719_v45 }
 0x566   : > { %7744 = vpow2.f32 %v6104_v22  ;;  %v6108_v60 = vmul.f32 1.442695, %v6009_v6  ;;  %v6010_v36 = vsub.f32 0.0, %v5892_v10  ;;  %v5894_v63 = vadd.f32 %v5893_v49, %v5637_v26  ;;  %v7723_v17 = vpop.eup %7722  ;;  %6507 = vmatmul.mubr.f32.gmra.mxu0 %v7715_v62  ;;  %v13166_v26 = vpop.f32.mrf.mxu0 }
 0x567   : > { %7746 = vrcp.f32 %v6192_v31  ;;  %v6193_v53 = vadd.f32 1.0, %v7721_v3  ;;  %v5897_v47 = vpop.f32.mrf.mxu1  ;;  %v7725_v29 = vpop.eup %7724  ;;  %v5659_v6 = vadd.f32 %v13108_v8, %v13029_v40 }
 0x568   : > { %7748 = vpow2.f32 %v6106_v54  ;;  %v6110_v48 = vmul.f32 1.442695, %v6010_v36  ;;  %v6011_v16 = vsub.f32 0.0, %v5894_v63  ;;  %v5898_v38 = vadd.f32 %v5897_v47, %v5641_v41  ;;  %v7727_v24 = vpop.eup %7726 }
 0x569   : > { %7750 = vrcp.f32 %v6193_v53  ;;  %v6194_v12 = vadd.f32 1.0, %v7725_v29  ;;  %v5899_v9 = vpop.f32.mrf.mxu1  ;;  %v7729_v46 = vpop.eup %7728  ;;  %6511 = vmatprep.mubr.f32.mxu0 %v7727_v24  ;;  %v5655_v54 = vadd.f32 %v13102_v20, %v13034_v39 }
 0x56a   : > { %7752 = vpow2.f32 %v6108_v60  ;;  %v6112_v21 = vmul.f32 1.442695, %v6011_v16  ;;  %v6012_v58 = vsub.f32 0.0, %v5898_v38  ;;  %v5900_v4 = vadd.f32 %v5899_v9, %v5643_v32  ;;  %v7731_v14 = vpop.eup %7730  ;;  %6512 = vmatmul.mubr.f32.gmra.mxu0 %v7723_v17  ;;  %v13174_v20 = vpop.f32.mrf.mxu0 }
 0x56b   : > { %7754 = vrcp.f32 %v6194_v12  ;;  %v6195_v35 = vadd.f32 1.0, %v7729_v46  ;;  %v5903_v7 = vpop.f32.mrf.mxu1  ;;  %v7733_v34 = vpop.eup %7732  ;;  %v5661_v60 = vadd.f32 %v13114_v37, %v13034_v39  ;;  %v5665_v12 = vadd.f32 %v13120_v13, %v13029_v40 }
 0x56c   : > { %7756 = vpow2.f32 %v6110_v48  ;;  %v6114_v11 = vmul.f32 1.442695, %v6012_v58  ;;  %v6013_v33 = vsub.f32 0.0, %v5900_v4  ;;  %v5904_v52 = vadd.f32 %v5903_v7, %v5647_v56  ;;  %v7735_v43 = vpop.eup %7734  ;;  %v13180_v4 = vpop.f32.mrf.mxu0 }
 0x56d   : > { %7758 = vrcp.f32 %v6195_v35  ;;  %v6196_v5 = vadd.f32 1.0, %v7733_v34  ;;  %v5905_v15 = vpop.f32.mrf.mxu1  ;;  %v7737_v30 = vpop.eup %7736  ;;  %6516 = vmatprep.mubr.f32.mxu0 %v7735_v43  ;;  %v5667_v9 = vadd.f32 %v13124_v28, %v13034_v39  ;;  %v5671_v34 = vadd.f32 %v13132_v25, %v13029_v40 }
 0x56e   : > { %7760 = vpow2.f32 %v6112_v21  ;;  %v6116_v51 = vmul.f32 1.442695, %v6013_v33  ;;  %v6014_v19 = vsub.f32 0.0, %v5904_v52  ;;  %v5906_v22 = vadd.f32 %v5905_v15, %v5649_v1  ;;  %6517 = vmatmul.mubr.f32.gmra.mxu0 %v7731_v14 }
 0x56f   : > { %7762 = vrcp.f32 %v6196_v5  ;;  %v6197_v50 = vadd.f32 1.0, %v7737_v30  ;;  %v5909_v59 = vpop.f32.mrf.mxu1  ;;  %v7739_v62 = vpop.eup %7738 }
 0x570   : > { %7764 = vpow2.f32 %v6114_v11  ;;  %v6118_v2 = vmul.f32 1.442695, %v6014_v19  ;;  %v6015_v18 = vsub.f32 0.0, %v5906_v22  ;;  %v5910_v57 = vadd.f32 %v5909_v59, %v5653_v0  ;;  %v7741_v42 = vpop.eup %7740 }
 0x571   : > { %7766 = vrcp.f32 %v6197_v50  ;;  %v5911_v10 = vpop.f32.mrf.mxu1  ;;  %v6198_v41 = vadd.f32 1.0, %v7741_v42  ;;  %v5673_v59 = vadd.f32 %v13138_v23, %v13034_v39 }
 0x572   : > { %v7743_v45 = vpop.eup %7742  ;;  %7768 = vpow2.f32 %v6116_v51  ;;  %v6120_v31 = vmul.f32 1.442695, %v6015_v18  ;;  %v6016_v49 = vsub.f32 0.0, %v5910_v57  ;;  %v5912_v36 = vadd.f32 %v5911_v10, %v5655_v54  ;;  %v13184_v51 = vpop.f32.mrf.mxu0 }
 0x573   : > { %v7745_v3 = vpop.eup %7744  ;;  %7770 = vpow2.f32 %v6118_v2  ;;  %6521 = vmatprep.mubr.f32.mxu0 %v7743_v45  ;;  %v5915_v63 = vpop.f32.mrf.mxu1  ;;  %v5679_v45 = vadd.f32 %v13150_v27, %v13034_v39  ;;  %v5683_v27 = vadd.f32 %v13156_v44, %v13029_v40 }
 0x574   : > { %v7747_v17 = vpop.eup %7746  ;;  %7772 = vrcp.f32 %v6198_v41  ;;  %v6199_v8 = vadd.f32 1.0, %v7745_v3  ;;  %v6122_v32 = vmul.f32 1.442695, %v6016_v49  ;;  %v5916_v53 = vadd.f32 %v5915_v63, %v5659_v6  ;;  %6522 = vmatmul.mubr.f32.gmra.mxu0 %v7739_v62  ;;  %v13192_v49 = vpop.f32.mrf.mxu0 }
 0x575   : > { %v7749_v47 = vpop.eup %7748  ;;  %7774 = vpow2.f32 %v6120_v31  ;;  %v6017_v29 = vsub.f32 0.0, %v5912_v36  ;;  %v5917_v48 = vpop.f32.mrf.mxu1  ;;  %v5677_v62 = vadd.f32 %v13144_v61, %v13029_v40 }
 0x576   : > { %v7751_v16 = vpop.eup %7750  ;;  %7776 = vrcp.f32 %v6199_v8  ;;  %v6200_v38 = vadd.f32 1.0, %v7749_v47  ;;  %v6018_v37 = vsub.f32 0.0, %v5916_v53  ;;  %v5918_v24 = vadd.f32 %v5917_v48, %v5661_v60 }
 0x577   : > { %v7753_v56 = vpop.eup %7752  ;;  %7778 = vpow2.f32 %v6122_v32  ;;  %v6124_v46 = vmul.f32 1.442695, %v6017_v29  ;;  %6526 = vmatprep.mubr.f32.mxu0 %v7751_v16  ;;  %v5921_v21 = vpop.f32.mrf.mxu1  ;;  %v5685_v48 = vadd.f32 %v13162_v55, %v13034_v39 }
 0x578   : > { %v7755_v58 = vpop.eup %7754  ;;  %7780 = vrcp.f32 %v6200_v38  ;;  %v6201_v14 = vadd.f32 1.0, %v7753_v56  ;;  %v6126_v1 = vmul.f32 1.442695, %v6018_v37  ;;  %v6019_v35 = vsub.f32 0.0, %v5918_v24  ;;  %6527 = vmatmul.mubr.f32.gmra.mxu0 %v7747_v17  ;;  %v13198_v56 = vpop.f32.mrf.mxu0 }
 0x579   : > { %v7757_v7 = vpop.eup %7756  ;;  %7782 = vpow2.f32 %v6124_v46  ;;  %v5922_v13 = vadd.f32 %v5921_v21, %v5665_v12  ;;  %v5923_v11 = vpop.f32.mrf.mxu1  ;;  %v5689_v21 = vadd.f32 %v13166_v26, %v13029_v40 }
 0x57a   : > { %v7759_v28 = vpop.eup %7758  ;;  %7784 = vrcp.f32 %v6201_v14  ;;  %v6202_v33 = vadd.f32 1.0, %v7757_v7  ;;  %v6128_v52 = vmul.f32 1.442695, %v6019_v35  ;;  %v5924_v43 = vadd.f32 %v5923_v11, %v5667_v9 }
 0x57b   : > { %v7761_v0 = vpop.eup %7760  ;;  %7786 = vpow2.f32 %v6126_v1  ;;  %v6020_v5 = vsub.f32 0.0, %v5922_v13  ;;  %6531 = vmatprep.mubr.f32.mxu0 %v7759_v28  ;;  %v5691_v13 = vadd.f32 %v13174_v20, %v13034_v39 }
 0x57c   : > { %v5927_v15 = vpop.f32.mrf.mxu1  ;;  %v7763_v30 = vpop.eup %7762  ;;  %7788 = vrcp.f32 %v6202_v33  ;;  %v6203_v19 = vadd.f32 1.0, %v7761_v0  ;;  %v6021_v22 = vsub.f32 0.0, %v5924_v43  ;;  %6532 = vmatmul.mubr.f32.gmra.mxu0 %v7755_v58 }
 0x57d   : > { %v5928_v25 = vadd.f32 %v5927_v15, %v5671_v34  ;;  %v7765_v50 = vpop.eup %7764  ;;  %7790 = vpow2.f32 %v6128_v52  ;;  %v6130_v2 = vmul.f32 1.442695, %v6020_v5  ;;  %v5706_v52 = vpop.f32.mrf.mxu0  ;;  %v5695_v15 = vadd.f32 %v13180_v4, %v13029_v40 }
 0x57e   : > { %v5929_v18 = vpop.f32.mrf.mxu1  ;;  %v7767_v57 = vpop.eup %7766  ;;  %7792 = vrcp.f32 %v6203_v19  ;;  %v6204_v42 = vadd.f32 1.0, %v7765_v50  ;;  %v6132_v54 = vmul.f32 1.442695, %v6021_v22 }
 0x57f   : > { %v6022_v6 = vsub.f32 0.0, %v5928_v25  ;;  %v7769_v10 = vpop.eup %7768  ;;  %7794 = vpow2.f32 %v6130_v2  ;;  %v5930_v41 = vadd.f32 %v5929_v18, %v5673_v59  ;;  %6536 = vmatprep.mubr.f32.mxu0 %v7767_v57 }
 0x580   : > { %v5933_v31 = vpop.f32.mrf.mxu1  ;;  %v7771_v23 = vpop.eup %7770  ;;  %7796 = vrcp.f32 %v6204_v42  ;;  %v6205_v61 = vadd.f32 1.0, %v7769_v10  ;;  %6537 = vmatmul.mubr.f32.gmra.mxu0 %v7763_v30 }
 0x581   : > { %v6134_v3 = vmul.f32 1.442695, %v6022_v6  ;;  %v5934_v60 = vadd.f32 %v5933_v31, %v5677_v62  ;;  %v7773_v36 = vpop.eup %7772  ;;  %v6206_v63 = vadd.f32 1.0, %v7771_v23  ;;  %7798 = vpow2.f32 %v6132_v54  ;;  %v5708_v42 = vpop.f32.mrf.mxu0 }
 0x582   : > { %v6023_v17 = vsub.f32 0.0, %v5930_v41  ;;  %v5935_v8 = vpop.f32.mrf.mxu1  ;;  %v7775_v32 = vpop.eup %7774  ;;  %7800 = vrcp.f32 %v6205_v61  ;;  %v5697_v62 = vadd.f32 %v13184_v51, %v13034_v39 }
 0x583   : > { %v6024_v53 = vsub.f32 0.0, %v5934_v60  ;;  %v5936_v47 = vadd.f32 %v5935_v8, %v5679_v45  ;;  %v7777_v29 = vpop.eup %7776  ;;  %7802 = vrcp.f32 %v6206_v63  ;;  %v6207_v16 = vadd.f32 1.0, %v7775_v32  ;;  %v5712_v8 = vpop.f32.mrf.mxu0 }
 0x584   : > { %v6136_v38 = vmul.f32 1.442695, %v6023_v17  ;;  %v5939_v37 = vpop.f32.mrf.mxu1  ;;  %v7779_v24 = vpop.eup %7778  ;;  %7804 = vpow2.f32 %v6134_v3  ;;  %6541 = vmatprep.mubr.f32.mxu0 %v7777_v29  ;;  %v5701_v45 = vadd.f32 %v13192_v49, %v13029_v40  ;;  %v5707_v29 = vadd.f32 %v5706_v52, %v13029_v40 }
 0x585   : > { %v6138_v12 = vmul.f32 1.442695, %v6024_v53  ;;  %v6025_v9 = vsub.f32 0.0, %v5936_v47  ;;  %v5940_v46 = vadd.f32 %v5939_v37, %v5683_v27  ;;  %v7781_v44 = vpop.eup %7780  ;;  %7806 = vrcp.f32 %v6207_v16  ;;  %6542 = vmatmul.mubr.f32.gmra.mxu0 %v7773_v36 }
 0x586   : > { %v6208_v58 = vadd.f32 1.0, %v7779_v24  ;;  %v5941_v55 = vpop.f32.mrf.mxu1  ;;  %v7783_v14 = vpop.eup %7782  ;;  %7808 = vpow2.f32 %v6136_v38  ;;  %v5703_v47 = vadd.f32 %v13198_v56, %v13034_v39  ;;  %v5713_v52 = vadd.f32 %v5712_v8, %v13029_v40 }
 0x587   : > { %v6140_v1 = vmul.f32 1.442695, %v6025_v9  ;;  %v6026_v35 = vsub.f32 0.0, %v5940_v46  ;;  %v5942_v7 = vadd.f32 %v5941_v55, %v5685_v48  ;;  %v7785_v34 = vpop.eup %7784  ;;  %v6209_v11 = vadd.f32 1.0, %v7783_v14 }
 0x588   : > { %7810 = vrcp.f32 %v6208_v58  ;;  %v5945_v28 = vpop.f32.mrf.mxu1  ;;  %v7787_v33 = vpop.eup %7786  ;;  %6546 = vmatprep.mubr.f32.mxu0 %v7785_v34  ;;  %v5709_v9 = vadd.f32 %v5708_v42, %v13034_v39 }
 0x589   : > { %7812 = vpow2.f32 %v6138_v12  ;;  %v6142_v26 = vmul.f32 1.442695, %v6026_v35  ;;  %v6027_v43 = vsub.f32 0.0, %v5942_v7  ;;  %v5946_v0 = vadd.f32 %v5945_v28, %v5689_v21  ;;  %v7789_v5 = vpop.eup %7788  ;;  %6547 = vmatmul.mubr.f32.gmra.mxu0 %v7781_v44  ;;  %v5714_v58 = vpop.f32.mrf.mxu0 }
 0x58a   : > { %7814 = vrcp.f32 %v6209_v11  ;;  %v6210_v30 = vadd.f32 1.0, %v7787_v33  ;;  %v5947_v19 = vpop.f32.mrf.mxu1  ;;  %v7791_v22 = vpop.eup %7790 }
 0x58b   : > { %7816 = vpow2.f32 %v6140_v1  ;;  %v6144_v20 = vmul.f32 1.442695, %v6027_v43  ;;  %v6028_v25 = vsub.f32 0.0, %v5946_v0  ;;  %v5948_v50 = vadd.f32 %v5947_v19, %v5691_v13  ;;  %v7793_v59 = vpop.eup %7792 }
 0x58c   : > { %7818 = vrcp.f32 %v6210_v30  ;;  %v6211_v2 = vadd.f32 1.0, %v7791_v22  ;;  %v5951_v18 = vpop.f32.mrf.mxu1  ;;  %v7795_v57 = vpop.eup %7794  ;;  %6551 = vmatprep.mubr.f32.mxu0 %v7793_v59 }
 0x58d   : > { %7820 = vpow2.f32 %v6142_v26  ;;  %v6146_v4 = vmul.f32 1.442695, %v6028_v25  ;;  %v6029_v54 = vsub.f32 0.0, %v5948_v50  ;;  %v5952_v6 = vadd.f32 %v5951_v18, %v5695_v15  ;;  %v7797_v10 = vpop.eup %7796  ;;  %6552 = vmatmul.mubr.f32.gmra.mxu0 %v7789_v5 }
 0x58e   : > { %7822 = vrcp.f32 %v6211_v2  ;;  %v6212_v41 = vadd.f32 1.0, %v7795_v57  ;;  %v5953_v31 = vpop.f32.mrf.mxu1  ;;  %v7799_v23 = vpop.eup %7798  ;;  %v5715_v26 = vadd.f32 %v5714_v58, %v13034_v39 }
 0x58f   : > { %7824 = vpow2.f32 %v6144_v20  ;;  %v6148_v51 = vmul.f32 1.442695, %v6029_v54  ;;  %v6030_v61 = vsub.f32 0.0, %v5952_v6  ;;  %v5954_v3 = vadd.f32 %v5953_v31, %v5697_v62  ;;  %v7801_v60 = vpop.eup %7800 }
 0x590   : > { %7826 = vrcp.f32 %v6212_v41  ;;  %v6213_v36 = vadd.f32 1.0, %v7799_v23  ;;  %v5957_v63 = vpop.f32.mrf.mxu1  ;;  %v7803_v17 = vpop.eup %7802  ;;  %6556 = vmatprep.mubr.f32.mxu0 %v7801_v60 }
 0x591   : > { %7828 = vpow2.f32 %v6146_v4  ;;  %v6150_v32 = vmul.f32 1.442695, %v6030_v61  ;;  %v6031_v27 = vsub.f32 0.0, %v5954_v3  ;;  %v5958_v49 = vadd.f32 %v5957_v63, %v5701_v45  ;;  %v7805_v53 = vpop.eup %7804  ;;  %6557 = vmatmul.mubr.f32.gmra.mxu0 %v7797_v10 }
 0x592   : > { %7830 = vrcp.f32 %v6213_v36  ;;  %v5959_v48 = vpop.f32.mrf.mxu1  ;;  %v7807_v16 = vpop.eup %7806  ;;  %v6214_v38 = vadd.f32 1.0, %v7805_v53 }
 0x593   : > { %7832 = vpow2.f32 %v6148_v51  ;;  %v6152_v37 = vmul.f32 1.442695, %v6031_v27  ;;  %v6032_v24 = vsub.f32 0.0, %v5958_v49  ;;  %v7809_v12 = vpop.eup %7808  ;;  %v5960_v46 = vadd.f32 %v5959_v48, %v5703_v47  ;;  %6561 = vmatprep.mubr.f32.mxu0 %v7807_v16 }
 0x594   : > { %7834 = vpow2.f32 %v6150_v32  ;;  %v5963_v44 = vpop.f32.mrf.mxu1  ;;  %v6215_v56 = vadd.f32 1.0, %v7809_v12 }
 0x595   : > { %v7811_v21 = vpop.eup %7810  ;;  %7836 = vrcp.f32 %v6214_v38  ;;  %v6154_v55 = vmul.f32 1.442695, %v6032_v24  ;;  %v5964_v14 = vadd.f32 %v5963_v44, %v5707_v29  ;;  %v6033_v35 = vsub.f32 0.0, %v5960_v46  ;;  %6562 = vmatmul.mubr.f32.gmra.mxu0 %v7803_v17 }
 0x596   : > { %v7813_v1 = vpop.eup %7812  ;;  %7838 = vpow2.f32 %v6152_v37  ;;  %v5965_v7 = vpop.f32.mrf.mxu1 }
 0x597   : > { %v7815_v34 = vpop.eup %7814  ;;  %7840 = vrcp.f32 %v6215_v56  ;;  %v6216_v13 = vadd.f32 1.0, %v7813_v1  ;;  %v6034_v11 = vsub.f32 0.0, %v5964_v14  ;;  %v5966_v28 = vadd.f32 %v5965_v7, %v5709_v9 }
 0x598   : > { %v7817_v33 = vpop.eup %7816  ;;  %7842 = vpow2.f32 %v6154_v55  ;;  %v6156_v43 = vmul.f32 1.442695, %v6033_v35  ;;  %6566 = vmatprep.mubr.f32.mxu0 %v7815_v34  ;;  %v5969_v0 = vpop.f32.mrf.mxu1  ;;  %v13219_v34 = vld [vmem:[#allocation14] ss:$0 sm:$0xff] }
 0x599   : > { %v7819_v5 = vpop.eup %7818  ;;  %7844 = vrcp.f32 %v6216_v13  ;;  %v6217_v15 = vadd.f32 1.0, %v7817_v33  ;;  %v6158_v30 = vmul.f32 1.442695, %v6034_v11  ;;  %v6035_v19 = vsub.f32 0.0, %v5966_v28  ;;  %6567 = vmatmul.mubr.f32.gmra.mxu0 %v7811_v21 }
 0x59a   : > { %v7821_v22 = vpop.eup %7820  ;;  %7846 = vpow2.f32 %v6156_v43  ;;  %v5970_v20 = vadd.f32 %v5969_v0, %v5713_v52  ;;  %v5971_v25 = vpop.f32.mrf.mxu1 }
 0x59b   : > { %v7823_v50 = vpop.eup %7822  ;;  %7848 = vrcp.f32 %v6217_v15  ;;  %v6218_v59 = vadd.f32 1.0, %v7821_v22  ;;  %v6160_v40 = vmul.f32 1.442695, %v6035_v19  ;;  %v5972_v62 = vadd.f32 %v5971_v25, %v5715_v26 }
 0x59c   : > { %v7825_v39 = vpop.eup %7824  ;;  %7850 = vpow2.f32 %v6158_v30  ;;  %v6036_v2 = vsub.f32 0.0, %v5970_v20  ;;  %6571 = vmatprep.mubr.f32.mxu0 %v7823_v50 }
 0x59d   : > { %v7827_v18 = vpop.eup %7826  ;;  %7852 = vrcp.f32 %v6218_v59  ;;  %v6219_v57 = vadd.f32 1.0, %v7825_v39  ;;  %v6037_v42 = vsub.f32 0.0, %v5972_v62  ;;  %6572 = vmatmul.mubr.f32.gmra.mxu0 %v7819_v5 }
 0x59e   : > { %v7829_v4 = vpop.eup %7828  ;;  %7854 = vpow2.f32 %v6160_v40  ;;  %v6162_v54 = vmul.f32 1.442695, %v6036_v2 }
 0x59f   : > { %v7831_v6 = vpop.eup %7830  ;;  %7856 = vrcp.f32 %v6219_v57  ;;  %v6164_v10 = vmul.f32 1.442695, %v6037_v42  ;;  %v6220_v41 = vadd.f32 1.0, %v7829_v4 }
 0x5a0   : > { %v7833_v45 = vpop.eup %7832  ;;  %7858 = vpow2.f32 %v6162_v54  ;;  %6576 = vmatprep.mubr.f32.mxu0 %v7831_v6 }
 0x5a1   : > { %v7835_v31 = vpop.eup %7834  ;;  %v6221_v23 = vadd.f32 1.0, %v7833_v45  ;;  %7860 = vpow2.f32 %v6164_v10  ;;  %6577 = vmatmul.mubr.f32.gmra.mxu0 %v7827_v18 }
 0x5a2   : > { %v7837_v51 = vpop.eup %7836  ;;  %v6222_v60 = vadd.f32 1.0, %v7835_v31 }
 0x5a3   : > { %v7839_v61 = vpop.eup %7838  ;;  %7862 = vrcp.f32 %v6221_v23 }
 0x5a4   : > { %v7841_v3 = vpop.eup %7840  ;;  %7864 = vrcp.f32 %v6220_v41  ;;  %v6223_v36 = vadd.f32 1.0, %v7839_v61 }
 0x5a5   : > { %v7843_v63 = vpop.eup %7842  ;;  %6581 = vmatprep.mubr.f32.mxu0 %v7841_v3 }
 0x5a6   : > { %v7845_v17 = vpop.eup %7844  ;;  %7866 = vrcp.f32 %v6223_v36  ;;  %6582 = vmatmul.mubr.f32.gmra.mxu0 %v7837_v51  ;;  %v6224_v27 = vadd.f32 1.0, %v7843_v63 }
 0x5a7   : > { %v7847_v8 = vpop.eup %7846  ;;  %7868 = vrcp.f32 %v6222_v60 }
 0x5a8   : > { %v7849_v32 = vpop.eup %7848  ;;  %v6225_v49 = vadd.f32 1.0, %v7847_v8 }
 0x5a9   : > { %v7851_v53 = vpop.eup %7850  ;;  %6586 = vmatprep.mubr.f32.mxu0 %v7849_v32 }
 0x5aa   : > { %v7853_v47 = vpop.eup %7852  ;;  %7870 = vrcp.f32 %v6225_v49  ;;  %6587 = vmatmul.mubr.f32.gmra.mxu0 %v7845_v17  ;;  %v6226_v16 = vadd.f32 1.0, %v7851_v53 }
 0x5ab   : > { %v7855_v29 = vpop.eup %7854  ;;  %7872 = vrcp.f32 %v6224_v27 }
 0x5ac   : > { %v7857_v48 = vpop.eup %7856  ;;  %v6227_v38 = vadd.f32 1.0, %v7855_v29 }
 0x5ad   : > { %v7859_v37 = vpop.eup %7858  ;;  %6591 = vmatprep.mubr.f32.mxu0 %v7857_v48 }
 0x5ae   : > { %7874 = vrcp.f32 %v6227_v38  ;;  %6592 = vmatmul.mubr.f32.gmra.mxu0 %v7853_v47  ;;  %v7861_v24 = vpop.eup %7860  ;;  %v6228_v9 = vadd.f32 1.0, %v7859_v37 }
 0x5af   : > { %7876 = vrcp.f32 %v6226_v16  ;;  %v6229_v46 = vadd.f32 1.0, %v7861_v24 }
 0x5b0   : > { %v7863_v12 = vpop.eup %7862 }
 0x5b1   : > { %v7865_v44 = vpop.eup %7864  ;;  %6596 = vmatprep.mubr.f32.mxu0 %v7863_v12  ;;  %7878 = vrcp.f32 %v6229_v46 }
 0x5b2   : > { %6597 = vmatmul.mubr.f32.gmra.mxu0 %v7865_v44  ;;  %7880 = vrcp.f32 %v6228_v9 }
 0x5b3   : > { %v7867_v21 = vpop.eup %7866 }
 0x5b4   : > { %6601 = vmatprep.mubr.f32.mxu0 %v7867_v21  ;;  %v7869_v58 = vpop.eup %7868 }
 0x5b6   : > { %6602 = vmatmul.mubr.f32.gmra.mxu0 %v7869_v58 }
 0x5b7   : > { %v7871_v56 = vpop.eup %7870 }
 0x5b8   : > { %6606 = vmatprep.mubr.f32.mxu0 %v7871_v56  ;;  %v7873_v55 = vpop.eup %7872 }
 0x5ba   : > { %6607 = vmatmul.mubr.f32.gmra.mxu0 %v7873_v55 }
 0x5bb   : > { %v7875_v14 = vpop.eup %7874 }
 0x5bc   : > { %6611 = vmatprep.mubr.f32.mxu0 %v7875_v14  ;;  %v7877_v1 = vpop.eup %7876 }
 0x5be   : > { %6612 = vmatmul.mubr.f32.gmra.mxu0 %v7877_v1  ;;  %v7879_v35 = vpop.eup %7878 }
 0x5bf   : > { %6616 = vmatprep.mubr.f32.mxu0 %v7879_v35  ;;  %v7881_v7 = vpop.eup %7880 }
 0x5c2   : > { %6617 = vmatmul.mubr.f32.gmra.mxu0 %v7881_v7 }
 0x600   : > { %v6463_v13 = vpop.f32.mrf.mxu0 }
 0x601   : > { %v6464_v11 = vadd.f32 %v13219_v34, %v6463_v13 }
 0x602   : > { %v6465_v28 = vpop.f32.mrf.mxu0 }
 0x603   : > { %6622 = vst [vmem:[%s13222_s23] sm:$0xff] %v6464_v11 }
 0x604   : > { %v6468_v33 = vpop.f32.mrf.mxu0 }
 0x605   : > { %v6469_v52 = vadd.f32 %v13219_v34, %v6468_v33 }
 0x606   : > { %v6470_v26 = vpop.f32.mrf.mxu0 }
 0x607   : > { %6623 = vst [vmem:[%s13222_s23 + $0x8] sm:$0xff] %v6469_v52 }
 0x608   : > { %v6473_v43 = vpop.f32.mrf.mxu0 }
 0x609   : > { %v6474_v0 = vadd.f32 %v13219_v34, %v6473_v43 }
 0x60a   : > { %v6475_v5 = vpop.f32.mrf.mxu0 }
 0x60b   : > { %6624 = vst [vmem:[%s13222_s23 + $0x10] sm:$0xff] %v6474_v0 }
 0x60c   : > { %v6478_v15 = vpop.f32.mrf.mxu0 }
 0x60d   : > { %v6479_v30 = vadd.f32 %v13219_v34, %v6478_v15 }
 0x60e   : > { %v6480_v19 = vpop.f32.mrf.mxu0 }
 0x60f   : > { %6625 = vst [vmem:[%s13222_s23 + $0x18] sm:$0xff] %v6479_v30 }
 0x611   : > { %v6483_v22 = vpop.f32.mrf.mxu0 }
 0x612   : > { %v6484_v20 = vadd.f32 %v13219_v34, %v6483_v22 }
 0x613   : > { %v6485_v25 = vpop.f32.mrf.mxu0 }
 0x614   : > { %6626 = vst [vmem:[%s13222_s23 + $0x20] sm:$0xff] %v6484_v20 }
 0x615   : > { %v6488_v50 = vpop.f32.mrf.mxu0 }
 0x616   : > { %v6489_v59 = vadd.f32 %v13219_v34, %v6488_v50 }
 0x617   : > { %v6490_v40 = vpop.f32.mrf.mxu0 }
 0x618   : > { %6627 = vst [vmem:[%s13222_s23 + $0x28] sm:$0xff] %v6489_v59 }
 0x619   : > { %v6493_v62 = vpop.f32.mrf.mxu0 }
 0x61a   : > { %v6494_v39 = vadd.f32 %v13219_v34, %v6493_v62 }
 0x61b   : > { %v6495_v2 = vpop.f32.mrf.mxu0 }
 0x61c   : > { %6628 = vst [vmem:[%s13222_s23 + $0x30] sm:$0xff] %v6494_v39 }
 0x61d   : > { %v6498_v18 = vpop.f32.mrf.mxu0 }
 0x61e   : > { %v6499_v57 = vadd.f32 %v13219_v34, %v6498_v18 }
 0x61f   : > { %v6500_v42 = vpop.f32.mrf.mxu0 }
 0x620   : > { %6629 = vst [vmem:[%s13222_s23 + $0x38] sm:$0xff] %v6499_v57 }
 0x622   : > { %v6503_v4 = vpop.f32.mrf.mxu0 }
 0x623   : > { %v6504_v54 = vadd.f32 %v13219_v34, %v6503_v4 }
 0x624   : > { %v6505_v6 = vpop.f32.mrf.mxu0 }
 0x625   : > { %6630 = vst [vmem:[%s13222_s23 + $0x40] sm:$0xff] %v6504_v54 }
 0x626   : > { %v6508_v10 = vpop.f32.mrf.mxu0 }
 0x627   : > { %v6509_v45 = vadd.f32 %v13219_v34, %v6508_v10 }
 0x628   : > { %v6510_v41 = vpop.f32.mrf.mxu0 }
 0x629   : > { %6631 = vst [vmem:[%s13222_s23 + $0x48] sm:$0xff] %v6509_v45 }
 0x62a   : > { %v6513_v31 = vpop.f32.mrf.mxu0 }
 0x62b   : > { %v6514_v23 = vadd.f32 %v13219_v34, %v6513_v31 }
 0x62c   : > { %v6515_v51 = vpop.f32.mrf.mxu0 }
 0x62d   : > { %6632 = vst [vmem:[%s13222_s23 + $0x50] sm:$0xff] %v6514_v23 }
 0x62e   : > { %v6518_v61 = vpop.f32.mrf.mxu0 }
 0x62f   : > { %v6519_v3 = vadd.f32 %v13219_v34, %v6518_v61 }
 0x630   : > { %v6520_v60 = vpop.f32.mrf.mxu0 }
 0x631   : > { %6633 = vst [vmem:[%s13222_s23 + $0x58] sm:$0xff] %v6519_v3 }
 0x634   : > { %v6523_v36 = vpop.f32.mrf.mxu0 }
 0x635   : > { %v6524_v63 = vadd.f32 %v13219_v34, %v6523_v36 }
 0x636   : > { %v6525_v17 = vpop.f32.mrf.mxu0 }
 0x637   : > { %6634 = vst [vmem:[%s13222_s23 + $0x60] sm:$0xff] %v6524_v63 }
 0x638   : > { %v6528_v8 = vpop.f32.mrf.mxu0 }
 0x639   : > { %v6529_v32 = vadd.f32 %v13219_v34, %v6528_v8 }
 0x63a   : > { %v6530_v27 = vpop.f32.mrf.mxu0 }
 0x63b   : > { %6635 = vst [vmem:[%s13222_s23 + $0x68] sm:$0xff] %v6529_v32 }
 0x63c   : > { %v6533_v49 = vpop.f32.mrf.mxu0 }
 0x63d   : > { %v6534_v53 = vadd.f32 %v13219_v34, %v6533_v49 }
 0x63e   : > { %v6535_v47 = vpop.f32.mrf.mxu0 }
 0x63f   : > { %6636 = vst [vmem:[%s13222_s23 + $0x70] sm:$0xff] %v6534_v53 }
 0x640   : > { %v6538_v29 = vpop.f32.mrf.mxu0 }
 0x641   : > { %v6539_v48 = vadd.f32 %v13219_v34, %v6538_v29 }
 0x642   : > { %v6540_v16 = vpop.f32.mrf.mxu0 }
 0x643   : > { %6637 = vst [vmem:[%s13222_s23 + $0x78] sm:$0xff] %v6539_v48 }
 0x645   : > { %v6543_v38 = vpop.f32.mrf.mxu0 }
 0x646   : > { %v6544_v37 = vadd.f32 %v13219_v34, %v6543_v38 }
 0x647   : > { %v6545_v24 = vpop.f32.mrf.mxu0 }
 0x648   : > { %6638 = vst [vmem:[%s13222_s23 + $0x80] sm:$0xff] %v6544_v37 }
 0x649   : > { %v6548_v12 = vpop.f32.mrf.mxu0 }
 0x64a   : > { %v6549_v9 = vadd.f32 %v13219_v34, %v6548_v12 }
 0x64b   : > { %v6550_v46 = vpop.f32.mrf.mxu0 }
 0x64c   : > { %6639 = vst [vmem:[%s13222_s23 + $0x88] sm:$0xff] %v6549_v9 }
 0x64d   : > { %v6553_v44 = vpop.f32.mrf.mxu0 }
 0x64e   : > { %v6554_v21 = vadd.f32 %v13219_v34, %v6553_v44 }
 0x64f   : > { %v6555_v58 = vpop.f32.mrf.mxu0 }
 0x650   : > { %6640 = vst [vmem:[%s13222_s23 + $0x90] sm:$0xff] %v6554_v21 }
 0x651   : > { %v6558_v56 = vpop.f32.mrf.mxu0 }
 0x652   : > { %v6559_v55 = vadd.f32 %v13219_v34, %v6558_v56 }
 0x653   : > { %v6560_v14 = vpop.f32.mrf.mxu0 }
 0x654   : > { %6641 = vst [vmem:[%s13222_s23 + $0x98] sm:$0xff] %v6559_v55 }
 0x655   : > { %v6563_v1 = vpop.f32.mrf.mxu0 }
 0x656   : > { %v6564_v35 = vadd.f32 %v13219_v34, %v6563_v1 }
 0x657   : > { %v6565_v7 = vpop.f32.mrf.mxu0 }
 0x658   : > { %6642 = vst [vmem:[%s13222_s23 + $0xa0] sm:$0xff] %v6564_v35 }
 0x659   : > { %v6568_v13 = vpop.f32.mrf.mxu0 }
 0x65a   : > { %v6569_v11 = vadd.f32 %v13219_v34, %v6568_v13 }
 0x65b   : > { %v6570_v28 = vpop.f32.mrf.mxu0 }
 0x65c   : > { %6643 = vst [vmem:[%s13222_s23 + $0xa8] sm:$0xff] %v6569_v11 }
 0x65d   : > { %v6573_v33 = vpop.f32.mrf.mxu0 }
 0x65e   : > { %v6574_v52 = vadd.f32 %v13219_v34, %v6573_v33 }
 0x65f   : > { %v6575_v26 = vpop.f32.mrf.mxu0 }
 0x660   : > { %6644 = vst [vmem:[%s13222_s23 + $0xb0] sm:$0xff] %v6574_v52 }
 0x661   : > { %v6578_v43 = vpop.f32.mrf.mxu0 }
 0x662   : > { %v6579_v0 = vadd.f32 %v13219_v34, %v6578_v43 }
 0x663   : > { %v6580_v5 = vpop.f32.mrf.mxu0 }
 0x664   : > { %6645 = vst [vmem:[%s13222_s23 + $0xb8] sm:$0xff] %v6579_v0 }
 0x666   : > { %v6583_v15 = vpop.f32.mrf.mxu0 }
 0x667   : > { %v6584_v30 = vadd.f32 %v13219_v34, %v6583_v15 }
 0x668   : > { %v6585_v19 = vpop.f32.mrf.mxu0 }
 0x669   : > { %6646 = vst [vmem:[%s13222_s23 + $0xc0] sm:$0xff] %v6584_v30 }
 0x66a   : > { %v6588_v22 = vpop.f32.mrf.mxu0 }
 0x66b   : > { %v6589_v20 = vadd.f32 %v13219_v34, %v6588_v22 }
 0x66c   : > { %v6590_v25 = vpop.f32.mrf.mxu0 }
 0x66d   : > { %6647 = vst [vmem:[%s13222_s23 + $0xc8] sm:$0xff] %v6589_v20 }
 0x66e   : > { %v6593_v50 = vpop.f32.mrf.mxu0 }
 0x66f   : > { %v6594_v59 = vadd.f32 %v13219_v34, %v6593_v50 }
 0x670   : > { %v6595_v40 = vpop.f32.mrf.mxu0 }
 0x671   : > { %6648 = vst [vmem:[%s13222_s23 + $0xd0] sm:$0xff] %v6594_v59 }
 0x672   : > { %v6598_v62 = vpop.f32.mrf.mxu0 }
 0x673   : > { %v6599_v39 = vadd.f32 %v13219_v34, %v6598_v62 }
 0x674   : > { %v6600_v2 = vpop.f32.mrf.mxu0 }
 0x675   : > { %6649 = vst [vmem:[%s13222_s23 + $0xd8] sm:$0xff] %v6599_v39 }
 0x676   : > { %v6603_v18 = vpop.f32.mrf.mxu0 }
 0x677   : > { %v6604_v57 = vadd.f32 %v13219_v34, %v6603_v18 }
 0x678   : > { %v6605_v42 = vpop.f32.mrf.mxu0 }
 0x679   : > { %6650 = vst [vmem:[%s13222_s23 + $0xe0] sm:$0xff] %v6604_v57 }
 0x67a   : > { %v6608_v4 = vpop.f32.mrf.mxu0 }
 0x67b   : > { %v6609_v54 = vadd.f32 %v13219_v34, %v6608_v4 }
 0x67c   : > { %v6610_v6 = vpop.f32.mrf.mxu0 }
 0x67d   : > { %6651 = vst [vmem:[%s13222_s23 + $0xe8] sm:$0xff] %v6609_v54 }
 0x67e   : > { %v6613_v10 = vpop.f32.mrf.mxu0 }
 0x67f   : > { %v6614_v45 = vadd.f32 %v13219_v34, %v6613_v10 }
 0x680   : > { %v6615_v41 = vpop.f32.mrf.mxu0 }
 0x681   : > { %6652 = vst [vmem:[%s13222_s23 + $0xf0] sm:$0xff] %v6614_v45 }
 0x682   : > { %v6618_v31 = vpop.f32.mrf.mxu0 }
 0x683   : > { %v6619_v23 = vadd.f32 %v13219_v34, %v6618_v31 }
 0x684   : > { %v6620_v51 = vpop.f32.mrf.mxu0 }
 0x685   : > { %6653 = vst [vmem:[%s13222_s23 + $0xf8] sm:$0xff] %v6619_v23 }
 0x686   : > { %8131 = shalt.err (!%p8128_p0)
}
 0x687   : > { %s8132_s29 = scalar_lea.hbm %s13290_s16, 4096  ;;  %s8136_s28 = scalar_lea.hbm %s13347_s9, 8192 }
 0x688   : > { %p8133_p12 = scmp.ne.s32.totalorder %s13290_s16, %s8132_s29  ;;  %p8137_p3 = scmp.lt.s32.totalorder %s13290_s16, %s13347_s9 }
 0x689   : > { %p8138_p9 = scmp.lt.s32.totalorder %s8136_s28, %s8132_s29 }
 0x68a   : > { %p8134_p1 = pnand %p8133_p12, %p15071_p6 }
 0x68b   : > { %p8139_p4 = por %p8138_p9, %p8137_p3 }
 0x68c   : > { %p8135_p2 = pneg %p8134_p1 }
 0x68e   : > { %p8140_p5 = pnand %p8139_p4, %p8135_p2 }
 0x690   : > { %8143 = shalt.err (!%p8140_p5)
}
 0x691   : > { %s8218_s25 = smov 128   ;;  %s8219_s2 = smov 8  }
 0x692   : > { %7015 = dma.vmem_to_hbm [thread:$0]  (%p15071_p6), %s13292_s14, 4096, %s13290_s16, %s13298_s13, %s8218_s25, %s8218_s25, %s8219_s2  }
 0x693 PF: > { %p7062_p10 = scmp.ge.s32.totalorder %s8198_s12, 2  ;;  %s6683_s17 = sand.u32 1, %s8186_s30  }
 0x694   : > { %p15072_p7 = scmp.ne.s32.totalorder %s13701_s20, 0  ;;  %s6684_s1 = scalar_lea.sflag [#allocation4], %s6683_s17 }
 0x696   : > { %p7043_p13 = pnand %p7062_p10, %p15072_p7 }
 0x698   : > { %p7044_p8 = pneg %p7043_p13 }
 0x69a   : > { %8181 = dma.done.wait (%p7044_p8), %s6684_s1, 4096  }
 0x69b   : > { %8183 = vsyncadd (%p7044_p8), %s6684_s1, 4294963200  ;;  %p24_p11 = scmp.ge.s32.totalorder %s8295_s15, 4   ;;  %s15073_s30 = smov %s8190_s10 }
 0x69c   : > { %s15074_s10 = smov %s8194_s11  ;;  %s15075_s11 = smov %s8306_s18 }
 0x69d   : > { %s15076_s12 = smov %s8295_s15  ;;  %26 = sbr.rel (!%p24_p11) target bundleno = 11 (0xb), region = 124 }
 0x6a2   :  { %6689 = vsyncpa [#allocation3], 1 }
 0x6a3   :  { %6691 = vsyncpa [#allocation3 + $0x1], 1 }
 0x6a4   :  { %6692 = vsyncpa [#allocation6], 1 }
 0x6a5   :  { %6693 = vsyncpa [#allocation9], 1 }
 0x6a6   :  { %6694 = vsyncpa [#allocation12], 1 }
 0x6a7   :  { %6695 = vsyncpa [#allocation15], 1 }
 0x6a8   :  { %6696 = vsyncpa [#allocation4], 1 }
 0x6a9   :  { %6698 = vsyncpa [#allocation4 + $0x1], 1 }

</bundles_post_ra>
